<compile_context>
chip_gen: v7x
topology: tpu7x:2x2x1
jax: 0.10.0
libtpu: 0.0.40
codegen_flags: <defaults>
</compile_context>

<pallas_src>
import math
from functools import partial

import jax
import jax.numpy as jnp
from jax.experimental import pallas as pl
from jax.experimental.pallas import tpu as pltpu


# ----------------------------------------------------------------------------
# Fused kernel
# ----------------------------------------------------------------------------

def _full_spec(shape):
    nd = len(shape)
    return pl.BlockSpec(shape, lambda *_: (0,) * nd)


def _layernorm(x, w, b, eps):
    mu = jnp.mean(x, axis=-1, keepdims=True)
    var = jnp.mean(jnp.square(x - mu), axis=-1, keepdims=True)
    return (x - mu) * jax.lax.rsqrt(var + eps) * w + b


# contract last dim of lhs with last dim of rhs (q @ k^T) without materializing
# a transpose.
_NT_DIMS = (((1,), (1,)), ((), ()))


def _fused_encoder_kernel(
    src_ref, pos_ref, bias_ref,
    emb_w_ref, emb_b_ref,
    inw_ref, inb_ref, outw_ref, outb_ref,
    ln1w_ref, ln1b_ref,
    l1w_ref, l1b_ref, l2w_ref, l2b_ref,
    ln2w_ref, ln2b_ref,
    head_w_ref, head_b_ref,
    o_ref,
    *, num_layers, n_heads, seq_len, eps=1e-5,
):
    D = emb_w_ref.shape[1]
    hd = D // n_heads
    scale = 1.0 / math.sqrt(hd)

    # ---- input embedding + positional embedding (rows ordered n*L + l) ----
    x = jnp.dot(src_ref[...], emb_w_ref[...], preferred_element_type=jnp.float32)
    x = x + emb_b_ref[...] + pos_ref[...]

    # (NL, NL) additive bias: 0 for (same batch element & unmasked key),
    # -1e30 otherwise.  Shared by all heads -> no head repeat needed.
    bias = bias_ref[...]

    for layer in range(num_layers):          # static unroll; weights live in VMEM
        # ---------------- self attention ----------------
        qkv = jnp.dot(x, inw_ref[layer], preferred_element_type=jnp.float32)
        qkv = qkv + inb_ref[layer]           # (NL, 3*D): [q | k | v] chunks

        heads = []
        for h in range(n_heads):             # static lane slices, no transposes
            q = qkv[:, h * hd:(h + 1) * hd]
            k = qkv[:, D + h * hd:D + (h + 1) * hd]
            v = qkv[:, 2 * D + h * hd:2 * D + (h + 1) * hd]
            s = jax.lax.dot_general(q, k, _NT_DIMS,
                                    preferred_element_type=jnp.float32)
            s = s * scale + bias
            m = jnp.max(s, axis=-1, keepdims=True)
            e = jnp.exp(s - m)
            p = e * pl.reciprocal(jnp.sum(e, axis=-1, keepdims=True), approx=True)
            heads.append(jnp.dot(p, v, preferred_element_type=jnp.float32))

        attn = jnp.concatenate(heads, axis=-1)                       # (NL, D)
        attn = jnp.dot(attn, outw_ref[layer],
                       preferred_element_type=jnp.float32) + outb_ref[layer]
        x = _layernorm(x + attn, ln1w_ref[layer], ln1b_ref[layer], eps)

        # ---------------- feed forward (hidden never leaves VMEM) ----------------
        h1 = jnp.dot(x, l1w_ref[layer], preferred_element_type=jnp.float32)
        h1 = jnp.maximum(h1 + l1b_ref[layer], 0.0)
        h2 = jnp.dot(h1, l2w_ref[layer], preferred_element_type=jnp.float32)
        h2 = h2 + l2b_ref[layer]
        x = _layernorm(x + h2, ln2w_ref[layer], ln2b_ref[layer], eps)

    # ---- output_layer(output[:, 0, :]): batch-0 rows are flat rows [0, L) ----
    out0 = x[0:seq_len, :]
    y = jnp.dot(out0, head_w_ref[...], preferred_element_type=jnp.float32)
    o_ref[...] = y + head_b_ref[...]


# ----------------------------------------------------------------------------
# Deterministic parameter init (synthetic values, matmul-ready layouts)
# ----------------------------------------------------------------------------

def init_params(key, input_dim, d_model, num_layers, dff=2048):
    def nxt():
        nonlocal key
        key, sub = jax.random.split(key)
        return sub

    def w(shape):
        return jax.random.normal(nxt(), shape, jnp.float32) * 0.02

    # All projection weights stored (in_features, out_features) and stacked
    # over layers -> the kernel consumes them directly (no transposes).
    return {
        "emb_w": w((input_dim, d_model)),                 # nn.Linear(input_dim, d_model)
        "emb_b": w((1, d_model)),
        "pos_w": w((10, d_model)),                        # nn.Embedding(10, d_model)
        "in_proj_w": w((num_layers, d_model, 3 * d_model)),   # cols: [q | k | v]
        "in_proj_b": w((num_layers, 1, 3 * d_model)),
        "out_proj_w": w((num_layers, d_model, d_model)),
        "out_proj_b": w((num_layers, 1, d_model)),
        "lin1_w": w((num_layers, d_model, dff)),
        "lin1_b": w((num_layers, 1, dff)),
        "lin2_w": w((num_layers, dff, d_model)),
        "lin2_b": w((num_layers, 1, d_model)),
        "ln1_w": jnp.ones((num_layers, 1, d_model), jnp.float32),
        "ln1_b": jnp.zeros((num_layers, 1, d_model), jnp.float32),
        "ln2_w": jnp.ones((num_layers, 1, d_model), jnp.float32),
        "ln2_b": jnp.zeros((num_layers, 1, d_model), jnp.float32),
        "out_w": w((d_model, input_dim)),                 # nn.Linear(d_model, input_dim)
        "out_b": w((1, input_dim)),
    }


# ----------------------------------------------------------------------------
# Forward: one fused pallas_call (tiny input prep stays in plain JAX)
# ----------------------------------------------------------------------------

def trajectory_transformer_forward(params, src, src_key_padding_mask, n_heads):
    D0, D1, F = src.shape
    d_model = params["emb_w"].shape[1]
    num_layers = params["in_proj_w"].shape[0]
    dff = params["lin1_w"].shape[2]
    L, N = D0, D1                      # seq / batch (batch_first=False)
    NL = N * L

    # --- tiny one-time input prep (a few KB, not per-layer) ---
    # Rows ordered n*L + l so that `output[:, 0, :]` is the contiguous slice [0, L).
    src_flat = jnp.transpose(src, (1, 0, 2)).reshape(NL, F)
    pos_flat = jnp.repeat(params["pos_w"][:N], L, axis=0)           # (NL, d_model)

    # Mask fix-up exactly as the PyTorch forward does -> (N, S) = (D1, D0).
    mask = src_key_padding_mask
    if mask is not None and mask.shape[1] != D0:
        mask = mask.T
    n_idx = jnp.arange(NL, dtype=jnp.int32) // L
    same_batch = n_idx[:, None] == n_idx[None, :]
    if mask is None:
        allow = same_batch
    else:
        allow = same_batch & (~mask.reshape(NL))[None, :]
    # -1e30 ~ -inf: disallowed keys get exactly zero attention weight.
    attn_bias = jnp.where(allow, 0.0, -1e30).astype(jnp.float32)    # (NL, NL)

    inputs = (
        src_flat, pos_flat, attn_bias,
        params["emb_w"], params["emb_b"],
        params["in_proj_w"], params["in_proj_b"],
        params["out_proj_w"], params["out_proj_b"],
        params["ln1_w"], params["ln1_b"],
        params["lin1_w"], params["lin1_b"],
        params["lin2_w"], params["lin2_b"],
        params["ln2_w"], params["ln2_b"],
        params["out_w"], params["out_b"],
    )

    flops = (
        2 * NL * F * d_model
        + num_layers * (
            2 * NL * d_model * 3 * d_model        # qkv projection
            + 4 * NL * NL * d_model               # scores + p@v (all heads)
            + 2 * NL * d_model * d_model          # out projection
            + 4 * NL * d_model * dff              # FFN lin1 + lin2
        )
        + 2 * L * d_model * F                     # output head
    )
    transcendentals = num_layers * (n_heads * NL * NL + n_heads * NL + 2 * NL)
    bytes_accessed = sum(int(a.size) * 4 for a in inputs) + L * F * 4

    return pl.pallas_call(
        partial(_fused_encoder_kernel,
                num_layers=num_layers, n_heads=n_heads, seq_len=L),
        out_shape=jax.ShapeDtypeStruct((L, F), jnp.float32),
        grid=(1,),
        in_specs=[_full_spec(a.shape) for a in inputs],
        out_specs=_full_spec((L, F)),
        compiler_params=pltpu.CompilerParams(
            dimension_semantics=("arbitrary",)),
        cost_estimate=pl.CostEstimate(
            flops=flops,
            transcendentals=transcendentals,
            bytes_accessed=bytes_accessed),
    )(*inputs)


# ----------------------------------------------------------------------------

if __name__ == "__main__":
    input_dim, d_model, n_heads, num_encoder_layers = 6, 32, 4, 2
    D0, D1 = 4, 8          # D1 <= 10 (position-embedding table size)

    key = jax.random.PRNGKey(0)
    k_params, k_src = jax.random.split(key)
    params = init_params(k_params, input_dim, d_model, num_encoder_layers)

    src = jax.random.normal(k_src, (D0, D1, input_dim), jnp.float32)
    # key padding mask, shape (N, S) = (D1, D0); True = masked key position.
    # (every batch row keeps at least one unmasked key)
    mask = jnp.zeros((D1, D0), dtype=bool).at[:, -1].set(jnp.arange(D1) % 2 == 0)

    fwd = jax.jit(partial(trajectory_transformer_forward, n_heads=n_heads))
    out = jax.block_until_ready(fwd(params, src, mask))

    assert out.shape == (D0, input_dim), out.shape
    assert bool(jnp.all(jnp.isfinite(out)))
    print("KERNEL_OK")
</pallas_src>

<mosaic_0001>
module attributes {stable_mosaic.version = 11 : i64} {
  func.func @_fused_encoder_kernel(%arg0: i32, %arg1: memref<32x6xf32, #tpu.memory_space<vmem>>, %arg2: memref<32x32xf32, #tpu.memory_space<vmem>>, %arg3: memref<32x32xf32, #tpu.memory_space<vmem>>, %arg4: memref<6x32xf32, #tpu.memory_space<vmem>>, %arg5: memref<1x32xf32, #tpu.memory_space<vmem>>, %arg6: memref<2x32x96xf32, #tpu.memory_space<vmem>>, %arg7: memref<2x1x96xf32, #tpu.memory_space<vmem>>, %arg8: memref<2x32x32xf32, #tpu.memory_space<vmem>>, %arg9: memref<2x1x32xf32, #tpu.memory_space<vmem>>, %arg10: memref<2x1x32xf32, #tpu.memory_space<vmem>>, %arg11: memref<2x1x32xf32, #tpu.memory_space<vmem>>, %arg12: memref<2x32x2048xf32, #tpu.memory_space<vmem>>, %arg13: memref<2x1x2048xf32, #tpu.memory_space<vmem>>, %arg14: memref<2x2048x32xf32, #tpu.memory_space<vmem>>, %arg15: memref<2x1x32xf32, #tpu.memory_space<vmem>>, %arg16: memref<2x1x32xf32, #tpu.memory_space<vmem>>, %arg17: memref<2x1x32xf32, #tpu.memory_space<vmem>>, %arg18: memref<32x6xf32, #tpu.memory_space<vmem>>, %arg19: memref<1x6xf32, #tpu.memory_space<vmem>>, %arg20: memref<4x6xf32, #tpu.memory_space<vmem>>) attributes {dimension_semantics = [#tpu.dimension_semantics<arbitrary>], iteration_bounds = array<i64: 1>, scalar_prefetch = 0 : i64, scratch_operands = 0 : i64, tpu.core_type = #tpu.core_type<tc>, window_params = [{pipeline_mode = #tpu.pipeline_mode<synchronous>, transform_indices = @transform_0, window_bounds = array<i64: 32, 6>}, {pipeline_mode = #tpu.pipeline_mode<synchronous>, transform_indices = @transform_1, window_bounds = array<i64: 32, 32>}, {pipeline_mode = #tpu.pipeline_mode<synchronous>, transform_indices = @transform_2, window_bounds = array<i64: 32, 32>}, {pipeline_mode = #tpu.pipeline_mode<synchronous>, transform_indices = @transform_3, window_bounds = array<i64: 6, 32>}, {pipeline_mode = #tpu.pipeline_mode<synchronous>, transform_indices = @transform_4, window_bounds = array<i64: 1, 32>}, {pipeline_mode = #tpu.pipeline_mode<synchronous>, transform_indices = @transform_5, window_bounds = array<i64: 2, 32, 96>}, {pipeline_mode = #tpu.pipeline_mode<synchronous>, transform_indices = @transform_6, window_bounds = array<i64: 2, 1, 96>}, {pipeline_mode = #tpu.pipeline_mode<synchronous>, transform_indices = @transform_7, window_bounds = array<i64: 2, 32, 32>}, {pipeline_mode = #tpu.pipeline_mode<synchronous>, transform_indices = @transform_8, window_bounds = array<i64: 2, 1, 32>}, {pipeline_mode = #tpu.pipeline_mode<synchronous>, transform_indices = @transform_9, window_bounds = array<i64: 2, 1, 32>}, {pipeline_mode = #tpu.pipeline_mode<synchronous>, transform_indices = @transform_10, window_bounds = array<i64: 2, 1, 32>}, {pipeline_mode = #tpu.pipeline_mode<synchronous>, transform_indices = @transform_11, window_bounds = array<i64: 2, 32, 2048>}, {pipeline_mode = #tpu.pipeline_mode<synchronous>, transform_indices = @transform_12, window_bounds = array<i64: 2, 1, 2048>}, {pipeline_mode = #tpu.pipeline_mode<synchronous>, transform_indices = @transform_13, window_bounds = array<i64: 2, 2048, 32>}, {pipeline_mode = #tpu.pipeline_mode<synchronous>, transform_indices = @transform_14, window_bounds = array<i64: 2, 1, 32>}, {pipeline_mode = #tpu.pipeline_mode<synchronous>, transform_indices = @transform_15, window_bounds = array<i64: 2, 1, 32>}, {pipeline_mode = #tpu.pipeline_mode<synchronous>, transform_indices = @transform_16, window_bounds = array<i64: 2, 1, 32>}, {pipeline_mode = #tpu.pipeline_mode<synchronous>, transform_indices = @transform_17, window_bounds = array<i64: 32, 6>}, {pipeline_mode = #tpu.pipeline_mode<synchronous>, transform_indices = @transform_18, window_bounds = array<i64: 1, 6>}, {pipeline_mode = #tpu.pipeline_mode<synchronous>, transform_indices = @transform_19, window_bounds = array<i64: 4, 6>}]} {
    %c0 = arith.constant 0 : index
    %c0_0 = arith.constant 0 : index
    %0 = vector.load %arg1[%c0, %c0_0] : memref<32x6xf32, #tpu.memory_space<vmem>>, vector<32x6xf32>
    %c0_1 = arith.constant 0 : index
    %c0_2 = arith.constant 0 : index
    %1 = vector.load %arg4[%c0_1, %c0_2] : memref<6x32xf32, #tpu.memory_space<vmem>>, vector<6x32xf32>
    %cst = arith.constant dense<0.000000e+00> : vector<32x32xf32>
    %2 = tpu.matmul %0, %1, %cst {dimension_numbers = #tpu.dot_dimension_numbers<[1], [0], [0], [1], [0, 0, 1, 1], [], []>} : vector<32x6xf32>, vector<6x32xf32>, vector<32x32xf32> -> vector<32x32xf32>
    %c0_3 = arith.constant 0 : index
    %c0_4 = arith.constant 0 : index
    %3 = vector.load %arg5[%c0_3, %c0_4] : memref<1x32xf32, #tpu.memory_space<vmem>>, vector<1x32xf32>
    %4 = vector.broadcast %3 : vector<1x32xf32> to vector<32x32xf32>
    %5 = arith.addf %2, %4 : vector<32x32xf32>
    %c0_5 = arith.constant 0 : index
    %c0_6 = arith.constant 0 : index
    %6 = vector.load %arg2[%c0_5, %c0_6] : memref<32x32xf32, #tpu.memory_space<vmem>>, vector<32x32xf32>
    %7 = arith.addf %5, %6 : vector<32x32xf32>
    %c0_7 = arith.constant 0 : index
    %c0_8 = arith.constant 0 : index
    %8 = vector.load %arg3[%c0_7, %c0_8] : memref<32x32xf32, #tpu.memory_space<vmem>>, vector<32x32xf32>
    %c0_9 = arith.constant 0 : index
    %c0_10 = arith.constant 0 : index
    %c0_11 = arith.constant 0 : index
    %9 = vector.load %arg6[%c0_9, %c0_10, %c0_11] : memref<2x32x96xf32, #tpu.memory_space<vmem>>, vector<1x32x96xf32>
    %10 = vector.shape_cast %9 : vector<1x32x96xf32> to vector<32x96xf32>
    %cst_12 = arith.constant dense<0.000000e+00> : vector<32x96xf32>
    %11 = tpu.matmul %7, %10, %cst_12 {dimension_numbers = #tpu.dot_dimension_numbers<[1], [0], [0], [1], [0, 0, 1, 1], [], []>} : vector<32x32xf32>, vector<32x96xf32>, vector<32x96xf32> -> vector<32x96xf32>
    %c0_13 = arith.constant 0 : index
    %c0_14 = arith.constant 0 : index
    %c0_15 = arith.constant 0 : index
    %12 = vector.load %arg7[%c0_13, %c0_14, %c0_15] : memref<2x1x96xf32, #tpu.memory_space<vmem>>, vector<1x1x96xf32>
    %13 = vector.shape_cast %12 : vector<1x1x96xf32> to vector<1x96xf32>
    %14 = vector.broadcast %13 : vector<1x96xf32> to vector<32x96xf32>
    %15 = arith.addf %11, %14 : vector<32x96xf32>
    %16 = vector.extract_strided_slice %15 {offsets = [0, 0], sizes = [32, 8], strides = [1, 1]} : vector<32x96xf32> to vector<32x8xf32>
    %17 = vector.extract_strided_slice %15 {offsets = [0, 32], sizes = [32, 8], strides = [1, 1]} : vector<32x96xf32> to vector<32x8xf32>
    %18 = vector.extract_strided_slice %15 {offsets = [0, 64], sizes = [32, 8], strides = [1, 1]} : vector<32x96xf32> to vector<32x8xf32>
    %cst_16 = arith.constant dense<0.000000e+00> : vector<32x32xf32>
    %19 = tpu.matmul %16, %17, %cst_16 {dimension_numbers = #tpu.dot_dimension_numbers<[1], [1], [0], [0], [0, 0, 1, 0], [], []>} : vector<32x8xf32>, vector<32x8xf32>, vector<32x32xf32> -> vector<32x32xf32>
    %cst_17 = arith.constant 0.353553385 : f32
    %20 = vector.broadcast %cst_17 : f32 to vector<32x32xf32>
    %21 = arith.mulf %19, %20 : vector<32x32xf32>
    %22 = arith.addf %21, %8 : vector<32x32xf32>
    %cst_18 = arith.constant dense<0xFF800000> : vector<32xf32>
    %23 = vector.multi_reduction <maximumf>, %22, %cst_18 [1] : vector<32x32xf32> to vector<32xf32>
    %24 = vector.shape_cast %23 : vector<32xf32> to vector<32x1xf32>
    %25 = vector.broadcast %24 : vector<32x1xf32> to vector<32x32xf32>
    %26 = arith.subf %22, %25 : vector<32x32xf32>
    %27 = math.exp %26 : vector<32x32xf32>
    %cst_19 = arith.constant dense<0.000000e+00> : vector<32xf32>
    %28 = vector.multi_reduction <add>, %27, %cst_19 [1] : vector<32x32xf32> to vector<32xf32>
    %29 = vector.shape_cast %28 : vector<32xf32> to vector<32x1xf32>
    %30 = tpu.reciprocal %29 {approx = true} : vector<32x1xf32> -> vector<32x1xf32>
    %31 = vector.broadcast %30 : vector<32x1xf32> to vector<32x32xf32>
    %32 = arith.mulf %27, %31 : vector<32x32xf32>
    %cst_20 = arith.constant dense<0.000000e+00> : vector<32x8xf32>
    %33 = tpu.matmul %32, %18, %cst_20 {dimension_numbers = #tpu.dot_dimension_numbers<[1], [0], [0], [1], [0, 0, 1, 1], [], []>} : vector<32x32xf32>, vector<32x8xf32>, vector<32x8xf32> -> vector<32x8xf32>
    %34 = vector.extract_strided_slice %15 {offsets = [0, 8], sizes = [32, 8], strides = [1, 1]} : vector<32x96xf32> to vector<32x8xf32>
    %35 = vector.extract_strided_slice %15 {offsets = [0, 40], sizes = [32, 8], strides = [1, 1]} : vector<32x96xf32> to vector<32x8xf32>
    %36 = vector.extract_strided_slice %15 {offsets = [0, 72], sizes = [32, 8], strides = [1, 1]} : vector<32x96xf32> to vector<32x8xf32>
    %cst_21 = arith.constant dense<0.000000e+00> : vector<32x32xf32>
    %37 = tpu.matmul %34, %35, %cst_21 {dimension_numbers = #tpu.dot_dimension_numbers<[1], [1], [0], [0], [0, 0, 1, 0], [], []>} : vector<32x8xf32>, vector<32x8xf32>, vector<32x32xf32> -> vector<32x32xf32>
    %cst_22 = arith.constant 0.353553385 : f32
    %38 = vector.broadcast %cst_22 : f32 to vector<32x32xf32>
    %39 = arith.mulf %37, %38 : vector<32x32xf32>
    %40 = arith.addf %39, %8 : vector<32x32xf32>
    %cst_23 = arith.constant dense<0xFF800000> : vector<32xf32>
    %41 = vector.multi_reduction <maximumf>, %40, %cst_23 [1] : vector<32x32xf32> to vector<32xf32>
    %42 = vector.shape_cast %41 : vector<32xf32> to vector<32x1xf32>
    %43 = vector.broadcast %42 : vector<32x1xf32> to vector<32x32xf32>
    %44 = arith.subf %40, %43 : vector<32x32xf32>
    %45 = math.exp %44 : vector<32x32xf32>
    %cst_24 = arith.constant dense<0.000000e+00> : vector<32xf32>
    %46 = vector.multi_reduction <add>, %45, %cst_24 [1] : vector<32x32xf32> to vector<32xf32>
    %47 = vector.shape_cast %46 : vector<32xf32> to vector<32x1xf32>
    %48 = tpu.reciprocal %47 {approx = true} : vector<32x1xf32> -> vector<32x1xf32>
    %49 = vector.broadcast %48 : vector<32x1xf32> to vector<32x32xf32>
    %50 = arith.mulf %45, %49 : vector<32x32xf32>
    %cst_25 = arith.constant dense<0.000000e+00> : vector<32x8xf32>
    %51 = tpu.matmul %50, %36, %cst_25 {dimension_numbers = #tpu.dot_dimension_numbers<[1], [0], [0], [1], [0, 0, 1, 1], [], []>} : vector<32x32xf32>, vector<32x8xf32>, vector<32x8xf32> -> vector<32x8xf32>
    %52 = vector.extract_strided_slice %15 {offsets = [0, 16], sizes = [32, 8], strides = [1, 1]} : vector<32x96xf32> to vector<32x8xf32>
    %53 = vector.extract_strided_slice %15 {offsets = [0, 48], sizes = [32, 8], strides = [1, 1]} : vector<32x96xf32> to vector<32x8xf32>
    %54 = vector.extract_strided_slice %15 {offsets = [0, 80], sizes = [32, 8], strides = [1, 1]} : vector<32x96xf32> to vector<32x8xf32>
    %cst_26 = arith.constant dense<0.000000e+00> : vector<32x32xf32>
    %55 = tpu.matmul %52, %53, %cst_26 {dimension_numbers = #tpu.dot_dimension_numbers<[1], [1], [0], [0], [0, 0, 1, 0], [], []>} : vector<32x8xf32>, vector<32x8xf32>, vector<32x32xf32> -> vector<32x32xf32>
    %cst_27 = arith.constant 0.353553385 : f32
    %56 = vector.broadcast %cst_27 : f32 to vector<32x32xf32>
    %57 = arith.mulf %55, %56 : vector<32x32xf32>
    %58 = arith.addf %57, %8 : vector<32x32xf32>
    %cst_28 = arith.constant dense<0xFF800000> : vector<32xf32>
    %59 = vector.multi_reduction <maximumf>, %58, %cst_28 [1] : vector<32x32xf32> to vector<32xf32>
    %60 = vector.shape_cast %59 : vector<32xf32> to vector<32x1xf32>
    %61 = vector.broadcast %60 : vector<32x1xf32> to vector<32x32xf32>
    %62 = arith.subf %58, %61 : vector<32x32xf32>
    %63 = math.exp %62 : vector<32x32xf32>
    %cst_29 = arith.constant dense<0.000000e+00> : vector<32xf32>
    %64 = vector.multi_reduction <add>, %63, %cst_29 [1] : vector<32x32xf32> to vector<32xf32>
    %65 = vector.shape_cast %64 : vector<32xf32> to vector<32x1xf32>
    %66 = tpu.reciprocal %65 {approx = true} : vector<32x1xf32> -> vector<32x1xf32>
    %67 = vector.broadcast %66 : vector<32x1xf32> to vector<32x32xf32>
    %68 = arith.mulf %63, %67 : vector<32x32xf32>
    %cst_30 = arith.constant dense<0.000000e+00> : vector<32x8xf32>
    %69 = tpu.matmul %68, %54, %cst_30 {dimension_numbers = #tpu.dot_dimension_numbers<[1], [0], [0], [1], [0, 0, 1, 1], [], []>} : vector<32x32xf32>, vector<32x8xf32>, vector<32x8xf32> -> vector<32x8xf32>
    %70 = vector.extract_strided_slice %15 {offsets = [0, 24], sizes = [32, 8], strides = [1, 1]} : vector<32x96xf32> to vector<32x8xf32>
    %71 = vector.extract_strided_slice %15 {offsets = [0, 56], sizes = [32, 8], strides = [1, 1]} : vector<32x96xf32> to vector<32x8xf32>
    %72 = vector.extract_strided_slice %15 {offsets = [0, 88], sizes = [32, 8], strides = [1, 1]} : vector<32x96xf32> to vector<32x8xf32>
    %cst_31 = arith.constant dense<0.000000e+00> : vector<32x32xf32>
    %73 = tpu.matmul %70, %71, %cst_31 {dimension_numbers = #tpu.dot_dimension_numbers<[1], [1], [0], [0], [0, 0, 1, 0], [], []>} : vector<32x8xf32>, vector<32x8xf32>, vector<32x32xf32> -> vector<32x32xf32>
    %cst_32 = arith.constant 0.353553385 : f32
    %74 = vector.broadcast %cst_32 : f32 to vector<32x32xf32>
    %75 = arith.mulf %73, %74 : vector<32x32xf32>
    %76 = arith.addf %75, %8 : vector<32x32xf32>
    %cst_33 = arith.constant dense<0xFF800000> : vector<32xf32>
    %77 = vector.multi_reduction <maximumf>, %76, %cst_33 [1] : vector<32x32xf32> to vector<32xf32>
    %78 = vector.shape_cast %77 : vector<32xf32> to vector<32x1xf32>
    %79 = vector.broadcast %78 : vector<32x1xf32> to vector<32x32xf32>
    %80 = arith.subf %76, %79 : vector<32x32xf32>
    %81 = math.exp %80 : vector<32x32xf32>
    %cst_34 = arith.constant dense<0.000000e+00> : vector<32xf32>
    %82 = vector.multi_reduction <add>, %81, %cst_34 [1] : vector<32x32xf32> to vector<32xf32>
    %83 = vector.shape_cast %82 : vector<32xf32> to vector<32x1xf32>
    %84 = tpu.reciprocal %83 {approx = true} : vector<32x1xf32> -> vector<32x1xf32>
    %85 = vector.broadcast %84 : vector<32x1xf32> to vector<32x32xf32>
    %86 = arith.mulf %81, %85 : vector<32x32xf32>
    %cst_35 = arith.constant dense<0.000000e+00> : vector<32x8xf32>
    %87 = tpu.matmul %86, %72, %cst_35 {dimension_numbers = #tpu.dot_dimension_numbers<[1], [0], [0], [1], [0, 0, 1, 1], [], []>} : vector<32x32xf32>, vector<32x8xf32>, vector<32x8xf32> -> vector<32x8xf32>
    %88 = tpu.concatenate %33, %51, %69, %87 in 1 : vector<32x8xf32>, vector<32x8xf32>, vector<32x8xf32>, vector<32x8xf32> -> vector<32x32xf32>
    %c0_36 = arith.constant 0 : index
    %c0_37 = arith.constant 0 : index
    %c0_38 = arith.constant 0 : index
    %89 = vector.load %arg8[%c0_36, %c0_37, %c0_38] : memref<2x32x32xf32, #tpu.memory_space<vmem>>, vector<1x32x32xf32>
    %90 = vector.shape_cast %89 : vector<1x32x32xf32> to vector<32x32xf32>
    %cst_39 = arith.constant dense<0.000000e+00> : vector<32x32xf32>
    %91 = tpu.matmul %88, %90, %cst_39 {dimension_numbers = #tpu.dot_dimension_numbers<[1], [0], [0], [1], [0, 0, 1, 1], [], []>} : vector<32x32xf32>, vector<32x32xf32>, vector<32x32xf32> -> vector<32x32xf32>
    %c0_40 = arith.constant 0 : index
    %c0_41 = arith.constant 0 : index
    %c0_42 = arith.constant 0 : index
    %92 = vector.load %arg9[%c0_40, %c0_41, %c0_42] : memref<2x1x32xf32, #tpu.memory_space<vmem>>, vector<1x1x32xf32>
    %93 = vector.shape_cast %92 : vector<1x1x32xf32> to vector<1x32xf32>
    %94 = vector.broadcast %93 : vector<1x32xf32> to vector<32x32xf32>
    %95 = arith.addf %91, %94 : vector<32x32xf32>
    %96 = arith.addf %7, %95 : vector<32x32xf32>
    %c0_43 = arith.constant 0 : index
    %c0_44 = arith.constant 0 : index
    %c0_45 = arith.constant 0 : index
    %97 = vector.load %arg10[%c0_43, %c0_44, %c0_45] : memref<2x1x32xf32, #tpu.memory_space<vmem>>, vector<1x1x32xf32>
    %98 = vector.shape_cast %97 : vector<1x1x32xf32> to vector<1x32xf32>
    %c0_46 = arith.constant 0 : index
    %c0_47 = arith.constant 0 : index
    %c0_48 = arith.constant 0 : index
    %99 = vector.load %arg11[%c0_46, %c0_47, %c0_48] : memref<2x1x32xf32, #tpu.memory_space<vmem>>, vector<1x1x32xf32>
    %100 = vector.shape_cast %99 : vector<1x1x32xf32> to vector<1x32xf32>
    %cst_49 = arith.constant dense<0.000000e+00> : vector<32xf32>
    %101 = vector.multi_reduction <add>, %96, %cst_49 [1] : vector<32x32xf32> to vector<32xf32>
    %102 = vector.shape_cast %101 : vector<32xf32> to vector<32x1xf32>
    %cst_50 = arith.constant 3.200000e+01 : f32
    %103 = vector.broadcast %cst_50 : f32 to vector<32x1xf32>
    %104 = arith.divf %102, %103 : vector<32x1xf32>
    %105 = vector.broadcast %104 : vector<32x1xf32> to vector<32x32xf32>
    %106 = arith.subf %96, %105 : vector<32x32xf32>
    %107 = arith.mulf %106, %106 : vector<32x32xf32>
    %cst_51 = arith.constant dense<0.000000e+00> : vector<32xf32>
    %108 = vector.multi_reduction <add>, %107, %cst_51 [1] : vector<32x32xf32> to vector<32xf32>
    %109 = vector.shape_cast %108 : vector<32xf32> to vector<32x1xf32>
    %cst_52 = arith.constant 3.200000e+01 : f32
    %110 = vector.broadcast %cst_52 : f32 to vector<32x1xf32>
    %111 = arith.divf %109, %110 : vector<32x1xf32>
    %112 = vector.broadcast %104 : vector<32x1xf32> to vector<32x32xf32>
    %113 = arith.subf %96, %112 : vector<32x32xf32>
    %cst_53 = arith.constant 9.99999974E-6 : f32
    %114 = vector.broadcast %cst_53 : f32 to vector<32x1xf32>
    %115 = arith.addf %111, %114 : vector<32x1xf32>
    %116 = math.rsqrt %115 : vector<32x1xf32>
    %117 = vector.broadcast %116 : vector<32x1xf32> to vector<32x32xf32>
    %118 = arith.mulf %113, %117 : vector<32x32xf32>
    %119 = vector.broadcast %98 : vector<1x32xf32> to vector<32x32xf32>
    %120 = arith.mulf %118, %119 : vector<32x32xf32>
    %121 = vector.broadcast %100 : vector<1x32xf32> to vector<32x32xf32>
    %122 = arith.addf %120, %121 : vector<32x32xf32>
    %c0_54 = arith.constant 0 : index
    %c0_55 = arith.constant 0 : index
    %c0_56 = arith.constant 0 : index
    %123 = vector.load %arg12[%c0_54, %c0_55, %c0_56] : memref<2x32x2048xf32, #tpu.memory_space<vmem>>, vector<1x32x2048xf32>
    %124 = vector.shape_cast %123 : vector<1x32x2048xf32> to vector<32x2048xf32>
    %cst_57 = arith.constant dense<0.000000e+00> : vector<32x2048xf32>
    %125 = tpu.matmul %122, %124, %cst_57 {dimension_numbers = #tpu.dot_dimension_numbers<[1], [0], [0], [1], [0, 0, 1, 1], [], []>} : vector<32x32xf32>, vector<32x2048xf32>, vector<32x2048xf32> -> vector<32x2048xf32>
    %c0_58 = arith.constant 0 : index
    %c0_59 = arith.constant 0 : index
    %c0_60 = arith.constant 0 : index
    %126 = vector.load %arg13[%c0_58, %c0_59, %c0_60] : memref<2x1x2048xf32, #tpu.memory_space<vmem>>, vector<1x1x2048xf32>
    %127 = vector.shape_cast %126 : vector<1x1x2048xf32> to vector<1x2048xf32>
    %128 = vector.broadcast %127 : vector<1x2048xf32> to vector<32x2048xf32>
    %129 = arith.addf %125, %128 : vector<32x2048xf32>
    %cst_61 = arith.constant 0.000000e+00 : f32
    %130 = vector.broadcast %cst_61 : f32 to vector<32x2048xf32>
    %131 = arith.maximumf %129, %130 : vector<32x2048xf32>
    %c0_62 = arith.constant 0 : index
    %c0_63 = arith.constant 0 : index
    %c0_64 = arith.constant 0 : index
    %132 = vector.load %arg14[%c0_62, %c0_63, %c0_64] : memref<2x2048x32xf32, #tpu.memory_space<vmem>>, vector<1x2048x32xf32>
    %133 = vector.shape_cast %132 : vector<1x2048x32xf32> to vector<2048x32xf32>
    %cst_65 = arith.constant dense<0.000000e+00> : vector<32x32xf32>
    %134 = tpu.matmul %131, %133, %cst_65 {dimension_numbers = #tpu.dot_dimension_numbers<[1], [0], [0], [1], [0, 0, 1, 1], [], []>} : vector<32x2048xf32>, vector<2048x32xf32>, vector<32x32xf32> -> vector<32x32xf32>
    %c0_66 = arith.constant 0 : index
    %c0_67 = arith.constant 0 : index
    %c0_68 = arith.constant 0 : index
    %135 = vector.load %arg15[%c0_66, %c0_67, %c0_68] : memref<2x1x32xf32, #tpu.memory_space<vmem>>, vector<1x1x32xf32>
    %136 = vector.shape_cast %135 : vector<1x1x32xf32> to vector<1x32xf32>
    %137 = vector.broadcast %136 : vector<1x32xf32> to vector<32x32xf32>
    %138 = arith.addf %134, %137 : vector<32x32xf32>
    %139 = arith.addf %122, %138 : vector<32x32xf32>
    %c0_69 = arith.constant 0 : index
    %c0_70 = arith.constant 0 : index
    %c0_71 = arith.constant 0 : index
    %140 = vector.load %arg16[%c0_69, %c0_70, %c0_71] : memref<2x1x32xf32, #tpu.memory_space<vmem>>, vector<1x1x32xf32>
    %141 = vector.shape_cast %140 : vector<1x1x32xf32> to vector<1x32xf32>
    %c0_72 = arith.constant 0 : index
    %c0_73 = arith.constant 0 : index
    %c0_74 = arith.constant 0 : index
    %142 = vector.load %arg17[%c0_72, %c0_73, %c0_74] : memref<2x1x32xf32, #tpu.memory_space<vmem>>, vector<1x1x32xf32>
    %143 = vector.shape_cast %142 : vector<1x1x32xf32> to vector<1x32xf32>
    %cst_75 = arith.constant dense<0.000000e+00> : vector<32xf32>
    %144 = vector.multi_reduction <add>, %139, %cst_75 [1] : vector<32x32xf32> to vector<32xf32>
    %145 = vector.shape_cast %144 : vector<32xf32> to vector<32x1xf32>
    %cst_76 = arith.constant 3.200000e+01 : f32
    %146 = vector.broadcast %cst_76 : f32 to vector<32x1xf32>
    %147 = arith.divf %145, %146 : vector<32x1xf32>
    %148 = vector.broadcast %147 : vector<32x1xf32> to vector<32x32xf32>
    %149 = arith.subf %139, %148 : vector<32x32xf32>
    %150 = arith.mulf %149, %149 : vector<32x32xf32>
    %cst_77 = arith.constant dense<0.000000e+00> : vector<32xf32>
    %151 = vector.multi_reduction <add>, %150, %cst_77 [1] : vector<32x32xf32> to vector<32xf32>
    %152 = vector.shape_cast %151 : vector<32xf32> to vector<32x1xf32>
    %cst_78 = arith.constant 3.200000e+01 : f32
    %153 = vector.broadcast %cst_78 : f32 to vector<32x1xf32>
    %154 = arith.divf %152, %153 : vector<32x1xf32>
    %155 = vector.broadcast %147 : vector<32x1xf32> to vector<32x32xf32>
    %156 = arith.subf %139, %155 : vector<32x32xf32>
    %cst_79 = arith.constant 9.99999974E-6 : f32
    %157 = vector.broadcast %cst_79 : f32 to vector<32x1xf32>
    %158 = arith.addf %154, %157 : vector<32x1xf32>
    %159 = math.rsqrt %158 : vector<32x1xf32>
    %160 = vector.broadcast %159 : vector<32x1xf32> to vector<32x32xf32>
    %161 = arith.mulf %156, %160 : vector<32x32xf32>
    %162 = vector.broadcast %141 : vector<1x32xf32> to vector<32x32xf32>
    %163 = arith.mulf %161, %162 : vector<32x32xf32>
    %164 = vector.broadcast %143 : vector<1x32xf32> to vector<32x32xf32>
    %165 = arith.addf %163, %164 : vector<32x32xf32>
    %c1 = arith.constant 1 : index
    %c0_80 = arith.constant 0 : index
    %c0_81 = arith.constant 0 : index
    %166 = vector.load %arg6[%c1, %c0_80, %c0_81] : memref<2x32x96xf32, #tpu.memory_space<vmem>>, vector<1x32x96xf32>
    %167 = vector.shape_cast %166 : vector<1x32x96xf32> to vector<32x96xf32>
    %cst_82 = arith.constant dense<0.000000e+00> : vector<32x96xf32>
    %168 = tpu.matmul %165, %167, %cst_82 {dimension_numbers = #tpu.dot_dimension_numbers<[1], [0], [0], [1], [0, 0, 1, 1], [], []>} : vector<32x32xf32>, vector<32x96xf32>, vector<32x96xf32> -> vector<32x96xf32>
    %c1_83 = arith.constant 1 : index
    %c0_84 = arith.constant 0 : index
    %c0_85 = arith.constant 0 : index
    %169 = vector.load %arg7[%c1_83, %c0_84, %c0_85] : memref<2x1x96xf32, #tpu.memory_space<vmem>>, vector<1x1x96xf32>
    %170 = vector.shape_cast %169 : vector<1x1x96xf32> to vector<1x96xf32>
    %171 = vector.broadcast %170 : vector<1x96xf32> to vector<32x96xf32>
    %172 = arith.addf %168, %171 : vector<32x96xf32>
    %173 = vector.extract_strided_slice %172 {offsets = [0, 0], sizes = [32, 8], strides = [1, 1]} : vector<32x96xf32> to vector<32x8xf32>
    %174 = vector.extract_strided_slice %172 {offsets = [0, 32], sizes = [32, 8], strides = [1, 1]} : vector<32x96xf32> to vector<32x8xf32>
    %175 = vector.extract_strided_slice %172 {offsets = [0, 64], sizes = [32, 8], strides = [1, 1]} : vector<32x96xf32> to vector<32x8xf32>
    %cst_86 = arith.constant dense<0.000000e+00> : vector<32x32xf32>
    %176 = tpu.matmul %173, %174, %cst_86 {dimension_numbers = #tpu.dot_dimension_numbers<[1], [1], [0], [0], [0, 0, 1, 0], [], []>} : vector<32x8xf32>, vector<32x8xf32>, vector<32x32xf32> -> vector<32x32xf32>
    %cst_87 = arith.constant 0.353553385 : f32
    %177 = vector.broadcast %cst_87 : f32 to vector<32x32xf32>
    %178 = arith.mulf %176, %177 : vector<32x32xf32>
    %179 = arith.addf %178, %8 : vector<32x32xf32>
    %cst_88 = arith.constant dense<0xFF800000> : vector<32xf32>
    %180 = vector.multi_reduction <maximumf>, %179, %cst_88 [1] : vector<32x32xf32> to vector<32xf32>
    %181 = vector.shape_cast %180 : vector<32xf32> to vector<32x1xf32>
    %182 = vector.broadcast %181 : vector<32x1xf32> to vector<32x32xf32>
    %183 = arith.subf %179, %182 : vector<32x32xf32>
    %184 = math.exp %183 : vector<32x32xf32>
    %cst_89 = arith.constant dense<0.000000e+00> : vector<32xf32>
    %185 = vector.multi_reduction <add>, %184, %cst_89 [1] : vector<32x32xf32> to vector<32xf32>
    %186 = vector.shape_cast %185 : vector<32xf32> to vector<32x1xf32>
    %187 = tpu.reciprocal %186 {approx = true} : vector<32x1xf32> -> vector<32x1xf32>
    %188 = vector.broadcast %187 : vector<32x1xf32> to vector<32x32xf32>
    %189 = arith.mulf %184, %188 : vector<32x32xf32>
    %cst_90 = arith.constant dense<0.000000e+00> : vector<32x8xf32>
    %190 = tpu.matmul %189, %175, %cst_90 {dimension_numbers = #tpu.dot_dimension_numbers<[1], [0], [0], [1], [0, 0, 1, 1], [], []>} : vector<32x32xf32>, vector<32x8xf32>, vector<32x8xf32> -> vector<32x8xf32>
    %191 = vector.extract_strided_slice %172 {offsets = [0, 8], sizes = [32, 8], strides = [1, 1]} : vector<32x96xf32> to vector<32x8xf32>
    %192 = vector.extract_strided_slice %172 {offsets = [0, 40], sizes = [32, 8], strides = [1, 1]} : vector<32x96xf32> to vector<32x8xf32>
    %193 = vector.extract_strided_slice %172 {offsets = [0, 72], sizes = [32, 8], strides = [1, 1]} : vector<32x96xf32> to vector<32x8xf32>
    %cst_91 = arith.constant dense<0.000000e+00> : vector<32x32xf32>
    %194 = tpu.matmul %191, %192, %cst_91 {dimension_numbers = #tpu.dot_dimension_numbers<[1], [1], [0], [0], [0, 0, 1, 0], [], []>} : vector<32x8xf32>, vector<32x8xf32>, vector<32x32xf32> -> vector<32x32xf32>
    %cst_92 = arith.constant 0.353553385 : f32
    %195 = vector.broadcast %cst_92 : f32 to vector<32x32xf32>
    %196 = arith.mulf %194, %195 : vector<32x32xf32>
    %197 = arith.addf %196, %8 : vector<32x32xf32>
    %cst_93 = arith.constant dense<0xFF800000> : vector<32xf32>
    %198 = vector.multi_reduction <maximumf>, %197, %cst_93 [1] : vector<32x32xf32> to vector<32xf32>
    %199 = vector.shape_cast %198 : vector<32xf32> to vector<32x1xf32>
    %200 = vector.broadcast %199 : vector<32x1xf32> to vector<32x32xf32>
    %201 = arith.subf %197, %200 : vector<32x32xf32>
    %202 = math.exp %201 : vector<32x32xf32>
    %cst_94 = arith.constant dense<0.000000e+00> : vector<32xf32>
    %203 = vector.multi_reduction <add>, %202, %cst_94 [1] : vector<32x32xf32> to vector<32xf32>
    %204 = vector.shape_cast %203 : vector<32xf32> to vector<32x1xf32>
    %205 = tpu.reciprocal %204 {approx = true} : vector<32x1xf32> -> vector<32x1xf32>
    %206 = vector.broadcast %205 : vector<32x1xf32> to vector<32x32xf32>
    %207 = arith.mulf %202, %206 : vector<32x32xf32>
    %cst_95 = arith.constant dense<0.000000e+00> : vector<32x8xf32>
    %208 = tpu.matmul %207, %193, %cst_95 {dimension_numbers = #tpu.dot_dimension_numbers<[1], [0], [0], [1], [0, 0, 1, 1], [], []>} : vector<32x32xf32>, vector<32x8xf32>, vector<32x8xf32> -> vector<32x8xf32>
    %209 = vector.extract_strided_slice %172 {offsets = [0, 16], sizes = [32, 8], strides = [1, 1]} : vector<32x96xf32> to vector<32x8xf32>
    %210 = vector.extract_strided_slice %172 {offsets = [0, 48], sizes = [32, 8], strides = [1, 1]} : vector<32x96xf32> to vector<32x8xf32>
    %211 = vector.extract_strided_slice %172 {offsets = [0, 80], sizes = [32, 8], strides = [1, 1]} : vector<32x96xf32> to vector<32x8xf32>
    %cst_96 = arith.constant dense<0.000000e+00> : vector<32x32xf32>
    %212 = tpu.matmul %209, %210, %cst_96 {dimension_numbers = #tpu.dot_dimension_numbers<[1], [1], [0], [0], [0, 0, 1, 0], [], []>} : vector<32x8xf32>, vector<32x8xf32>, vector<32x32xf32> -> vector<32x32xf32>
    %cst_97 = arith.constant 0.353553385 : f32
    %213 = vector.broadcast %cst_97 : f32 to vector<32x32xf32>
    %214 = arith.mulf %212, %213 : vector<32x32xf32>
    %215 = arith.addf %214, %8 : vector<32x32xf32>
    %cst_98 = arith.constant dense<0xFF800000> : vector<32xf32>
    %216 = vector.multi_reduction <maximumf>, %215, %cst_98 [1] : vector<32x32xf32> to vector<32xf32>
    %217 = vector.shape_cast %216 : vector<32xf32> to vector<32x1xf32>
    %218 = vector.broadcast %217 : vector<32x1xf32> to vector<32x32xf32>
    %219 = arith.subf %215, %218 : vector<32x32xf32>
    %220 = math.exp %219 : vector<32x32xf32>
    %cst_99 = arith.constant dense<0.000000e+00> : vector<32xf32>
    %221 = vector.multi_reduction <add>, %220, %cst_99 [1] : vector<32x32xf32> to vector<32xf32>
    %222 = vector.shape_cast %221 : vector<32xf32> to vector<32x1xf32>
    %223 = tpu.reciprocal %222 {approx = true} : vector<32x1xf32> -> vector<32x1xf32>
    %224 = vector.broadcast %223 : vector<32x1xf32> to vector<32x32xf32>
    %225 = arith.mulf %220, %224 : vector<32x32xf32>
    %cst_100 = arith.constant dense<0.000000e+00> : vector<32x8xf32>
    %226 = tpu.matmul %225, %211, %cst_100 {dimension_numbers = #tpu.dot_dimension_numbers<[1], [0], [0], [1], [0, 0, 1, 1], [], []>} : vector<32x32xf32>, vector<32x8xf32>, vector<32x8xf32> -> vector<32x8xf32>
    %227 = vector.extract_strided_slice %172 {offsets = [0, 24], sizes = [32, 8], strides = [1, 1]} : vector<32x96xf32> to vector<32x8xf32>
    %228 = vector.extract_strided_slice %172 {offsets = [0, 56], sizes = [32, 8], strides = [1, 1]} : vector<32x96xf32> to vector<32x8xf32>
    %229 = vector.extract_strided_slice %172 {offsets = [0, 88], sizes = [32, 8], strides = [1, 1]} : vector<32x96xf32> to vector<32x8xf32>
    %cst_101 = arith.constant dense<0.000000e+00> : vector<32x32xf32>
    %230 = tpu.matmul %227, %228, %cst_101 {dimension_numbers = #tpu.dot_dimension_numbers<[1], [1], [0], [0], [0, 0, 1, 0], [], []>} : vector<32x8xf32>, vector<32x8xf32>, vector<32x32xf32> -> vector<32x32xf32>
    %cst_102 = arith.constant 0.353553385 : f32
    %231 = vector.broadcast %cst_102 : f32 to vector<32x32xf32>
    %232 = arith.mulf %230, %231 : vector<32x32xf32>
    %233 = arith.addf %232, %8 : vector<32x32xf32>
    %cst_103 = arith.constant dense<0xFF800000> : vector<32xf32>
    %234 = vector.multi_reduction <maximumf>, %233, %cst_103 [1] : vector<32x32xf32> to vector<32xf32>
    %235 = vector.shape_cast %234 : vector<32xf32> to vector<32x1xf32>
    %236 = vector.broadcast %235 : vector<32x1xf32> to vector<32x32xf32>
    %237 = arith.subf %233, %236 : vector<32x32xf32>
    %238 = math.exp %237 : vector<32x32xf32>
    %cst_104 = arith.constant dense<0.000000e+00> : vector<32xf32>
    %239 = vector.multi_reduction <add>, %238, %cst_104 [1] : vector<32x32xf32> to vector<32xf32>
    %240 = vector.shape_cast %239 : vector<32xf32> to vector<32x1xf32>
    %241 = tpu.reciprocal %240 {approx = true} : vector<32x1xf32> -> vector<32x1xf32>
    %242 = vector.broadcast %241 : vector<32x1xf32> to vector<32x32xf32>
    %243 = arith.mulf %238, %242 : vector<32x32xf32>
    %cst_105 = arith.constant dense<0.000000e+00> : vector<32x8xf32>
    %244 = tpu.matmul %243, %229, %cst_105 {dimension_numbers = #tpu.dot_dimension_numbers<[1], [0], [0], [1], [0, 0, 1, 1], [], []>} : vector<32x32xf32>, vector<32x8xf32>, vector<32x8xf32> -> vector<32x8xf32>
    %245 = tpu.concatenate %190, %208, %226, %244 in 1 : vector<32x8xf32>, vector<32x8xf32>, vector<32x8xf32>, vector<32x8xf32> -> vector<32x32xf32>
    %c1_106 = arith.constant 1 : index
    %c0_107 = arith.constant 0 : index
    %c0_108 = arith.constant 0 : index
    %246 = vector.load %arg8[%c1_106, %c0_107, %c0_108] : memref<2x32x32xf32, #tpu.memory_space<vmem>>, vector<1x32x32xf32>
    %247 = vector.shape_cast %246 : vector<1x32x32xf32> to vector<32x32xf32>
    %cst_109 = arith.constant dense<0.000000e+00> : vector<32x32xf32>
    %248 = tpu.matmul %245, %247, %cst_109 {dimension_numbers = #tpu.dot_dimension_numbers<[1], [0], [0], [1], [0, 0, 1, 1], [], []>} : vector<32x32xf32>, vector<32x32xf32>, vector<32x32xf32> -> vector<32x32xf32>
    %c1_110 = arith.constant 1 : index
    %c0_111 = arith.constant 0 : index
    %c0_112 = arith.constant 0 : index
    %249 = vector.load %arg9[%c1_110, %c0_111, %c0_112] : memref<2x1x32xf32, #tpu.memory_space<vmem>>, vector<1x1x32xf32>
    %250 = vector.shape_cast %249 : vector<1x1x32xf32> to vector<1x32xf32>
    %251 = vector.broadcast %250 : vector<1x32xf32> to vector<32x32xf32>
    %252 = arith.addf %248, %251 : vector<32x32xf32>
    %253 = arith.addf %165, %252 : vector<32x32xf32>
    %c1_113 = arith.constant 1 : index
    %c0_114 = arith.constant 0 : index
    %c0_115 = arith.constant 0 : index
    %254 = vector.load %arg10[%c1_113, %c0_114, %c0_115] : memref<2x1x32xf32, #tpu.memory_space<vmem>>, vector<1x1x32xf32>
    %255 = vector.shape_cast %254 : vector<1x1x32xf32> to vector<1x32xf32>
    %c1_116 = arith.constant 1 : index
    %c0_117 = arith.constant 0 : index
    %c0_118 = arith.constant 0 : index
    %256 = vector.load %arg11[%c1_116, %c0_117, %c0_118] : memref<2x1x32xf32, #tpu.memory_space<vmem>>, vector<1x1x32xf32>
    %257 = vector.shape_cast %256 : vector<1x1x32xf32> to vector<1x32xf32>
    %cst_119 = arith.constant dense<0.000000e+00> : vector<32xf32>
    %258 = vector.multi_reduction <add>, %253, %cst_119 [1] : vector<32x32xf32> to vector<32xf32>
    %259 = vector.shape_cast %258 : vector<32xf32> to vector<32x1xf32>
    %cst_120 = arith.constant 3.200000e+01 : f32
    %260 = vector.broadcast %cst_120 : f32 to vector<32x1xf32>
    %261 = arith.divf %259, %260 : vector<32x1xf32>
    %262 = vector.broadcast %261 : vector<32x1xf32> to vector<32x32xf32>
    %263 = arith.subf %253, %262 : vector<32x32xf32>
    %264 = arith.mulf %263, %263 : vector<32x32xf32>
    %cst_121 = arith.constant dense<0.000000e+00> : vector<32xf32>
    %265 = vector.multi_reduction <add>, %264, %cst_121 [1] : vector<32x32xf32> to vector<32xf32>
    %266 = vector.shape_cast %265 : vector<32xf32> to vector<32x1xf32>
    %cst_122 = arith.constant 3.200000e+01 : f32
    %267 = vector.broadcast %cst_122 : f32 to vector<32x1xf32>
    %268 = arith.divf %266, %267 : vector<32x1xf32>
    %269 = vector.broadcast %261 : vector<32x1xf32> to vector<32x32xf32>
    %270 = arith.subf %253, %269 : vector<32x32xf32>
    %cst_123 = arith.constant 9.99999974E-6 : f32
    %271 = vector.broadcast %cst_123 : f32 to vector<32x1xf32>
    %272 = arith.addf %268, %271 : vector<32x1xf32>
    %273 = math.rsqrt %272 : vector<32x1xf32>
    %274 = vector.broadcast %273 : vector<32x1xf32> to vector<32x32xf32>
    %275 = arith.mulf %270, %274 : vector<32x32xf32>
    %276 = vector.broadcast %255 : vector<1x32xf32> to vector<32x32xf32>
    %277 = arith.mulf %275, %276 : vector<32x32xf32>
    %278 = vector.broadcast %257 : vector<1x32xf32> to vector<32x32xf32>
    %279 = arith.addf %277, %278 : vector<32x32xf32>
    %c1_124 = arith.constant 1 : index
    %c0_125 = arith.constant 0 : index
    %c0_126 = arith.constant 0 : index
    %280 = vector.load %arg12[%c1_124, %c0_125, %c0_126] : memref<2x32x2048xf32, #tpu.memory_space<vmem>>, vector<1x32x2048xf32>
    %281 = vector.shape_cast %280 : vector<1x32x2048xf32> to vector<32x2048xf32>
    %cst_127 = arith.constant dense<0.000000e+00> : vector<32x2048xf32>
    %282 = tpu.matmul %279, %281, %cst_127 {dimension_numbers = #tpu.dot_dimension_numbers<[1], [0], [0], [1], [0, 0, 1, 1], [], []>} : vector<32x32xf32>, vector<32x2048xf32>, vector<32x2048xf32> -> vector<32x2048xf32>
    %c1_128 = arith.constant 1 : index
    %c0_129 = arith.constant 0 : index
    %c0_130 = arith.constant 0 : index
    %283 = vector.load %arg13[%c1_128, %c0_129, %c0_130] : memref<2x1x2048xf32, #tpu.memory_space<vmem>>, vector<1x1x2048xf32>
    %284 = vector.shape_cast %283 : vector<1x1x2048xf32> to vector<1x2048xf32>
    %285 = vector.broadcast %284 : vector<1x2048xf32> to vector<32x2048xf32>
    %286 = arith.addf %282, %285 : vector<32x2048xf32>
    %cst_131 = arith.constant 0.000000e+00 : f32
    %287 = vector.broadcast %cst_131 : f32 to vector<32x2048xf32>
    %288 = arith.maximumf %286, %287 : vector<32x2048xf32>
    %c1_132 = arith.constant 1 : index
    %c0_133 = arith.constant 0 : index
    %c0_134 = arith.constant 0 : index
    %289 = vector.load %arg14[%c1_132, %c0_133, %c0_134] : memref<2x2048x32xf32, #tpu.memory_space<vmem>>, vector<1x2048x32xf32>
    %290 = vector.shape_cast %289 : vector<1x2048x32xf32> to vector<2048x32xf32>
    %cst_135 = arith.constant dense<0.000000e+00> : vector<32x32xf32>
    %291 = tpu.matmul %288, %290, %cst_135 {dimension_numbers = #tpu.dot_dimension_numbers<[1], [0], [0], [1], [0, 0, 1, 1], [], []>} : vector<32x2048xf32>, vector<2048x32xf32>, vector<32x32xf32> -> vector<32x32xf32>
    %c1_136 = arith.constant 1 : index
    %c0_137 = arith.constant 0 : index
    %c0_138 = arith.constant 0 : index
    %292 = vector.load %arg15[%c1_136, %c0_137, %c0_138] : memref<2x1x32xf32, #tpu.memory_space<vmem>>, vector<1x1x32xf32>
    %293 = vector.shape_cast %292 : vector<1x1x32xf32> to vector<1x32xf32>
    %294 = vector.broadcast %293 : vector<1x32xf32> to vector<32x32xf32>
    %295 = arith.addf %291, %294 : vector<32x32xf32>
    %296 = arith.addf %279, %295 : vector<32x32xf32>
    %c1_139 = arith.constant 1 : index
    %c0_140 = arith.constant 0 : index
    %c0_141 = arith.constant 0 : index
    %297 = vector.load %arg16[%c1_139, %c0_140, %c0_141] : memref<2x1x32xf32, #tpu.memory_space<vmem>>, vector<1x1x32xf32>
    %298 = vector.shape_cast %297 : vector<1x1x32xf32> to vector<1x32xf32>
    %c1_142 = arith.constant 1 : index
    %c0_143 = arith.constant 0 : index
    %c0_144 = arith.constant 0 : index
    %299 = vector.load %arg17[%c1_142, %c0_143, %c0_144] : memref<2x1x32xf32, #tpu.memory_space<vmem>>, vector<1x1x32xf32>
    %300 = vector.shape_cast %299 : vector<1x1x32xf32> to vector<1x32xf32>
    %cst_145 = arith.constant dense<0.000000e+00> : vector<32xf32>
    %301 = vector.multi_reduction <add>, %296, %cst_145 [1] : vector<32x32xf32> to vector<32xf32>
    %302 = vector.shape_cast %301 : vector<32xf32> to vector<32x1xf32>
    %cst_146 = arith.constant 3.200000e+01 : f32
    %303 = vector.broadcast %cst_146 : f32 to vector<32x1xf32>
    %304 = arith.divf %302, %303 : vector<32x1xf32>
    %305 = vector.broadcast %304 : vector<32x1xf32> to vector<32x32xf32>
    %306 = arith.subf %296, %305 : vector<32x32xf32>
    %307 = arith.mulf %306, %306 : vector<32x32xf32>
    %cst_147 = arith.constant dense<0.000000e+00> : vector<32xf32>
    %308 = vector.multi_reduction <add>, %307, %cst_147 [1] : vector<32x32xf32> to vector<32xf32>
    %309 = vector.shape_cast %308 : vector<32xf32> to vector<32x1xf32>
    %cst_148 = arith.constant 3.200000e+01 : f32
    %310 = vector.broadcast %cst_148 : f32 to vector<32x1xf32>
    %311 = arith.divf %309, %310 : vector<32x1xf32>
    %312 = vector.broadcast %304 : vector<32x1xf32> to vector<32x32xf32>
    %313 = arith.subf %296, %312 : vector<32x32xf32>
    %cst_149 = arith.constant 9.99999974E-6 : f32
    %314 = vector.broadcast %cst_149 : f32 to vector<32x1xf32>
    %315 = arith.addf %311, %314 : vector<32x1xf32>
    %316 = math.rsqrt %315 : vector<32x1xf32>
    %317 = vector.broadcast %316 : vector<32x1xf32> to vector<32x32xf32>
    %318 = arith.mulf %313, %317 : vector<32x32xf32>
    %319 = vector.broadcast %298 : vector<1x32xf32> to vector<32x32xf32>
    %320 = arith.mulf %318, %319 : vector<32x32xf32>
    %321 = vector.broadcast %300 : vector<1x32xf32> to vector<32x32xf32>
    %322 = arith.addf %320, %321 : vector<32x32xf32>
    %323 = vector.extract_strided_slice %322 {offsets = [0, 0], sizes = [4, 32], strides = [1, 1]} : vector<32x32xf32> to vector<4x32xf32>
    %c0_150 = arith.constant 0 : index
    %c0_151 = arith.constant 0 : index
    %324 = vector.load %arg18[%c0_150, %c0_151] : memref<32x6xf32, #tpu.memory_space<vmem>>, vector<32x6xf32>
    %cst_152 = arith.constant dense<0.000000e+00> : vector<4x6xf32>
    %325 = tpu.matmul %323, %324, %cst_152 {dimension_numbers = #tpu.dot_dimension_numbers<[1], [0], [0], [1], [0, 0, 1, 1], [], []>} : vector<4x32xf32>, vector<32x6xf32>, vector<4x6xf32> -> vector<4x6xf32>
    %c0_153 = arith.constant 0 : index
    %c0_154 = arith.constant 0 : index
    %326 = vector.load %arg19[%c0_153, %c0_154] : memref<1x6xf32, #tpu.memory_space<vmem>>, vector<1x6xf32>
    %327 = vector.broadcast %326 : vector<1x6xf32> to vector<4x6xf32>
    %328 = arith.addf %325, %327 : vector<4x6xf32>
    %c0_155 = arith.constant 0 : index
    %c0_156 = arith.constant 0 : index
    %329 = vector.load %arg20[%c0_155, %c0_156] : memref<4x6xf32, #tpu.memory_space<vmem>>, vector<4x6xf32>
    tpu.vector_store %arg20[%c0_155, %c0_156], %328 {strides = array<i32>} : memref<4x6xf32, #tpu.memory_space<vmem>>, vector<4x6xf32>,
    return
  }
  func.func @transform_0(%arg0: i32) -> (i32, i32) {
    %c0_i32 = arith.constant 0 : i32
    %c0_i32_0 = arith.constant 0 : i32
    %c0_i32_1 = arith.constant 0 : i32
    return %c0_i32, %c0_i32_0 : i32, i32
  }
  func.func @transform_1(%arg0: i32) -> (i32, i32) {
    %c0_i32 = arith.constant 0 : i32
    %c0_i32_0 = arith.constant 0 : i32
    %c0_i32_1 = arith.constant 0 : i32
    return %c0_i32, %c0_i32_0 : i32, i32
  }
  func.func @transform_2(%arg0: i32) -> (i32, i32) {
    %c0_i32 = arith.constant 0 : i32
    %c0_i32_0 = arith.constant 0 : i32
    %c0_i32_1 = arith.constant 0 : i32
    return %c0_i32, %c0_i32_0 : i32, i32
  }
  func.func @transform_3(%arg0: i32) -> (i32, i32) {
    %c0_i32 = arith.constant 0 : i32
    %c0_i32_0 = arith.constant 0 : i32
    %c0_i32_1 = arith.constant 0 : i32
    return %c0_i32, %c0_i32_0 : i32, i32
  }
  func.func @transform_4(%arg0: i32) -> (i32, i32) {
    %c0_i32 = arith.constant 0 : i32
    %c0_i32_0 = arith.constant 0 : i32
    %c0_i32_1 = arith.constant 0 : i32
    return %c0_i32, %c0_i32_0 : i32, i32
  }
  func.func @transform_5(%arg0: i32) -> (i32, i32, i32) {
    %c0_i32 = arith.constant 0 : i32
    %c0_i32_0 = arith.constant 0 : i32
    %c0_i32_1 = arith.constant 0 : i32
    %c0_i32_2 = arith.constant 0 : i32
    return %c0_i32, %c0_i32_0, %c0_i32_1 : i32, i32, i32
  }
  func.func @transform_6(%arg0: i32) -> (i32, i32, i32) {
    %c0_i32 = arith.constant 0 : i32
    %c0_i32_0 = arith.constant 0 : i32
    %c0_i32_1 = arith.constant 0 : i32
    %c0_i32_2 = arith.constant 0 : i32
    return %c0_i32, %c0_i32_0, %c0_i32_1 : i32, i32, i32
  }
  func.func @transform_7(%arg0: i32) -> (i32, i32, i32) {
    %c0_i32 = arith.constant 0 : i32
    %c0_i32_0 = arith.constant 0 : i32
    %c0_i32_1 = arith.constant 0 : i32
    %c0_i32_2 = arith.constant 0 : i32
    return %c0_i32, %c0_i32_0, %c0_i32_1 : i32, i32, i32
  }
  func.func @transform_8(%arg0: i32) -> (i32, i32, i32) {
    %c0_i32 = arith.constant 0 : i32
    %c0_i32_0 = arith.constant 0 : i32
    %c0_i32_1 = arith.constant 0 : i32
    %c0_i32_2 = arith.constant 0 : i32
    return %c0_i32, %c0_i32_0, %c0_i32_1 : i32, i32, i32
  }
  func.func @transform_9(%arg0: i32) -> (i32, i32, i32) {
    %c0_i32 = arith.constant 0 : i32
    %c0_i32_0 = arith.constant 0 : i32
    %c0_i32_1 = arith.constant 0 : i32
    %c0_i32_2 = arith.constant 0 : i32
    return %c0_i32, %c0_i32_0, %c0_i32_1 : i32, i32, i32
  }
  func.func @transform_10(%arg0: i32) -> (i32, i32, i32) {
    %c0_i32 = arith.constant 0 : i32
    %c0_i32_0 = arith.constant 0 : i32
    %c0_i32_1 = arith.constant 0 : i32
    %c0_i32_2 = arith.constant 0 : i32
    return %c0_i32, %c0_i32_0, %c0_i32_1 : i32, i32, i32
  }
  func.func @transform_11(%arg0: i32) -> (i32, i32, i32) {
    %c0_i32 = arith.constant 0 : i32
    %c0_i32_0 = arith.constant 0 : i32
    %c0_i32_1 = arith.constant 0 : i32
    %c0_i32_2 = arith.constant 0 : i32
    return %c0_i32, %c0_i32_0, %c0_i32_1 : i32, i32, i32
  }
  func.func @transform_12(%arg0: i32) -> (i32, i32, i32) {
    %c0_i32 = arith.constant 0 : i32
    %c0_i32_0 = arith.constant 0 : i32
    %c0_i32_1 = arith.constant 0 : i32
    %c0_i32_2 = arith.constant 0 : i32
    return %c0_i32, %c0_i32_0, %c0_i32_1 : i32, i32, i32
  }
  func.func @transform_13(%arg0: i32) -> (i32, i32, i32) {
    %c0_i32 = arith.constant 0 : i32
    %c0_i32_0 = arith.constant 0 : i32
    %c0_i32_1 = arith.constant 0 : i32
    %c0_i32_2 = arith.constant 0 : i32
    return %c0_i32, %c0_i32_0, %c0_i32_1 : i32, i32, i32
  }
  func.func @transform_14(%arg0: i32) -> (i32, i32, i32) {
    %c0_i32 = arith.constant 0 : i32
    %c0_i32_0 = arith.constant 0 : i32
    %c0_i32_1 = arith.constant 0 : i32
    %c0_i32_2 = arith.constant 0 : i32
    return %c0_i32, %c0_i32_0, %c0_i32_1 : i32, i32, i32
  }
  func.func @transform_15(%arg0: i32) -> (i32, i32, i32) {
    %c0_i32 = arith.constant 0 : i32
    %c0_i32_0 = arith.constant 0 : i32
    %c0_i32_1 = arith.constant 0 : i32
    %c0_i32_2 = arith.constant 0 : i32
    return %c0_i32, %c0_i32_0, %c0_i32_1 : i32, i32, i32
  }
  func.func @transform_16(%arg0: i32) -> (i32, i32, i32) {
    %c0_i32 = arith.constant 0 : i32
    %c0_i32_0 = arith.constant 0 : i32
    %c0_i32_1 = arith.constant 0 : i32
    %c0_i32_2 = arith.constant 0 : i32
    return %c0_i32, %c0_i32_0, %c0_i32_1 : i32, i32, i32
  }
  func.func @transform_17(%arg0: i32) -> (i32, i32) {
    %c0_i32 = arith.constant 0 : i32
    %c0_i32_0 = arith.constant 0 : i32
    %c0_i32_1 = arith.constant 0 : i32
    return %c0_i32, %c0_i32_0 : i32, i32
  }
  func.func @transform_18(%arg0: i32) -> (i32, i32) {
    %c0_i32 = arith.constant 0 : i32
    %c0_i32_0 = arith.constant 0 : i32
    %c0_i32_1 = arith.constant 0 : i32
    return %c0_i32, %c0_i32_0 : i32, i32
  }
  func.func @transform_19(%arg0: i32) -> (i32, i32) {
    %c0_i32 = arith.constant 0 : i32
    %c0_i32_0 = arith.constant 0 : i32
    %c0_i32_1 = arith.constant 0 : i32
    return %c0_i32, %c0_i32_0 : i32, i32
  }
}

</mosaic_0001>

<bundles_post_ra>
// kernel: trajectory_transformer_forward.1
= control target key start
LH: loop header
LB: loop body
LE: loop exit
PB: predicated region body
PF: predicated region fallthrough
CT: control target
= control target key end

     0   :  { %s13750_s0 = inlined_call_operand.vmem [shape: f32[32,6], index: 0, kind: input, shape index: {}]   ;;  %s13751_s1 = inlined_call_operand.vmem [shape: f32[32,32], index: 1, kind: input, shape index: {}]   ;;  %s13752_s2 = inlined_call_operand.vmem [shape: f32[32,32], index: 2, kind: input, shape index: {}]   ;;  %s13753_s3 = inlined_call_operand.vmem [shape: f32[6,32], index: 3, kind: input, shape index: {}]   ;;  %s13754_s4 = inlined_call_operand.vmem [shape: f32[1,32], index: 4, kind: input, shape index: {}]   ;;  %s13755_s5 = inlined_call_operand.vmem [shape: f32[2,32,96], index: 5, kind: input, shape index: {}]   ;;  %s13756_s6 = inlined_call_operand.vmem [shape: f32[2,1,96], index: 6, kind: input, shape index: {}]   ;;  %s13757_s7 = inlined_call_operand.vmem [shape: f32[2,32,32], index: 7, kind: input, shape index: {}]   ;;  %s13758_s8 = inlined_call_operand.vmem [shape: f32[2,1,32], index: 8, kind: input, shape index: {}]   ;;  %s13759_s9 = inlined_call_operand.vmem [shape: f32[2,1,32], index: 9, kind: input, shape index: {}]   ;;  %s13760_s10 = inlined_call_operand.vmem [shape: f32[2,1,32], index: 10, kind: input, shape index: {}]   ;;  %s13761_s11 = inlined_call_operand.vmem [shape: f32[2,32,2048], index: 11, kind: input, shape index: {}]   ;;  %s13762_s12 = inlined_call_operand.vmem [shape: f32[2,1,2048], index: 12, kind: input, shape index: {}]   ;;  %s13763_s13 = inlined_call_operand.vmem [shape: f32[2,2048,32], index: 13, kind: input, shape index: {}]   ;;  %s13764_s14 = inlined_call_operand.vmem [shape: f32[2,1,32], index: 14, kind: input, shape index: {}]   ;;  %s13765_s15 = inlined_call_operand.vmem [shape: f32[2,1,32], index: 15, kind: input, shape index: {}]   ;;  %s13766_s16 = inlined_call_operand.vmem [shape: f32[2,1,32], index: 16, kind: input, shape index: {}]   ;;  %s13767_s17 = inlined_call_operand.vmem [shape: f32[32,6], index: 17, kind: input, shape index: {}]   ;;  %s13768_s18 = inlined_call_operand.vmem [shape: f32[1,6], index: 18, kind: input, shape index: {}]   ;;  %s13769_s19 = inlined_call_operand.hbm [shape: f32[4,6], index: 19, kind: output, shape index: {}]  }
   0x1   :  { %13795 = sst [smem:[#allocation5_spill]] %s13750_s0 }
   0x2   :  { %13796 = sst [smem:[#allocation6_spill]] %s13751_s1 }
   0x3   :  { %13797 = sst [smem:[#allocation7_spill]] %s13752_s2 }
   0x4   :  { %13798 = sst [smem:[#allocation8_spill]] %s13753_s3 }
   0x5   :  { %s13799_s20 = sld [smem:[#allocation8_spill]]  ;;  %vm88_vm0 = vcmask 1045504   ;;  %s13800_s22 = sld [smem:[#allocation5_spill]]  ;;  %vm75_vm1 = vcmask 48128   ;;  %v189_v4 = vld [vmem:[%s13755_s5] sm:$0xff]  ;;  %v190_v5 = vld [vmem:[%s13755_s5 + $0x8] sm:$0xff] }
   0xb   :  { %v67_v0 = vld [vmem:[%s13799_s20] sm:$0x3f]  ;;  %v64_v2 = vld [vmem:[%s13800_s22 + $0x8] sm:$0xff]  ;;  %v65_v3 = vld [vmem:[%s13800_s22 + $0x10] sm:$0xff] }
   0xc   :  { %v63_v1 = vld [vmem:[%s13800_s22] sm:$0xff]  ;;  %8481 = vmatprep.subr.msk.mxu0 %vm88_vm0, %v67_v0 }
   0xd   :  { %8483 = vmatprep.mubr.msk.f32.mxu0 %vm75_vm1, %v63_v1  ;;  %8482 = vmatpush3.msk.msra.mxu0 %vm88_vm0, %v67_v0 }
   0xe   :  { %24 = vsyncpa [#allocation3], 0  ;;  %8484 = vmatmul.mubr.msk.f32.vlgmr.msra.gmra.mrb[0].mxu0 %vm75_vm1, %v64_v2  ;;  %v8780_v6 = vpack.c.bf16 %v190_v5, %v189_v4  ;;  %v66_v7 = vld [vmem:[%s13800_s22 + $0x18] sm:$0xff]  ;;  %v191_v8 = vld [vmem:[%s13755_s5 + $0x10] sm:$0xff]  ;;  %s13801_s25 = sld [smem:[#allocation6_spill]]  ;;  %vm200_vm2 = vcmask 261120  }
   0xf   :  { %8486 = vmatprep.mubr.msk.f32.mxu0 %vm75_vm1, %v65_v3  ;;  %v192_v9 = vld [vmem:[%s13755_s5 + $0x18] sm:$0xff]  ;;  %v7072_v11 = vld [vmem:[%s13754_s4] ss:$0 sm:$0xff]  ;;  %vm310_vm3 = vcmask 64512   ;;  %s9978_s20 = smov 96   ;;  %s13804_s2 = sld [smem:[#allocation7_spill]] }
  0x10   :  { %8781 = vmatprep.subr.bf16.mxu1 %v8780_v6  ;;  %v8784_v10 = vpack.c.bf16 %v192_v9, %v191_v8  ;;  %v7078_v28 = vld [vmem:[%s13756_s6] ss:$0 sm:$0xff]  ;;  %vm10181_vm4 = vmpackc.low %vm310_vm3, %vm310_vm3  ;;  %s13793_s27 = smov 64   ;;  %s9980_s28 = smov 88   ;;  %vm1459_vm5 = vcmask 130048   ;;  %vm1464_vm6 = vcmask 195584  }
  0x11   :  { %8783 = vmatpush3.bf16.msra.mxu1 %v8780_v6  ;;  %s9981_s4 = smov 120   ;;  %s13791_s29 = smov 56   ;;  %vm9994_vm7 = vmmov 0   ;;  %vm7056_vm8 = vcmask 44032  }
  0x12   :  { %8487 = vmatmul.mubr.msk.f32.gmra.mrb[2].mxu0 %vm75_vm1, %v66_v7  ;;  %8785 = vmatprep.subr.bf16.mxu1 %v8784_v10  ;;  %s13783_s0 = smov 80   ;;  %s13781_s30 = smov 112  }
  0x13   :  { %s13779_s21 = smov 48   ;;  %s13777_s1 = smov 72  }
  0x14   :  { %v177_v15 = vld [vmem:[%s13801_s25] sm:$0xff]  ;;  %v178_v16 = vld [vmem:[%s13801_s25 + $0x8] sm:$0xff]  ;;  %v180_v19 = vld [vmem:[%s13801_s25 + $0x18] sm:$0xff]  ;;  %s13775_s23 = smov 104   ;;  %s13773_s22 = smov 40  }
  0x15   :  { %8787 = vmatpush3.bf16.msra.mxu1 %v8784_v10  ;;  %v179_v24 = vld [vmem:[%s13801_s25 + $0x10] sm:$0xff]  ;;  %v10202_v50 = vld [vmem:[%s13804_s2] sm:$0xff]  ;;  %v10207_v53 = vld [vmem:[%s13804_s2 + $0x8] sm:$0xff]  ;;  %s13789_s24 = smov 8   ;;  %s13787_s25 = smov 16  }
  0x16   :  { %v10213_v57 = vld [vmem:[%s13804_s2 + $0x10] sm:$0xff]  ;;  %v10220_v62 = vld [vmem:[%s13804_s2 + $0x18] sm:$0xff]  ;;  %s13785_s3 = smov 24   ;;  %s13807_s26 = smov 80  }
  0xe1   :  { %v8485_v12 = vpop.f32.mrb[0].mxu0 }
  0xe2   :  { %v164_v13 = vadd.f32 %v8485_v12, %v7072_v11  ;;  %v158_v14 = vpop.f32.mrb[1].mxu0 }
  0xe3   :  { %v159_v17 = vadd.f32 %v7072_v11, %v158_v14 }
  0xe4   :  { %v10137_v21 = vadd.f32 %v178_v16, %v164_v13 }
  0xe5   :  { %v8488_v18 = vpop.f32.mrb[2].mxu0  ;;  %v10135_v20 = vadd.f32 %v177_v15, %v159_v17 }
  0xe6   :  { %v174_v22 = vadd.f32 %v8488_v18, %v7072_v11  ;;  %v168_v23 = vpop.f32.mrb[3].mxu0 }
  0xe7   :  { %v169_v25 = vadd.f32 %v7072_v11, %v168_v23  ;;  %8497 = vmatprep.mubr.msk.f32.mxu1 %vm200_vm2, %v10135_v20 }
  0xe8   :  { %v10144_v26 = vadd.f32 %v180_v19, %v174_v22  ;;  %8498 = vmatmul.mubr.msk.f32.vlgmr.msra.gmra.mrb[0].mxu1 %vm200_vm2, %v10137_v21 }
  0xe9   :  { %v10148_v27 = vadd.f32 %v179_v24, %v169_v25 }
  0xeb   :  { %8500 = vmatprep.mubr.msk.f32.mxu1 %vm200_vm2, %v10148_v27 }
  0xec   :  { %8501 = vmatmul.mubr.msk.f32.gmra.mrb[2].mxu1 %vm200_vm2, %v10144_v26 }
 0x1bb   :  { %v8499_v29 = vpop.f32.mrb[0].mxu1 }
 0x1bc   :  { %v10157_v30 = vadd.f32 %v8499_v29, %v7078_v28  ;;  %v279_v31 = vpop.f32.mrb[1].mxu1 }
 0x1bd   :  { %v10159_v32 = vadd.f32 %v7078_v28, %v279_v31 }
 0x1bf   :  { %8511 = vmatprep.mubr.msk.f32.mxu0 %vm310_vm3, %v10159_v32  ;;  %v8502_v33 = vpop.f32.mrb[2].mxu1  ;;  %v10165_v34 = vpack.i.bf16 %v10157_v30, %v10159_v32 }
 0x1c0   :  { %v10167_v35 = vadd.f32 %v8502_v33, %v7078_v28  ;;  %v289_v36 = vpop.f32.mrb[3].mxu1 }
 0x1c1   :  { %v10169_v37 = vadd.f32 %v7078_v28, %v289_v36  ;;  %9637 = vrot.lane.b32.xlu0 %v10165_v34, %s9978_s20 }
 0x1c3   :  { %v10175_v38 = vpack.i.bf16 %v10167_v35, %v10169_v37 }
 0x1c5   :  { %9642 = vrot.lane.b32.xlu0 %v10175_v38, %s9978_s20 }
 0x233   :  { %v9638_v39 = vpop.permute.xlu0 %9637 }
 0x234   :  { %v9640_v40 = vunpack.i.h.bf16 %v9638_v39  ;;  %v9639_v41 = vunpack.i.l.bf16 %v9638_v39 }
 0x236   :  { %v8788_v43 = vpack.c.bf16 %v9640_v40, %v9639_v41 }
 0x237   :  { %v9643_v44 = vpop.permute.xlu0 %9642 }
 0x238   :  { %v9645_v45 = vunpack.i.h.bf16 %v9643_v44  ;;  %v9644_v46 = vunpack.i.l.bf16 %v9643_v44  ;;  %8790 = vmatprep.subr.msk.bf16.mxu0 %vm10181_vm4, %v8788_v43 }
 0x239   :  { %8793 = vmatpush3.bf16.xpose.msk.msra.mxu0 %vm10181_vm4, %v8788_v43 }
 0x23a   :  { %v8794_v47 = vpack.c.bf16 %v9645_v45, %v9644_v46 }
 0x23c   :  { %8796 = vmatprep.subr.msk.bf16.mxu0 %vm10181_vm4, %v8794_v47 }
 0x241   :  { %8799 = vmatpush3.bf16.xpose.msk.msra.mxu0 %vm10181_vm4, %v8794_v47 }
 0x248   :  { %8512 = vmatmul.mubr.msk.f32.vlgmr.msra.gmra.mrb[4].mxu0 %vm310_vm3, %v10157_v30 }
 0x249   :  { %8514 = vmatprep.mubr.msk.f32.mxu0 %vm310_vm3, %v10169_v37 }
 0x24c   :  { %8515 = vmatmul.mubr.msk.f32.gmra.mrb[6].mxu0 %vm310_vm3, %v10167_v35 }
 0x31b   :  { %v8513_v48 = vpop.f32.mrb[4].mxu0 }
 0x31c   :  { %v393_v49 = vpop.f32.mrb[5].mxu0  ;;  %v413_v51 = vmul.f32 0.35355338, %v8513_v48 }
 0x31d   :  { %v412_v52 = vmul.f32 0.35355338, %v393_v49 }
 0x31e   :  { %v417_v61 = vadd.f32 %v413_v51, %v10207_v53 }
 0x31f   :  { %v8516_v54 = vpop.f32.mrb[6].mxu0  ;;  %v416_v55 = vadd.f32 %v412_v52, %v10202_v50 }
 0x320   :  { %v403_v56 = vpop.f32.mrb[7].mxu0  ;;  %v415_v58 = vmul.f32 0.35355338, %v8516_v54  ;;  %v423_v0 = vsel %vm200_vm2, %v417_v61, -inf }
 0x321   :  { %v414_v59 = vmul.f32 0.35355338, %v403_v56  ;;  %v420_v60 = vsel %vm200_vm2, %v416_v55, -inf }
 0x322   :  { %421 = vmax.xlane.f32.xlu1 %v420_v60  ;;  %v419_v2 = vadd.f32 %v415_v58, %v10220_v62 }
 0x323   :  { %v418_v63 = vadd.f32 %v414_v59, %v10213_v57 }
 0x324   :  { %v429_v3 = vsel %vm200_vm2, %v419_v2, -inf }
 0x325   :  { %v426_v1 = vsel %vm200_vm2, %v418_v63, -inf }
 0x326   :  { %424 = vmax.xlane.f32.xlu1 %v423_v0  ;;  %427 = vmax.xlane.f32.xlu0 %v426_v1 }
 0x32a   :  { %430 = vmax.xlane.f32.xlu1 %v429_v3 }
 0x33b   :  { %9647 = vrot.lane.b32.xlu1 %v10165_v34, %s13793_s27 }
 0x33c   :  { %9652 = vrot.lane.b32.xlu0 %v10175_v38, %s13793_s27  ;;  %s13814_s27 = smov 16  }
 0x33f   :  { %9657 = vrot.lane.b32.xlu1 %v10165_v34, %s9980_s28 }
 0x340   :  { %577 = vrot.lane.b32.xlu0 %v10169_v37, %s9981_s4 }
 0x343   :  { %9662 = vrot.lane.b32.xlu1 %v10175_v38, %s9980_s28 }
 0x347   :  { %573 = vrot.lane.b32.xlu1 %v10159_v32, %s9981_s4 }
 0x3af   :  { %v422_v4 = vpop.xlane.xlu1 %421 }
 0x3b0   :  { %v432_v5 = vsub.f32 %v416_v55, %v422_v4 }
 0x3b2   :  { %v436_v9 = vmul.f32 1.442695, %v432_v5 }
 0x3b3   :  { %v425_v6 = vpop.xlane.xlu1 %424  ;;  %v428_v7 = vpop.xlane.xlu0 %427 }
 0x3b4   :  { %v433_v8 = vsub.f32 %v417_v61, %v425_v6  ;;  %v434_v14 = vsub.f32 %v418_v63, %v428_v7 }
 0x3b6   :  { %v438_v10 = vmul.f32 1.442695, %v433_v8  ;;  %v440_v23 = vmul.f32 1.442695, %v434_v14 }
 0x3b7   :  { %v431_v11 = vpop.xlane.xlu1 %430  ;;  %v9653_v13 = vpop.permute.xlu0 %9652 }
 0x3b8   :  { %9796 = vpow2.f32 %v438_v10  ;;  %v435_v12 = vsub.f32 %v419_v2, %v431_v11  ;;  %v9655_v17 = vunpack.i.h.bf16 %v9653_v13  ;;  %v9654_v18 = vunpack.i.l.bf16 %v9653_v13 }
 0x3b9   :  { %9798 = vpow2.f32 %v436_v9 }
 0x3ba   :  { %v442_v15 = vmul.f32 1.442695, %v435_v12  ;;  %v8804_v31 = vpack.c.bf16 %v9655_v17, %v9654_v18 }
 0x3bb   :  { %v9648_v16 = vpop.permute.xlu1 %9647  ;;  %v578_v5 = vpop.permute.xlu0 %577 }
 0x3bc   :  { %v9650_v19 = vunpack.i.h.bf16 %v9648_v16  ;;  %v9649_v22 = vunpack.i.l.bf16 %v9648_v16  ;;  %9800 = vpow2.f32 %v442_v15 }
 0x3bd   :  { %9802 = vpow2.f32 %v440_v23 }
 0x3be   :  { %v8800_v24 = vpack.c.bf16 %v9650_v19, %v9649_v22 }
 0x3bf   :  { %v9658_v25 = vpop.permute.xlu1 %9657 }
 0x3c0   :  { %v9660_v28 = vunpack.i.h.bf16 %v9658_v25  ;;  %v9659_v29 = vunpack.i.l.bf16 %v9658_v25  ;;  %8801 = vmatprep.subr.bf16.mxu1 %v8800_v24 }
 0x3c1   :  { %8803 = vmatpush3.bf16.msra.mxu1 %v8800_v24 }
 0x3c2   :  { %v9797_v33 = vpop.eup %9796  ;;  %8805 = vmatprep.subr.bf16.mxu1 %v8804_v31  ;;  %v8808_v40 = vpack.c.bf16 %v9660_v28, %v9659_v29 }
 0x3c3   :  { %v447_v36 = vsel %vm200_vm2, %v9797_v33, 0.0  ;;  %v9799_v39 = vpop.eup %9798  ;;  %v9663_v47 = vpop.permute.xlu1 %9662 }
 0x3c4   :  { %448 = vadd.xlane.f32.xlu1 %v447_v36  ;;  %v444_v41 = vsel %vm200_vm2, %v9799_v39, 0.0  ;;  %v9665_v58 = vunpack.i.h.bf16 %v9663_v47  ;;  %v9664_v59 = vunpack.i.l.bf16 %v9663_v47 }
 0x3c5   :  { %8807 = vmatpush3.bf16.msra.mxu1 %v8804_v31 }
 0x3c6   :  { %8810 = vmatprep.subr.msk.bf16.mxu1 %vm10181_vm4, %v8808_v40  ;;  %v9801_v43 = vpop.eup %9800  ;;  %v8814_v63 = vpack.c.bf16 %v9665_v58, %v9664_v59 }
 0x3c7   :  { %v453_v44 = vsel %vm200_vm2, %v9801_v43, 0.0  ;;  %v9803_v45 = vpop.eup %9802  ;;  %v574_v48 = vpop.permute.xlu1 %573 }
 0x3c8   :  { %445 = vadd.xlane.f32.xlu1 %v444_v41  ;;  %v450_v46 = vsel %vm200_vm2, %v9803_v45, 0.0 }
 0x3cc   :  { %454 = vadd.xlane.f32.xlu1 %v453_v44 }
 0x3d0   :  { %451 = vadd.xlane.f32.xlu1 %v450_v46 }
 0x3e1   :  { %575 = vrot.lane.b32.xlu1 %v10157_v30, %s9981_s4 }
 0x3e5   :  { %579 = vrot.lane.b32.xlu1 %v10167_v35, %s9981_s4 }
 0x451   :  { %v449_v49 = vpop.xlane.xlu1 %448 }
 0x452   :  { %9804 = vrcp.f32 %v449_v49 }
 0x455   :  { %v446_v51 = vpop.xlane.xlu1 %445 }
 0x456   :  { %9806 = vrcp.f32 %v446_v51 }
 0x459   :  { %v455_v52 = vpop.xlane.xlu1 %454 }
 0x45a   :  { %9808 = vrcp.f32 %v455_v52 }
 0x45c   :  { %v9805_v55 = vpop.eup %9804 }
 0x45d   :  { %v452_v54 = vpop.xlane.xlu1 %451  ;;  %v461_v61 = vmul.f32 %v9805_v55, %v9797_v33 }
 0x45e   :  { %9810 = vrcp.f32 %v452_v54 }
 0x460   :  { %v9807_v56 = vpop.eup %9806 }
 0x461   :  { %v460_v60 = vmul.f32 %v9807_v56, %v9799_v39  ;;  %v576_v4 = vpop.permute.xlu1 %575 }
 0x463   :  { %8525 = vmatprep.mubr.msk.f32.mxu1 %vm200_vm2, %v460_v60 }
 0x464   :  { %8526 = vmatmul.mubr.msk.f32.vlgmr.msra.gmra.mrb[4].mxu1 %vm200_vm2, %v461_v61  ;;  %v9809_v0 = vpop.eup %9808 }
 0x465   :  { %8813 = vmatpush3.bf16.xpose.msk.msra.mxu1 %vm10181_vm4, %v8808_v40  ;;  %v463_v3 = vmul.f32 %v9809_v0, %v9801_v43  ;;  %v580_v6 = vpop.permute.xlu1 %579 }
 0x466   :  { %8816 = vmatprep.subr.msk.bf16.mxu1 %vm10181_vm4, %v8814_v63 }
 0x468   :  { %v9811_v1 = vpop.eup %9810 }
 0x469   :  { %v462_v2 = vmul.f32 %v9811_v1, %v9803_v45 }
 0x46b   :  { %8528 = vmatprep.mubr.msk.f32.mxu1 %vm200_vm2, %v462_v2 }
 0x46c   :  { %8529 = vmatmul.mubr.msk.f32.gmra.mrb[6].mxu1 %vm200_vm2, %v463_v3 }
 0x46d   :  { %8819 = vmatpush3.bf16.xpose.msk.msra.mxu1 %vm10181_vm4, %v8814_v63  ;;  %8539 = vmatprep.mubr.msk.f32.mxu1 %vm310_vm3, %v574_v48 }
 0x474   :  { %8540 = vmatmul.mubr.msk.f32.vlgmr.msra.gmra.mrb[8].mxu1 %vm310_vm3, %v576_v4 }
 0x475   :  { %8542 = vmatprep.mubr.msk.f32.mxu1 %vm310_vm3, %v578_v5 }
 0x478   :  { %8543 = vmatmul.mubr.msk.f32.gmra.mrb[10].mxu1 %vm310_vm3, %v580_v6 }
 0x537   :  { %v10263_v7 = vpop.f32.mrb[4].mxu1 }
 0x538   :  { %v10265_v8 = vpop.f32.mrb[5].mxu1 }
 0x53f   :  { %v10267_v9 = vpop.f32.mrb[6].mxu1 }
 0x540   :  { %v10269_v10 = vpop.f32.mrb[7].mxu1 }
 0x547   :  { %v8541_v11 = vpop.f32.mrb[8].mxu1 }
 0x548   :  { %v691_v12 = vmul.f32 0.35355338, %v8541_v11  ;;  %v671_v13 = vpop.f32.mrb[9].mxu1 }
 0x549   :  { %v690_v14 = vmul.f32 0.35355338, %v671_v13 }
 0x54a   :  { %v695_v15 = vadd.f32 %v691_v12, %v10207_v53 }
 0x54b   :  { %v8544_v16 = vpop.f32.mrb[10].mxu1  ;;  %v694_v17 = vadd.f32 %v690_v14, %v10202_v50 }
 0x54c   :  { %v681_v18 = vpop.f32.mrb[11].mxu1  ;;  %v701_v19 = vsel %vm200_vm2, %v695_v15, -inf  ;;  %v693_v22 = vmul.f32 0.35355338, %v8544_v16 }
 0x54d   :  { %v692_v23 = vmul.f32 0.35355338, %v681_v18  ;;  %702 = vmax.xlane.f32.xlu1 %v701_v19  ;;  %v698_v24 = vsel %vm200_vm2, %v694_v17, -inf }
 0x54e   :  { %699 = vmax.xlane.f32.xlu0 %v698_v24  ;;  %v697_v29 = vadd.f32 %v693_v22, %v10220_v62 }
 0x54f   :  { %v696_v25 = vadd.f32 %v692_v23, %v10213_v57 }
 0x550   :  { %v707_v31 = vsel %vm200_vm2, %v697_v29, -inf }
 0x551   :  { %v704_v28 = vsel %vm200_vm2, %v696_v25, -inf }
 0x552   :  { %705 = vmax.xlane.f32.xlu0 %v704_v28 }
 0x556   :  { %708 = vmax.xlane.f32.xlu0 %v707_v31 }
 0x55e   :  { %9667 = vrot.lane.b32.xlu1 %v10165_v34, %s13791_s29 }
 0x562   :  { %9677 = vrot.lane.b32.xlu1 %v10165_v34, %s13783_s0 }
 0x5da   :  { %v703_v33 = vpop.xlane.xlu1 %702 }
 0x5db   :  { %v711_v36 = vsub.f32 %v695_v15, %v703_v33  ;;  %v700_v39 = vpop.xlane.xlu0 %699 }
 0x5dc   :  { %v710_v40 = vsub.f32 %v694_v17, %v700_v39 }
 0x5dd   :  { %v716_v41 = vmul.f32 1.442695, %v711_v36 }
 0x5de   :  { %v714_v43 = vmul.f32 1.442695, %v710_v40  ;;  %v9668_v44 = vpop.permute.xlu1 %9667 }
 0x5df   :  { %9812 = vpow2.f32 %v716_v41  ;;  %v9670_v45 = vunpack.i.h.bf16 %v9668_v44  ;;  %v9669_v46 = vunpack.i.l.bf16 %v9668_v44  ;;  %v706_v54 = vpop.xlane.xlu0 %705 }
 0x5e0   :  { %9814 = vpow2.f32 %v714_v43  ;;  %v712_v58 = vsub.f32 %v696_v25, %v706_v54 }
 0x5e1   :  { %v8820_v47 = vpack.c.bf16 %v9670_v45, %v9669_v46 }
 0x5e2   :  { %v718_v60 = vmul.f32 1.442695, %v712_v58  ;;  %v9678_v2 = vpop.permute.xlu1 %9677 }
 0x5e3   :  { %8821 = vmatprep.subr.bf16.mxu0 %v8820_v47  ;;  %v709_v55 = vpop.xlane.xlu0 %708  ;;  %v9680_v6 = vunpack.i.h.bf16 %v9678_v2  ;;  %v9679_v11 = vunpack.i.l.bf16 %v9678_v2 }
 0x5e4   :  { %8823 = vmatpush3.bf16.msra.mxu0 %v8820_v47  ;;  %v713_v56 = vsub.f32 %v697_v29, %v709_v55 }
 0x5e5   :  { %v8828_v15 = vpack.c.bf16 %v9680_v6, %v9679_v11 }
 0x5e6   :  { %v720_v59 = vmul.f32 1.442695, %v713_v56 }
 0x5e8   :  { %9816 = vpow2.f32 %v720_v59 }
 0x5e9   :  { %v9813_v48 = vpop.eup %9812  ;;  %9818 = vpow2.f32 %v718_v60 }
 0x5ea   :  { %v9815_v49 = vpop.eup %9814  ;;  %v725_v51 = vsel %vm200_vm2, %v9813_v48, 0.0 }
 0x5eb   :  { %726 = vadd.xlane.f32.xlu0 %v725_v51  ;;  %v722_v52 = vsel %vm200_vm2, %v9815_v49, 0.0 }
 0x5ec   :  { %723 = vadd.xlane.f32.xlu1 %v722_v52 }
 0x5f2   :  { %v9817_v61 = vpop.eup %9816 }
 0x5f3   :  { %v9819_v63 = vpop.eup %9818  ;;  %v731_v0 = vsel %vm200_vm2, %v9817_v61, 0.0 }
 0x5f4   :  { %v728_v1 = vsel %vm200_vm2, %v9819_v63, 0.0 }
 0x5fd   :  { %9682 = vrot.lane.b32.xlu1 %v10175_v38, %s13783_s0  ;;  %s13813_s0 = smov 8  }
 0x601   :  { %9672 = vrot.lane.b32.xlu0 %v10175_v38, %s13791_s29  ;;  %s13811_s29 = smov 104  }
 0x620   :  { %732 = vadd.xlane.f32.xlu0 %v731_v0 }
 0x621   :  { %729 = vadd.xlane.f32.xlu1 %v728_v1 }
 0x632   :  { %853 = vrot.lane.b32.xlu1 %v10157_v30, %s13781_s30 }
 0x636   :  { %857 = vrot.lane.b32.xlu1 %v10167_v35, %s13781_s30  ;;  %851 = vrot.lane.b32.xlu0 %v10159_v32, %s13781_s30 }
 0x63a   :  { %855 = vrot.lane.b32.xlu0 %v10169_v37, %s13781_s30 }
 0x678   :  { %v727_v3 = vpop.xlane.xlu0 %726 }
 0x679   :  { %9820 = vrcp.f32 %v727_v3  ;;  %v724_v4 = vpop.xlane.xlu1 %723 }
 0x67a   :  { %9822 = vrcp.f32 %v724_v4 }
 0x67c   :  { %v9673_v5 = vpop.permute.xlu0 %9672 }
 0x67d   :  { %v9675_v12 = vunpack.i.h.bf16 %v9673_v5  ;;  %v9674_v13 = vunpack.i.l.bf16 %v9673_v5  ;;  %v9683_v17 = vpop.permute.xlu1 %9682 }
 0x67e   :  { %v9685_v23 = vunpack.i.h.bf16 %v9683_v17  ;;  %v9684_v24 = vunpack.i.l.bf16 %v9683_v17 }
 0x67f   :  { %v8824_v14 = vpack.c.bf16 %v9675_v12, %v9674_v13 }
 0x680   :  { %v8834_v25 = vpack.c.bf16 %v9685_v23, %v9684_v24 }
 0x681   :  { %8825 = vmatprep.subr.bf16.mxu0 %v8824_v14 }
 0x682   :  { %8827 = vmatpush3.bf16.msra.mxu0 %v8824_v14 }
 0x683   :  { %v9821_v16 = vpop.eup %9820  ;;  %8830 = vmatprep.subr.msk.bf16.mxu0 %vm10181_vm4, %v8828_v15 }
 0x684   :  { %v9823_v18 = vpop.eup %9822  ;;  %v739_v22 = vmul.f32 %v9821_v16, %v9813_v48 }
 0x685   :  { %v738_v19 = vmul.f32 %v9823_v18, %v9815_v49 }
 0x687   :  { %8553 = vmatprep.mubr.msk.f32.mxu0 %vm200_vm2, %v738_v19 }
 0x688   :  { %8554 = vmatmul.mubr.msk.f32.vlgmr.msra.gmra.mrb[8].mxu0 %vm200_vm2, %v739_v22 }
 0x68b   :  { %8833 = vmatpush3.bf16.xpose.msk.msra.mxu0 %vm10181_vm4, %v8828_v15 }
 0x68c   :  { %8836 = vmatprep.subr.msk.bf16.mxu0 %vm10181_vm4, %v8834_v25 }
 0x693   :  { %8839 = vmatpush3.bf16.xpose.msk.msra.mxu0 %vm10181_vm4, %v8834_v25 }
 0x6ad   :  { %v733_v28 = vpop.xlane.xlu0 %732 }
 0x6ae   :  { %9824 = vrcp.f32 %v733_v28  ;;  %v730_v29 = vpop.xlane.xlu1 %729 }
 0x6af   :  { %9826 = vrcp.f32 %v730_v29 }
 0x6b1   :  { %v852_v39 = vpop.permute.xlu0 %851 }
 0x6b2   :  { %v854_v41 = vpop.permute.xlu1 %853 }
 0x6b5   :  { %v856_v43 = vpop.permute.xlu0 %855 }
 0x6b6   :  { %v858_v44 = vpop.permute.xlu1 %857 }
 0x6b8   :  { %v9825_v31 = vpop.eup %9824 }
 0x6b9   :  { %v9827_v33 = vpop.eup %9826  ;;  %v741_v40 = vmul.f32 %v9825_v31, %v9817_v61 }
 0x6ba   :  { %v740_v36 = vmul.f32 %v9827_v33, %v9819_v63 }
 0x6bc   :  { %8556 = vmatprep.mubr.msk.f32.mxu0 %vm200_vm2, %v740_v36 }
 0x6bd   :  { %8557 = vmatmul.mubr.msk.f32.gmra.mrb[10].mxu0 %vm200_vm2, %v741_v40 }
 0x6be   :  { %8567 = vmatprep.mubr.msk.f32.mxu0 %vm310_vm3, %v852_v39 }
 0x6c1   :  { %8568 = vmatmul.mubr.msk.f32.vlgmr.msra.gmra.mrb[12].mxu0 %vm310_vm3, %v854_v41 }
 0x6c2   :  { %8570 = vmatprep.mubr.msk.f32.mxu0 %vm310_vm3, %v856_v43 }
 0x6c5   :  { %8571 = vmatmul.mubr.msk.f32.gmra.mrb[14].mxu0 %vm310_vm3, %v858_v44 }
 0x75b   :  { %v10315_v45 = vpop.f32.mrb[8].mxu0 }
 0x75c   :  { %v10317_v46 = vpop.f32.mrb[9].mxu0 }
 0x790   :  { %v10319_v47 = vpop.f32.mrb[10].mxu0 }
 0x791   :  { %v10321_v48 = vpop.f32.mrb[11].mxu0 }
 0x794   :  { %v8569_v49 = vpop.f32.mrb[12].mxu0 }
 0x795   :  { %v969_v51 = vmul.f32 0.35355338, %v8569_v49  ;;  %v949_v52 = vpop.f32.mrb[13].mxu0 }
 0x796   :  { %v968_v54 = vmul.f32 0.35355338, %v949_v52 }
 0x797   :  { %v973_v55 = vadd.f32 %v969_v51, %v10207_v53 }
 0x798   :  { %v8572_v56 = vpop.f32.mrb[14].mxu0  ;;  %v972_v58 = vadd.f32 %v968_v54, %v10202_v50 }
 0x799   :  { %v959_v59 = vpop.f32.mrb[15].mxu0  ;;  %v979_v60 = vsel %vm200_vm2, %v973_v55, -inf  ;;  %v971_v61 = vmul.f32 0.35355338, %v8572_v56 }
 0x79a   :  { %v970_v63 = vmul.f32 0.35355338, %v959_v59  ;;  %980 = vmax.xlane.f32.xlu1 %v979_v60  ;;  %v976_v0 = vsel %vm200_vm2, %v972_v58, -inf }
 0x79b   :  { %977 = vmax.xlane.f32.xlu0 %v976_v0  ;;  %v975_v3 = vadd.f32 %v971_v61, %v10220_v62 }
 0x79c   :  { %v974_v1 = vadd.f32 %v970_v63, %v10213_v57 }
 0x79d   :  { %v985_v4 = vsel %vm200_vm2, %v975_v3, -inf }
 0x79e   :  { %v982_v2 = vsel %vm200_vm2, %v974_v1, -inf }
 0x79f   :  { %983 = vmax.xlane.f32.xlu0 %v982_v2 }
 0x7a3   :  { %986 = vmax.xlane.f32.xlu0 %v985_v4 }
 0x7ab   :  { %9687 = vrot.lane.b32.xlu1 %v10165_v34, %s13779_s21 }
 0x7af   :  { %9697 = vrot.lane.b32.xlu1 %v10165_v34, %s13777_s1 }
 0x827   :  { %v981_v5 = vpop.xlane.xlu1 %980 }
 0x828   :  { %v989_v6 = vsub.f32 %v973_v55, %v981_v5  ;;  %v978_v11 = vpop.xlane.xlu0 %977 }
 0x829   :  { %v988_v12 = vsub.f32 %v972_v58, %v978_v11 }
 0x82a   :  { %v994_v13 = vmul.f32 1.442695, %v989_v6 }
 0x82b   :  { %v992_v14 = vmul.f32 1.442695, %v988_v12  ;;  %v9688_v15 = vpop.permute.xlu1 %9687 }
 0x82c   :  { %9828 = vpow2.f32 %v994_v13  ;;  %v9690_v16 = vunpack.i.h.bf16 %v9688_v15  ;;  %v9689_v17 = vunpack.i.l.bf16 %v9688_v15  ;;  %v984_v25 = vpop.xlane.xlu0 %983 }
 0x82d   :  { %9830 = vpow2.f32 %v992_v14  ;;  %v990_v31 = vsub.f32 %v974_v1, %v984_v25 }
 0x82e   :  { %v8840_v18 = vpack.c.bf16 %v9690_v16, %v9689_v17 }
 0x82f   :  { %v996_v36 = vmul.f32 1.442695, %v990_v31  ;;  %v9698_v44 = vpop.permute.xlu1 %9697 }
 0x830   :  { %8841 = vmatprep.subr.bf16.mxu1 %v8840_v18  ;;  %v987_v28 = vpop.xlane.xlu0 %986  ;;  %v9700_v54 = vunpack.i.h.bf16 %v9698_v44  ;;  %v9699_v55 = vunpack.i.l.bf16 %v9698_v44 }
 0x831   :  { %8843 = vmatpush3.bf16.msra.mxu1 %v8840_v18  ;;  %v991_v29 = vsub.f32 %v975_v3, %v987_v28 }
 0x832   :  { %v8848_v59 = vpack.c.bf16 %v9700_v54, %v9699_v55 }
 0x833   :  { %v998_v33 = vmul.f32 1.442695, %v991_v29 }
 0x835   :  { %9832 = vpow2.f32 %v998_v33 }
 0x836   :  { %v9829_v19 = vpop.eup %9828  ;;  %9834 = vpow2.f32 %v996_v36 }
 0x837   :  { %v9831_v22 = vpop.eup %9830  ;;  %v1003_v23 = vsel %vm200_vm2, %v9829_v19, 0.0 }
 0x838   :  { %1004 = vadd.xlane.f32.xlu0 %v1003_v23  ;;  %v1000_v24 = vsel %vm200_vm2, %v9831_v22, 0.0 }
 0x839   :  { %1001 = vadd.xlane.f32.xlu1 %v1000_v24 }
 0x83f   :  { %v9833_v39 = vpop.eup %9832 }
 0x840   :  { %v9835_v40 = vpop.eup %9834  ;;  %v1009_v41 = vsel %vm200_vm2, %v9833_v39, 0.0 }
 0x841   :  { %v1006_v43 = vsel %vm200_vm2, %v9835_v40, 0.0 }
 0x84a   :  { %9702 = vrot.lane.b32.xlu1 %v10175_v38, %s13777_s1 }
 0x84e   :  { %9692 = vrot.lane.b32.xlu0 %v10175_v38, %s13779_s21  ;;  %s9995_s21 = smov [#allocation2]  }
 0x84f   :  { %s7064_s1 = sshll.u32 %s9995_s21, 4  ;;  %s7065_s1 = int_to_ptr.vmem [resolvable:$true] %s7064_s1 }
 0x850   :  { %p9959_p1 = scmp.lt.s32.totalorder %s7065_s1, %s7065_s1 }
 0x86d   :  { %1010 = vadd.xlane.f32.xlu0 %v1009_v41 }
 0x86e   :  { %1007 = vadd.xlane.f32.xlu1 %v1006_v43 }
 0x87f   :  { %1131 = vrot.lane.b32.xlu1 %v10157_v30, %s13775_s23 }
 0x883   :  { %1135 = vrot.lane.b32.xlu1 %v10167_v35, %s13775_s23  ;;  %1129 = vrot.lane.b32.xlu0 %v10159_v32, %s13775_s23 }
 0x887   :  { %1133 = vrot.lane.b32.xlu0 %v10169_v37, %s13775_s23 }
 0x8c5   :  { %v1005_v49 = vpop.xlane.xlu0 %1004 }
 0x8c6   :  { %9836 = vrcp.f32 %v1005_v49  ;;  %v1002_v51 = vpop.xlane.xlu1 %1001 }
 0x8c7   :  { %9838 = vrcp.f32 %v1002_v51 }
 0x8c9   :  { %v9693_v52 = vpop.permute.xlu0 %9692 }
 0x8ca   :  { %v9695_v56 = vunpack.i.h.bf16 %v9693_v52  ;;  %v9694_v58 = vunpack.i.l.bf16 %v9693_v52  ;;  %v9703_v60 = vpop.permute.xlu1 %9702 }
 0x8cb   :  { %v9705_v63 = vunpack.i.h.bf16 %v9703_v60  ;;  %v9704_v0 = vunpack.i.l.bf16 %v9703_v60 }
 0x8cc   :  { %v8844_v30 = vpack.c.bf16 %v9695_v56, %v9694_v58 }
 0x8cd   :  { %v8854_v1 = vpack.c.bf16 %v9705_v63, %v9704_v0 }
 0x8ce   :  { %8845 = vmatprep.subr.bf16.mxu1 %v8844_v30 }
 0x8cf   :  { %8847 = vmatpush3.bf16.msra.mxu1 %v8844_v30 }
 0x8d0   :  { %v9837_v35 = vpop.eup %9836  ;;  %8850 = vmatprep.subr.msk.bf16.mxu1 %vm10181_vm4, %v8848_v59 }
 0x8d1   :  { %v9839_v32 = vpop.eup %9838  ;;  %v1017_v61 = vmul.f32 %v9837_v35, %v9829_v19 }
 0x8d2   :  { %v1016_v37 = vmul.f32 %v9839_v32, %v9831_v22 }
 0x8d4   :  { %8581 = vmatprep.mubr.msk.f32.mxu1 %vm200_vm2, %v1016_v37 }
 0x8d5   :  { %8582 = vmatmul.mubr.msk.f32.vlgmr.msra.gmra.mrb[12].mxu1 %vm200_vm2, %v1017_v61 }
 0x8d8   :  { %8853 = vmatpush3.bf16.xpose.msk.msra.mxu1 %vm10181_vm4, %v8848_v59 }
 0x8d9   :  { %8856 = vmatprep.subr.msk.bf16.mxu1 %vm10181_vm4, %v8854_v1 }
 0x8e0   :  { %8859 = vmatpush3.bf16.xpose.msk.msra.mxu1 %vm10181_vm4, %v8854_v1 }
 0x8fa   :  { %v1011_v2 = vpop.xlane.xlu0 %1010 }
 0x8fb   :  { %9840 = vrcp.f32 %v1011_v2  ;;  %v1008_v3 = vpop.xlane.xlu1 %1007 }
 0x8fc   :  { %9842 = vrcp.f32 %v1008_v3 }
 0x8fe   :  { %v1130_v11 = vpop.permute.xlu0 %1129 }
 0x8ff   :  { %v1132_v13 = vpop.permute.xlu1 %1131 }
 0x902   :  { %v1134_v14 = vpop.permute.xlu0 %1133 }
 0x903   :  { %v1136_v15 = vpop.permute.xlu1 %1135 }
 0x905   :  { %v9841_v4 = vpop.eup %9840 }
 0x906   :  { %v9843_v5 = vpop.eup %9842  ;;  %v1019_v12 = vmul.f32 %v9841_v4, %v9833_v39 }
 0x907   :  { %v1018_v6 = vmul.f32 %v9843_v5, %v9835_v40 }
 0x909   :  { %8584 = vmatprep.mubr.msk.f32.mxu1 %vm200_vm2, %v1018_v6 }
 0x90a   :  { %8585 = vmatmul.mubr.msk.f32.gmra.mrb[14].mxu1 %vm200_vm2, %v1019_v12 }
 0x90b   :  { %8595 = vmatprep.mubr.msk.f32.mxu1 %vm310_vm3, %v1130_v11 }
 0x90e   :  { %8596 = vmatmul.mubr.msk.f32.vlgmr.msra.gmra.mrb[16].mxu1 %vm310_vm3, %v1132_v13 }
 0x90f   :  { %8598 = vmatprep.mubr.msk.f32.mxu1 %vm310_vm3, %v1134_v14 }
 0x912   :  { %8599 = vmatmul.mubr.msk.f32.gmra.mrb[18].mxu1 %vm310_vm3, %v1136_v15 }
 0x9a8   :  { %v8583_v16 = vpop.f32.mrb[12].mxu1 }
 0x9a9   :  { %v1110_v17 = vpop.f32.mrb[13].mxu1 }
 0x9dd   :  { %v10367_v18 = vpop.f32.mrb[14].mxu1 }
 0x9de   :  { %v10369_v19 = vpop.f32.mrb[15].mxu1 }
 0x9e1   :  { %v8597_v22 = vpop.f32.mrb[16].mxu1 }
 0x9e2   :  { %v1247_v23 = vmul.f32 0.35355338, %v8597_v22  ;;  %v1227_v24 = vpop.f32.mrb[17].mxu1 }
 0x9e3   :  { %v1246_v25 = vmul.f32 0.35355338, %v1227_v24 }
 0x9e4   :  { %v1251_v28 = vadd.f32 %v1247_v23, %v10207_v53 }
 0x9e5   :  { %v8600_v29 = vpop.f32.mrb[18].mxu1  ;;  %v1250_v31 = vadd.f32 %v1246_v25, %v10202_v50 }
 0x9e6   :  { %v1237_v33 = vpop.f32.mrb[19].mxu1  ;;  %v1257_v36 = vsel %vm200_vm2, %v1251_v28, -inf  ;;  %v1249_v39 = vmul.f32 0.35355338, %v8600_v29  ;;  %v1469_v29 = vld [vmem:[%s13757_s7] sm:$0xff] }
 0x9e7   :  { %v1248_v40 = vmul.f32 0.35355338, %v1237_v33  ;;  %1258 = vmax.xlane.f32.xlu1 %v1257_v36  ;;  %v1254_v41 = vsel %vm200_vm2, %v1250_v31, -inf  ;;  %v1471_v33 = vld [vmem:[%s13757_s7 + $0x10] sm:$0xff] }
 0x9e8   :  { %1255 = vmax.xlane.f32.xlu0 %v1254_v41  ;;  %v1253_v49 = vadd.f32 %v1249_v39, %v10220_v62  ;;  %v1472_v39 = vld [vmem:[%s13757_s7 + $0x18] sm:$0xff] }
 0x9e9   :  { %v1252_v43 = vadd.f32 %v1248_v40, %v10213_v57  ;;  %v8872_v40 = vpack.c.bf16 %v1472_v39, %v1471_v33  ;;  %v1675_v33 = vld [vmem:[%s13761_s11 + $0x98] sm:$0xff]  ;;  %v1672_v39 = vld [vmem:[%s13761_s11 + $0x80] sm:$0xff] }
 0x9ea   :  { %v1263_v53 = vsel %vm200_vm2, %v1253_v49, -inf }
 0x9eb   :  { %v1260_v44 = vsel %vm200_vm2, %v1252_v43, -inf }
 0x9ec   :  { %1261 = vmax.xlane.f32.xlu0 %v1260_v44 }
 0x9f0   :  { %1264 = vmax.xlane.f32.xlu0 %v1263_v53 }
 0xa74   :  { %v1259_v50 = vpop.xlane.xlu1 %1258 }
 0xa75   :  { %v1267_v51 = vsub.f32 %v1251_v28, %v1259_v50  ;;  %v1256_v52 = vpop.xlane.xlu0 %1255 }
 0xa76   :  { %v1266_v54 = vsub.f32 %v1250_v31, %v1256_v52  ;;  %v1470_v31 = vld [vmem:[%s13757_s7 + $0x8] sm:$0xff] }
 0xa77   :  { %v1272_v55 = vmul.f32 1.442695, %v1267_v51  ;;  %v8868_v36 = vpack.c.bf16 %v1470_v31, %v1469_v29  ;;  %v1659_v29 = vld [vmem:[%s13761_s11 + $0x18] sm:$0xff] }
 0xa78   :  { %v1270_v56 = vmul.f32 1.442695, %v1266_v54 }
 0xa79   :  { %9844 = vpow2.f32 %v1272_v55  ;;  %v1262_v62 = vpop.xlane.xlu0 %1261 }
 0xa7a   :  { %9846 = vpow2.f32 %v1270_v56  ;;  %v1268_v32 = vsub.f32 %v1252_v43, %v1262_v62 }
 0xa7c   :  { %v1274_v61 = vmul.f32 1.442695, %v1268_v32 }
 0xa7d   :  { %v1265_v35 = vpop.xlane.xlu0 %1264 }
 0xa7e   :  { %v1269_v60 = vsub.f32 %v1253_v49, %v1265_v35 }
 0xa80   :  { %v1276_v37 = vmul.f32 1.442695, %v1269_v60 }
 0xa82   :  { %9848 = vpow2.f32 %v1276_v37 }
 0xa83   :  { %v9845_v58 = vpop.eup %9844  ;;  %9850 = vpow2.f32 %v1274_v61 }
 0xa84   :  { %v9847_v30 = vpop.eup %9846  ;;  %v1281_v57 = vsel %vm200_vm2, %v9845_v58, 0.0 }
 0xa85   :  { %1282 = vadd.xlane.f32.xlu0 %v1281_v57  ;;  %v1278_v59 = vsel %vm200_vm2, %v9847_v30, 0.0 }
 0xa86   :  { %1279 = vadd.xlane.f32.xlu1 %v1278_v59 }
 0xa8c   :  { %v9849_v63 = vpop.eup %9848 }
 0xa8d   :  { %v9851_v0 = vpop.eup %9850  ;;  %v1287_v1 = vsel %vm200_vm2, %v9849_v63, 0.0 }
 0xa8e   :  { %v1284_v2 = vsel %vm200_vm2, %v9851_v0, 0.0 }
 0xa97   :  { %9707 = vrot.lane.b32.xlu1 %v10165_v34, %s13773_s22 }
 0xa9b   :  { %9712 = vrot.lane.b32.xlu0 %v10175_v38, %s13773_s22  ;;  %s13815_s22 = smov 24  }
 0xaba   :  { %1288 = vadd.xlane.f32.xlu0 %v1287_v1 }
 0xabb   :  { %1285 = vadd.xlane.f32.xlu1 %v1284_v2 }
 0xacc   :  { %1411 = vrot.lane.b32.xlu1 %v10317_v46, %s13789_s24 }
 0xad0   :  { %1427 = vrot.lane.b32.xlu1 %v1110_v17, %s13787_s25  ;;  %1413 = vrot.lane.b32.xlu0 %v10315_v45, %s13789_s24 }
 0xad4   :  { %1429 = vrot.lane.b32.xlu1 %v8583_v16, %s13787_s25 }
 0xb12   :  { %v1283_v34 = vpop.xlane.xlu0 %1282 }
 0xb13   :  { %v1280_v38 = vpop.xlane.xlu1 %1279 }
 0xb14   :  { %9852 = vrcp.f32 %v1280_v38 }
 0xb15   :  { %9854 = vrcp.f32 %v1283_v34 }
 0xb16   :  { %v9713_v3 = vpop.permute.xlu0 %9712 }
 0xb17   :  { %v9708_v4 = vpop.permute.xlu1 %9707  ;;  %v9715_v5 = vunpack.i.h.bf16 %v9713_v3  ;;  %v9714_v6 = vunpack.i.l.bf16 %v9713_v3 }
 0xb18   :  { %v9710_v11 = vunpack.i.h.bf16 %v9708_v4  ;;  %v9709_v12 = vunpack.i.l.bf16 %v9708_v4 }
 0xb19   :  { %v8864_v46 = vpack.c.bf16 %v9715_v5, %v9714_v6 }
 0xb1a   :  { %v8860_v13 = vpack.c.bf16 %v9710_v11, %v9709_v12 }
 0xb1c   :  { %8861 = vmatprep.subr.bf16.mxu0 %v8860_v13 }
 0xb1d   :  { %8863 = vmatpush3.bf16.msra.mxu0 %v8860_v13 }
 0xb1e   :  { %v9853_v14 = vpop.eup %9852  ;;  %8865 = vmatprep.subr.bf16.mxu0 %v8864_v46 }
 0xb1f   :  { %v9855_v15 = vpop.eup %9854  ;;  %v1294_v45 = vmul.f32 %v9853_v14, %v9847_v30 }
 0xb20   :  { %v1295_v16 = vmul.f32 %v9855_v15, %v9845_v58 }
 0xb21   :  { %8867 = vmatpush3.bf16.msra.mxu0 %v8864_v46  ;;  %8609 = vmatprep.mubr.msk.f32.mxu0 %vm200_vm2, %v1294_v45 }
 0xb22   :  { %8869 = vmatprep.subr.bf16.mxu0 %v8868_v36 }
 0xb24   :  { %8610 = vmatmul.mubr.msk.f32.vlgmr.msra.gmra.mrb[16].mxu0 %vm200_vm2, %v1295_v16 }
 0xb25   :  { %8871 = vmatpush3.bf16.msra.mxu0 %v8868_v36  ;;  %v1656_v36 = vld [vmem:[%s13761_s11] sm:$0xff] }
 0xb26   :  { %8873 = vmatprep.subr.bf16.mxu0 %v8872_v40 }
 0xb29   :  { %8875 = vmatpush3.bf16.msra.mxu0 %v8872_v40  ;;  %v8884_v40 = vpack.c.bf16 %v1675_v33, %v1659_v29  ;;  %v1708_v33 = vld [vmem:[%s13761_s11 + $0x1a0] sm:$0xff] }
 0xb2b   :  { %8885 = vmatprep.subr.bf16.mxu0 %v8884_v40  ;;  %v1694_v40 = vld [vmem:[%s13761_s11 + $0x130] sm:$0xff] }
 0xb47   :  { %v1289_v17 = vpop.xlane.xlu0 %1288 }
 0xb48   :  { %9856 = vrcp.f32 %v1289_v17  ;;  %v1286_v22 = vpop.xlane.xlu1 %1285 }
 0xb49   :  { %9858 = vrcp.f32 %v1286_v22 }
 0xb4b   :  { %v1414_v52 = vpop.permute.xlu0 %1413 }
 0xb4c   :  { %v1412_v53 = vpop.permute.xlu1 %1411 }
 0xb50   :  { %v1428_v50 = vpop.permute.xlu1 %1427 }
 0xb52   :  { %v9857_v23 = vpop.eup %9856 }
 0xb53   :  { %v9859_v24 = vpop.eup %9858  ;;  %v1297_v28 = vmul.f32 %v9857_v23, %v9849_v63 }
 0xb54   :  { %v1296_v25 = vmul.f32 %v9859_v24, %v9851_v0  ;;  %v1430_v51 = vpop.permute.xlu1 %1429 }
 0xb56   :  { %8612 = vmatprep.mubr.msk.f32.mxu0 %vm200_vm2, %v1296_v25  ;;  %v1657_v25 = vld [vmem:[%s13761_s11 + $0x8] sm:$0xff] }
 0xb57   :  { %8613 = vmatmul.mubr.msk.f32.gmra.mrb[18].mxu0 %vm200_vm2, %v1297_v28  ;;  %v1673_v28 = vld [vmem:[%s13761_s11 + $0x88] sm:$0xff] }
 0xb58   :  { %v8876_v31 = vpack.c.bf16 %v1673_v28, %v1657_v25 }
 0xb5a   :  { %8877 = vmatprep.subr.bf16.mxu1 %v8876_v31  ;;  %v1692_v31 = vld [vmem:[%s13761_s11 + $0x120] sm:$0xff] }
 0xbf7   :  { %v8611_v41 = vpop.f32.mrb[16].mxu0 }
 0xbf8   :  { %1445 = vrot.lane.b32.xlu1 %v8611_v41, %s13785_s3  ;;  %v1388_v43 = vpop.f32.mrb[17].mxu0  ;;  %v8878_v41 = vpack.c.bf16 %v1672_v39, %v1656_v36 }
 0xbf9   :  { %1443 = vrot.lane.b32.xlu0 %v1388_v43, %s13785_s3  ;;  %v1658_v43 = vld [vmem:[%s13761_s11 + $0x10] sm:$0xff] }
 0xbfa   :  { %8879 = vmatpush1.bf16.msra.mxu1 %v8878_v41  ;;  %v1710_v41 = vld [vmem:[%s13761_s11 + $0x1b0] sm:$0xff] }
 0xbfc   :  { %1417 = vrot.lane.b32.xlu1 %v10319_v47, %s13789_s24  ;;  %v1455_v47 = vsel %vm310_vm3, %v10265_v8, %v1412_v53  ;;  %v1689_v53 = vld [vmem:[%s13761_s11 + $0x108] sm:$0xff] }
 0xbfd   :  { %1415 = vrot.lane.b32.xlu0 %v10321_v48, %s13789_s24  ;;  %s13808_s24 = smov 112  }
 0xc00   :  { %1433 = vrot.lane.b32.xlu1 %v10367_v18, %s13787_s25  ;;  %v1456_v18 = vsel %vm310_vm3, %v10263_v7, %v1414_v52 }
 0xc01   :  { %1431 = vrot.lane.b32.xlu0 %v10369_v19, %s13787_s25  ;;  %v1460_v19 = vsel %vm1459_vm5, %v1455_v47, %v1428_v50  ;;  %v1461_v55 = vsel %vm1459_vm5, %v1456_v18, %v1430_v51  ;;  %v1705_v50 = vld [vmem:[%s13761_s11 + $0x188] sm:$0xff]  ;;  %v1691_v51 = vld [vmem:[%s13761_s11 + $0x118] sm:$0xff]  ;;  %v1704_v18 = vld [vmem:[%s13761_s11 + $0x180] sm:$0xff]  ;;  %s13810_s25 = smov 72  }
 0xc02   :  { %v8880_v52 = vpack.c.bf16 %v1705_v50, %v1689_v53  ;;  %v1707_v47 = vld [vmem:[%s13761_s11 + $0x198] sm:$0xff] }
 0xc03   :  { %v1683_v53 = vld [vmem:[%s13761_s11 + $0xd8] sm:$0xff] }
 0xc04   :  { %8881 = vmatprep.subr.bf16.mxu1 %v8880_v52  ;;  %v8906_v52 = vpack.c.bf16 %v1710_v41, %v1694_v40 }
 0xc2a   :  { %v8614_v44 = vpop.f32.mrb[18].mxu0 }
 0xc2b   :  { %1449 = vrot.lane.b32.xlu1 %v8614_v44, %s13785_s3  ;;  %v1398_v49 = vpop.f32.mrb[19].mxu0  ;;  %v1674_v44 = vld [vmem:[%s13761_s11 + $0x90] sm:$0xff] }
 0xc2c   :  { %1447 = vrot.lane.b32.xlu0 %v1398_v49, %s13785_s3  ;;  %v8886_v49 = vpack.c.bf16 %v1674_v44, %v1658_v43  ;;  %v1665_v43 = vld [vmem:[%s13761_s11 + $0x48] sm:$0xff]  ;;  %s13812_s3 = smov 40  }
 0xc2d   :  { %v1681_v44 = vld [vmem:[%s13761_s11 + $0xc8] sm:$0xff] }
 0xc6a   :  { %v1446_v48 = vpop.permute.xlu1 %1445 }
 0xc6b   :  { %v1444_v54 = vpop.permute.xlu0 %1443  ;;  %v1466_v58 = vsel %vm1464_vm6, %v1461_v55, %v1446_v48  ;;  %v1688_v48 = vld [vmem:[%s13761_s11 + $0x100] sm:$0xff]  ;;  %v1690_v55 = vld [vmem:[%s13761_s11 + $0x110] sm:$0xff] }
 0xc6c   :  { %v1465_v56 = vsel %vm1464_vm6, %v1460_v19, %v1444_v54  ;;  %v8888_v19 = vpack.c.bf16 %v1707_v47, %v1691_v51  ;;  %v8882_v54 = vpack.c.bf16 %v1704_v18, %v1688_v48  ;;  %v8898_v51 = vpack.c.bf16 %v1708_v33, %v1692_v31 }
 0xc6d   :  { %8623 = vmatprep.mubr.msk.f32.mxu0 %vm200_vm2, %v1465_v56  ;;  %v1706_v56 = vld [vmem:[%s13761_s11 + $0x190] sm:$0xff]  ;;  %v8908_v47 = vpack.c.bf16 %v1681_v44, %v1665_v43 }
 0xc6e   :  { %8624 = vmatmul.mubr.msk.f32.vlgmr.msra.gmra.mrb[20].mxu0 %vm200_vm2, %v1466_v58  ;;  %v1418_v30 = vpop.permute.xlu1 %1417  ;;  %v8890_v58 = vpack.c.bf16 %v1706_v56, %v1690_v55  ;;  %8883 = vmatpush1.bf16.msra.mxu1 %v8882_v54  ;;  %v1702_v43 = vld [vmem:[%s13761_s11 + $0x170] sm:$0xff] }
 0xc6f   :  { %v1416_v57 = vpop.permute.xlu0 %1415  ;;  %v1458_v35 = vsel %vm310_vm3, %v10267_v9, %v1418_v30  ;;  %8887 = vmatpush1.bf16.msra.mxu0 %v8886_v49  ;;  %v9992_v30 = vmov 0.0   ;;  %v1667_v49 = vld [vmem:[%s13761_s11 + $0x58] sm:$0xff]  ;;  %v1718_v44 = vld [vmem:[%s13761_s11 + $0x1f0] sm:$0xff] }
 0xc70   :  { %v1457_v7 = vsel %vm310_vm3, %v10269_v10, %v1416_v57  ;;  %v7131_v10 = vld [vmem:[%s13758_s8] ss:$0 sm:$0xff]  ;;  %8889 = vmatprep.subr.bf16.mxu0 %v8888_v19  ;;  %1880 = vmatprep.mubr.f32.mxu1 %v9992_v30  ;;  %v8916_v48 = vpack.c.bf16 %v1683_v53, %v1667_v49  ;;  %v2609_v53 = vld [vmem:[%s13763_s13 + $0x88] sm:$0xff] }
 0xc71   :  { %v2608_v49 = vld [vmem:[%s13763_s13 + $0x80] sm:$0xff] }
 0xc72   :  { %v1434_v8 = vpop.permute.xlu1 %1433 }
 0xc73   :  { %v1432_v59 = vpop.permute.xlu0 %1431  ;;  %v1463_v37 = vsel %vm1459_vm5, %v1458_v35, %v1434_v8  ;;  %8891 = vmatpush1.bf16.msra.mxu0 %v8890_v58 }
 0xc74   :  { %v1462_v60 = vsel %vm1459_vm5, %v1457_v7, %v1432_v59 }
 0xc9d   :  { %v1450_v62 = vpop.permute.xlu1 %1449 }
 0xc9e   :  { %v1448_v32 = vpop.permute.xlu0 %1447  ;;  %v1468_v63 = vsel %vm1464_vm6, %v1463_v37, %v1450_v62 }
 0xc9f   :  { %v1467_v61 = vsel %vm1464_vm6, %v1462_v60, %v1448_v32 }
 0xca0   :  { %8626 = vmatprep.mubr.msk.f32.mxu0 %vm200_vm2, %v1467_v61 }
 0xca1   :  { %8627 = vmatmul.mubr.msk.f32.gmra.mrb[22].mxu0 %vm200_vm2, %v1468_v63  ;;  %v1661_v63 = vld [vmem:[%s13761_s11 + $0x28] sm:$0xff] }
 0xca2   :  { %1969 = vmatprep.mubr.f32.mxu0 %v9992_v30 }
 0xd41   :  { %v8625_v0 = vpop.f32.mrb[20].mxu0 }
 0xd42   :  { %v1564_v1 = vadd.f32 %v8625_v0, %v7131_v10  ;;  %v1558_v9 = vpop.f32.mrb[21].mxu0  ;;  %v1663_v0 = vld [vmem:[%s13761_s11 + $0x38] sm:$0xff] }
 0xd43   :  { %v1559_v2 = vadd.f32 %v7131_v10, %v1558_v9  ;;  %v1679_v9 = vld [vmem:[%s13761_s11 + $0xb8] sm:$0xff] }
 0xd44   :  { %v1578_v34 = vadd.f32 %v1564_v1, %v10137_v21 }
 0xd45   :  { %v1577_v38 = vadd.f32 %v1559_v2, %v10135_v20  ;;  %v8900_v2 = vpack.c.bf16 %v1679_v9, %v1663_v0  ;;  %v1697_v0 = vld [vmem:[%s13761_s11 + $0x148] sm:$0xff]  ;;  %v1699_v9 = vld [vmem:[%s13761_s11 + $0x158] sm:$0xff] }
 0xd46   :  { %v1586_v3 = vsel %vm200_vm2, %v1578_v34, 0.0 }
 0xd47   :  { %1587 = vadd.xlane.f32.xlu1 %v1586_v3  ;;  %v1583_v4 = vsel %vm200_vm2, %v1577_v38, 0.0  ;;  %8901 = vmatprep.subr.bf16.mxu0 %v8900_v2  ;;  %v1715_v2 = vld [vmem:[%s13761_s11 + $0x1d8] sm:$0xff] }
 0xd48   :  { %1584 = vadd.xlane.f32.xlu0 %v1583_v4 }
 0xd74   :  { %v8628_v5 = vpop.f32.mrb[22].mxu0 }
 0xd75   :  { %v1568_v6 = vpop.f32.mrb[23].mxu0  ;;  %v1574_v11 = vadd.f32 %v8628_v5, %v7131_v10 }
 0xd76   :  { %v1569_v12 = vadd.f32 %v7131_v10, %v1568_v6  ;;  %v1677_v10 = vld [vmem:[%s13761_s11 + $0xa8] sm:$0xff] }
 0xd77   :  { %v1580_v14 = vadd.f32 %v1574_v11, %v10144_v26  ;;  %v8892_v1 = vpack.c.bf16 %v1677_v10, %v1661_v63  ;;  %v1666_v63 = vld [vmem:[%s13761_s11 + $0x50] sm:$0xff] }
 0xd78   :  { %v1579_v13 = vadd.f32 %v1569_v12, %v10148_v27  ;;  %v1682_v10 = vld [vmem:[%s13761_s11 + $0xd0] sm:$0xff] }
 0xd79   :  { %v1592_v21 = vsel %vm200_vm2, %v1580_v14, 0.0  ;;  %8893 = vmatprep.subr.bf16.mxu1 %v8892_v1  ;;  %v1713_v1 = vld [vmem:[%s13761_s11 + $0x1c8] sm:$0xff] }
 0xd7a   :  { %v1589_v46 = vsel %vm200_vm2, %v1579_v13, 0.0 }
 0xd7b   :  { %1590 = vadd.xlane.f32.xlu0 %v1589_v46  ;;  %v10540_v46 = vld [vmem:[%s13760_s10] ss:$0 sm:$0xff] }
 0xd7f   :  { %1593 = vadd.xlane.f32.xlu0 %v1592_v21 }
 0xdd4   :  { %v1588_v20 = vpop.xlane.xlu1 %1587 }
 0xdd5   :  { %v1597_v15 = vmul.f32 0.03125, %v1588_v20  ;;  %v1585_v45 = vpop.xlane.xlu0 %1584  ;;  %v1660_v20 = vld [vmem:[%s13761_s11 + $0x20] sm:$0xff] }
 0xdd6   :  { %v1596_v16 = vmul.f32 0.03125, %v1585_v45  ;;  %v1662_v45 = vld [vmem:[%s13761_s11 + $0x30] sm:$0xff] }
 0xdd7   :  { %v10452_v17 = vsub.f32 %v1578_v34, %v1597_v15  ;;  %v1676_v15 = vld [vmem:[%s13761_s11 + $0xa0] sm:$0xff] }
 0xdd8   :  { %v10454_v22 = vsub.f32 %v1577_v38, %v1596_v16  ;;  %v1678_v16 = vld [vmem:[%s13761_s11 + $0xb0] sm:$0xff]  ;;  %v8894_v28 = vpack.c.bf16 %v1676_v15, %v1660_v20 }
 0xdd9   :  { %v1605_v23 = vmul.f32 %v10452_v17, %v10452_v17  ;;  %v8902_v29 = vpack.c.bf16 %v1678_v16, %v1662_v45 }
 0xdda   :  { %v1604_v27 = vmul.f32 %v10454_v22, %v10454_v22 }
 0xddb   :  { %v1611_v26 = vsel %vm200_vm2, %v1605_v23, 0.0  ;;  %v1709_v23 = vld [vmem:[%s13761_s11 + $0x1a8] sm:$0xff] }
 0xddc   :  { %1612 = vadd.xlane.f32.xlu0 %v1611_v26  ;;  %v1608_v24 = vsel %vm200_vm2, %v1604_v27, 0.0  ;;  %v1695_v27 = vld [vmem:[%s13761_s11 + $0x138] sm:$0xff] }
 0xddd   :  { %1609 = vadd.xlane.f32.xlu1 %v1608_v24  ;;  %v1711_v26 = vld [vmem:[%s13761_s11 + $0x1b8] sm:$0xff] }
 0xdde   :  { %v8904_v39 = vpack.c.bf16 %v1711_v26, %v1695_v27  ;;  %v1686_v27 = vld [vmem:[%s13761_s11 + $0xf0] sm:$0xff]  ;;  %v1701_v26 = vld [vmem:[%s13761_s11 + $0x168] sm:$0xff] }
 0xe08   :  { %v1591_v57 = vpop.xlane.xlu0 %1590 }
 0xe09   :  { %v1598_v8 = vmul.f32 0.03125, %v1591_v57 }
 0xe0b   :  { %v10512_v59 = vsub.f32 %v1579_v13, %v1598_v8  ;;  %v7136_v13 = vld [vmem:[%s13759_s9] ss:$0 sm:$0xff] }
 0xe0c   :  { %v1594_v7 = vpop.xlane.xlu0 %1593 }
 0xe0d   :  { %v1599_v62 = vmul.f32 0.03125, %v1594_v7  ;;  %v1606_v35 = vmul.f32 %v10512_v59, %v10512_v59 }
 0xe0f   :  { %v10516_v60 = vsub.f32 %v1580_v14, %v1599_v62  ;;  %v1614_v32 = vsel %vm200_vm2, %v1606_v35, 0.0 }
 0xe10   :  { %1615 = vadd.xlane.f32.xlu1 %v1614_v32 }
 0xe11   :  { %v1607_v37 = vmul.f32 %v10516_v60, %v10516_v60 }
 0xe13   :  { %v1617_v61 = vsel %vm200_vm2, %v1607_v37, 0.0 }
 0xe14   :  { %1618 = vadd.xlane.f32.xlu0 %v1617_v61  ;;  %v1664_v61 = vld [vmem:[%s13761_s11 + $0x40] sm:$0xff] }
 0xe69   :  { %v1613_v34 = vpop.xlane.xlu0 %1612 }
 0xe6a   :  { %v1621_v38 = vmul.f32 0.03125, %v1613_v34  ;;  %v1610_v3 = vpop.xlane.xlu1 %1609 }
 0xe6b   :  { %v1620_v4 = vmul.f32 0.03125, %v1610_v3  ;;  %v1696_v3 = vld [vmem:[%s13761_s11 + $0x140] sm:$0xff] }
 0xe6c   :  { %v1625_v5 = vadd.f32 1e-05, %v1621_v38  ;;  %v8918_v38 = vpack.c.bf16 %v1682_v10, %v1666_v63 }
 0xe6d   :  { %v1624_v6 = vadd.f32 1e-05, %v1620_v4  ;;  %v1712_v4 = vld [vmem:[%s13761_s11 + $0x1c0] sm:$0xff] }
 0xe6e   :  { %9860 = vrsqrt.f32 %v1625_v5  ;;  %v8912_v5 = vpack.c.bf16 %v1713_v1, %v1697_v0  ;;  %v8914_v20 = vpack.c.bf16 %v1712_v4, %v1696_v3  ;;  %v2626_v0 = vld [vmem:[%s13763_s13 + $0x110] sm:$0xff]  ;;  %v2627_v1 = vld [vmem:[%s13763_s13 + $0x118] sm:$0xff] }
 0xe6f   :  { %9862 = vrsqrt.f32 %v1624_v6  ;;  %v8920_v6 = vpack.c.bf16 %v1715_v2, %v1699_v9  ;;  %v2612_v9 = vld [vmem:[%s13763_s13 + $0xa0] sm:$0xff]  ;;  %v2613_v2 = vld [vmem:[%s13763_s13 + $0xa8] sm:$0xff]  ;;  %v8978_v4 = vpack.c.bf16 %v2627_v1, %v2626_v0 }
 0xe78   :  { %v9861_v11 = vpop.eup %9860 }
 0xe79   :  { %v9863_v12 = vpop.eup %9862  ;;  %v1633_v14 = vmul.f32 %v9861_v11, %v10452_v17  ;;  %v1693_v17 = vld [vmem:[%s13761_s11 + $0x128] sm:$0xff]  ;;  %v1698_v11 = vld [vmem:[%s13761_s11 + $0x150] sm:$0xff] }
 0xe7a   :  { %v1632_v21 = vmul.f32 %v9863_v12, %v10454_v22  ;;  %v8896_v36 = vpack.c.bf16 %v1709_v23, %v1693_v17  ;;  %v1714_v12 = vld [vmem:[%s13761_s11 + $0x1d0] sm:$0xff]  ;;  %v1668_v17 = vld [vmem:[%s13761_s11 + $0x60] sm:$0xff] }
 0xe7b   :  { %v1643_v24 = vmul.f32 %v7136_v13, %v1633_v14  ;;  %v1671_v14 = vld [vmem:[%s13761_s11 + $0x78] sm:$0xff]  ;;  %v8922_v15 = vpack.c.bf16 %v1714_v12, %v1698_v11  ;;  %v1670_v23 = vld [vmem:[%s13761_s11 + $0x70] sm:$0xff]  ;;  %v8948_v11 = vpack.c.bf16 %v2613_v2, %v2612_v9  ;;  %v2636_v9 = vld [vmem:[%s13763_s13 + $0x160] sm:$0xff] }
 0xe7c   :  { %v1642_v22 = vmul.f32 %v7136_v13, %v1632_v21  ;;  %v1687_v21 = vld [vmem:[%s13761_s11 + $0xf8] sm:$0xff]  ;;  %v8934_v33 = vpack.c.bf16 %v1686_v27, %v1670_v23  ;;  %v2637_v2 = vld [vmem:[%s13763_s13 + $0x168] sm:$0xff] }
 0xe7d   :  { %v10602_v50 = vadd.f32 %v10540_v46, %v1643_v24  ;;  %v8932_v16 = vpack.c.bf16 %v1687_v21, %v1671_v14  ;;  %v1717_v24 = vld [vmem:[%s13761_s11 + $0x1e8] sm:$0xff]  ;;  %v2614_v14 = vld [vmem:[%s13763_s13 + $0xb0] sm:$0xff]  ;;  %v2615_v21 = vld [vmem:[%s13763_s13 + $0xb8] sm:$0xff] }
 0xe7e   :  { %v10569_v25 = vadd.f32 %v10540_v46, %v1642_v22  ;;  %v1684_v22 = vld [vmem:[%s13761_s11 + $0xe0] sm:$0xff]  ;;  %v8928_v40 = vpack.c.bf16 %v1717_v24, %v1701_v26  ;;  %v8952_v23 = vpack.c.bf16 %v2615_v21, %v2614_v14  ;;  %v2630_v26 = vld [vmem:[%s13763_s13 + $0x130] sm:$0xff]  ;;  %v2631_v24 = vld [vmem:[%s13763_s13 + $0x138] sm:$0xff] }
 0xe7f   :  { %v8926_v31 = vpack.c.bf16 %v1684_v22, %v1668_v17  ;;  %v2598_v17 = vld [vmem:[%s13763_s13 + $0x30] sm:$0xff]  ;;  %v2599_v22 = vld [vmem:[%s13763_s13 + $0x38] sm:$0xff] }
 0xe80   :  { %7138 = vmatmul.mubr.msk.f32.vlgmr.msra.gmra.mrb[20].mxu1 %vm200_vm2, %v10569_v25  ;;  %7142 = vmatmul.mubr.msk.f32.vlgmr.msra.gmra.mrb[24].mxu0 %vm200_vm2, %v10569_v25  ;;  %v2638_v14 = vld [vmem:[%s13763_s13 + $0x170] sm:$0xff]  ;;  %v2639_v21 = vld [vmem:[%s13763_s13 + $0x178] sm:$0xff] }
 0xe81   :  { %1886 = vmatprep.mubr.f32.mxu1 %v9992_v30  ;;  %1975 = vmatprep.mubr.f32.mxu0 %v9992_v30 }
 0xe82   :  { %8895 = vmatpush1.bf16.msra.mxu1 %v8894_v28  ;;  %8903 = vmatpush1.bf16.msra.mxu0 %v8902_v29  ;;  %v1703_v28 = vld [vmem:[%s13761_s11 + $0x178] sm:$0xff] }
 0xe83   :  { %8897 = vmatprep.subr.bf16.mxu1 %v8896_v36  ;;  %8905 = vmatprep.subr.bf16.mxu0 %v8904_v39  ;;  %v1719_v29 = vld [vmem:[%s13761_s11 + $0x1f8] sm:$0xff]  ;;  %v1700_v36 = vld [vmem:[%s13761_s11 + $0x160] sm:$0xff] }
 0xe84   :  { %7139 = vmatmul.mubr.msk.f32.gmra.mrb[22].mxu1 %vm200_vm2, %v10602_v50  ;;  %7143 = vmatmul.mubr.msk.f32.gmra.mrb[26].mxu0 %vm200_vm2, %v10602_v50  ;;  %v1716_v39 = vld [vmem:[%s13761_s11 + $0x1e0] sm:$0xff]  ;;  %v8936_v41 = vpack.c.bf16 %v1719_v29, %v1703_v28  ;;  %v2617_v29 = vld [vmem:[%s13763_s13 + $0xc8] sm:$0xff] }
 0xe85   :  { %1892 = vmatprep.mubr.f32.mxu1 %v9992_v30  ;;  %1981 = vmatprep.mubr.f32.mxu0 %v9992_v30  ;;  %v2616_v28 = vld [vmem:[%s13763_s13 + $0xc0] sm:$0xff] }
 0xe86   :  { %8899 = vmatpush1.bf16.msra.mxu1 %v8898_v51  ;;  %8907 = vmatpush1.bf16.msra.mxu0 %v8906_v52  ;;  %v2640_v51 = vld [vmem:[%s13763_s13 + $0x180] sm:$0xff]  ;;  %v2641_v52 = vld [vmem:[%s13763_s13 + $0x188] sm:$0xff] }
 0xe87   :  { %8909 = vmatprep.subr.bf16.mxu1 %v8908_v47  ;;  %8917 = vmatprep.subr.bf16.mxu0 %v8916_v48  ;;  %v8930_v47 = vpack.c.bf16 %v1716_v39, %v1700_v36  ;;  %v8938_v48 = vpack.c.bf16 %v1718_v44, %v1702_v43  ;;  %v8954_v36 = vpack.c.bf16 %v2599_v22, %v2598_v17 }
 0xe88   :  { %v8986_v39 = vpack.c.bf16 %v2631_v24, %v2630_v26  ;;  %v8956_v43 = vpack.c.bf16 %v2617_v29, %v2616_v28  ;;  %v9002_v22 = vpack.c.bf16 %v2639_v21, %v2638_v14  ;;  %v1724_v26 = vlaneseq  ;;  %v2677_v14 = vld [vmem:[%s13763_s13 + $0x2a8] sm:$0xff]  ;;  %v2708_v21 = vld [vmem:[%s13763_s13 + $0x3a0] sm:$0xff] }
 0xe8a   :  { %v10988_v24 = vshrl.u32 %v1724_v26, 7 }
 0xe8c   :  { %v10991_v28 = vsub.s32 0, %v10988_v24  ;;  %v10994_v29 = vsub.s32 2, %v10988_v24 }
 0xe9d   :  { %v1616_v18 = vpop.xlane.xlu1 %1615 }
 0xe9e   :  { %v1622_v19 = vmul.f32 0.03125, %v1616_v18  ;;  %v8940_v18 = vpack.c.bf16 %v2609_v53, %v2608_v49  ;;  %v2632_v49 = vld [vmem:[%s13763_s13 + $0x140] sm:$0xff]  ;;  %v2633_v53 = vld [vmem:[%s13763_s13 + $0x148] sm:$0xff] }
 0xea0   :  { %v1626_v54 = vadd.f32 1e-05, %v1622_v19  ;;  %v8972_v19 = vpack.c.bf16 %v2641_v52, %v2640_v51  ;;  %v2618_v51 = vld [vmem:[%s13763_s13 + $0xd0] sm:$0xff]  ;;  %v2619_v52 = vld [vmem:[%s13763_s13 + $0xd8] sm:$0xff] }
 0xea1   :  { %v1619_v55 = vpop.xlane.xlu0 %1618 }
 0xea2   :  { %9864 = vrsqrt.f32 %v1626_v54  ;;  %v1623_v56 = vmul.f32 0.03125, %v1619_v55  ;;  %v2592_v54 = vld [vmem:[%s13763_s13] sm:$0xff]  ;;  %v2593_v55 = vld [vmem:[%s13763_s13 + $0x8] sm:$0xff] }
 0xea4   :  { %v1627_v58 = vadd.f32 1e-05, %v1623_v56  ;;  %v2624_v56 = vld [vmem:[%s13763_s13 + $0x100] sm:$0xff] }
 0xea6   :  { %9866 = vrsqrt.f32 %v1627_v58  ;;  %v2625_v58 = vld [vmem:[%s13763_s13 + $0x108] sm:$0xff] }
 0xeac   :  { %v9865_v57 = vpop.eup %9864 }
 0xead   :  { %v1634_v8 = vmul.f32 %v9865_v57, %v10512_v59  ;;  %v2610_v57 = vld [vmem:[%s13763_s13 + $0x90] sm:$0xff] }
 0xeaf   :  { %v1644_v7 = vmul.f32 %v7136_v13, %v1634_v8  ;;  %v2611_v8 = vld [vmem:[%s13763_s13 + $0x98] sm:$0xff] }
 0xeb0   :  { %v9867_v62 = vpop.eup %9866  ;;  %v8944_v63 = vpack.c.bf16 %v2611_v8, %v2610_v57  ;;  %v2634_v57 = vld [vmem:[%s13763_s13 + $0x150] sm:$0xff]  ;;  %v2635_v8 = vld [vmem:[%s13763_s13 + $0x158] sm:$0xff] }
 0xeb1   :  { %v10612_v35 = vadd.f32 %v10540_v46, %v1644_v7  ;;  %v1635_v32 = vmul.f32 %v9867_v62, %v10516_v60  ;;  %v1680_v60 = vld [vmem:[%s13761_s11 + $0xc0] sm:$0xff]  ;;  %v2642_v7 = vld [vmem:[%s13763_s13 + $0x190] sm:$0xff]  ;;  %v2643_v62 = vld [vmem:[%s13763_s13 + $0x198] sm:$0xff] }
 0xeb2   :  { %v8910_v34 = vpack.c.bf16 %v1680_v60, %v1664_v61  ;;  %v2594_v61 = vld [vmem:[%s13763_s13 + $0x10] sm:$0xff]  ;;  %v2595_v60 = vld [vmem:[%s13763_s13 + $0x18] sm:$0xff]  ;;  %v8976_v10 = vpack.c.bf16 %v2643_v62, %v2642_v7  ;;  %v2620_v7 = vld [vmem:[%s13763_s13 + $0xe0] sm:$0xff] }
 0xeb3   :  { %v1645_v37 = vmul.f32 %v7136_v13, %v1635_v32  ;;  %7140 = vmatmul.mubr.msk.f32.gmra.mrb[24].mxu1 %vm200_vm2, %v10612_v35  ;;  %7144 = vmatmul.mubr.msk.f32.gmra.mrb[28].mxu0 %vm200_vm2, %v10612_v35  ;;  %v1669_v13 = vld [vmem:[%s13761_s11 + $0x68] sm:$0xff]  ;;  %v8942_v32 = vpack.c.bf16 %v2593_v55, %v2592_v54  ;;  %v8946_v3 = vpack.c.bf16 %v2595_v60, %v2594_v61  ;;  %v2602_v54 = vld [vmem:[%s13763_s13 + $0x50] sm:$0xff]  ;;  %v2603_v55 = vld [vmem:[%s13763_s13 + $0x58] sm:$0xff] }
 0xeb4   :  { %1898 = vmatprep.mubr.f32.mxu1 %v9992_v30  ;;  %1987 = vmatprep.mubr.f32.mxu0 %v9992_v30  ;;  %v2621_v62 = vld [vmem:[%s13763_s13 + $0xe8] sm:$0xff]  ;;  %v8962_v61 = vpack.c.bf16 %v2603_v55, %v2602_v54  ;;  %v8994_v60 = vpack.c.bf16 %v2635_v8, %v2634_v57  ;;  %v2707_v57 = vld [vmem:[%s13763_s13 + $0x398] sm:$0xff] }
 0xeb5   :  { %v10622_v59 = vadd.f32 %v10540_v46, %v1645_v37  ;;  %v1685_v46 = vld [vmem:[%s13761_s11 + $0xe8] sm:$0xff]  ;;  %v8974_v37 = vpack.c.bf16 %v2625_v58, %v2624_v56  ;;  %v8960_v56 = vpack.c.bf16 %v2619_v52, %v2618_v51  ;;  %v8964_v0 = vpack.c.bf16 %v2621_v62, %v2620_v7  ;;  %v2688_v52 = vld [vmem:[%s13763_s13 + $0x300] sm:$0xff] }
 0xeb6   :  { %v8924_v45 = vpack.c.bf16 %v1685_v46, %v1669_v13  ;;  %v2628_v13 = vld [vmem:[%s13763_s13 + $0x120] sm:$0xff]  ;;  %v2629_v46 = vld [vmem:[%s13763_s13 + $0x128] sm:$0xff] }
 0xeb7   :  { %7141 = vmatmul.mubr.msk.f32.gmra.mrb[26].mxu1 %vm200_vm2, %v10622_v59  ;;  %7145 = vmatmul.mubr.msk.f32.gmra.mrb[30].mxu0 %vm200_vm2, %v10622_v59 }
 0xeb8   :  { %2058 = vmatprep.mubr.f32.mxu1 %v9992_v30  ;;  %2147 = vmatprep.mubr.f32.mxu0 %v9992_v30 }
 0xebb   :  { %7146 = vmatmul.mubr.msk.f32.vlgmr.msra.gmra.mrb[28].mxu1 %vm200_vm2, %v10569_v25  ;;  %7150 = vmatmul.mubr.msk.f32.vlgmr.msra.gmra.mrb[32].mxu0 %vm200_vm2, %v10569_v25 }
 0xebc   :  { %2064 = vmatprep.mubr.f32.mxu1 %v9992_v30  ;;  %2153 = vmatprep.mubr.f32.mxu0 %v9992_v30 }
 0xebd   :  { %8911 = vmatpush1.bf16.msra.mxu1 %v8910_v34  ;;  %8919 = vmatpush1.bf16.msra.mxu0 %v8918_v38  ;;  %v2644_v34 = vld [vmem:[%s13763_s13 + $0x1a0] sm:$0xff]  ;;  %v2645_v38 = vld [vmem:[%s13763_s13 + $0x1a8] sm:$0xff] }
 0xebe   :  { %8913 = vmatprep.subr.bf16.mxu1 %v8912_v5  ;;  %8921 = vmatprep.subr.bf16.mxu0 %v8920_v6  ;;  %v2596_v5 = vld [vmem:[%s13763_s13 + $0x20] sm:$0xff]  ;;  %v2597_v6 = vld [vmem:[%s13763_s13 + $0x28] sm:$0xff]  ;;  %v8980_v12 = vpack.c.bf16 %v2645_v38, %v2644_v34  ;;  %v2622_v34 = vld [vmem:[%s13763_s13 + $0xf0] sm:$0xff] }
 0xebf   :  { %7147 = vmatmul.mubr.msk.f32.gmra.mrb[30].mxu1 %vm200_vm2, %v10602_v50  ;;  %7151 = vmatmul.mubr.msk.f32.gmra.mrb[34].mxu0 %vm200_vm2, %v10602_v50  ;;  %v2623_v38 = vld [vmem:[%s13763_s13 + $0xf8] sm:$0xff] }
 0xec0   :  { %2070 = vmatprep.mubr.f32.mxu1 %v9992_v30  ;;  %2159 = vmatprep.mubr.f32.mxu0 %v9992_v30 }
 0xec1   :  { %8915 = vmatpush1.bf16.msra.mxu1 %v8914_v20  ;;  %8923 = vmatpush1.bf16.msra.mxu0 %v8922_v15  ;;  %v2646_v20 = vld [vmem:[%s13763_s13 + $0x1b0] sm:$0xff]  ;;  %v2647_v15 = vld [vmem:[%s13763_s13 + $0x1b8] sm:$0xff] }
 0xec2   :  { %8925 = vmatprep.subr.bf16.mxu1 %v8924_v45  ;;  %8933 = vmatprep.subr.bf16.mxu0 %v8932_v16  ;;  %v8950_v45 = vpack.c.bf16 %v2597_v6, %v2596_v5  ;;  %v8982_v16 = vpack.c.bf16 %v2629_v46, %v2628_v13  ;;  %v8984_v27 = vpack.c.bf16 %v2647_v15, %v2646_v20  ;;  %v2672_v20 = vld [vmem:[%s13763_s13 + $0x280] sm:$0xff]  ;;  %v2673_v15 = vld [vmem:[%s13763_s13 + $0x288] sm:$0xff] }
 0xec3   :  { %7148 = vmatmul.mubr.msk.f32.gmra.mrb[32].mxu1 %vm200_vm2, %v10612_v35  ;;  %7152 = vmatmul.mubr.msk.f32.gmra.mrb[36].mxu0 %vm200_vm2, %v10612_v35  ;;  %v8998_v6 = vpack.c.bf16 %v2637_v2, %v2636_v9  ;;  %v8968_v13 = vpack.c.bf16 %v2623_v38, %v2622_v34  ;;  %v2659_v9 = vld [vmem:[%s13763_s13 + $0x218] sm:$0xff]  ;;  %v2690_v2 = vld [vmem:[%s13763_s13 + $0x310] sm:$0xff] }
 0xec4   :  { %2076 = vmatprep.mubr.f32.mxu1 %v9992_v30  ;;  %2165 = vmatprep.mubr.f32.mxu0 %v9992_v30 }
 0xec7   :  { %7149 = vmatmul.mubr.msk.f32.gmra.mrb[34].mxu1 %vm200_vm2, %v10622_v59  ;;  %7153 = vmatmul.mubr.msk.f32.gmra.mrb[38].mxu0 %vm200_vm2, %v10622_v59 }
 0xec8   :  { %2236 = vmatprep.mubr.f32.mxu1 %v9992_v30  ;;  %2325 = vmatprep.mubr.f32.mxu0 %v9992_v30 }
 0xecb   :  { %7154 = vmatmul.mubr.msk.f32.vlgmr.msra.gmra.mrb[36].mxu1 %vm200_vm2, %v10569_v25  ;;  %7158 = vmatmul.mubr.msk.f32.vlgmr.msra.gmra.mrb[40].mxu0 %vm200_vm2, %v10569_v25 }
 0xecc   :  { %2242 = vmatprep.mubr.f32.mxu1 %v9992_v30  ;;  %2331 = vmatprep.mubr.f32.mxu0 %v9992_v30 }
 0xecd   :  { %8927 = vmatpush1.bf16.msra.mxu1 %v8926_v31  ;;  %8935 = vmatpush1.bf16.msra.mxu0 %v8934_v33  ;;  %v2648_v31 = vld [vmem:[%s13763_s13 + $0x1c0] sm:$0xff]  ;;  %v2649_v33 = vld [vmem:[%s13763_s13 + $0x1c8] sm:$0xff] }
 0xece   :  { %8929 = vmatprep.subr.bf16.mxu1 %v8928_v40  ;;  %8937 = vmatprep.subr.bf16.mxu0 %v8936_v41  ;;  %v2600_v40 = vld [vmem:[%s13763_s13 + $0x40] sm:$0xff]  ;;  %v2601_v41 = vld [vmem:[%s13763_s13 + $0x48] sm:$0xff]  ;;  %v8988_v44 = vpack.c.bf16 %v2649_v33, %v2648_v31  ;;  %v11002_v33 = vsub.s32 1, %v10988_v24 }
 0xecf   :  { %7155 = vmatmul.mubr.msk.f32.gmra.mrb[38].mxu1 %vm200_vm2, %v10602_v50  ;;  %7159 = vmatmul.mubr.msk.f32.gmra.mrb[42].mxu0 %vm200_vm2, %v10602_v50  ;;  %v10999_v31 = vld [vmem:[%s13762_s12] sm:$0xff] }
 0xed0   :  { %2248 = vmatprep.mubr.f32.mxu1 %v9992_v30  ;;  %2337 = vmatprep.mubr.f32.mxu0 %v9992_v30 }
 0xed1   :  { %8931 = vmatpush1.bf16.msra.mxu1 %v8930_v47  ;;  %8939 = vmatpush1.bf16.msra.mxu0 %v8938_v48  ;;  %v2650_v47 = vld [vmem:[%s13763_s13 + $0x1d0] sm:$0xff]  ;;  %v2651_v48 = vld [vmem:[%s13763_s13 + $0x1d8] sm:$0xff] }
 0xed2   :  { %8941 = vmatprep.subr.bf16.mxu1 %v8940_v18  ;;  %8973 = vmatprep.subr.bf16.mxu0 %v8972_v19  ;;  %v8958_v18 = vpack.c.bf16 %v2601_v41, %v2600_v40  ;;  %v8990_v19 = vpack.c.bf16 %v2633_v53, %v2632_v49  ;;  %v8992_v58 = vpack.c.bf16 %v2651_v48, %v2650_v47  ;;  %v2657_v49 = vld [vmem:[%s13763_s13 + $0x208] sm:$0xff]  ;;  %v2674_v48 = vld [vmem:[%s13763_s13 + $0x290] sm:$0xff] }
 0xed3   :  { %7156 = vmatmul.mubr.msk.f32.gmra.mrb[40].mxu1 %vm200_vm2, %v10612_v35  ;;  %7160 = vmatmul.mubr.msk.f32.gmra.mrb[44].mxu0 %vm200_vm2, %v10612_v35  ;;  %v11013_v40 = vrot.slane %v10999_v31, %v10994_v29  ;;  %v11017_v41 = vrot.slane %v10999_v31, %v11002_v33  ;;  %v2689_v47 = vld [vmem:[%s13763_s13 + $0x308] sm:$0xff] }
 0xed4   :  { %2254 = vmatprep.mubr.f32.mxu1 %v9992_v30  ;;  %2343 = vmatprep.mubr.f32.mxu0 %v9992_v30 }
 0xed7   :  { %7157 = vmatmul.mubr.msk.f32.gmra.mrb[42].mxu1 %vm200_vm2, %v10622_v59  ;;  %7161 = vmatmul.mubr.msk.f32.gmra.mrb[46].mxu0 %vm200_vm2, %v10622_v59 }
 0xed8   :  { %2414 = vmatprep.mubr.f32.mxu1 %v9992_v30  ;;  %2503 = vmatprep.mubr.f32.mxu0 %v9992_v30 }
 0xedb   :  { %7162 = vmatmul.mubr.msk.f32.vlgmr.msra.gmra.mrb[44].mxu1 %vm200_vm2, %v10569_v25  ;;  %7166 = vmatmul.mubr.msk.f32.vlgmr.msra.gmra.mrb[48].mxu0 %vm200_vm2, %v10569_v25 }
 0xedc   :  { %2420 = vmatprep.mubr.f32.mxu1 %v9992_v30  ;;  %2509 = vmatprep.mubr.f32.mxu0 %v9992_v30 }
 0xedd   :  { %8943 = vmatpush3.bf16.msra.mxu1 %v8942_v32  ;;  %8975 = vmatpush3.bf16.msra.mxu0 %v8974_v37  ;;  %v2652_v32 = vld [vmem:[%s13763_s13 + $0x1e0] sm:$0xff]  ;;  %v2653_v37 = vld [vmem:[%s13763_s13 + $0x1e8] sm:$0xff] }
 0xede   :  { %8945 = vmatprep.subr.bf16.mxu1 %v8944_v63  ;;  %8977 = vmatprep.subr.bf16.mxu0 %v8976_v10  ;;  %v2604_v63 = vld [vmem:[%s13763_s13 + $0x60] sm:$0xff]  ;;  %v2605_v10 = vld [vmem:[%s13763_s13 + $0x68] sm:$0xff]  ;;  %v8996_v1 = vpack.c.bf16 %v2653_v37, %v2652_v32  ;;  %v9038_v32 = vpack.c.bf16 %v2689_v47, %v2688_v52  ;;  %v2658_v37 = vld [vmem:[%s13763_s13 + $0x210] sm:$0xff] }
 0xedf   :  { %7163 = vmatmul.mubr.msk.f32.gmra.mrb[46].mxu1 %vm200_vm2, %v10602_v50  ;;  %7167 = vmatmul.mubr.msk.f32.gmra.mrb[50].mxu0 %vm200_vm2, %v10602_v50  ;;  %v8966_v5 = vpack.c.bf16 %v2605_v10, %v2604_v63  ;;  %v2678_v52 = vld [vmem:[%s13763_s13 + $0x2b0] sm:$0xff]  ;;  %v2679_v47 = vld [vmem:[%s13763_s13 + $0x2b8] sm:$0xff] }
 0xee0   :  { %2426 = vmatprep.mubr.f32.mxu1 %v9992_v30  ;;  %2515 = vmatprep.mubr.f32.mxu0 %v9992_v30 }
 0xee1   :  { %8947 = vmatpush3.bf16.msra.mxu1 %v8946_v3  ;;  %8979 = vmatpush3.bf16.msra.mxu0 %v8978_v4  ;;  %v2654_v3 = vld [vmem:[%s13763_s13 + $0x1f0] sm:$0xff]  ;;  %v2655_v4 = vld [vmem:[%s13763_s13 + $0x1f8] sm:$0xff] }
 0xee2   :  { %8949 = vmatprep.subr.bf16.mxu1 %v8948_v11  ;;  %8981 = vmatprep.subr.bf16.mxu0 %v8980_v12  ;;  %v2606_v11 = vld [vmem:[%s13763_s13 + $0x70] sm:$0xff]  ;;  %v2607_v12 = vld [vmem:[%s13763_s13 + $0x78] sm:$0xff]  ;;  %v9000_v46 = vpack.c.bf16 %v2655_v4, %v2654_v3 }
 0xee3   :  { %7164 = vmatmul.mubr.msk.f32.gmra.mrb[48].mxu1 %vm200_vm2, %v10612_v35  ;;  %7168 = vmatmul.mubr.msk.f32.gmra.mrb[52].mxu0 %vm200_vm2, %v10612_v35  ;;  %v8970_v17 = vpack.c.bf16 %v2607_v12, %v2606_v11  ;;  %v2691_v11 = vld [vmem:[%s13763_s13 + $0x318] sm:$0xff]  ;;  %v2676_v12 = vld [vmem:[%s13763_s13 + $0x2a0] sm:$0xff] }
 0xee4   :  { %2432 = vmatprep.mubr.f32.mxu1 %v9992_v30  ;;  %2521 = vmatprep.mubr.f32.mxu0 %v9992_v30 }
 0xee5   :  { %8951 = vmatpush3.bf16.msra.mxu1 %v8950_v45  ;;  %8983 = vmatpush3.bf16.msra.mxu0 %v8982_v16  ;;  %v2704_v45 = vld [vmem:[%s13763_s13 + $0x380] sm:$0xff]  ;;  %v2705_v16 = vld [vmem:[%s13763_s13 + $0x388] sm:$0xff] }
 0xee6   :  { %8953 = vmatprep.subr.bf16.mxu1 %v8952_v23  ;;  %8985 = vmatprep.subr.bf16.mxu0 %v8984_v27  ;;  %v9004_v23 = vpack.c.bf16 %v2673_v15, %v2672_v20  ;;  %v9036_v27 = vpack.c.bf16 %v2705_v16, %v2704_v45  ;;  %v2709_v20 = vld [vmem:[%s13763_s13 + $0x3a8] sm:$0xff]  ;;  %v9010_v16 = vpack.c.bf16 %v2659_v9, %v2658_v37  ;;  %v2712_v37 = vld [vmem:[%s13763_s13 + $0x3c0] sm:$0xff] }
 0xee7   :  { %7165 = vmatmul.mubr.msk.f32.gmra.mrb[50].mxu1 %vm200_vm2, %v10622_v59  ;;  %7169 = vmatmul.mubr.msk.f32.gmra.mrb[54].mxu0 %vm200_vm2, %v10622_v59 }
 0xee9   :  { %8955 = vmatpush3.bf16.msra.mxu1 %v8954_v36  ;;  %8987 = vmatpush3.bf16.msra.mxu0 %v8986_v39  ;;  %v11005_v36 = vsub.s32 3, %v10988_v24  ;;  %v11009_v39 = vrot.slane %v10999_v31, %v10991_v28 }
 0xeea   :  { %8957 = vmatprep.subr.bf16.mxu1 %v8956_v43  ;;  %8989 = vmatprep.subr.bf16.mxu0 %v8988_v44  ;;  %v2656_v44 = vld [vmem:[%s13763_s13 + $0x200] sm:$0xff] }
 0xeeb   :  { %v11021_v43 = vrot.slane %v10999_v31, %v11005_v36  ;;  %v9006_v62 = vpack.c.bf16 %v2657_v49, %v2656_v44  ;;  %v9012_v44 = vpack.c.bf16 %v2677_v14, %v2676_v12  ;;  %v9044_v49 = vpack.c.bf16 %v2709_v20, %v2708_v21  ;;  %v2666_v12 = vld [vmem:[%s13763_s13 + $0x250] sm:$0xff]  ;;  %v2699_v20 = vld [vmem:[%s13763_s13 + $0x358] sm:$0xff] }
 0xeec   :  { %v2698_v21 = vld [vmem:[%s13763_s13 + $0x350] sm:$0xff] }
 0xeed   :  { %8959 = vmatpush3.bf16.msra.mxu1 %v8958_v18  ;;  %8991 = vmatpush3.bf16.msra.mxu0 %v8990_v19 }
 0xeee   :  { %8961 = vmatprep.subr.bf16.mxu1 %v8960_v56  ;;  %8993 = vmatprep.subr.bf16.mxu0 %v8992_v58  ;;  %v2675_v56 = vld [vmem:[%s13763_s13 + $0x298] sm:$0xff]  ;;  %v2706_v58 = vld [vmem:[%s13763_s13 + $0x390] sm:$0xff] }
 0xef1   :  { %8963 = vmatpush3.bf16.msra.mxu1 %v8962_v61  ;;  %8995 = vmatpush3.bf16.msra.mxu0 %v8994_v60 }
 0xef2   :  { %8965 = vmatprep.subr.bf16.mxu1 %v8964_v0  ;;  %8997 = vmatprep.subr.bf16.mxu0 %v8996_v1  ;;  %v9008_v0 = vpack.c.bf16 %v2675_v56, %v2674_v48  ;;  %v9040_v1 = vpack.c.bf16 %v2707_v57, %v2706_v58  ;;  %v2710_v48 = vld [vmem:[%s13763_s13 + $0x3b0] sm:$0xff]  ;;  %v2663_v56 = vld [vmem:[%s13763_s13 + $0x238] sm:$0xff]  ;;  %v9016_v58 = vpack.c.bf16 %v2679_v47, %v2678_v52 }
 0xef3   :  { %v2686_v52 = vld [vmem:[%s13763_s13 + $0x2f0] sm:$0xff]  ;;  %v2687_v47 = vld [vmem:[%s13763_s13 + $0x2f8] sm:$0xff] }
 0xef5   :  { %8967 = vmatpush3.bf16.msra.mxu1 %v8966_v5  ;;  %8999 = vmatpush3.bf16.msra.mxu0 %v8998_v6 }
 0xef6   :  { %8969 = vmatprep.subr.bf16.mxu1 %v8968_v13  ;;  %9001 = vmatprep.subr.bf16.mxu0 %v9000_v46 }
 0xef9   :  { %8971 = vmatpush3.bf16.msra.mxu1 %v8970_v17  ;;  %9003 = vmatpush3.bf16.msra.mxu0 %v9002_v22  ;;  %v9042_v17 = vpack.c.bf16 %v2691_v11, %v2690_v2  ;;  %v2660_v22 = vld [vmem:[%s13763_s13 + $0x220] sm:$0xff] }
 0xefa   :  { %9005 = vmatprep.subr.bf16.mxu1 %v9004_v23  ;;  %9037 = vmatprep.subr.bf16.mxu0 %v9036_v27  ;;  %v2661_v23 = vld [vmem:[%s13763_s13 + $0x228] sm:$0xff]  ;;  %v2696_v2 = vld [vmem:[%s13763_s13 + $0x340] sm:$0xff] }
 0xf53   :  { %v1882_v53 = vpop.f32.mrb[20].mxu1  ;;  %v1971_v51 = vpop.f32.mrb[24].mxu0 }
 0xf54   :  { %v1883_v18 = vadd.f32 %v1882_v53, %v11009_v39  ;;  %v1972_v19 = vadd.f32 %v1971_v51, %v11013_v40  ;;  %v1884_v54 = vpop.f32.mrb[21].mxu1  ;;  %v1973_v55 = vpop.f32.mrb[25].mxu0  ;;  %v2692_v53 = vld [vmem:[%s13763_s13 + $0x320] sm:$0xff]  ;;  %v2693_v51 = vld [vmem:[%s13763_s13 + $0x328] sm:$0xff] }
 0xf55   :  { %v1885_v8 = vadd.f32 %v1884_v54, %v11017_v41  ;;  %v1974_v7 = vadd.f32 %v1973_v55, %v11021_v43  ;;  %v9046_v54 = vpack.c.bf16 %v2693_v51, %v2692_v53  ;;  %v2662_v55 = vld [vmem:[%s13763_s13 + $0x230] sm:$0xff]  ;;  %v2700_v53 = vld [vmem:[%s13763_s13 + $0x360] sm:$0xff]  ;;  %v2701_v51 = vld [vmem:[%s13763_s13 + $0x368] sm:$0xff] }
 0xf56   :  { %v2528_v34 = vmax.f32 %v1883_v18, 0.0  ;;  %v2530_v38 = vmax.f32 %v1972_v19, 0.0  ;;  %v2711_v18 = vld [vmem:[%s13763_s13 + $0x3b8] sm:$0xff]  ;;  %v9014_v19 = vpack.c.bf16 %v2661_v23, %v2660_v22  ;;  %v9058_v23 = vpack.c.bf16 %v2699_v20, %v2698_v21 }
 0xf57   :  { %v2529_v61 = vmax.f32 %v1885_v8, 0.0  ;;  %v2531_v60 = vmax.f32 %v1974_v7, 0.0  ;;  %v1888_v63 = vpop.f32.mrb[22].mxu1  ;;  %v1977_v10 = vpop.f32.mrb[26].mxu0  ;;  %v9048_v57 = vpack.c.bf16 %v2711_v18, %v2710_v48  ;;  %v2694_v8 = vld [vmem:[%s13763_s13 + $0x330] sm:$0xff]  ;;  %v2695_v7 = vld [vmem:[%s13763_s13 + $0x338] sm:$0xff] }
 0xf58   :  { %v1889_v3 = vadd.f32 %v1888_v63, %v11009_v39  ;;  %v1978_v4 = vadd.f32 %v1977_v10, %v11013_v40  ;;  %v1890_v5 = vpop.f32.mrb[23].mxu1  ;;  %v1979_v6 = vpop.f32.mrb[27].mxu0  ;;  %v9050_v63 = vpack.c.bf16 %v2695_v7, %v2694_v8  ;;  %v2664_v10 = vld [vmem:[%s13763_s13 + $0x240] sm:$0xff]  ;;  %v2718_v48 = vld [vmem:[%s13763_s13 + $0x3f0] sm:$0xff]  ;;  %v2719_v18 = vld [vmem:[%s13763_s13 + $0x3f8] sm:$0xff] }
 0xf59   :  { %v1891_v13 = vadd.f32 %v1890_v5, %v11017_v41  ;;  %v1980_v46 = vadd.f32 %v1979_v6, %v11021_v43  ;;  %2919 = vmatprep.mubr.f32.mxu1 %v2529_v61  ;;  %3004 = vmatprep.mubr.f32.mxu0 %v2531_v60  ;;  %v2713_v61 = vld [vmem:[%s13763_s13 + $0x3c8] sm:$0xff]  ;;  %v9018_v60 = vpack.c.bf16 %v2663_v56, %v2662_v55  ;;  %v2715_v5 = vld [vmem:[%s13763_s13 + $0x3d8] sm:$0xff]  ;;  %v2670_v55 = vld [vmem:[%s13763_s13 + $0x270] sm:$0xff] }
 0xf5a   :  { %2920 = vmatmul.mubr.f32.vlgmr.msra.gmra.mrb[52].mxu1 %v2528_v34  ;;  %3005 = vmatmul.mubr.f32.vlgmr.msra.gmra.mrb[56].mxu0 %v2530_v38  ;;  %v2544_v27 = vmax.f32 %v1889_v3, 0.0  ;;  %v2546_v26 = vmax.f32 %v1978_v4, 0.0  ;;  %v9052_v9 = vpack.c.bf16 %v2713_v61, %v2712_v37  ;;  %v2697_v34 = vld [vmem:[%s13763_s13 + $0x348] sm:$0xff]  ;;  %v2682_v38 = vld [vmem:[%s13763_s13 + $0x2d0] sm:$0xff]  ;;  %v2683_v3 = vld [vmem:[%s13763_s13 + $0x2d8] sm:$0xff] }
 0xf5b   :  { %v2545_v15 = vmax.f32 %v1891_v13, 0.0  ;;  %v2547_v45 = vmax.f32 %v1980_v46, 0.0  ;;  %9007 = vmatpush3.bf16.msra.mxu1 %v9006_v62  ;;  %9039 = vmatpush3.bf16.msra.mxu0 %v9038_v32  ;;  %v2680_v62 = vld [vmem:[%s13763_s13 + $0x2c0] sm:$0xff]  ;;  %v2681_v32 = vld [vmem:[%s13763_s13 + $0x2c8] sm:$0xff]  ;;  %v2714_v4 = vld [vmem:[%s13763_s13 + $0x3d0] sm:$0xff]  ;;  %v9054_v11 = vpack.c.bf16 %v2697_v34, %v2696_v2  ;;  %v9024_v46 = vpack.c.bf16 %v2683_v3, %v2682_v38 }
 0xf5c   :  { %9009 = vmatprep.subr.bf16.mxu1 %v9008_v0  ;;  %9041 = vmatprep.subr.bf16.mxu0 %v9040_v1  ;;  %v2665_v0 = vld [vmem:[%s13763_s13 + $0x248] sm:$0xff]  ;;  %v9020_v1 = vpack.c.bf16 %v2681_v32, %v2680_v62  ;;  %v2667_v13 = vld [vmem:[%s13763_s13 + $0x258] sm:$0xff]  ;;  %v9056_v14 = vpack.c.bf16 %v2715_v5, %v2714_v4  ;;  %v2702_v8 = vld [vmem:[%s13763_s13 + $0x370] sm:$0xff]  ;;  %v11227_v34 = vsub.s32 6, %v10988_v24  ;;  %v11230_v38 = vsub.s32 5, %v10988_v24 }
 0xf5d   :  { %2924 = vmatprep.mubr.f32.mxu1 %v2545_v15  ;;  %3009 = vmatprep.mubr.f32.mxu0 %v2547_v45  ;;  %v9022_v6 = vpack.c.bf16 %v2665_v0, %v2664_v10  ;;  %v2684_v15 = vld [vmem:[%s13763_s13 + $0x2e0] sm:$0xff]  ;;  %v2685_v45 = vld [vmem:[%s13763_s13 + $0x2e8] sm:$0xff]  ;;  %v9026_v22 = vpack.c.bf16 %v2667_v13, %v2666_v12  ;;  %v2671_v56 = vld [vmem:[%s13763_s13 + $0x278] sm:$0xff]  ;;  %v11237_v13 = vsub.s32 7, %v10988_v24 }
 0xf5e   :  { %2925 = vmatmul.mubr.f32.gmra.mrb[54].mxu1 %v2544_v27  ;;  %3010 = vmatmul.mubr.f32.gmra.mrb[58].mxu0 %v2546_v26  ;;  %v2668_v27 = vld [vmem:[%s13763_s13 + $0x260] sm:$0xff]  ;;  %v2669_v26 = vld [vmem:[%s13763_s13 + $0x268] sm:$0xff]  ;;  %v2703_v7 = vld [vmem:[%s13763_s13 + $0x378] sm:$0xff] }
 0xf5f   :  { %9011 = vmatpush3.bf16.msra.mxu1 %v9010_v16  ;;  %9043 = vmatpush3.bf16.msra.mxu0 %v9042_v17  ;;  %v2716_v16 = vld [vmem:[%s13763_s13 + $0x3e0] sm:$0xff]  ;;  %v2717_v17 = vld [vmem:[%s13763_s13 + $0x3e8] sm:$0xff] }
 0xf60   :  { %9013 = vmatprep.subr.bf16.mxu1 %v9012_v44  ;;  %9045 = vmatprep.subr.bf16.mxu0 %v9044_v49  ;;  %v9028_v44 = vpack.c.bf16 %v2685_v45, %v2684_v15  ;;  %v9060_v49 = vpack.c.bf16 %v2717_v17, %v2716_v16  ;;  %v2736_v62 = vld [vmem:[%s13763_s13 + $0x480] sm:$0xff]  ;;  %v2737_v32 = vld [vmem:[%s13763_s13 + $0x488] sm:$0xff]  ;;  %v11245_v45 = vrot.slane %v10999_v31, %v11227_v34 }
 0xf61   :  { %v2768_v37 = vld [vmem:[%s13763_s13 + $0x580] sm:$0xff]  ;;  %v2769_v61 = vld [vmem:[%s13763_s13 + $0x588] sm:$0xff]  ;;  %v9068_v10 = vpack.c.bf16 %v2737_v32, %v2736_v62  ;;  %v11249_v16 = vrot.slane %v10999_v31, %v11230_v38 }
 0xf62   :  { %v9100_v0 = vpack.c.bf16 %v2769_v61, %v2768_v37  ;;  %v11296_v37 = vld [vmem:[%s13763_s13 + $0x410] sm:$0xff] }
 0xf63   :  { %9015 = vmatpush3.bf16.msra.mxu1 %v9014_v19  ;;  %9047 = vmatpush3.bf16.msra.mxu0 %v9046_v54  ;;  %v9030_v19 = vpack.c.bf16 %v2669_v26, %v2668_v27  ;;  %v9062_v54 = vpack.c.bf16 %v2701_v51, %v2700_v53  ;;  %v11257_v53 = vrot.slane %v10999_v31, %v11237_v13  ;;  %v11262_v51 = vld [vmem:[%s13763_s13 + $0x400] sm:$0xff] }
 0xf64   :  { %9017 = vmatprep.subr.bf16.mxu1 %v9016_v58  ;;  %9049 = vmatprep.subr.bf16.mxu0 %v9048_v57  ;;  %v9032_v58 = vpack.c.bf16 %v2687_v47, %v2686_v52  ;;  %v9064_v57 = vpack.c.bf16 %v2719_v18, %v2718_v48  ;;  %v11276_v48 = vld [vmem:[%s13763_s13 + $0x490] sm:$0xff]  ;;  %v11281_v18 = vld [vmem:[%s13763_s13 + $0x498] sm:$0xff] }
 0xf67   :  { %9019 = vmatpush3.bf16.msra.mxu1 %v9018_v60  ;;  %9051 = vmatpush3.bf16.msra.mxu0 %v9050_v63  ;;  %v9034_v60 = vpack.c.bf16 %v2671_v56, %v2670_v55  ;;  %v9066_v63 = vpack.c.bf16 %v2703_v7, %v2702_v8  ;;  %v2770_v8 = vld [vmem:[%s13763_s13 + $0x590] sm:$0xff]  ;;  %v2771_v7 = vld [vmem:[%s13763_s13 + $0x598] sm:$0xff] }
 0xf68   :  { %9021 = vmatprep.subr.bf16.mxu1 %v9020_v1  ;;  %9053 = vmatprep.subr.bf16.mxu0 %v9052_v9  ;;  %v11224_v1 = vsub.s32 4, %v10988_v24 }
 0xf6b   :  { %9023 = vmatpush3.bf16.msra.mxu1 %v9022_v6  ;;  %9055 = vmatpush3.bf16.msra.mxu0 %v9054_v11 }
 0xf6c   :  { %9025 = vmatprep.subr.bf16.mxu1 %v9024_v46  ;;  %9057 = vmatprep.subr.bf16.mxu0 %v9056_v14  ;;  %v11241_v46 = vrot.slane %v10999_v31, %v11224_v1  ;;  %v2753_v31 = vld [vmem:[%s13763_s13 + $0x508] sm:$0xff] }
 0xf6f   :  { %9027 = vmatpush3.bf16.msra.mxu1 %v9026_v22  ;;  %9059 = vmatpush3.bf16.msra.mxu0 %v9058_v23 }
 0xf70   :  { %9029 = vmatprep.subr.bf16.mxu1 %v9028_v44  ;;  %9061 = vmatprep.subr.bf16.mxu0 %v9060_v49 }
 0xf73   :  { %9031 = vmatpush3.bf16.msra.mxu1 %v9030_v19  ;;  %9063 = vmatpush3.bf16.msra.mxu0 %v9062_v54 }
 0xf74   :  { %9033 = vmatprep.subr.bf16.mxu1 %v9032_v58  ;;  %9065 = vmatprep.subr.bf16.mxu0 %v9064_v57 }
 0xf77   :  { %9035 = vmatpush3.bf16.msra.mxu1 %v9034_v60  ;;  %9067 = vmatpush3.bf16.msra.mxu0 %v9066_v63  ;;  %v11302_v63 = vld [vmem:[%s13763_s13 + $0x418] sm:$0xff] }
 0xf78   :  { %9069 = vmatprep.subr.bf16.mxu1 %v9068_v10  ;;  %9101 = vmatprep.subr.bf16.mxu0 %v9100_v0  ;;  %v11307_v10 = vld [vmem:[%s13763_s13 + $0x510] sm:$0xff]  ;;  %v11312_v0 = vld [vmem:[%s13763_s13 + $0x518] sm:$0xff] }
 0xf86   :  { %v1894_v9 = vpop.f32.mrb[24].mxu1  ;;  %v1983_v2 = vpop.f32.mrb[28].mxu0 }
 0xf87   :  { %v1895_v3 = vadd.f32 %v1894_v9, %v11009_v39  ;;  %v1984_v4 = vadd.f32 %v1983_v2, %v11013_v40  ;;  %v1896_v5 = vpop.f32.mrb[25].mxu1  ;;  %v1985_v6 = vpop.f32.mrb[29].mxu0 }
 0xf88   :  { %v1897_v11 = vadd.f32 %v1896_v5, %v11017_v41  ;;  %v1986_v12 = vadd.f32 %v1985_v6, %v11021_v43  ;;  %v9072_v5 = vpack.c.bf16 %v11281_v18, %v11276_v48  ;;  %v9104_v6 = vpack.c.bf16 %v2771_v7, %v2770_v8 }
 0xf89   :  { %v2560_v17 = vmax.f32 %v1895_v3, 0.0  ;;  %v2562_v22 = vmax.f32 %v1984_v4, 0.0 }
 0xf8a   :  { %v2561_v14 = vmax.f32 %v1897_v11, 0.0  ;;  %v2563_v21 = vmax.f32 %v1986_v12, 0.0  ;;  %v1900_v20 = vpop.f32.mrb[26].mxu1  ;;  %v1989_v15 = vpop.f32.mrb[30].mxu0  ;;  %v11319_v11 = vld [vmem:[%s13763_s13 + $0x4a0] sm:$0xff]  ;;  %v11324_v12 = vld [vmem:[%s13763_s13 + $0x4a8] sm:$0xff] }
 0xf8b   :  { %v1901_v24 = vadd.f32 %v1900_v20, %v11009_v39  ;;  %v1990_v23 = vadd.f32 %v1989_v15, %v11013_v40  ;;  %v1902_v27 = vpop.f32.mrb[27].mxu1  ;;  %v1991_v26 = vpop.f32.mrb[31].mxu0  ;;  %v2721_v39 = vld [vmem:[%s13763_s13 + $0x408] sm:$0xff]  ;;  %v2752_v40 = vld [vmem:[%s13763_s13 + $0x500] sm:$0xff]  ;;  %v9076_v18 = vpack.c.bf16 %v11324_v12, %v11319_v11  ;;  %v2727_v12 = vld [vmem:[%s13763_s13 + $0x438] sm:$0xff] }
 0xf8c   :  { %v1903_v44 = vadd.f32 %v1902_v27, %v11017_v41  ;;  %v1992_v49 = vadd.f32 %v1991_v26, %v11021_v43  ;;  %2929 = vmatprep.mubr.f32.mxu1 %v2561_v14  ;;  %3014 = vmatprep.mubr.f32.mxu0 %v2563_v21  ;;  %v9070_v61 = vpack.c.bf16 %v2721_v39, %v11262_v51 }
 0xf8d   :  { %2930 = vmatmul.mubr.f32.gmra.mrb[56].mxu1 %v2560_v17  ;;  %3015 = vmatmul.mubr.f32.gmra.mrb[60].mxu0 %v2562_v22  ;;  %v2576_v19 = vmax.f32 %v1901_v24, 0.0  ;;  %v2578_v54 = vmax.f32 %v1990_v23, 0.0  ;;  %v9102_v60 = vpack.c.bf16 %v2753_v31, %v2752_v40  ;;  %v2772_v24 = vld [vmem:[%s13763_s13 + $0x5a0] sm:$0xff]  ;;  %v2773_v23 = vld [vmem:[%s13763_s13 + $0x5a8] sm:$0xff]  ;;  %v9074_v51 = vpack.c.bf16 %v11302_v63, %v11296_v37  ;;  %v2775_v37 = vld [vmem:[%s13763_s13 + $0x5b8] sm:$0xff] }
 0xf8e   :  { %v2577_v41 = vmax.f32 %v1903_v44, 0.0  ;;  %v2579_v43 = vmax.f32 %v1992_v49, 0.0  ;;  %v2060_v52 = vpop.f32.mrb[28].mxu1  ;;  %v2149_v47 = vpop.f32.mrb[32].mxu0  ;;  %v11339_v44 = vld [vmem:[%s13763_s13 + $0x420] sm:$0xff]  ;;  %v11344_v49 = vld [vmem:[%s13763_s13 + $0x428] sm:$0xff]  ;;  %v9106_v39 = vpack.c.bf16 %v11312_v0, %v11307_v10 }
 0xf8f   :  { %v2061_v55 = vadd.f32 %v2060_v52, %v11241_v46  ;;  %v2150_v56 = vadd.f32 %v2149_v47, %v11245_v45  ;;  %v2062_v58 = vpop.f32.mrb[29].mxu1  ;;  %v2151_v57 = vpop.f32.mrb[33].mxu0  ;;  %v11353_v40 = vld [vmem:[%s13763_s13 + $0x520] sm:$0xff]  ;;  %v11358_v31 = vld [vmem:[%s13763_s13 + $0x528] sm:$0xff]  ;;  %v9078_v63 = vpack.c.bf16 %v11344_v49, %v11339_v44 }
 0xf90   :  { %v2063_v62 = vadd.f32 %v2062_v58, %v11249_v16  ;;  %v2152_v32 = vadd.f32 %v2151_v57, %v11257_v53  ;;  %2934 = vmatprep.mubr.f32.mxu1 %v2577_v41  ;;  %3019 = vmatprep.mubr.f32.mxu0 %v2579_v43  ;;  %v11363_v41 = vld [vmem:[%s13762_s12 + $0x8] sm:$0xff]  ;;  %v9110_v10 = vpack.c.bf16 %v11358_v31, %v11353_v40  ;;  %v2776_v49 = vld [vmem:[%s13763_s13 + $0x5c0] sm:$0xff] }
 0xf91   :  { %2935 = vmatmul.mubr.f32.gmra.mrb[58].mxu1 %v2576_v19  ;;  %3020 = vmatmul.mubr.f32.gmra.mrb[62].mxu0 %v2578_v54  ;;  %v2532_v14 = vmax.f32 %v2061_v55, 0.0  ;;  %v2534_v21 = vmax.f32 %v2150_v56, 0.0  ;;  %v9108_v19 = vpack.c.bf16 %v2773_v23, %v2772_v24  ;;  %v11370_v54 = vld [vmem:[%s13763_s13 + $0x4b0] sm:$0xff]  ;;  %v11375_v55 = vld [vmem:[%s13763_s13 + $0x4b8] sm:$0xff]  ;;  %v11393_v0 = vrot.slane %v11363_v41, %v11002_v33 }
 0xf92   :  { %v2533_v9 = vmax.f32 %v2063_v62, 0.0  ;;  %v2535_v2 = vmax.f32 %v2152_v32, 0.0  ;;  %v2066_v3 = vpop.f32.mrb[30].mxu1  ;;  %v2155_v4 = vpop.f32.mrb[34].mxu0  ;;  %v2774_v32 = vld [vmem:[%s13763_s13 + $0x5b0] sm:$0xff]  ;;  %v2759_v23 = vld [vmem:[%s13763_s13 + $0x538] sm:$0xff] }
 0xf93   :  { %v2067_v20 = vadd.f32 %v2066_v3, %v11241_v46  ;;  %v2156_v15 = vadd.f32 %v2155_v4, %v11245_v45  ;;  %v2068_v17 = vpop.f32.mrb[31].mxu1  ;;  %v2157_v22 = vpop.f32.mrb[35].mxu0  ;;  %v9112_v11 = vpack.c.bf16 %v2775_v37, %v2774_v32  ;;  %v2747_v32 = vld [vmem:[%s13763_s13 + $0x4d8] sm:$0xff]  ;;  %v2778_v37 = vld [vmem:[%s13763_s13 + $0x5d0] sm:$0xff] }
 0xf94   :  { %v2069_v27 = vadd.f32 %v2068_v17, %v11249_v16  ;;  %v2158_v26 = vadd.f32 %v2157_v22, %v11257_v53  ;;  %3089 = vmatprep.mubr.f32.mxu1 %v2533_v9  ;;  %3174 = vmatprep.mubr.f32.mxu0 %v2535_v2  ;;  %v11398_v9 = vld [vmem:[%s13763_s13 + $0x430] sm:$0xff] }
 0xf95   :  { %3090 = vmatmul.mubr.f32.vlgmr.msra.gmra.mrb[60].mxu1 %v2532_v14  ;;  %3175 = vmatmul.mubr.f32.vlgmr.msra.gmra.mrb[64].mxu0 %v2534_v21  ;;  %v2548_v56 = vmax.f32 %v2067_v20, 0.0  ;;  %v2550_v58 = vmax.f32 %v2156_v15, 0.0  ;;  %v2758_v14 = vld [vmem:[%s13763_s13 + $0x530] sm:$0xff] }
 0xf96   :  { %v2549_v43 = vmax.f32 %v2069_v27, 0.0  ;;  %v2551_v52 = vmax.f32 %v2158_v26, 0.0  ;;  %9071 = vmatpush3.bf16.msra.mxu1 %v9070_v61  ;;  %9103 = vmatpush3.bf16.msra.mxu0 %v9102_v60  ;;  %v2072_v47 = vpop.f32.mrb[32].mxu1  ;;  %v2161_v48 = vpop.f32.mrb[36].mxu0  ;;  %v2744_v27 = vld [vmem:[%s13763_s13 + $0x4c0] sm:$0xff] }
 0xf97   :  { %v2073_v57 = vadd.f32 %v2072_v47, %v11241_v46  ;;  %v2162_v8 = vadd.f32 %v2161_v48, %v11245_v45  ;;  %v2074_v7 = vpop.f32.mrb[33].mxu1  ;;  %v2163_v62 = vpop.f32.mrb[37].mxu0  ;;  %9073 = vmatprep.subr.bf16.mxu1 %v9072_v5  ;;  %9105 = vmatprep.subr.bf16.mxu0 %v9104_v6  ;;  %v9080_v6 = vpack.c.bf16 %v11375_v55, %v11370_v54  ;;  %v2729_v47 = vld [vmem:[%s13763_s13 + $0x448] sm:$0xff]  ;;  %v2760_v48 = vld [vmem:[%s13763_s13 + $0x540] sm:$0xff] }
 0xf98   :  { %v2075_v61 = vadd.f32 %v2074_v7, %v11249_v16  ;;  %v2164_v60 = vadd.f32 %v2163_v62, %v11257_v53  ;;  %3094 = vmatprep.mubr.f32.mxu1 %v2549_v43  ;;  %3179 = vmatprep.mubr.f32.mxu0 %v2551_v52  ;;  %v9082_v43 = vpack.c.bf16 %v2727_v12, %v11398_v9 }
 0xf99   :  { %3095 = vmatmul.mubr.f32.gmra.mrb[62].mxu1 %v2548_v56  ;;  %3180 = vmatmul.mubr.f32.gmra.mrb[66].mxu0 %v2550_v58  ;;  %v2564_v21 = vmax.f32 %v2073_v57, 0.0  ;;  %v2566_v20 = vmax.f32 %v2162_v8, 0.0  ;;  %v9114_v52 = vpack.c.bf16 %v2759_v23, %v2758_v14  ;;  %v2761_v57 = vld [vmem:[%s13763_s13 + $0x548] sm:$0xff]  ;;  %v2746_v8 = vld [vmem:[%s13763_s13 + $0x4d0] sm:$0xff] }
 0xf9a   :  { %v2565_v2 = vmax.f32 %v2075_v61, 0.0  ;;  %v2567_v3 = vmax.f32 %v2164_v60, 0.0  ;;  %9075 = vmatpush3.bf16.msra.mxu1 %v9074_v51  ;;  %9107 = vmatpush3.bf16.msra.mxu0 %v9106_v39  ;;  %v2078_v4 = vpop.f32.mrb[34].mxu1  ;;  %v2167_v5 = vpop.f32.mrb[38].mxu0  ;;  %v2779_v61 = vld [vmem:[%s13763_s13 + $0x5d8] sm:$0xff]  ;;  %v9088_v12 = vpack.c.bf16 %v2747_v32, %v2746_v8  ;;  %v2734_v8 = vld [vmem:[%s13763_s13 + $0x470] sm:$0xff]  ;;  %v11545_v32 = vrot.slane %v11363_v41, %v10994_v29 }
 0xf9b   :  { %v2079_v15 = vadd.f32 %v2078_v4, %v11241_v46  ;;  %v2168_v17 = vadd.f32 %v2167_v5, %v11245_v45  ;;  %v2080_v22 = vpop.f32.mrb[35].mxu1  ;;  %v2169_v24 = vpop.f32.mrb[39].mxu0  ;;  %9077 = vmatprep.subr.bf16.mxu1 %v9076_v18  ;;  %9109 = vmatprep.subr.bf16.mxu0 %v9108_v19  ;;  %v11420_v46 = vrot.slane %v11363_v41, %v11005_v36  ;;  %v2745_v45 = vld [vmem:[%s13763_s13 + $0x4c8] sm:$0xff]  ;;  %v2730_v4 = vld [vmem:[%s13763_s13 + $0x450] sm:$0xff]  ;;  %v2731_v5 = vld [vmem:[%s13763_s13 + $0x458] sm:$0xff] }
 0xf9c   :  { %v2081_v26 = vadd.f32 %v2080_v22, %v11249_v16  ;;  %v2170_v44 = vadd.f32 %v2169_v24, %v11257_v53  ;;  %3099 = vmatprep.mubr.f32.mxu1 %v2565_v2  ;;  %3184 = vmatprep.mubr.f32.mxu0 %v2567_v3  ;;  %v2777_v16 = vld [vmem:[%s13763_s13 + $0x5c8] sm:$0xff]  ;;  %v2728_v53 = vld [vmem:[%s13763_s13 + $0x440] sm:$0xff]  ;;  %v9084_v56 = vpack.c.bf16 %v2745_v45, %v2744_v27 }
 0xf9d   :  { %3100 = vmatmul.mubr.f32.gmra.mrb[64].mxu1 %v2564_v21  ;;  %3185 = vmatmul.mubr.f32.gmra.mrb[68].mxu0 %v2566_v20  ;;  %v2580_v18 = vmax.f32 %v2079_v15, 0.0  ;;  %v2582_v19 = vmax.f32 %v2168_v17, 0.0  ;;  %v9116_v58 = vpack.c.bf16 %v2777_v16, %v2776_v49  ;;  %v9086_v2 = vpack.c.bf16 %v2729_v47, %v2728_v53  ;;  %v2762_v21 = vld [vmem:[%s13763_s13 + $0x550] sm:$0xff]  ;;  %v2763_v20 = vld [vmem:[%s13763_s13 + $0x558] sm:$0xff]  ;;  %v2748_v15 = vld [vmem:[%s13763_s13 + $0x4e0] sm:$0xff] }
 0xf9e   :  { %v2581_v51 = vmax.f32 %v2081_v26, 0.0  ;;  %v2583_v39 = vmax.f32 %v2170_v44, 0.0  ;;  %9079 = vmatpush3.bf16.msra.mxu1 %v9078_v63  ;;  %9111 = vmatpush3.bf16.msra.mxu0 %v9110_v10  ;;  %v11434_v40 = vpop.f32.mrb[36].mxu1  ;;  %v11436_v31 = vpop.f32.mrb[40].mxu0  ;;  %v9118_v3 = vpack.c.bf16 %v2761_v57, %v2760_v48  ;;  %v9120_v14 = vpack.c.bf16 %v2779_v61, %v2778_v37  ;;  %v2749_v17 = vld [vmem:[%s13763_s13 + $0x4e8] sm:$0xff]  ;;  %v2780_v22 = vld [vmem:[%s13763_s13 + $0x5e0] sm:$0xff] }
 0xf9f   :  { %v2240_v54 = vpop.f32.mrb[37].mxu1  ;;  %v2329_v55 = vpop.f32.mrb[41].mxu0  ;;  %9081 = vmatprep.subr.bf16.mxu1 %v9080_v6  ;;  %9113 = vmatprep.subr.bf16.mxu0 %v9112_v11  ;;  %v2781_v24 = vld [vmem:[%s13763_s13 + $0x5e8] sm:$0xff]  ;;  %v9090_v26 = vpack.c.bf16 %v2731_v5, %v2730_v4  ;;  %v9122_v44 = vpack.c.bf16 %v2763_v20, %v2762_v21  ;;  %v2732_v45 = vld [vmem:[%s13763_s13 + $0x460] sm:$0xff]  ;;  %v2750_v47 = vld [vmem:[%s13763_s13 + $0x4f0] sm:$0xff] }
 0xfa0   :  { %v2241_v7 = vadd.f32 %v2240_v54, %v11393_v0  ;;  %v2330_v62 = vadd.f32 %v2329_v55, %v11420_v46  ;;  %3104 = vmatprep.mubr.f32.mxu1 %v2581_v51  ;;  %3189 = vmatprep.mubr.f32.mxu0 %v2583_v39  ;;  %v2733_v49 = vld [vmem:[%s13763_s13 + $0x468] sm:$0xff]  ;;  %v9092_v51 = vpack.c.bf16 %v2749_v17, %v2748_v15  ;;  %v2751_v48 = vld [vmem:[%s13763_s13 + $0x4f8] sm:$0xff]  ;;  %v2832_v5 = vld [vmem:[%s13763_s13 + $0x780] sm:$0xff] }
 0xfa1   :  { %3105 = vmatmul.mubr.f32.gmra.mrb[66].mxu1 %v2580_v18  ;;  %3190 = vmatmul.mubr.f32.gmra.mrb[70].mxu0 %v2582_v19  ;;  %v9124_v39 = vpack.c.bf16 %v2781_v24, %v2780_v22  ;;  %v2782_v18 = vld [vmem:[%s13763_s13 + $0x5f0] sm:$0xff]  ;;  %v2783_v19 = vld [vmem:[%s13763_s13 + $0x5f8] sm:$0xff]  ;;  %v11528_v54 = vrot.slane %v11363_v41, %v10991_v28  ;;  %v2801_v4 = vld [vmem:[%s13763_s13 + $0x688] sm:$0xff] }
 0xfa2   :  { %v2537_v60 = vmax.f32 %v2241_v7, 0.0  ;;  %v2539_v63 = vmax.f32 %v2330_v62, 0.0  ;;  %9083 = vmatpush3.bf16.msra.mxu1 %v9082_v43  ;;  %9115 = vmatpush3.bf16.msra.mxu0 %v9114_v52  ;;  %v11462_v10 = vpop.f32.mrb[38].mxu1  ;;  %v11464_v9 = vpop.f32.mrb[42].mxu0  ;;  %v2764_v43 = vld [vmem:[%s13763_s13 + $0x560] sm:$0xff]  ;;  %v2765_v52 = vld [vmem:[%s13763_s13 + $0x568] sm:$0xff] }
 0xfa3   :  { %v11472_v6 = vpop.f32.mrb[39].mxu1  ;;  %v11474_v11 = vpop.f32.mrb[43].mxu0  ;;  %9085 = vmatprep.subr.bf16.mxu1 %v9084_v56  ;;  %9117 = vmatprep.subr.bf16.mxu0 %v9116_v58  ;;  %v9094_v58 = vpack.c.bf16 %v2733_v49, %v2732_v45  ;;  %v9126_v57 = vpack.c.bf16 %v2765_v52, %v2764_v43  ;;  %v2735_v7 = vld [vmem:[%s13763_s13 + $0x478] sm:$0xff]  ;;  %v2766_v62 = vld [vmem:[%s13763_s13 + $0x570] sm:$0xff]  ;;  %v11574_v21 = vld [vmem:[%s13763_s13 + $0x608] sm:$0xff]  ;;  %v2239_v49 = vadd.f32 %v11434_v40, %v11528_v54 }
 0xfa4   :  { %3259 = vmatprep.mubr.f32.mxu1 %v2537_v60  ;;  %3344 = vmatprep.mubr.f32.mxu0 %v2539_v63  ;;  %v9096_v60 = vpack.c.bf16 %v2751_v48, %v2750_v47  ;;  %v9128_v63 = vpack.c.bf16 %v2783_v19, %v2782_v18  ;;  %v9098_v17 = vpack.c.bf16 %v2735_v7, %v2734_v8  ;;  %v11593_v45 = vld [vmem:[%s13763_s13 + $0x690] sm:$0xff]  ;;  %v11606_v47 = vld [vmem:[%s13763_s13 + $0x698] sm:$0xff] }
 0xfa5   :  { %v11611_v48 = vld [vmem:[%s13763_s13 + $0x790] sm:$0xff]  ;;  %v11616_v40 = vld [vmem:[%s13763_s13 + $0x798] sm:$0xff]  ;;  %v2336_v18 = vadd.f32 %v11474_v11, %v11420_v46 }
 0xfa6   :  { %9087 = vmatpush3.bf16.msra.mxu1 %v9086_v2  ;;  %9119 = vmatpush3.bf16.msra.mxu0 %v9118_v3  ;;  %v11494_v23 = vpop.f32.mrb[40].mxu1  ;;  %v11496_v27 = vpop.f32.mrb[44].mxu0  ;;  %v2767_v2 = vld [vmem:[%s13763_s13 + $0x578] sm:$0xff]  ;;  %v2800_v3 = vld [vmem:[%s13763_s13 + $0x680] sm:$0xff] }
 0xfa7   :  { %v11504_v16 = vpop.f32.mrb[41].mxu1  ;;  %v11506_v53 = vpop.f32.mrb[45].mxu0  ;;  %9089 = vmatprep.subr.bf16.mxu1 %v9088_v12  ;;  %9121 = vmatprep.subr.bf16.mxu0 %v9120_v14  ;;  %v2833_v12 = vld [vmem:[%s13763_s13 + $0x788] sm:$0xff]  ;;  %v11569_v14 = vld [vmem:[%s13763_s13 + $0x600] sm:$0xff]  ;;  %v9130_v22 = vpack.c.bf16 %v2767_v2, %v2766_v62  ;;  %v9132_v24 = vpack.c.bf16 %v2801_v4, %v2800_v3  ;;  %v9136_v62 = vpack.c.bf16 %v11606_v47, %v11593_v45  ;;  %v2536_v4 = vmax.f32 %v2239_v49, 0.0 }
 0xfa8   :  { %v9164_v52 = vpack.c.bf16 %v2833_v12, %v2832_v5  ;;  %v9134_v19 = vpack.c.bf16 %v11574_v21, %v11569_v14  ;;  %v11657_v2 = vld [vmem:[%s13763_s13 + $0x6a0] sm:$0xff]  ;;  %v11662_v3 = vld [vmem:[%s13763_s13 + $0x6a8] sm:$0xff]  ;;  %v2245_v12 = vadd.f32 %v11462_v10, %v11528_v54  ;;  %v2334_v14 = vadd.f32 %v11464_v9, %v11545_v32 }
 0xfa9   :  { %v2253_v9 = vadd.f32 %v11504_v16, %v11393_v0  ;;  %v2342_v45 = vadd.f32 %v11506_v53, %v11420_v46  ;;  %v11692_v49 = vrot.slane %v11363_v41, %v11237_v13  ;;  %v11699_v16 = vld [vmem:[%s13763_s13 + $0x620] sm:$0xff]  ;;  %v11704_v53 = vld [vmem:[%s13763_s13 + $0x628] sm:$0xff] }
 0xfaa   :  { %9091 = vmatpush3.bf16.msra.mxu1 %v9090_v26  ;;  %9123 = vmatpush3.bf16.msra.mxu0 %v9122_v44  ;;  %v11530_v55 = vpop.f32.mrb[42].mxu1  ;;  %v11532_v56 = vpop.f32.mrb[46].mxu0  ;;  %v11583_v26 = vld [vmem:[%s13763_s13 + $0x700] sm:$0xff]  ;;  %v11588_v44 = vld [vmem:[%s13763_s13 + $0x708] sm:$0xff] }
 0xfab   :  { %v11547_v37 = vpop.f32.mrb[43].mxu1  ;;  %v11549_v61 = vpop.f32.mrb[47].mxu0  ;;  %9093 = vmatprep.subr.bf16.mxu1 %v9092_v51  ;;  %9125 = vmatprep.subr.bf16.mxu0 %v9124_v39  ;;  %v2328_v51 = vadd.f32 %v11436_v31, %v11545_v32  ;;  %v2247_v31 = vadd.f32 %v11472_v6, %v11393_v0  ;;  %v11637_v6 = vld [vmem:[%s13763_s13 + $0x710] sm:$0xff]  ;;  %v9166_v7 = vpack.c.bf16 %v11588_v44, %v11583_v26  ;;  %v11680_v26 = vld [vmem:[%s13763_s13 + $0x7a8] sm:$0xff]  ;;  %v2555_v44 = vmax.f32 %v2336_v18, 0.0 }
 0xfad   :  { %v2538_v5 = vmax.f32 %v2328_v51, 0.0  ;;  %v2553_v10 = vmax.f32 %v2247_v31, 0.0  ;;  %v9140_v31 = vpack.c.bf16 %v11662_v3, %v11657_v2  ;;  %v2251_v2 = vadd.f32 %v11494_v23, %v11528_v54 }
 0xfae   :  { %9095 = vmatpush3.bf16.msra.mxu1 %v9094_v58  ;;  %9127 = vmatpush3.bf16.msra.mxu0 %v9126_v57  ;;  %v11576_v20 = vpop.f32.mrb[44].mxu1  ;;  %v11578_v15 = vpop.f32.mrb[48].mxu0  ;;  %v11627_v58 = vld [vmem:[%s13763_s13 + $0x610] sm:$0xff]  ;;  %v11632_v57 = vld [vmem:[%s13763_s13 + $0x618] sm:$0xff]  ;;  %v2340_v3 = vadd.f32 %v11496_v27, %v11545_v32  ;;  %v2259_v23 = vadd.f32 %v11547_v37, %v11393_v0  ;;  %v2348_v27 = vadd.f32 %v11549_v61, %v11420_v46 }
 0xfaf   :  { %v11599_v39 = vpop.f32.mrb[45].mxu1  ;;  %v11601_v43 = vpop.f32.mrb[49].mxu0  ;;  %9097 = vmatprep.subr.bf16.mxu1 %v9096_v60  ;;  %9129 = vmatprep.subr.bf16.mxu0 %v9128_v63  ;;  %v9168_v60 = vpack.c.bf16 %v11616_v40, %v11611_v48  ;;  %v11652_v63 = vld [vmem:[%s13763_s13 + $0x718] sm:$0xff]  ;;  %v9138_v51 = vpack.c.bf16 %v11632_v57, %v11627_v58  ;;  %v2821_v58 = vld [vmem:[%s13763_s13 + $0x728] sm:$0xff]  ;;  %v11727_v57 = vld [vmem:[%s13763_s13 + $0x6b0] sm:$0xff]  ;;  %v2568_v46 = vmax.f32 %v2251_v2, 0.0 }
 0xfb0   :  { %v9170_v40 = vpack.c.bf16 %v11652_v63, %v11637_v6  ;;  %v2552_v6 = vmax.f32 %v2245_v12, 0.0  ;;  %v2554_v63 = vmax.f32 %v2334_v14, 0.0  ;;  %v2839_v12 = vld [vmem:[%s13763_s13 + $0x7b8] sm:$0xff]  ;;  %v2569_v14 = vmax.f32 %v2253_v9, 0.0  ;;  %v2793_v2 = vld [vmem:[%s13763_s13 + $0x648] sm:$0xff] }
 0xfb1   :  { %v2570_v61 = vmax.f32 %v2340_v3, 0.0 }
 0xfb2   :  { %9099 = vmatpush3.bf16.msra.mxu1 %v9098_v17  ;;  %9131 = vmatpush3.bf16.msra.mxu0 %v9130_v22  ;;  %v11639_v11 = vpop.f32.mrb[46].mxu1  ;;  %v11641_v8 = vpop.f32.mrb[50].mxu0  ;;  %v11675_v22 = vld [vmem:[%s13763_s13 + $0x7a0] sm:$0xff] }
 0xfb3   :  { %v11668_v21 = vpop.f32.mrb[47].mxu1  ;;  %v11670_v17 = vpop.f32.mrb[51].mxu0  ;;  %9133 = vmatprep.subr.bf16.mxu1 %v9132_v24  ;;  %9165 = vmatprep.subr.bf16.mxu0 %v9164_v52  ;;  %v11688_v24 = vrot.slane %v11363_v41, %v11230_v38  ;;  %v11709_v52 = vld [vmem:[%s13763_s13 + $0x720] sm:$0xff]  ;;  %v9172_v18 = vpack.c.bf16 %v11680_v26, %v11675_v22  ;;  %v2838_v26 = vld [vmem:[%s13763_s13 + $0x7b0] sm:$0xff] }
 0xfb4   :  { %v9174_v9 = vpack.c.bf16 %v2821_v58, %v11709_v52  ;;  %v9176_v37 = vpack.c.bf16 %v2839_v12, %v2838_v26  ;;  %v2791_v52 = vld [vmem:[%s13763_s13 + $0x638] sm:$0xff]  ;;  %v2585_v58 = vmax.f32 %v2259_v23, 0.0  ;;  %v2825_v23 = vld [vmem:[%s13763_s13 + $0x748] sm:$0xff] }
 0xfb5   :  { %3260 = vmatmul.mubr.f32.vlgmr.msra.gmra.mrb[68].mxu1 %v2536_v4  ;;  %3345 = vmatmul.mubr.f32.vlgmr.msra.gmra.mrb[72].mxu0 %v2538_v5  ;;  %v11732_v4 = vld [vmem:[%s13763_s13 + $0x6b8] sm:$0xff] }
 0xfb6   :  { %3264 = vmatprep.mubr.f32.mxu1 %v2553_v10  ;;  %3349 = vmatprep.mubr.f32.mxu0 %v2555_v44  ;;  %v11711_v47 = vpop.f32.mrb[48].mxu1  ;;  %v11713_v48 = vpop.f32.mrb[52].mxu0  ;;  %v2571_v10 = vmax.f32 %v2342_v45, 0.0  ;;  %v9144_v0 = vpack.c.bf16 %v11732_v4, %v11727_v57  ;;  %v2587_v57 = vmax.f32 %v2348_v27, 0.0  ;;  %v2810_v27 = vld [vmem:[%s13763_s13 + $0x6d0] sm:$0xff] }
 0xfb7   :  { %9135 = vmatpush3.bf16.msra.mxu1 %v9134_v19  ;;  %9167 = vmatpush3.bf16.msra.mxu0 %v9166_v7  ;;  %v11738_v5 = vpop.f32.mrb[49].mxu1  ;;  %v11740_v22 = vpop.f32.mrb[53].mxu0  ;;  %v9142_v19 = vpack.c.bf16 %v11704_v53, %v11699_v16  ;;  %v2790_v53 = vld [vmem:[%s13763_s13 + $0x630] sm:$0xff] }
 0xfb8   :  { %9137 = vmatprep.subr.bf16.mxu1 %v9136_v62  ;;  %9169 = vmatprep.subr.bf16.mxu0 %v9168_v60  ;;  %v2257_v62 = vadd.f32 %v11530_v55, %v11528_v54  ;;  %v2346_v60 = vadd.f32 %v11532_v56, %v11545_v32  ;;  %v2419_v54 = vadd.f32 %v11599_v39, %v11688_v24  ;;  %v2822_v56 = vld [vmem:[%s13763_s13 + $0x730] sm:$0xff]  ;;  %v2823_v32 = vld [vmem:[%s13763_s13 + $0x738] sm:$0xff]  ;;  %v2809_v39 = vld [vmem:[%s13763_s13 + $0x6c8] sm:$0xff] }
 0xfb9   :  { %3265 = vmatmul.mubr.f32.gmra.mrb[70].mxu1 %v2552_v6  ;;  %3350 = vmatmul.mubr.f32.gmra.mrb[74].mxu0 %v2554_v63  ;;  %v2508_v55 = vadd.f32 %v11601_v43, %v11692_v49  ;;  %v2840_v43 = vld [vmem:[%s13763_s13 + $0x7c0] sm:$0xff]  ;;  %v9146_v4 = vpack.c.bf16 %v2791_v52, %v2790_v53  ;;  %v9178_v6 = vpack.c.bf16 %v2823_v32, %v2822_v56  ;;  %v2826_v52 = vld [vmem:[%s13763_s13 + $0x750] sm:$0xff]  ;;  %v2845_v56 = vld [vmem:[%s13763_s13 + $0x7e8] sm:$0xff] }
 0xfba   :  { %3269 = vmatprep.mubr.f32.mxu1 %v2569_v14  ;;  %3354 = vmatprep.mubr.f32.mxu0 %v2571_v10  ;;  %v11754_v7 = vpop.f32.mrb[50].mxu1  ;;  %v11756_v44 = vpop.f32.mrb[54].mxu0  ;;  %v2792_v63 = vld [vmem:[%s13763_s13 + $0x640] sm:$0xff]  ;;  %v2541_v3 = vmax.f32 %v2419_v54, 0.0  ;;  %v2813_v54 = vld [vmem:[%s13763_s13 + $0x6e8] sm:$0xff] }
 0xfbb   :  { %9139 = vmatpush3.bf16.msra.mxu1 %v9138_v51  ;;  %9171 = vmatpush3.bf16.msra.mxu0 %v9170_v40  ;;  %v11765_v45 = vpop.f32.mrb[51].mxu1  ;;  %v11767_v16 = vpop.f32.mrb[55].mxu0  ;;  %v2808_v51 = vld [vmem:[%s13763_s13 + $0x6c0] sm:$0xff]  ;;  %v2841_v40 = vld [vmem:[%s13763_s13 + $0x7c8] sm:$0xff]  ;;  %v2543_v26 = vmax.f32 %v2508_v55, 0.0 }
 0xfbc   :  { %9141 = vmatprep.subr.bf16.mxu1 %v9140_v31  ;;  %9173 = vmatprep.subr.bf16.mxu0 %v9172_v18  ;;  %v2584_v31 = vmax.f32 %v2257_v62, 0.0  ;;  %v2586_v18 = vmax.f32 %v2346_v60, 0.0  ;;  %v9148_v12 = vpack.c.bf16 %v2809_v39, %v2808_v51  ;;  %v9180_v14 = vpack.c.bf16 %v2841_v40, %v2840_v43  ;;  %v2824_v10 = vld [vmem:[%s13763_s13 + $0x740] sm:$0xff]  ;;  %v2795_v62 = vld [vmem:[%s13763_s13 + $0x658] sm:$0xff]  ;;  %v2797_v43 = vld [vmem:[%s13763_s13 + $0x668] sm:$0xff] }
 0xfbd   :  { %3270 = vmatmul.mubr.f32.gmra.mrb[72].mxu1 %v2568_v46  ;;  %3355 = vmatmul.mubr.f32.gmra.mrb[76].mxu0 %v2570_v61  ;;  %v9182_v46 = vpack.c.bf16 %v2825_v23, %v2824_v10  ;;  %v2794_v61 = vld [vmem:[%s13763_s13 + $0x650] sm:$0xff]  ;;  %v2844_v55 = vld [vmem:[%s13763_s13 + $0x7e0] sm:$0xff]  ;;  %v1783_v23 = vrot.slane %v11363_v41, %v11227_v34 }
 0xfbe   :  { %3274 = vmatprep.mubr.f32.mxu1 %v2585_v58  ;;  %3359 = vmatprep.mubr.f32.mxu0 %v2587_v57  ;;  %v2827_v58 = vld [vmem:[%s13763_s13 + $0x758] sm:$0xff]  ;;  %v2812_v57 = vld [vmem:[%s13763_s13 + $0x6e0] sm:$0xff]  ;;  %v9154_v32 = vpack.c.bf16 %v2795_v62, %v2794_v61  ;;  %v2798_v10 = vld [vmem:[%s13763_s13 + $0x670] sm:$0xff] }
 0xfbf   :  { %9143 = vmatpush3.bf16.msra.mxu1 %v9142_v19  ;;  %9175 = vmatpush3.bf16.msra.mxu0 %v9174_v9  ;;  %v2811_v19 = vld [vmem:[%s13763_s13 + $0x6d8] sm:$0xff]  ;;  %v2842_v9 = vld [vmem:[%s13763_s13 + $0x7d0] sm:$0xff]  ;;  %v9186_v51 = vpack.c.bf16 %v2827_v58, %v2826_v52  ;;  %v2796_v39 = vld [vmem:[%s13763_s13 + $0x660] sm:$0xff]  ;;  %v9156_v40 = vpack.c.bf16 %v2813_v54, %v2812_v57  ;;  %v2506_v62 = vadd.f32 %v11578_v15, %v1783_v23 }
 0xfc0   :  { %9145 = vmatprep.subr.bf16.mxu1 %v9144_v0  ;;  %9177 = vmatprep.subr.bf16.mxu0 %v9176_v37  ;;  %v2843_v0 = vld [vmem:[%s13763_s13 + $0x7d8] sm:$0xff]  ;;  %v9150_v37 = vpack.c.bf16 %v2793_v2, %v2792_v63  ;;  %v9152_v60 = vpack.c.bf16 %v2811_v19, %v2810_v27  ;;  %v2846_v2 = vld [vmem:[%s13763_s13 + $0x7f0] sm:$0xff]  ;;  %v2512_v54 = vadd.f32 %v11641_v8, %v1783_v23 }
 0xfc1   :  { %3275 = vmatmul.mubr.f32.gmra.mrb[74].mxu1 %v2584_v31  ;;  %3360 = vmatmul.mubr.f32.gmra.mrb[78].mxu0 %v2586_v18  ;;  %v9184_v53 = vpack.c.bf16 %v2843_v0, %v2842_v9  ;;  %v9188_v31 = vpack.c.bf16 %v2845_v56, %v2844_v55  ;;  %v2828_v18 = vld [vmem:[%s13763_s13 + $0x760] sm:$0xff]  ;;  %v2815_v63 = vld [vmem:[%s13763_s13 + $0x6f8] sm:$0xff]  ;;  %v2830_v0 = vld [vmem:[%s13763_s13 + $0x770] sm:$0xff]  ;;  %v2542_v58 = vmax.f32 %v2506_v62, 0.0  ;;  %v2431_v15 = vadd.f32 %v11738_v5, %v11688_v24 }
 0xfc2   :  { %3429 = vmatprep.mubr.f32.mxu1 %v2541_v3  ;;  %3514 = vmatprep.mubr.f32.mxu0 %v2543_v26  ;;  %v2847_v3 = vld [vmem:[%s13763_s13 + $0x7f8] sm:$0xff]  ;;  %v1775_v26 = vrot.slane %v11363_v41, %v11224_v1  ;;  %v2520_v56 = vadd.f32 %v11740_v22, %v11692_v49  ;;  %v2526_v5 = vadd.f32 %v11767_v16, %v11692_v49 }
 0xfc3   :  { %9147 = vmatpush3.bf16.msra.mxu1 %v9146_v4  ;;  %9179 = vmatpush3.bf16.msra.mxu0 %v9178_v6  ;;  %v2829_v4 = vld [vmem:[%s13763_s13 + $0x768] sm:$0xff]  ;;  %v2814_v6 = vld [vmem:[%s13763_s13 + $0x6f0] sm:$0xff]  ;;  %v9192_v19 = vpack.c.bf16 %v2847_v3, %v2846_v2  ;;  %v2799_v9 = vld [vmem:[%s13763_s13 + $0x678] sm:$0xff] }
 0xfc4   :  { %9149 = vmatprep.subr.bf16.mxu1 %v9148_v12  ;;  %9181 = vmatprep.subr.bf16.mxu0 %v9180_v14  ;;  %v9158_v12 = vpack.c.bf16 %v2797_v43, %v2796_v39  ;;  %v9190_v14 = vpack.c.bf16 %v2829_v4, %v2828_v18  ;;  %v9160_v27 = vpack.c.bf16 %v2815_v63, %v2814_v6  ;;  %v2575_v8 = vmax.f32 %v2520_v56, 0.0  ;;  %v7170_v18 = vld [vmem:[%s13764_s14] ss:$0 sm:$0xff] }
 0xfc5   :  { %v2417_v61 = vadd.f32 %v11576_v20, %v1775_v26  ;;  %v2423_v57 = vadd.f32 %v11639_v11, %v1775_v26  ;;  %v2518_v11 = vadd.f32 %v11713_v48, %v1783_v23  ;;  %v2437_v39 = vadd.f32 %v11765_v45, %v11688_v24 }
 0xfc6   :  { %v2591_v48 = vmax.f32 %v2526_v5, 0.0 }
 0xfc7   :  { %9151 = vmatpush3.bf16.msra.mxu1 %v9150_v37  ;;  %9183 = vmatpush3.bf16.msra.mxu0 %v9182_v46  ;;  %v2831_v37 = vld [vmem:[%s13763_s13 + $0x778] sm:$0xff]  ;;  %v9162_v46 = vpack.c.bf16 %v2799_v9, %v2798_v10  ;;  %v2540_v52 = vmax.f32 %v2417_v61, 0.0  ;;  %v2574_v43 = vmax.f32 %v2518_v11, 0.0 }
 0xfc8   :  { %9153 = vmatprep.subr.bf16.mxu1 %v9152_v60  ;;  %9185 = vmatprep.subr.bf16.mxu0 %v9184_v53  ;;  %v9194_v41 = vpack.c.bf16 %v2831_v37, %v2830_v0  ;;  %v2425_v60 = vadd.f32 %v11668_v21, %v11688_v24  ;;  %v2514_v53 = vadd.f32 %v11670_v17, %v11692_v49  ;;  %v2556_v21 = vmax.f32 %v2423_v57, 0.0 }
 0xfc9   :  { %v2558_v17 = vmax.f32 %v2512_v54, 0.0 }
 0xfca   :  { %v2557_v55 = vmax.f32 %v2425_v60, 0.0  ;;  %v2559_v20 = vmax.f32 %v2514_v53, 0.0 }
 0xfcb   :  { %9155 = vmatpush3.bf16.msra.mxu1 %v9154_v32  ;;  %9187 = vmatpush3.bf16.msra.mxu0 %v9186_v51  ;;  %v2429_v32 = vadd.f32 %v11711_v47, %v1775_v26  ;;  %v2573_v51 = vmax.f32 %v2431_v15, 0.0  ;;  %v2524_v47 = vadd.f32 %v11756_v44, %v1783_v23 }
 0xfcc   :  { %9157 = vmatprep.subr.bf16.mxu1 %v9156_v40  ;;  %9189 = vmatprep.subr.bf16.mxu0 %v9188_v31  ;;  %v2435_v40 = vadd.f32 %v11754_v7, %v1775_v26  ;;  %v2589_v31 = vmax.f32 %v2437_v39, 0.0 }
 0xfcd   :  { %v2572_v22 = vmax.f32 %v2429_v32, 0.0  ;;  %v2590_v45 = vmax.f32 %v2524_v47, 0.0 }
 0xfce   :  { %v2588_v24 = vmax.f32 %v2435_v40, 0.0 }
 0xfcf   :  { %9159 = vmatpush3.bf16.msra.mxu1 %v9158_v12  ;;  %9191 = vmatpush3.bf16.msra.mxu0 %v9190_v14 }
 0xfd0   :  { %9161 = vmatprep.subr.bf16.mxu1 %v9160_v27  ;;  %9193 = vmatprep.subr.bf16.mxu0 %v9192_v19 }
 0xfd3   :  { %9163 = vmatpush3.bf16.msra.mxu1 %v9162_v46  ;;  %9195 = vmatpush3.bf16.msra.mxu0 %v9194_v41 }
 0xfd6   :  { %3430 = vmatmul.mubr.f32.vlgmr.msra.gmra.mrb[76].mxu1 %v2540_v52  ;;  %3515 = vmatmul.mubr.f32.vlgmr.msra.gmra.mrb[80].mxu0 %v2542_v58 }
 0xfd7   :  { %3434 = vmatprep.mubr.f32.mxu1 %v2557_v55  ;;  %3519 = vmatprep.mubr.f32.mxu0 %v2559_v20 }
 0xfda   :  { %3435 = vmatmul.mubr.f32.gmra.mrb[78].mxu1 %v2556_v21  ;;  %3520 = vmatmul.mubr.f32.gmra.mrb[82].mxu0 %v2558_v17 }
 0xfdb   :  { %3439 = vmatprep.mubr.f32.mxu1 %v2573_v51  ;;  %3524 = vmatprep.mubr.f32.mxu0 %v2575_v8 }
 0xfde   :  { %3440 = vmatmul.mubr.f32.gmra.mrb[80].mxu1 %v2572_v22  ;;  %3525 = vmatmul.mubr.f32.gmra.mrb[84].mxu0 %v2574_v43 }
 0xfdf   :  { %3444 = vmatprep.mubr.f32.mxu1 %v2589_v31  ;;  %3529 = vmatprep.mubr.f32.mxu0 %v2591_v48 }
 0xfe2   :  { %3445 = vmatmul.mubr.f32.gmra.mrb[82].mxu1 %v2588_v24  ;;  %3530 = vmatmul.mubr.f32.gmra.mrb[86].mxu0 %v2590_v45 }
0x102d   :  { %v7724_v49 = vpop.f32.mrb[52].mxu1  ;;  %v7768_v16 = vpop.f32.mrb[56].mxu0 }
0x102e   :  { %v7725_v4 = vpop.f32.mrb[53].mxu1  ;;  %v7769_v7 = vpop.f32.mrb[57].mxu0 }
0x102f   :  { %v7726_v6 = vadd.f32 %v7725_v4, %v7724_v49  ;;  %v7770_v44 = vadd.f32 %v7769_v7, %v7768_v16 }
0x1031   :  { %v2922_v63 = vadd.f32 %v7726_v6, %v7170_v18  ;;  %v7727_v2 = vpop.f32.mrb[54].mxu1  ;;  %v7771_v3 = vpop.f32.mrb[58].mxu0 }
0x1032   :  { %v7728_v26 = vpop.f32.mrb[55].mxu1  ;;  %v7772_v12 = vpop.f32.mrb[59].mxu0 }
0x1033   :  { %v3007_v14 = vadd.f32 %v7770_v44, %v2922_v63  ;;  %v7729_v10 = vadd.f32 %v7728_v26, %v7727_v2  ;;  %v7773_v23 = vadd.f32 %v7772_v12, %v7771_v3 }
0x1035   :  { %v2927_v27 = vadd.f32 %v7729_v10, %v7170_v18 }
0x1037   :  { %v3012_v19 = vadd.f32 %v7773_v23, %v2927_v27 }
0x1060   :  { %v7730_v9 = vpop.f32.mrb[56].mxu1  ;;  %v7774_v0 = vpop.f32.mrb[60].mxu0 }
0x1061   :  { %v7731_v37 = vpop.f32.mrb[57].mxu1  ;;  %v7775_v46 = vpop.f32.mrb[61].mxu0 }
0x1062   :  { %v7732_v41 = vadd.f32 %v7731_v37, %v7730_v9  ;;  %v7776_v61 = vadd.f32 %v7775_v46, %v7774_v0 }
0x1064   :  { %v2932_v62 = vadd.f32 %v7732_v41, %v7170_v18  ;;  %v7733_v60 = vpop.f32.mrb[58].mxu1  ;;  %v7777_v53 = vpop.f32.mrb[62].mxu0 }
0x1065   :  { %v7734_v52 = vpop.f32.mrb[59].mxu1  ;;  %v7778_v58 = vpop.f32.mrb[63].mxu0 }
0x1066   :  { %v3017_v57 = vadd.f32 %v7776_v61, %v2932_v62  ;;  %v7735_v54 = vadd.f32 %v7734_v52, %v7733_v60  ;;  %v7779_v55 = vadd.f32 %v7778_v58, %v7777_v53 }
0x1068   :  { %v2937_v20 = vadd.f32 %v7735_v54, %v7170_v18  ;;  %v7812_v15 = vpop.f32.mrb[60].mxu1  ;;  %v7856_v56 = vpop.f32.mrb[64].mxu0 }
0x1069   :  { %v7813_v21 = vpop.f32.mrb[61].mxu1  ;;  %v7857_v17 = vpop.f32.mrb[65].mxu0 }
0x106a   :  { %v3022_v32 = vadd.f32 %v7779_v55, %v2937_v20  ;;  %v7814_v11 = vadd.f32 %v7813_v21, %v7812_v15  ;;  %v7858_v51 = vadd.f32 %v7857_v17, %v7856_v56 }
0x106c   :  { %v3092_v8 = vadd.f32 %v7814_v11, %v3007_v14  ;;  %v7815_v39 = vpop.f32.mrb[62].mxu1  ;;  %v7859_v5 = vpop.f32.mrb[66].mxu0 }
0x106d   :  { %v7816_v22 = vpop.f32.mrb[63].mxu1  ;;  %v7860_v43 = vpop.f32.mrb[67].mxu0 }
0x106e   :  { %v3177_v40 = vadd.f32 %v7858_v51, %v3092_v8  ;;  %v7817_v47 = vadd.f32 %v7816_v22, %v7815_v39  ;;  %v7861_v31 = vadd.f32 %v7860_v43, %v7859_v5 }
0x1070   :  { %v3097_v48 = vadd.f32 %v7817_v47, %v3012_v19  ;;  %v7818_v24 = vpop.f32.mrb[64].mxu1  ;;  %v7862_v45 = vpop.f32.mrb[68].mxu0 }
0x1071   :  { %v7819_v49 = vpop.f32.mrb[65].mxu1  ;;  %v7863_v16 = vpop.f32.mrb[69].mxu0 }
0x1072   :  { %v3182_v18 = vadd.f32 %v7861_v31, %v3097_v48  ;;  %v7820_v4 = vadd.f32 %v7819_v49, %v7818_v24  ;;  %v7864_v7 = vadd.f32 %v7863_v16, %v7862_v45 }
0x1074   :  { %v3102_v6 = vadd.f32 %v7820_v4, %v3017_v57  ;;  %v7821_v44 = vpop.f32.mrb[66].mxu1  ;;  %v7865_v63 = vpop.f32.mrb[70].mxu0 }
0x1075   :  { %v7822_v2 = vpop.f32.mrb[67].mxu1  ;;  %v7866_v3 = vpop.f32.mrb[71].mxu0 }
0x1076   :  { %v3187_v26 = vadd.f32 %v7864_v7, %v3102_v6  ;;  %v7823_v12 = vadd.f32 %v7822_v2, %v7821_v44  ;;  %v7867_v14 = vadd.f32 %v7866_v3, %v7865_v63 }
0x1078   :  { %v3107_v10 = vadd.f32 %v7823_v12, %v3022_v32 }
0x107a   :  { %v3192_v23 = vadd.f32 %v7867_v14, %v3107_v10 }
0x1088   :  { %v7900_v27 = vpop.f32.mrb[68].mxu1  ;;  %v7944_v9 = vpop.f32.mrb[72].mxu0 }
0x1089   :  { %v7901_v19 = vpop.f32.mrb[69].mxu1  ;;  %v7945_v0 = vpop.f32.mrb[73].mxu0 }
0x108a   :  { %v7902_v37 = vadd.f32 %v7901_v19, %v7900_v27  ;;  %v7946_v46 = vadd.f32 %v7945_v0, %v7944_v9 }
0x108c   :  { %v3262_v41 = vadd.f32 %v7902_v37, %v3177_v40  ;;  %v7903_v61 = vpop.f32.mrb[70].mxu1  ;;  %v7947_v62 = vpop.f32.mrb[74].mxu0 }
0x108d   :  { %v7904_v60 = vpop.f32.mrb[71].mxu1  ;;  %v7948_v53 = vpop.f32.mrb[75].mxu0 }
0x108e   :  { %v3347_v52 = vadd.f32 %v7946_v46, %v3262_v41  ;;  %v7905_v58 = vadd.f32 %v7904_v60, %v7903_v61  ;;  %v7949_v57 = vadd.f32 %v7948_v53, %v7947_v62 }
0x1090   :  { %v3267_v54 = vadd.f32 %v7905_v58, %v3182_v18  ;;  %v7906_v55 = vpop.f32.mrb[72].mxu1  ;;  %v7950_v20 = vpop.f32.mrb[76].mxu0 }
0x1091   :  { %v7907_v15 = vpop.f32.mrb[73].mxu1  ;;  %v7951_v56 = vpop.f32.mrb[77].mxu0 }
0x1092   :  { %v3352_v21 = vadd.f32 %v7949_v57, %v3267_v54  ;;  %v7908_v17 = vadd.f32 %v7907_v15, %v7906_v55  ;;  %v7952_v32 = vadd.f32 %v7951_v56, %v7950_v20 }
0x1094   :  { %v3272_v11 = vadd.f32 %v7908_v17, %v3187_v26  ;;  %v7909_v51 = vpop.f32.mrb[74].mxu1  ;;  %v7953_v8 = vpop.f32.mrb[78].mxu0 }
0x1095   :  { %v7910_v39 = vpop.f32.mrb[75].mxu1  ;;  %v7954_v5 = vpop.f32.mrb[79].mxu0 }
0x1096   :  { %v3357_v22 = vadd.f32 %v7952_v32, %v3272_v11  ;;  %v7911_v43 = vadd.f32 %v7910_v39, %v7909_v51  ;;  %v7955_v40 = vadd.f32 %v7954_v5, %v7953_v8 }
0x1098   :  { %v3277_v47 = vadd.f32 %v7911_v43, %v3192_v23 }
0x109a   :  { %v3362_v31 = vadd.f32 %v7955_v40, %v3277_v47 }
0x10a9   :  { %v7988_v48 = vpop.f32.mrb[76].mxu1  ;;  %v8032_v24 = vpop.f32.mrb[80].mxu0 }
0x10aa   :  { %v7989_v45 = vpop.f32.mrb[77].mxu1  ;;  %v8033_v49 = vpop.f32.mrb[81].mxu0 }
0x10ab   :  { %v7990_v16 = vadd.f32 %v7989_v45, %v7988_v48  ;;  %v8034_v18 = vadd.f32 %v8033_v49, %v8032_v24 }
0x10ad   :  { %v3432_v4 = vadd.f32 %v7990_v16, %v3347_v52  ;;  %v7991_v7 = vpop.f32.mrb[78].mxu1  ;;  %v8035_v6 = vpop.f32.mrb[82].mxu0 }
0x10ae   :  { %v7992_v44 = vpop.f32.mrb[79].mxu1  ;;  %v8036_v63 = vpop.f32.mrb[83].mxu0 }
0x10af   :  { %v3517_v2 = vadd.f32 %v8034_v18, %v3432_v4  ;;  %v7993_v3 = vadd.f32 %v7992_v44, %v7991_v7  ;;  %v8037_v26 = vadd.f32 %v8036_v63, %v8035_v6  ;;  %v7173_v4 = vld [vmem:[%s13755_s5 + $0x20] sm:$0xff]  ;;  %v7174_v7 = vld [vmem:[%s13755_s5 + $0x28] sm:$0xff]  ;;  %v7175_v44 = vld [vmem:[%s13755_s5 + $0x30] sm:$0xff] }
0x10b0   :  { %v9196_v6 = vpack.c.bf16 %v7174_v7, %v7173_v4  ;;  %v7176_v63 = vld [vmem:[%s13755_s5 + $0x38] sm:$0xff]  ;;  %s13809_s5 = smov 48  }
0x10b1   :  { %v3437_v12 = vadd.f32 %v7993_v3, %v3352_v21  ;;  %v7994_v14 = vpop.f32.mrb[80].mxu1  ;;  %v8038_v10 = vpop.f32.mrb[84].mxu0  ;;  %v3535_v23 = vadd.f32 %v3517_v2, %v10569_v25  ;;  %v9200_v2 = vpack.c.bf16 %v7176_v63, %v7175_v44 }
0x10b2   :  { %v7995_v27 = vpop.f32.mrb[81].mxu1  ;;  %v8039_v9 = vpop.f32.mrb[85].mxu0  ;;  %9197 = vmatprep.subr.bf16.mxu1 %v9196_v6 }
0x10b3   :  { %v3522_v19 = vadd.f32 %v8037_v26, %v3437_v12  ;;  %v7996_v0 = vadd.f32 %v7995_v27, %v7994_v14  ;;  %v8040_v37 = vadd.f32 %v8039_v9, %v8038_v10  ;;  %v3541_v46 = vsel %vm200_vm2, %v3535_v23, 0.0  ;;  %9199 = vmatpush3.bf16.msra.mxu1 %v9196_v6 }
0x10b4   :  { %3542 = vadd.xlane.f32.xlu1 %v3541_v46  ;;  %9201 = vmatprep.subr.bf16.mxu1 %v9200_v2 }
0x10b5   :  { %v3442_v41 = vadd.f32 %v7996_v0, %v3357_v22  ;;  %v7997_v61 = vpop.f32.mrb[82].mxu1  ;;  %v8041_v62 = vpop.f32.mrb[86].mxu0  ;;  %v3536_v60 = vadd.f32 %v3522_v19, %v10602_v50 }
0x10b6   :  { %v7998_v53 = vpop.f32.mrb[83].mxu1  ;;  %v8042_v52 = vpop.f32.mrb[87].mxu0 }
0x10b7   :  { %v3527_v58 = vadd.f32 %v8040_v37, %v3442_v41  ;;  %v7999_v57 = vadd.f32 %v7998_v53, %v7997_v61  ;;  %v8043_v54 = vadd.f32 %v8042_v52, %v8041_v62  ;;  %v3544_v25 = vsel %vm200_vm2, %v3536_v60, 0.0  ;;  %9203 = vmatpush3.bf16.msra.mxu1 %v9200_v2  ;;  %v7171_v61 = vld [vmem:[%s13765_s15] ss:$0 sm:$0xff] }
0x10b8   :  { %3545 = vadd.xlane.f32.xlu0 %v3544_v25 }
0x10b9   :  { %v3447_v55 = vadd.f32 %v7999_v57, %v3362_v31  ;;  %v3537_v20 = vadd.f32 %v3527_v58, %v10612_v35 }
0x10bb   :  { %v3532_v15 = vadd.f32 %v8043_v54, %v3447_v55  ;;  %v3547_v56 = vsel %vm200_vm2, %v3537_v20, 0.0 }
0x10bc   :  { %3548 = vadd.xlane.f32.xlu1 %v3547_v56 }
0x10bd   :  { %v3538_v21 = vadd.f32 %v3532_v15, %v10622_v59 }
0x10bf   :  { %v3550_v17 = vsel %vm200_vm2, %v3538_v21, 0.0 }
0x10c0   :  { %3551 = vadd.xlane.f32.xlu0 %v3550_v17 }
0x1141   :  { %v3543_v50 = vpop.xlane.xlu1 %3542 }
0x1142   :  { %v3553_v32 = vmul.f32 0.03125, %v3543_v50 }
0x1144   :  { %v3557_v11 = vsub.f32 %v3535_v23, %v3553_v32 }
0x1145   :  { %v3546_v51 = vpop.xlane.xlu0 %3545 }
0x1146   :  { %v3554_v8 = vmul.f32 0.03125, %v3546_v51  ;;  %v3561_v39 = vmul.f32 %v3557_v11, %v3557_v11 }
0x1148   :  { %v3558_v5 = vsub.f32 %v3536_v60, %v3554_v8  ;;  %v3565_v22 = vsel %vm200_vm2, %v3561_v39, 0.0  ;;  %v7172_v60 = vld [vmem:[%s13766_s16] ss:$0 sm:$0xff] }
0x1149   :  { %3566 = vadd.xlane.f32.xlu1 %v3565_v22  ;;  %v3549_v35 = vpop.xlane.xlu1 %3548 }
0x114a   :  { %v3555_v43 = vmul.f32 0.03125, %v3549_v35  ;;  %v3562_v40 = vmul.f32 %v3558_v5, %v3558_v5 }
0x114c   :  { %v3559_v47 = vsub.f32 %v3537_v20, %v3555_v43  ;;  %v3568_v31 = vsel %vm200_vm2, %v3562_v40, 0.0 }
0x114d   :  { %3569 = vadd.xlane.f32.xlu0 %v3568_v31  ;;  %v3552_v59 = vpop.xlane.xlu0 %3551 }
0x114e   :  { %v3556_v48 = vmul.f32 0.03125, %v3552_v59  ;;  %v3563_v24 = vmul.f32 %v3559_v47, %v3559_v47 }
0x1150   :  { %v3560_v45 = vsub.f32 %v3538_v21, %v3556_v48  ;;  %v3571_v49 = vsel %vm200_vm2, %v3563_v24, 0.0 }
0x1151   :  { %3572 = vadd.xlane.f32.xlu1 %v3571_v49 }
0x1152   :  { %v3564_v16 = vmul.f32 %v3560_v45, %v3560_v45 }
0x1154   :  { %v3574_v18 = vsel %vm200_vm2, %v3564_v16, 0.0 }
0x1155   :  { %3575 = vadd.xlane.f32.xlu0 %v3574_v18 }
0x11d6   :  { %v3567_v3 = vpop.xlane.xlu1 %3566 }
0x11d7   :  { %v3577_v26 = vmul.f32 0.03125, %v3567_v3 }
0x11d9   :  { %v3581_v12 = vadd.f32 1e-05, %v3577_v26 }
0x11da   :  { %v3570_v14 = vpop.xlane.xlu0 %3569 }
0x11db   :  { %9868 = vrsqrt.f32 %v3581_v12  ;;  %v3578_v10 = vmul.f32 0.03125, %v3570_v14 }
0x11dd   :  { %v3582_v23 = vadd.f32 1e-05, %v3578_v10 }
0x11de   :  { %v3573_v27 = vpop.xlane.xlu1 %3572 }
0x11df   :  { %9870 = vrsqrt.f32 %v3582_v23  ;;  %v3579_v9 = vmul.f32 0.03125, %v3573_v27 }
0x11e1   :  { %v3583_v19 = vadd.f32 1e-05, %v3579_v9 }
0x11e2   :  { %v3576_v0 = vpop.xlane.xlu0 %3575 }
0x11e3   :  { %9872 = vrsqrt.f32 %v3583_v19  ;;  %v3580_v37 = vmul.f32 0.03125, %v3576_v0 }
0x11e5   :  { %v9869_v46 = vpop.eup %9868  ;;  %v3584_v41 = vadd.f32 1e-05, %v3580_v37 }
0x11e6   :  { %v3589_v62 = vmul.f32 %v9869_v46, %v3557_v11  ;;  %v7178_v11 = vld [vmem:[%s13756_s6 + $0x1] ss:$0 sm:$0xff]  ;;  %s13805_s6 = smov 64  }
0x11e7   :  { %9874 = vrsqrt.f32 %v3584_v41 }
0x11e8   :  { %v3599_v53 = vmul.f32 %v7171_v61, %v3589_v62 }
0x11e9   :  { %v9871_v52 = vpop.eup %9870 }
0x11ea   :  { %v3590_v58 = vmul.f32 %v9871_v52, %v3558_v5  ;;  %v11938_v57 = vadd.f32 %v7172_v60, %v3599_v53 }
0x11ec   :  { %v3600_v54 = vmul.f32 %v7171_v61, %v3590_v58  ;;  %8637 = vmatprep.mubr.msk.f32.mxu1 %vm200_vm2, %v11938_v57  ;;  %v12028_v58 = vld [vmem:[%s13804_s2] sm:$0xff] }
0x11ed   :  { %v9873_v25 = vpop.eup %9872 }
0x11ee   :  { %v11942_v55 = vadd.f32 %v7172_v60, %v3600_v54  ;;  %v3591_v20 = vmul.f32 %v9873_v25, %v3559_v47 }
0x11f0   :  { %8638 = vmatmul.mubr.msk.f32.vlgmr.msra.gmra.mrb[84].mxu1 %vm200_vm2, %v11942_v55  ;;  %v3601_v15 = vmul.f32 %v7171_v61, %v3591_v20 }
0x11f1   :  { %v9875_v56 = vpop.eup %9874 }
0x11f2   :  { %v11946_v21 = vadd.f32 %v7172_v60, %v3601_v15  ;;  %v3592_v17 = vmul.f32 %v9875_v56, %v3560_v45 }
0x11f4   :  { %8640 = vmatprep.mubr.msk.f32.mxu1 %vm200_vm2, %v11946_v21  ;;  %v3602_v50 = vmul.f32 %v7171_v61, %v3592_v17 }
0x11f6   :  { %v11950_v32 = vadd.f32 %v7172_v60, %v3602_v50  ;;  %v12022_v60 = vld [vmem:[%s13804_s2 + $0x8] sm:$0xff]  ;;  %v12036_v50 = vld [vmem:[%s13804_s2 + $0x18] sm:$0xff] }
0x11f8   :  { %8641 = vmatmul.mubr.msk.f32.gmra.mrb[86].mxu1 %vm200_vm2, %v11950_v32 }
0x12c3   :  { %v8639_v51 = vpop.f32.mrb[84].mxu1 }
0x12c4   :  { %v11957_v8 = vadd.f32 %v8639_v51, %v7178_v11  ;;  %v3704_v39 = vpop.f32.mrb[85].mxu1 }
0x12c5   :  { %v11959_v5 = vadd.f32 %v7178_v11, %v3704_v39  ;;  %v12043_v39 = vld [vmem:[%s13804_s2 + $0x10] sm:$0xff]  ;;  %s13806_s2 = smov 56  }
0x12c7   :  { %8651 = vmatprep.mubr.msk.f32.mxu0 %vm310_vm3, %v11959_v5  ;;  %v11965_v22 = vpack.i.bf16 %v11957_v8, %v11959_v5 }
0x12c9   :  { %9717 = vrot.lane.b32.xlu1 %v11965_v22, %s9978_s20 }
0x12cb   :  { %v8642_v35 = vpop.f32.mrb[86].mxu1 }
0x12cc   :  { %v11969_v43 = vadd.f32 %v8642_v35, %v7178_v11  ;;  %v3714_v40 = vpop.f32.mrb[87].mxu1 }
0x12cd   :  { %v11971_v47 = vadd.f32 %v7178_v11, %v3714_v40  ;;  %9727 = vrot.lane.b32.xlu1 %v11965_v22, %s9980_s28 }
0x12cf   :  { %v11977_v31 = vpack.i.bf16 %v11969_v43, %v11971_v47 }
0x12d1   :  { %9732 = vrot.lane.b32.xlu1 %v11977_v31, %s9980_s28  ;;  %9722 = vrot.lane.b32.xlu0 %v11977_v31, %s9978_s20 }
0x12d5   :  { %3999 = vrot.lane.b32.xlu1 %v11957_v8, %s9981_s4  ;;  %3997 = vrot.lane.b32.xlu0 %v11959_v5, %s9981_s4 }
0x12d9   :  { %4003 = vrot.lane.b32.xlu1 %v11969_v43, %s9981_s4  ;;  %4001 = vrot.lane.b32.xlu0 %v11971_v47, %s9981_s4 }
0x12dd   :  { %9737 = vrot.lane.b32.xlu1 %v11965_v22, %s13805_s6 }
0x133b   :  { %v9718_v59 = vpop.permute.xlu1 %9717 }
0x133c   :  { %v9720_v48 = vunpack.i.h.bf16 %v9718_v59  ;;  %v9719_v24 = vunpack.i.l.bf16 %v9718_v59 }
0x133e   :  { %v9204_v45 = vpack.c.bf16 %v9720_v48, %v9719_v24 }
0x133f   :  { %v9728_v49 = vpop.permute.xlu1 %9727 }
0x1340   :  { %9206 = vmatprep.subr.msk.bf16.mxu0 %vm10181_vm4, %v9204_v45  ;;  %v9730_v4 = vunpack.i.h.bf16 %v9728_v49  ;;  %v9729_v7 = vunpack.i.l.bf16 %v9728_v49 }
0x1341   :  { %9209 = vmatpush3.bf16.xpose.msk.msra.mxu0 %vm10181_vm4, %v9204_v45 }
0x1342   :  { %v9224_v3 = vpack.c.bf16 %v9730_v4, %v9729_v7 }
0x1343   :  { %v9733_v16 = vpop.permute.xlu1 %9732  ;;  %v9723_v18 = vpop.permute.xlu0 %9722 }
0x1344   :  { %v9725_v6 = vunpack.i.h.bf16 %v9723_v18  ;;  %v9724_v44 = vunpack.i.l.bf16 %v9723_v18  ;;  %v9735_v12 = vunpack.i.h.bf16 %v9733_v16  ;;  %v9734_v14 = vunpack.i.l.bf16 %v9733_v16 }
0x1346   :  { %v9210_v63 = vpack.c.bf16 %v9725_v6, %v9724_v44  ;;  %v9230_v23 = vpack.c.bf16 %v9735_v12, %v9734_v14 }
0x1347   :  { %v4000_v2 = vpop.permute.xlu1 %3999  ;;  %v3998_v0 = vpop.permute.xlu0 %3997 }
0x1348   :  { %9212 = vmatprep.subr.msk.bf16.mxu0 %vm10181_vm4, %v9210_v63 }
0x1349   :  { %9215 = vmatpush3.bf16.xpose.msk.msra.mxu0 %vm10181_vm4, %v9210_v63 }
0x134a   :  { %9226 = vmatprep.subr.msk.bf16.mxu0 %vm10181_vm4, %v9224_v3 }
0x134b   :  { %v4004_v26 = vpop.permute.xlu1 %4003  ;;  %v4002_v37 = vpop.permute.xlu0 %4001 }
0x134f   :  { %v9738_v10 = vpop.permute.xlu1 %9737 }
0x1350   :  { %v9740_v27 = vunpack.i.h.bf16 %v9738_v10  ;;  %v9739_v9 = vunpack.i.l.bf16 %v9738_v10  ;;  %8652 = vmatmul.mubr.msk.f32.vlgmr.msra.gmra.mrb[88].mxu0 %vm310_vm3, %v11957_v8 }
0x1351   :  { %8654 = vmatprep.mubr.msk.f32.mxu0 %vm310_vm3, %v11971_v47  ;;  %9229 = vmatpush3.bf16.xpose.msk.msra.mxu0 %vm10181_vm4, %v9224_v3 }
0x1352   :  { %v9216_v19 = vpack.c.bf16 %v9740_v27, %v9739_v9  ;;  %9232 = vmatprep.subr.msk.bf16.mxu0 %vm10181_vm4, %v9230_v23 }
0x1354   :  { %8655 = vmatmul.mubr.msk.f32.gmra.mrb[90].mxu0 %vm310_vm3, %v11969_v43  ;;  %9217 = vmatprep.subr.bf16.mxu1 %v9216_v19 }
0x1355   :  { %9219 = vmatpush3.bf16.msra.mxu1 %v9216_v19  ;;  %8679 = vmatprep.mubr.msk.f32.mxu0 %vm310_vm3, %v3998_v0 }
0x1359   :  { %9235 = vmatpush3.bf16.xpose.msk.msra.mxu0 %vm10181_vm4, %v9230_v23 }
0x1360   :  { %8680 = vmatmul.mubr.msk.f32.vlgmr.msra.gmra.mrb[92].mxu0 %vm310_vm3, %v4000_v2 }
0x1361   :  { %8682 = vmatprep.mubr.msk.f32.mxu0 %vm310_vm3, %v4002_v37 }
0x1364   :  { %8683 = vmatmul.mubr.msk.f32.gmra.mrb[94].mxu0 %vm310_vm3, %v4004_v26 }
0x1423   :  { %v8653_v46 = vpop.f32.mrb[88].mxu0 }
0x1424   :  { %v3837_v41 = vmul.f32 0.35355338, %v8653_v46  ;;  %v3817_v61 = vpop.f32.mrb[89].mxu0 }
0x1425   :  { %v3836_v62 = vmul.f32 0.35355338, %v3817_v61 }
0x1426   :  { %v3841_v53 = vadd.f32 %v12022_v60, %v3837_v41 }
0x1427   :  { %v8656_v52 = vpop.f32.mrb[90].mxu0  ;;  %v3840_v54 = vadd.f32 %v12028_v58, %v3836_v62 }
0x1428   :  { %v3839_v25 = vmul.f32 0.35355338, %v8656_v52  ;;  %v3827_v20 = vpop.f32.mrb[91].mxu0  ;;  %v3847_v15 = vsel %vm200_vm2, %v3841_v53, -inf }
0x1429   :  { %v3838_v56 = vmul.f32 0.35355338, %v3827_v20  ;;  %3848 = vmax.xlane.f32.xlu1 %v3847_v15  ;;  %v3844_v17 = vsel %vm200_vm2, %v3840_v54, -inf }
0x142a   :  { %3845 = vmax.xlane.f32.xlu0 %v3844_v17  ;;  %v3843_v11 = vadd.f32 %v12036_v50, %v3839_v25 }
0x142b   :  { %v3842_v35 = vadd.f32 %v12043_v39, %v3838_v56 }
0x142c   :  { %v3853_v51 = vsel %vm200_vm2, %v3843_v11, -inf }
0x142d   :  { %v3850_v40 = vsel %vm200_vm2, %v3842_v35, -inf }
0x142e   :  { %3854 = vmax.xlane.f32.xlu0 %v3853_v51 }
0x1432   :  { %3851 = vmax.xlane.f32.xlu0 %v3850_v40 }
0x1433   :  { %v8681_v59 = vpop.f32.mrb[92].mxu0 }
0x1434   :  { %v4115_v48 = vmul.f32 0.35355338, %v8681_v59  ;;  %v4095_v24 = vpop.f32.mrb[93].mxu0 }
0x1435   :  { %v4114_v45 = vmul.f32 0.35355338, %v4095_v24 }
0x1436   :  { %v4119_v49 = vadd.f32 %v12022_v60, %v4115_v48 }
0x1437   :  { %v12049_v16 = vadd.f32 %v12028_v58, %v4114_v45  ;;  %v8684_v18 = vpop.f32.mrb[94].mxu0 }
0x1438   :  { %v4117_v4 = vmul.f32 0.35355338, %v8684_v18  ;;  %v4105_v7 = vpop.f32.mrb[95].mxu0  ;;  %v4125_v6 = vsel %vm200_vm2, %v4119_v49, -inf }
0x1439   :  { %4126 = vmax.xlane.f32.xlu0 %v4125_v6  ;;  %v4122_v44 = vsel %vm200_vm2, %v12049_v16, -inf  ;;  %v4116_v3 = vmul.f32 0.35355338, %v4105_v7 }
0x143a   :  { %4123 = vmax.xlane.f32.xlu1 %v4122_v44  ;;  %v12055_v63 = vadd.f32 %v12036_v50, %v4117_v4 }
0x143b   :  { %v12064_v26 = vadd.f32 %v12043_v39, %v4116_v3 }
0x143c   :  { %v4131_v2 = vsel %vm200_vm2, %v12055_v63, -inf }
0x143d   :  { %4132 = vmax.xlane.f32.xlu0 %v4131_v2  ;;  %v4128_v12 = vsel %vm200_vm2, %v12064_v26, -inf }
0x144b   :  { %9747 = vrot.lane.b32.xlu1 %v11965_v22, %s13806_s2 }
0x1453   :  { %9742 = vrot.lane.b32.xlu0 %v11977_v31, %s13805_s6 }
0x146f   :  { %4129 = vmax.xlane.f32.xlu1 %v4128_v12 }
0x14b6   :  { %v3849_v14 = vpop.xlane.xlu1 %3848 }
0x14b7   :  { %v3857_v10 = vsub.f32 %v3841_v53, %v3849_v14  ;;  %v3846_v23 = vpop.xlane.xlu0 %3845 }
0x14b8   :  { %v3856_v27 = vsub.f32 %v3840_v54, %v3846_v23 }
0x14b9   :  { %v3862_v9 = vmul.f32 1.442695, %v3857_v10 }
0x14ba   :  { %v3860_v19 = vmul.f32 1.442695, %v3856_v27 }
0x14bb   :  { %9876 = vpow2.f32 %v3862_v9  ;;  %v3855_v0 = vpop.xlane.xlu0 %3854 }
0x14bc   :  { %9878 = vpow2.f32 %v3860_v19  ;;  %v3859_v37 = vsub.f32 %v3843_v11, %v3855_v0 }
0x14be   :  { %v3866_v46 = vmul.f32 1.442695, %v3859_v37 }
0x14bf   :  { %v3852_v41 = vpop.xlane.xlu0 %3851 }
0x14c0   :  { %9880 = vpow2.f32 %v3866_v46  ;;  %v3858_v61 = vsub.f32 %v3842_v35, %v3852_v41 }
0x14c2   :  { %v3864_v62 = vmul.f32 1.442695, %v3858_v61 }
0x14c4   :  { %9882 = vpow2.f32 %v3864_v62 }
0x14c5   :  { %v12068_v52 = vpop.eup %9876 }
0x14c6   :  { %v12070_v25 = vpop.eup %9878  ;;  %v4127_v20 = vpop.xlane.xlu0 %4126  ;;  %v3871_v53 = vsel %vm200_vm2, %v12068_v52, 0.0 }
0x14c7   :  { %v4135_v54 = vsub.f32 %v4119_v49, %v4127_v20  ;;  %v4124_v15 = vpop.xlane.xlu1 %4123  ;;  %3872 = vadd.xlane.f32.xlu0 %v3871_v53  ;;  %v3868_v56 = vsel %vm200_vm2, %v12070_v25, 0.0 }
0x14c8   :  { %3869 = vadd.xlane.f32.xlu1 %v3868_v56  ;;  %v4134_v3 = vsub.f32 %v12049_v16, %v4124_v15 }
0x14c9   :  { %v4140_v17 = vmul.f32 1.442695, %v4135_v54 }
0x14ca   :  { %v12076_v11 = vpop.eup %9880  ;;  %v4133_v51 = vpop.xlane.xlu0 %4132  ;;  %v4138_v12 = vmul.f32 1.442695, %v4134_v3 }
0x14cb   :  { %9884 = vpow2.f32 %v4140_v17  ;;  %v9748_v35 = vpop.permute.xlu1 %9747  ;;  %v3877_v40 = vsel %vm200_vm2, %v12076_v11, 0.0  ;;  %v4137_v14 = vsub.f32 %v12055_v63, %v4133_v51 }
0x14cc   :  { %3878 = vadd.xlane.f32.xlu0 %v3877_v40  ;;  %v9750_v48 = vunpack.i.h.bf16 %v9748_v35  ;;  %v9749_v45 = vunpack.i.l.bf16 %v9748_v35  ;;  %9886 = vpow2.f32 %v4138_v12 }
0x14cd   :  { %v4144_v10 = vmul.f32 1.442695, %v4137_v14 }
0x14ce   :  { %v12080_v59 = vpop.eup %9882  ;;  %v9743_v24 = vpop.permute.xlu0 %9742  ;;  %v9236_v6 = vpack.c.bf16 %v9750_v48, %v9749_v45 }
0x14cf   :  { %v9745_v49 = vunpack.i.h.bf16 %v9743_v24  ;;  %v9744_v18 = vunpack.i.l.bf16 %v9743_v24  ;;  %v3874_v4 = vsel %vm200_vm2, %v12080_v59, 0.0  ;;  %9888 = vpow2.f32 %v4144_v10 }
0x14d0   :  { %3875 = vadd.xlane.f32.xlu1 %v3874_v4 }
0x14d1   :  { %v9220_v7 = vpack.c.bf16 %v9745_v49, %v9744_v18 }
0x14d3   :  { %9221 = vmatprep.subr.bf16.mxu1 %v9220_v7 }
0x14d4   :  { %9223 = vmatpush3.bf16.msra.mxu1 %v9220_v7 }
0x14d5   :  { %v12084_v44 = vpop.eup %9884  ;;  %9237 = vmatprep.subr.bf16.mxu1 %v9236_v6 }
0x14d6   :  { %v4149_v2 = vsel %vm200_vm2, %v12084_v44, 0.0  ;;  %v9887_v23 = vpop.eup %9886 }
0x14d7   :  { %4150 = vadd.xlane.f32.xlu0 %v4149_v2  ;;  %v4146_v27 = vsel %vm200_vm2, %v9887_v23, 0.0 }
0x14d9   :  { %v12095_v9 = vpop.eup %9888 }
0x14da   :  { %v4155_v19 = vsel %vm200_vm2, %v12095_v9, 0.0 }
0x14e1   :  { %9757 = vrot.lane.b32.xlu1 %v11965_v22, %s13807_s26 }
0x14ed   :  { %9752 = vrot.lane.b32.xlu0 %v11977_v31, %s13806_s2 }
0x14fc   :  { %v4130_v16 = vpop.xlane.xlu1 %4129 }
0x14fd   :  { %v4136_v63 = vsub.f32 %v12064_v26, %v4130_v16 }
0x14ff   :  { %v4142_v0 = vmul.f32 1.442695, %v4136_v63 }
0x1501   :  { %9890 = vpow2.f32 %v4142_v0 }
0x1505   :  { %4147 = vadd.xlane.f32.xlu1 %v4146_v27 }
0x150b   :  { %v9891_v37 = vpop.eup %9890 }
0x150c   :  { %4156 = vadd.xlane.f32.xlu0 %v4155_v19  ;;  %v4152_v46 = vsel %vm200_vm2, %v9891_v37, 0.0 }
0x1516   :  { %9762 = vrot.lane.b32.xlu1 %v11977_v31, %s13807_s26 }
0x1522   :  { %4275 = vrot.lane.b32.xlu0 %v11959_v5, %s13808_s24 }
0x1526   :  { %4279 = vrot.lane.b32.xlu0 %v11971_v47, %s13808_s24 }
0x153a   :  { %4153 = vadd.xlane.f32.xlu1 %v4152_v46 }
0x154b   :  { %4277 = vrot.lane.b32.xlu1 %v11957_v8, %s13808_s24 }
0x154f   :  { %4281 = vrot.lane.b32.xlu1 %v11969_v43, %s13808_s24 }
0x1554   :  { %v3873_v41 = vpop.xlane.xlu0 %3872 }
0x1555   :  { %9892 = vrcp.f32 %v3873_v41  ;;  %v3870_v61 = vpop.xlane.xlu1 %3869 }
0x1556   :  { %9894 = vrcp.f32 %v3870_v61 }
0x1559   :  { %v3879_v26 = vpop.xlane.xlu0 %3878 }
0x155a   :  { %9896 = vrcp.f32 %v3879_v26 }
0x155d   :  { %v3876_v62 = vpop.xlane.xlu1 %3875 }
0x155e   :  { %9898 = vrcp.f32 %v3876_v62 }
0x155f   :  { %v9893_v20 = vpop.eup %9892 }
0x1560   :  { %v9895_v53 = vpop.eup %9894  ;;  %v3885_v15 = vmul.f32 %v9893_v20, %v12068_v52 }
0x1561   :  { %v3884_v54 = vmul.f32 %v9895_v53, %v12070_v25  ;;  %v9758_v17 = vpop.permute.xlu1 %9757 }
0x1562   :  { %v9760_v40 = vunpack.i.h.bf16 %v9758_v17  ;;  %v9759_v24 = vunpack.i.l.bf16 %v9758_v17 }
0x1563   :  { %8665 = vmatprep.mubr.msk.f32.mxu1 %vm200_vm2, %v3884_v54 }
0x1564   :  { %v4151_v56 = vpop.xlane.xlu0 %4150  ;;  %8666 = vmatmul.mubr.msk.f32.vlgmr.msra.gmra.mrb[88].mxu1 %vm200_vm2, %v3885_v15  ;;  %v9897_v51 = vpop.eup %9896  ;;  %v9244_v52 = vpack.c.bf16 %v9760_v40, %v9759_v24 }
0x1565   :  { %9239 = vmatpush3.bf16.msra.mxu1 %v9236_v6  ;;  %v3887_v25 = vmul.f32 %v9897_v51, %v12076_v11  ;;  %9900 = vrcp.f32 %v4151_v56 }
0x1568   :  { %v9899_v35 = vpop.eup %9898  ;;  %v9753_v48 = vpop.permute.xlu0 %9752 }
0x1569   :  { %v9755_v45 = vunpack.i.h.bf16 %v9753_v48  ;;  %v9754_v49 = vunpack.i.l.bf16 %v9753_v48  ;;  %v3886_v18 = vmul.f32 %v9899_v35, %v12080_v59 }
0x156b   :  { %v9240_v4 = vpack.c.bf16 %v9755_v45, %v9754_v49  ;;  %8668 = vmatprep.mubr.msk.f32.mxu1 %vm200_vm2, %v3886_v18 }
0x156c   :  { %8669 = vmatmul.mubr.msk.f32.gmra.mrb[90].mxu1 %vm200_vm2, %v3887_v25 }
0x156d   :  { %9241 = vmatprep.subr.bf16.mxu1 %v9240_v4 }
0x156e   :  { %9243 = vmatpush3.bf16.msra.mxu1 %v9240_v4 }
0x156f   :  { %9246 = vmatprep.subr.msk.bf16.mxu1 %vm10181_vm4, %v9244_v52  ;;  %v9901_v2 = vpop.eup %9900 }
0x1570   :  { %v4163_v14 = vmul.f32 %v9901_v2, %v12084_v44 }
0x1592   :  { %v4148_v7 = vpop.xlane.xlu1 %4147 }
0x1593   :  { %9902 = vrcp.f32 %v4148_v7 }
0x1596   :  { %v9763_v6 = vpop.permute.xlu1 %9762 }
0x1597   :  { %v9765_v59 = vunpack.i.h.bf16 %v9763_v6  ;;  %v9764_v12 = vunpack.i.l.bf16 %v9763_v6 }
0x1599   :  { %v9250_v10 = vpack.c.bf16 %v9765_v59, %v9764_v12  ;;  %v4157_v27 = vpop.xlane.xlu0 %4156 }
0x159a   :  { %9904 = vrcp.f32 %v4157_v27 }
0x159d   :  { %v9903_v3 = vpop.eup %9902  ;;  %v4276_v63 = vpop.permute.xlu0 %4275 }
0x159e   :  { %v4162_v11 = vmul.f32 %v9903_v3, %v9887_v23 }
0x15a0   :  { %8693 = vmatprep.mubr.msk.f32.mxu1 %vm200_vm2, %v4162_v11 }
0x15a1   :  { %8694 = vmatmul.mubr.msk.f32.vlgmr.msra.gmra.mrb[92].mxu1 %vm200_vm2, %v4163_v14  ;;  %v4280_v41 = vpop.permute.xlu0 %4279 }
0x15a2   :  { %9249 = vmatpush3.bf16.xpose.msk.msra.mxu1 %vm10181_vm4, %v9244_v52 }
0x15a3   :  { %9252 = vmatprep.subr.msk.bf16.mxu1 %vm10181_vm4, %v9250_v10 }
0x15a4   :  { %v9905_v23 = vpop.eup %9904 }
0x15a5   :  { %v4165_v0 = vmul.f32 %v9905_v23, %v12095_v9 }
0x15aa   :  { %9255 = vmatpush3.bf16.xpose.msk.msra.mxu1 %vm10181_vm4, %v9250_v10 }
0x15c7   :  { %v4154_v19 = vpop.xlane.xlu1 %4153 }
0x15c8   :  { %9906 = vrcp.f32 %v4154_v19 }
0x15cb   :  { %v4278_v46 = vpop.permute.xlu1 %4277 }
0x15cf   :  { %v4282_v61 = vpop.permute.xlu1 %4281 }
0x15d2   :  { %v9907_v44 = vpop.eup %9906 }
0x15d3   :  { %v4164_v16 = vmul.f32 %v9907_v44, %v9891_v37 }
0x15d5   :  { %8696 = vmatprep.mubr.msk.f32.mxu1 %vm200_vm2, %v4164_v16 }
0x15d6   :  { %8697 = vmatmul.mubr.msk.f32.gmra.mrb[94].mxu1 %vm200_vm2, %v4165_v0 }
0x15d7   :  { %8707 = vmatprep.mubr.msk.f32.mxu1 %vm310_vm3, %v4276_v63 }
0x15da   :  { %8708 = vmatmul.mubr.msk.f32.vlgmr.msra.gmra.mrb[96].mxu1 %vm310_vm3, %v4278_v46 }
0x15db   :  { %8710 = vmatprep.mubr.msk.f32.mxu1 %vm310_vm3, %v4280_v41 }
0x15de   :  { %8711 = vmatmul.mubr.msk.f32.gmra.mrb[98].mxu1 %vm310_vm3, %v4282_v61 }
0x1637   :  { %v12137_v26 = vpop.f32.mrb[88].mxu1 }
0x1638   :  { %v12139_v37 = vpop.f32.mrb[89].mxu1 }
0x163f   :  { %v12141_v9 = vpop.f32.mrb[90].mxu1 }
0x1640   :  { %v12143_v62 = vpop.f32.mrb[91].mxu1 }
0x1674   :  { %v12145_v20 = vpop.f32.mrb[92].mxu1 }
0x1675   :  { %v12147_v53 = vpop.f32.mrb[93].mxu1 }
0x16a9   :  { %v12149_v54 = vpop.f32.mrb[94].mxu1 }
0x16aa   :  { %v12151_v15 = vpop.f32.mrb[95].mxu1 }
0x16ad   :  { %v8709_v56 = vpop.f32.mrb[96].mxu1 }
0x16ae   :  { %v4393_v17 = vmul.f32 0.35355338, %v8709_v56  ;;  %v4373_v51 = vpop.f32.mrb[97].mxu1 }
0x16af   :  { %v4392_v35 = vmul.f32 0.35355338, %v4373_v51 }
0x16b0   :  { %v4397_v40 = vadd.f32 %v12022_v60, %v4393_v17 }
0x16b1   :  { %v4396_v48 = vadd.f32 %v12028_v58, %v4392_v35  ;;  %v8712_v24 = vpop.f32.mrb[98].mxu1 }
0x16b2   :  { %v4383_v45 = vpop.f32.mrb[99].mxu1  ;;  %v4403_v49 = vsel %vm200_vm2, %v4397_v40, -inf  ;;  %v4395_v18 = vmul.f32 0.35355338, %v8712_v24 }
0x16b3   :  { %v4394_v25 = vmul.f32 0.35355338, %v4383_v45  ;;  %4404 = vmax.xlane.f32.xlu1 %v4403_v49  ;;  %v4400_v4 = vsel %vm200_vm2, %v4396_v48, -inf }
0x16b4   :  { %4401 = vmax.xlane.f32.xlu0 %v4400_v4  ;;  %v4399_v7 = vadd.f32 %v12036_v50, %v4395_v18 }
0x16b5   :  { %v4398_v52 = vadd.f32 %v12043_v39, %v4394_v25 }
0x16b6   :  { %v4409_v2 = vsel %vm200_vm2, %v4399_v7, -inf }
0x16b7   :  { %v4406_v6 = vsel %vm200_vm2, %v4398_v52, -inf }
0x16b8   :  { %4407 = vmax.xlane.f32.xlu0 %v4406_v6 }
0x16bc   :  { %4410 = vmax.xlane.f32.xlu0 %v4409_v2 }
0x16c4   :  { %9767 = vrot.lane.b32.xlu1 %v11965_v22, %s13809_s5 }
0x16c8   :  { %9777 = vrot.lane.b32.xlu1 %v11965_v22, %s13810_s25 }
0x1740   :  { %v4405_v3 = vpop.xlane.xlu1 %4404 }
0x1741   :  { %v4413_v59 = vsub.f32 %v4397_v40, %v4405_v3  ;;  %v4402_v12 = vpop.xlane.xlu0 %4401 }
0x1742   :  { %v4412_v11 = vsub.f32 %v4396_v48, %v4402_v12 }
0x1743   :  { %v4418_v14 = vmul.f32 1.442695, %v4413_v59 }
0x1744   :  { %v4416_v10 = vmul.f32 1.442695, %v4412_v11  ;;  %v9768_v27 = vpop.permute.xlu1 %9767 }
0x1745   :  { %9908 = vpow2.f32 %v4418_v14  ;;  %v9770_v19 = vunpack.i.h.bf16 %v9768_v27  ;;  %v9769_v23 = vunpack.i.l.bf16 %v9768_v27  ;;  %v4408_v41 = vpop.xlane.xlu0 %4407 }
0x1746   :  { %9910 = vpow2.f32 %v4416_v10  ;;  %v4414_v17 = vsub.f32 %v4398_v52, %v4408_v41 }
0x1747   :  { %v9256_v44 = vpack.c.bf16 %v9770_v19, %v9769_v23 }
0x1748   :  { %v4420_v35 = vmul.f32 1.442695, %v4414_v17  ;;  %v9778_v49 = vpop.permute.xlu1 %9777 }
0x1749   :  { %9257 = vmatprep.subr.bf16.mxu0 %v9256_v44  ;;  %v4411_v61 = vpop.xlane.xlu0 %4410  ;;  %v9780_v52 = vunpack.i.h.bf16 %v9778_v49 }
0x174a   :  { %9259 = vmatpush3.bf16.msra.mxu0 %v9256_v44  ;;  %v4415_v56 = vsub.f32 %v4399_v7, %v4411_v61  ;;  %v9779_v7 = vunpack.i.l.bf16 %v9778_v49 }
0x174c   :  { %v4422_v51 = vmul.f32 1.442695, %v4415_v56  ;;  %v9264_v3 = vpack.c.bf16 %v9780_v52, %v9779_v7 }
0x174e   :  { %9912 = vpow2.f32 %v4422_v51 }
0x174f   :  { %v9909_v16 = vpop.eup %9908  ;;  %9914 = vpow2.f32 %v4420_v35 }
0x1750   :  { %v9911_v63 = vpop.eup %9910  ;;  %v4427_v0 = vsel %vm200_vm2, %v9909_v16, 0.0 }
0x1751   :  { %4428 = vadd.xlane.f32.xlu0 %v4427_v0  ;;  %v4424_v46 = vsel %vm200_vm2, %v9911_v63, 0.0 }
0x1752   :  { %4425 = vadd.xlane.f32.xlu1 %v4424_v46 }
0x1758   :  { %v9913_v40 = vpop.eup %9912 }
0x1759   :  { %v9915_v48 = vpop.eup %9914  ;;  %v4433_v24 = vsel %vm200_vm2, %v9913_v40, 0.0 }
0x175a   :  { %v4430_v45 = vsel %vm200_vm2, %v9915_v48, 0.0 }
0x1763   :  { %9782 = vrot.lane.b32.xlu1 %v11977_v31, %s13810_s25 }
0x1767   :  { %9772 = vrot.lane.b32.xlu0 %v11977_v31, %s13809_s5 }
0x1786   :  { %4434 = vadd.xlane.f32.xlu0 %v4433_v24 }
0x1787   :  { %4431 = vadd.xlane.f32.xlu1 %v4430_v45 }
0x1798   :  { %4555 = vrot.lane.b32.xlu1 %v11957_v8, %s13811_s29 }
0x179c   :  { %4559 = vrot.lane.b32.xlu1 %v11969_v43, %s13811_s29  ;;  %4553 = vrot.lane.b32.xlu0 %v11959_v5, %s13811_s29 }
0x17a0   :  { %4557 = vrot.lane.b32.xlu0 %v11971_v47, %s13811_s29 }
0x17de   :  { %v4429_v18 = vpop.xlane.xlu0 %4428 }
0x17df   :  { %9916 = vrcp.f32 %v4429_v18  ;;  %v4426_v25 = vpop.xlane.xlu1 %4425 }
0x17e0   :  { %9918 = vrcp.f32 %v4426_v25 }
0x17e2   :  { %v9773_v4 = vpop.permute.xlu0 %9772 }
0x17e3   :  { %v9775_v6 = vunpack.i.h.bf16 %v9773_v4  ;;  %v9774_v2 = vunpack.i.l.bf16 %v9773_v4  ;;  %v9783_v59 = vpop.permute.xlu1 %9782 }
0x17e4   :  { %v9785_v11 = vunpack.i.h.bf16 %v9783_v59  ;;  %v9784_v14 = vunpack.i.l.bf16 %v9783_v59 }
0x17e5   :  { %v9260_v8 = vpack.c.bf16 %v9775_v6, %v9774_v2 }
0x17e6   :  { %v9270_v10 = vpack.c.bf16 %v9785_v11, %v9784_v14 }
0x17e7   :  { %9261 = vmatprep.subr.bf16.mxu0 %v9260_v8 }
0x17e8   :  { %9263 = vmatpush3.bf16.msra.mxu0 %v9260_v8 }
0x17e9   :  { %v9917_v43 = vpop.eup %9916  ;;  %9266 = vmatprep.subr.msk.bf16.mxu0 %vm10181_vm4, %v9264_v3 }
0x17ea   :  { %v9919_v5 = vpop.eup %9918  ;;  %v4441_v12 = vmul.f32 %v9917_v43, %v9909_v16 }
0x17eb   :  { %v4440_v47 = vmul.f32 %v9919_v5, %v9911_v63 }
0x17ed   :  { %8721 = vmatprep.mubr.msk.f32.mxu0 %vm200_vm2, %v4440_v47 }
0x17ee   :  { %8722 = vmatmul.mubr.msk.f32.vlgmr.msra.gmra.mrb[96].mxu0 %vm200_vm2, %v4441_v12 }
0x17f1   :  { %9269 = vmatpush3.bf16.xpose.msk.msra.mxu0 %vm10181_vm4, %v9264_v3 }
0x17f2   :  { %9272 = vmatprep.subr.msk.bf16.mxu0 %vm10181_vm4, %v9270_v10 }
0x17f9   :  { %9275 = vmatpush3.bf16.xpose.msk.msra.mxu0 %vm10181_vm4, %v9270_v10 }
0x1813   :  { %v4435_v27 = vpop.xlane.xlu0 %4434 }
0x1814   :  { %9920 = vrcp.f32 %v4435_v27  ;;  %v4432_v19 = vpop.xlane.xlu1 %4431 }
0x1815   :  { %9922 = vrcp.f32 %v4432_v19 }
0x1817   :  { %v4554_v63 = vpop.permute.xlu0 %4553 }
0x1818   :  { %v4556_v46 = vpop.permute.xlu1 %4555 }
0x181b   :  { %v4558_v41 = vpop.permute.xlu0 %4557 }
0x181c   :  { %v4560_v42 = vpop.permute.xlu1 %4559 }
0x181e   :  { %v9921_v23 = vpop.eup %9920 }
0x181f   :  { %v9923_v44 = vpop.eup %9922  ;;  %v4443_v0 = vmul.f32 %v9921_v23, %v9913_v40 }
0x1820   :  { %v4442_v16 = vmul.f32 %v9923_v44, %v9915_v48 }
0x1822   :  { %8724 = vmatprep.mubr.msk.f32.mxu0 %vm200_vm2, %v4442_v16 }
0x1823   :  { %8725 = vmatmul.mubr.msk.f32.gmra.mrb[98].mxu0 %vm200_vm2, %v4443_v0 }
0x1824   :  { %8735 = vmatprep.mubr.msk.f32.mxu0 %vm310_vm3, %v4554_v63 }
0x1827   :  { %8736 = vmatmul.mubr.msk.f32.vlgmr.msra.gmra.mrb[100].mxu0 %vm310_vm3, %v4556_v46 }
0x1828   :  { %8738 = vmatprep.mubr.msk.f32.mxu0 %vm310_vm3, %v4558_v41 }
0x182b   :  { %8739 = vmatmul.mubr.msk.f32.gmra.mrb[102].mxu0 %vm310_vm3, %v4560_v42 }
0x182c   :  { %5307 = vmatprep.mubr.f32.mxu0 %v9992_v30 }
0x18c1   :  { %v8723_v61 = vpop.f32.mrb[96].mxu0 }
0x18c2   :  { %v4534_v56 = vpop.f32.mrb[97].mxu0 }
0x18f6   :  { %v12198_v17 = vpop.f32.mrb[98].mxu0 }
0x18f7   :  { %v12200_v51 = vpop.f32.mrb[99].mxu0 }
0x18fa   :  { %v8737_v35 = vpop.f32.mrb[100].mxu0 }
0x18fb   :  { %v4671_v40 = vmul.f32 0.35355338, %v8737_v35  ;;  %v4651_v48 = vpop.f32.mrb[101].mxu0 }
0x18fc   :  { %v4670_v24 = vmul.f32 0.35355338, %v4651_v48 }
0x18fd   :  { %v4675_v45 = vadd.f32 %v12022_v60, %v4671_v40 }
0x18fe   :  { %v4674_v49 = vadd.f32 %v12028_v58, %v4670_v24  ;;  %v8740_v18 = vpop.f32.mrb[102].mxu0 }
0x18ff   :  { %v4661_v25 = vpop.f32.mrb[103].mxu0  ;;  %v4681_v4 = vsel %vm200_vm2, %v4675_v45, -inf  ;;  %v4673_v52 = vmul.f32 0.35355338, %v8740_v18 }
0x1900   :  { %v4672_v7 = vmul.f32 0.35355338, %v4661_v25  ;;  %4682 = vmax.xlane.f32.xlu1 %v4681_v4  ;;  %v4678_v6 = vsel %vm200_vm2, %v4674_v49, -inf }
0x1901   :  { %4679 = vmax.xlane.f32.xlu0 %v4678_v6  ;;  %v4677_v8 = vadd.f32 %v12036_v50, %v4673_v52 }
0x1902   :  { %v4676_v2 = vadd.f32 %v12043_v39, %v4672_v7 }
0x1903   :  { %v4687_v60 = vsel %vm200_vm2, %v4677_v8, -inf }
0x1904   :  { %v4684_v3 = vsel %vm200_vm2, %v4676_v2, -inf }
0x1905   :  { %4685 = vmax.xlane.f32.xlu0 %v4684_v3  ;;  %v7232_v3 = vld [vmem:[%s13757_s7 + $0x28] sm:$0xff] }
0x1909   :  { %4688 = vmax.xlane.f32.xlu0 %v4687_v60  ;;  %v7233_v60 = vld [vmem:[%s13757_s7 + $0x30] sm:$0xff] }
0x198d   :  { %v4683_v58 = vpop.xlane.xlu1 %4682 }
0x198e   :  { %v4691_v43 = vsub.f32 %v4675_v45, %v4683_v58  ;;  %v4680_v59 = vpop.xlane.xlu0 %4679 }
0x198f   :  { %v4690_v5 = vsub.f32 %v4674_v49, %v4680_v59 }
0x1990   :  { %v4696_v47 = vmul.f32 1.442695, %v4691_v43  ;;  %v7234_v43 = vld [vmem:[%s13757_s7 + $0x38] sm:$0xff] }
0x1991   :  { %v4694_v12 = vmul.f32 1.442695, %v4690_v5  ;;  %v9288_v59 = vpack.c.bf16 %v7234_v43, %v7233_v60 }
0x1992   :  { %9924 = vpow2.f32 %v4696_v47  ;;  %v4686_v10 = vpop.xlane.xlu0 %4685 }
0x1993   :  { %9926 = vpow2.f32 %v4694_v12  ;;  %v4692_v23 = vsub.f32 %v4676_v2, %v4686_v10 }
0x1995   :  { %v4698_v16 = vmul.f32 1.442695, %v4692_v23 }
0x1996   :  { %v4689_v27 = vpop.xlane.xlu0 %4688 }
0x1997   :  { %v4693_v19 = vsub.f32 %v4677_v8, %v4689_v27  ;;  %v7231_v8 = vld [vmem:[%s13757_s7 + $0x20] sm:$0xff] }
0x1998   :  { %v9284_v58 = vpack.c.bf16 %v7232_v3, %v7231_v8 }
0x1999   :  { %v4700_v44 = vmul.f32 1.442695, %v4693_v19 }
0x199b   :  { %9928 = vpow2.f32 %v4700_v44 }
0x199c   :  { %v9925_v11 = vpop.eup %9924  ;;  %9930 = vpow2.f32 %v4698_v16 }
0x199d   :  { %v9927_v14 = vpop.eup %9926  ;;  %v4705_v39 = vsel %vm200_vm2, %v9925_v11, 0.0 }
0x199e   :  { %4706 = vadd.xlane.f32.xlu0 %v4705_v39  ;;  %v4702_v50 = vsel %vm200_vm2, %v9927_v14, 0.0 }
0x199f   :  { %4703 = vadd.xlane.f32.xlu1 %v4702_v50 }
0x19a5   :  { %v9929_v63 = vpop.eup %9928 }
0x19a6   :  { %v9931_v0 = vpop.eup %9930  ;;  %v4711_v46 = vsel %vm200_vm2, %v9929_v63, 0.0 }
0x19a7   :  { %v4708_v41 = vsel %vm200_vm2, %v9931_v0, 0.0 }
0x19b0   :  { %9787 = vrot.lane.b32.xlu1 %v11965_v22, %s13812_s3 }
0x19b4   :  { %9792 = vrot.lane.b32.xlu0 %v11977_v31, %s13812_s3 }
0x19d3   :  { %4712 = vadd.xlane.f32.xlu0 %v4711_v46 }
0x19d4   :  { %4709 = vadd.xlane.f32.xlu1 %v4708_v41 }
0x19e5   :  { %4835 = vrot.lane.b32.xlu1 %v12147_v53, %s13813_s0 }
0x19e9   :  { %4851 = vrot.lane.b32.xlu1 %v4534_v56, %s13814_s27  ;;  %4837 = vrot.lane.b32.xlu0 %v12145_v20, %s13813_s0 }
0x19ed   :  { %4853 = vrot.lane.b32.xlu1 %v8723_v61, %s13814_s27 }
0x1a2b   :  { %v4707_v22 = vpop.xlane.xlu0 %4706 }
0x1a2c   :  { %v4704_v31 = vpop.xlane.xlu1 %4703 }
0x1a2d   :  { %9932 = vrcp.f32 %v4704_v31 }
0x1a2e   :  { %9934 = vrcp.f32 %v4707_v22 }
0x1a2f   :  { %v9793_v42 = vpop.permute.xlu0 %9792 }
0x1a30   :  { %v9788_v35 = vpop.permute.xlu1 %9787  ;;  %v9795_v40 = vunpack.i.h.bf16 %v9793_v42  ;;  %v9794_v48 = vunpack.i.l.bf16 %v9793_v42 }
0x1a31   :  { %v9790_v24 = vunpack.i.h.bf16 %v9788_v35  ;;  %v9789_v45 = vunpack.i.l.bf16 %v9788_v35 }
0x1a32   :  { %v9280_v18 = vpack.c.bf16 %v9795_v40, %v9794_v48 }
0x1a33   :  { %v9276_v49 = vpack.c.bf16 %v9790_v24, %v9789_v45 }
0x1a35   :  { %9277 = vmatprep.subr.bf16.mxu1 %v9276_v49 }
0x1a36   :  { %9279 = vmatpush3.bf16.msra.mxu1 %v9276_v49 }
0x1a37   :  { %v9933_v53 = vpop.eup %9932  ;;  %9281 = vmatprep.subr.bf16.mxu1 %v9280_v18 }
0x1a38   :  { %v9935_v56 = vpop.eup %9934  ;;  %v4718_v20 = vmul.f32 %v9933_v53, %v9927_v14 }
0x1a39   :  { %v4719_v61 = vmul.f32 %v9935_v56, %v9925_v11 }
0x1a3a   :  { %9283 = vmatpush3.bf16.msra.mxu1 %v9280_v18  ;;  %8749 = vmatprep.mubr.msk.f32.mxu1 %vm200_vm2, %v4718_v20 }
0x1a3b   :  { %9285 = vmatprep.subr.bf16.mxu1 %v9284_v58 }
0x1a3d   :  { %8750 = vmatmul.mubr.msk.f32.vlgmr.msra.gmra.mrb[100].mxu1 %vm200_vm2, %v4719_v61 }
0x1a3e   :  { %9287 = vmatpush3.bf16.msra.mxu1 %v9284_v58 }
0x1a3f   :  { %9289 = vmatprep.subr.bf16.mxu1 %v9288_v59 }
0x1a42   :  { %9291 = vmatpush3.bf16.msra.mxu1 %v9288_v59 }
0x1a60   :  { %v4713_v25 = vpop.xlane.xlu0 %4712 }
0x1a61   :  { %9936 = vrcp.f32 %v4713_v25  ;;  %v4710_v4 = vpop.xlane.xlu1 %4709 }
0x1a62   :  { %9938 = vrcp.f32 %v4710_v4 }
0x1a64   :  { %v4838_v10 = vpop.permute.xlu0 %4837 }
0x1a65   :  { %v4836_v14 = vpop.permute.xlu1 %4835 }
0x1a69   :  { %v4852_v39 = vpop.permute.xlu1 %4851 }
0x1a6b   :  { %v9937_v52 = vpop.eup %9936 }
0x1a6c   :  { %v9939_v7 = vpop.eup %9938  ;;  %v4721_v2 = vmul.f32 %v9937_v52, %v9929_v63 }
0x1a6d   :  { %v4720_v6 = vmul.f32 %v9939_v7, %v9931_v0  ;;  %v4854_v50 = vpop.permute.xlu1 %4853 }
0x1a6f   :  { %8752 = vmatprep.mubr.msk.f32.mxu1 %vm200_vm2, %v4720_v6 }
0x1a70   :  { %8753 = vmatmul.mubr.msk.f32.gmra.mrb[102].mxu1 %vm200_vm2, %v4721_v2 }
0x1b10   :  { %v8751_v5 = vpop.f32.mrb[100].mxu1 }
0x1b11   :  { %4869 = vrot.lane.b32.xlu1 %v8751_v5, %s13815_s22  ;;  %v4812_v47 = vpop.f32.mrb[101].mxu1  ;;  %v7246_v5 = vld [vmem:[%s13761_s11 + $0x208] sm:$0xff] }
0x1b12   :  { %4867 = vrot.lane.b32.xlu0 %v4812_v47, %s13815_s22  ;;  %v7262_v47 = vld [vmem:[%s13761_s11 + $0x288] sm:$0xff] }
0x1b15   :  { %4841 = vrot.lane.b32.xlu1 %v12149_v54, %s13813_s0  ;;  %v4879_v54 = vsel %vm310_vm3, %v12139_v37, %v4836_v14  ;;  %v7264_v14 = vld [vmem:[%s13761_s11 + $0x298] sm:$0xff] }
0x1b16   :  { %4839 = vrot.lane.b32.xlu0 %v12151_v15, %s13813_s0  ;;  %v4883_v27 = vsel %vm1459_vm5, %v4879_v54, %v4852_v39  ;;  %v7245_v39 = vld [vmem:[%s13761_s11 + $0x200] sm:$0xff] }
0x1b19   :  { %4857 = vrot.lane.b32.xlu1 %v12198_v17, %s13814_s27  ;;  %v4880_v17 = vsel %vm310_vm3, %v12137_v26, %v4838_v10 }
0x1b1a   :  { %4855 = vrot.lane.b32.xlu0 %v12200_v51, %s13814_s27  ;;  %v4884_v19 = vsel %vm1459_vm5, %v4880_v17, %v4854_v50  ;;  %v7261_v50 = vld [vmem:[%s13761_s11 + $0x280] sm:$0xff]  ;;  %v7263_v17 = vld [vmem:[%s13761_s11 + $0x290] sm:$0xff] }
0x1b1b   :  { %v9294_v54 = vpack.c.bf16 %v7261_v50, %v7245_v39  ;;  %v7300_v39 = vld [vmem:[%s13761_s11 + $0x3b8] sm:$0xff] }
0x1b43   :  { %v8754_v12 = vpop.f32.mrb[102].mxu1 }
0x1b44   :  { %4873 = vrot.lane.b32.xlu1 %v8754_v12, %s13815_s22  ;;  %v4822_v11 = vpop.f32.mrb[103].mxu1  ;;  %v7248_v12 = vld [vmem:[%s13761_s11 + $0x218] sm:$0xff] }
0x1b45   :  { %4871 = vrot.lane.b32.xlu0 %v4822_v11, %s13815_s22  ;;  %v9292_v11 = vpack.c.bf16 %v7262_v47, %v7246_v5  ;;  %v9300_v10 = vpack.c.bf16 %v7264_v14, %v7248_v12  ;;  %v7265_v5 = vld [vmem:[%s13761_s11 + $0x2a0] sm:$0xff]  ;;  %v7251_v47 = vld [vmem:[%s13761_s11 + $0x230] sm:$0xff]  ;;  %v7284_v14 = vld [vmem:[%s13761_s11 + $0x338] sm:$0xff] }
0x1b46   :  { %v7267_v12 = vld [vmem:[%s13761_s11 + $0x2b0] sm:$0xff] }
0x1b47   :  { %9293 = vmatprep.subr.bf16.mxu0 %v9292_v11  ;;  %9301 = vmatprep.subr.bf16.mxu1 %v9300_v10  ;;  %v7298_v11 = vld [vmem:[%s13761_s11 + $0x3a8] sm:$0xff] }
0x1b48   :  { %9295 = vmatpush1.bf16.msra.mxu0 %v9294_v54 }
0x1b83   :  { %v4870_v15 = vpop.permute.xlu1 %4869 }
0x1b84   :  { %v4868_v51 = vpop.permute.xlu0 %4867  ;;  %v4888_v44 = vsel %vm1464_vm6, %v4884_v19, %v4870_v15  ;;  %v7247_v15 = vld [vmem:[%s13761_s11 + $0x210] sm:$0xff]  ;;  %v7294_v19 = vld [vmem:[%s13761_s11 + $0x388] sm:$0xff] }
0x1b85   :  { %v4887_v23 = vsel %vm1464_vm6, %v4883_v27, %v4868_v51  ;;  %v9302_v27 = vpack.c.bf16 %v7263_v17, %v7247_v15  ;;  %v7278_v51 = vld [vmem:[%s13761_s11 + $0x308] sm:$0xff]  ;;  %v9318_v15 = vpack.c.bf16 %v7267_v12, %v7251_v47  ;;  %v7281_v17 = vld [vmem:[%s13761_s11 + $0x320] sm:$0xff]  ;;  %v7303_v47 = vld [vmem:[%s13761_s11 + $0x3d0] sm:$0xff] }
0x1b86   :  { %8763 = vmatprep.mubr.msk.f32.mxu1 %vm200_vm2, %v4887_v23  ;;  %v7280_v23 = vld [vmem:[%s13761_s11 + $0x318] sm:$0xff]  ;;  %v7258_v12 = vld [vmem:[%s13761_s11 + $0x268] sm:$0xff] }
0x1b87   :  { %8764 = vmatmul.mubr.msk.f32.vlgmr.msra.gmra.mrb[104].mxu1 %vm200_vm2, %v4888_v44  ;;  %v4842_v16 = vpop.permute.xlu1 %4841  ;;  %v9296_v44 = vpack.c.bf16 %v7294_v19, %v7278_v51  ;;  %v9320_v19 = vpack.c.bf16 %v7300_v39, %v7284_v14 }
0x1b88   :  { %v4840_v63 = vpop.permute.xlu0 %4839  ;;  %v4882_v41 = vsel %vm310_vm3, %v12141_v9, %v4842_v16  ;;  %9303 = vmatpush1.bf16.msra.mxu1 %v9302_v27  ;;  %v7296_v16 = vld [vmem:[%s13761_s11 + $0x398] sm:$0xff]  ;;  %v7297_v27 = vld [vmem:[%s13761_s11 + $0x3a0] sm:$0xff] }
0x1b89   :  { %v4881_v26 = vsel %vm310_vm3, %v12143_v62, %v4840_v63  ;;  %v7236_v62 = vld [vmem:[%s13758_s8 + $0x1] ss:$0 sm:$0xff]  ;;  %9297 = vmatprep.subr.bf16.mxu0 %v9296_v44  ;;  %v7299_v44 = vld [vmem:[%s13761_s11 + $0x3b0] sm:$0xff] }
0x1b8a   :  { %v7277_v63 = vld [vmem:[%s13761_s11 + $0x300] sm:$0xff] }
0x1b8b   :  { %v4858_v37 = vpop.permute.xlu1 %4857 }
0x1b8c   :  { %v4856_v0 = vpop.permute.xlu0 %4855  ;;  %v4886_v42 = vsel %vm1459_vm5, %v4882_v41, %v4858_v37  ;;  %v7293_v37 = vld [vmem:[%s13761_s11 + $0x380] sm:$0xff]  ;;  %v7295_v41 = vld [vmem:[%s13761_s11 + $0x390] sm:$0xff] }
0x1b8d   :  { %v4885_v22 = vsel %vm1459_vm5, %v4881_v26, %v4856_v0  ;;  %v9304_v0 = vpack.c.bf16 %v7296_v16, %v7280_v23  ;;  %v9298_v26 = vpack.c.bf16 %v7293_v37, %v7277_v63  ;;  %v7283_v23 = vld [vmem:[%s13761_s11 + $0x330] sm:$0xff]  ;;  %v7254_v16 = vld [vmem:[%s13761_s11 + $0x248] sm:$0xff]  ;;  %v7256_v37 = vld [vmem:[%s13761_s11 + $0x258] sm:$0xff] }
0x1b8e   :  { %v7270_v63 = vld [vmem:[%s13761_s11 + $0x2c8] sm:$0xff] }
0x1b8f   :  { %9305 = vmatprep.subr.bf16.mxu1 %v9304_v0  ;;  %9299 = vmatpush1.bf16.msra.mxu0 %v9298_v26  ;;  %v7272_v0 = vld [vmem:[%s13761_s11 + $0x2d8] sm:$0xff] }
0x1bb6   :  { %v4874_v46 = vpop.permute.xlu1 %4873 }
0x1bb7   :  { %v4872_v31 = vpop.permute.xlu0 %4871  ;;  %v4890_v40 = vsel %vm1464_vm6, %v4886_v42, %v4874_v46  ;;  %v7279_v46 = vld [vmem:[%s13761_s11 + $0x310] sm:$0xff] }
0x1bb8   :  { %v4889_v35 = vsel %vm1464_vm6, %v4885_v22, %v4872_v31  ;;  %v9306_v22 = vpack.c.bf16 %v7295_v41, %v7279_v46  ;;  %v9314_v46 = vpack.c.bf16 %v7297_v27, %v7281_v17  ;;  %v9322_v41 = vpack.c.bf16 %v7299_v44, %v7283_v23  ;;  %v7273_v17 = vld [vmem:[%s13761_s11 + $0x2e0] sm:$0xff]  ;;  %v7259_v27 = vld [vmem:[%s13761_s11 + $0x270] sm:$0xff]  ;;  %v7306_v23 = vld [vmem:[%s13761_s11 + $0x3e8] sm:$0xff] }
0x1bb9   :  { %8766 = vmatprep.mubr.msk.f32.mxu1 %vm200_vm2, %v4889_v35  ;;  %v7292_v44 = vld [vmem:[%s13761_s11 + $0x378] sm:$0xff] }
0x1bba   :  { %8767 = vmatmul.mubr.msk.f32.gmra.mrb[106].mxu1 %vm200_vm2, %v4890_v40 }
0x1bbb   :  { %5396 = vmatprep.mubr.f32.mxu1 %v9992_v30  ;;  %9307 = vmatpush1.bf16.msra.mxu1 %v9306_v22  ;;  %v9324_v22 = vpack.c.bf16 %v7270_v63, %v7254_v16  ;;  %v7308_v16 = vld [vmem:[%s13761_s11 + $0x3f8] sm:$0xff] }
0x1c5a   :  { %v8765_v9 = vpop.f32.mrb[104].mxu1 }
0x1c5b   :  { %v4988_v48 = vadd.f32 %v8765_v9, %v7236_v62  ;;  %v4982_v24 = vpop.f32.mrb[105].mxu1 }
0x1c5c   :  { %v4983_v45 = vadd.f32 %v7236_v62, %v4982_v24 }
0x1c5d   :  { %v5002_v49 = vadd.f32 %v4988_v48, %v11942_v55 }
0x1c5e   :  { %v5001_v18 = vadd.f32 %v4983_v45, %v11938_v57 }
0x1c5f   :  { %v5012_v53 = vsel %vm200_vm2, %v5002_v49, 0.0 }
0x1c60   :  { %5013 = vadd.xlane.f32.xlu1 %v5012_v53  ;;  %v5009_v56 = vsel %vm200_vm2, %v5001_v18, 0.0  ;;  %v7266_v53 = vld [vmem:[%s13761_s11 + $0x2a8] sm:$0xff] }
0x1c61   :  { %5010 = vadd.xlane.f32.xlu0 %v5009_v56  ;;  %v7252_v56 = vld [vmem:[%s13761_s11 + $0x238] sm:$0xff] }
0x1c8d   :  { %v8768_v20 = vpop.f32.mrb[106].mxu1 }
0x1c8e   :  { %v4992_v61 = vpop.f32.mrb[107].mxu1  ;;  %v4998_v25 = vadd.f32 %v8768_v20, %v7236_v62 }
0x1c8f   :  { %v4993_v4 = vadd.f32 %v7236_v62, %v4992_v61  ;;  %v7268_v61 = vld [vmem:[%s13761_s11 + $0x2b8] sm:$0xff] }
0x1c90   :  { %v5004_v7 = vadd.f32 %v4998_v25, %v11950_v32  ;;  %v9316_v25 = vpack.c.bf16 %v7268_v61, %v7252_v56 }
0x1c91   :  { %v5003_v52 = vadd.f32 %v4993_v4, %v11946_v21 }
0x1c92   :  { %v5018_v55 = vsel %vm200_vm2, %v5004_v7, 0.0  ;;  %9317 = vmatprep.subr.bf16.mxu1 %v9316_v25 }
0x1c93   :  { %v5015_v6 = vsel %vm200_vm2, %v5003_v52, 0.0 }
0x1c94   :  { %5016 = vadd.xlane.f32.xlu0 %v5015_v6 }
0x1c98   :  { %5019 = vadd.xlane.f32.xlu0 %v5018_v55 }
0x1ced   :  { %v5014_v57 = vpop.xlane.xlu1 %5013 }
0x1cee   :  { %v5022_v2 = vmul.f32 0.03125, %v5014_v57  ;;  %v5011_v8 = vpop.xlane.xlu0 %5010 }
0x1cef   :  { %v5021_v3 = vmul.f32 0.03125, %v5011_v8 }
0x1cf0   :  { %v12284_v60 = vsub.f32 %v5002_v49, %v5022_v2 }
0x1cf1   :  { %v12286_v58 = vsub.f32 %v5001_v18, %v5021_v3  ;;  %v7250_v18 = vld [vmem:[%s13761_s11 + $0x228] sm:$0xff]  ;;  %v7243_v3 = vld [vmem:[%s13759_s9 + $0x1] ss:$0 sm:$0xff] }
0x1cf2   :  { %v5030_v43 = vmul.f32 %v12284_v60, %v12284_v60  ;;  %v9308_v20 = vpack.c.bf16 %v7266_v53, %v7250_v18 }
0x1cf3   :  { %v5029_v21 = vmul.f32 %v12286_v58, %v12286_v58 }
0x1cf4   :  { %v5036_v32 = vsel %vm200_vm2, %v5030_v43, 0.0  ;;  %9309 = vmatprep.subr.bf16.mxu0 %v9308_v20  ;;  %v12370_v43 = vld [vmem:[%s13760_s10 + $0x1] ss:$0 sm:$0xff] }
0x1cf5   :  { %5037 = vadd.xlane.f32.xlu0 %v5036_v32  ;;  %v5033_v59 = vsel %vm200_vm2, %v5029_v21, 0.0 }
0x1cf6   :  { %5034 = vadd.xlane.f32.xlu1 %v5033_v59  ;;  %v7249_v59 = vld [vmem:[%s13761_s11 + $0x220] sm:$0xff] }
0x1cf7   :  { %v9310_v54 = vpack.c.bf16 %v7265_v5, %v7249_v59  ;;  %v7287_v5 = vld [vmem:[%s13761_s11 + $0x350] sm:$0xff] }
0x1cf8   :  { %v9338_v39 = vpack.c.bf16 %v7303_v47, %v7287_v5  ;;  %v7364_v5 = vld [vmem:[%s13763_s13 + $0x8a8] sm:$0xff]  ;;  %v7395_v47 = vld [vmem:[%s13763_s13 + $0x9a0] sm:$0xff] }
0x1d21   :  { %v5017_v31 = vpop.xlane.xlu0 %5016 }
0x1d22   :  { %v5023_v42 = vmul.f32 0.03125, %v5017_v31  ;;  %v9332_v31 = vpack.c.bf16 %v7272_v0, %v7256_v37  ;;  %v7289_v0 = vld [vmem:[%s13761_s11 + $0x360] sm:$0xff] }
0x1d24   :  { %v12342_v35 = vsub.f32 %v5003_v52, %v5023_v42 }
0x1d25   :  { %v5020_v40 = vpop.xlane.xlu0 %5019 }
0x1d26   :  { %v5024_v62 = vmul.f32 0.03125, %v5020_v40  ;;  %v5031_v9 = vmul.f32 %v12342_v35, %v12342_v35 }
0x1d28   :  { %v12346_v48 = vsub.f32 %v5004_v7, %v5024_v62  ;;  %v5039_v24 = vsel %vm200_vm2, %v5031_v9, 0.0 }
0x1d29   :  { %5040 = vadd.xlane.f32.xlu1 %v5039_v24 }
0x1d2a   :  { %v5032_v45 = vmul.f32 %v12346_v48, %v12346_v48 }
0x1d2c   :  { %v5042_v49 = vsel %vm200_vm2, %v5032_v45, 0.0 }
0x1d2d   :  { %5043 = vadd.xlane.f32.xlu0 %v5042_v49 }
0x1d82   :  { %v5038_v4 = vpop.xlane.xlu0 %5037 }
0x1d83   :  { %v5046_v52 = vmul.f32 0.03125, %v5038_v4  ;;  %v5035_v7 = vpop.xlane.xlu1 %5034  ;;  %v7253_v4 = vld [vmem:[%s13761_s11 + $0x240] sm:$0xff] }
0x1d84   :  { %v5045_v6 = vmul.f32 0.03125, %v5035_v7  ;;  %v7271_v7 = vld [vmem:[%s13761_s11 + $0x2d0] sm:$0xff] }
0x1d85   :  { %v5050_v55 = vadd.f32 1e-05, %v5046_v52  ;;  %v7255_v52 = vld [vmem:[%s13761_s11 + $0x250] sm:$0xff] }
0x1d86   :  { %v5049_v57 = vadd.f32 1e-05, %v5045_v6  ;;  %v7286_v6 = vld [vmem:[%s13761_s11 + $0x348] sm:$0xff] }
0x1d87   :  { %9940 = vrsqrt.f32 %v5050_v55  ;;  %v7302_v55 = vld [vmem:[%s13761_s11 + $0x3c8] sm:$0xff] }
0x1d88   :  { %9942 = vrsqrt.f32 %v5049_v57  ;;  %v7288_v57 = vld [vmem:[%s13761_s11 + $0x358] sm:$0xff] }
0x1d91   :  { %v9941_v2 = vpop.eup %9940 }
0x1d92   :  { %v9943_v8 = vpop.eup %9942  ;;  %v5058_v21 = vmul.f32 %v9941_v2, %v12284_v60  ;;  %v7282_v60 = vld [vmem:[%s13761_s11 + $0x328] sm:$0xff]  ;;  %v7304_v2 = vld [vmem:[%s13761_s11 + $0x3d8] sm:$0xff] }
0x1d93   :  { %v5057_v32 = vmul.f32 %v9943_v8, %v12286_v58  ;;  %v9312_v51 = vpack.c.bf16 %v7298_v11, %v7282_v60  ;;  %v9336_v59 = vpack.c.bf16 %v7304_v2, %v7288_v57  ;;  %v7274_v60 = vld [vmem:[%s13761_s11 + $0x2e8] sm:$0xff]  ;;  %v7276_v11 = vld [vmem:[%s13761_s11 + $0x2f8] sm:$0xff]  ;;  %v7345_v2 = vld [vmem:[%s13763_s13 + $0x810] sm:$0xff] }
0x1d94   :  { %v5068_v50 = vmul.f32 %v7243_v3, %v5058_v21  ;;  %v7301_v21 = vld [vmem:[%s13761_s11 + $0x3c0] sm:$0xff] }
0x1d95   :  { %v5067_v58 = vmul.f32 %v7243_v3, %v5057_v32  ;;  %v9328_v32 = vpack.c.bf16 %v7302_v55, %v7286_v6  ;;  %v7394_v6 = vld [vmem:[%s13763_s13 + $0x998] sm:$0xff] }
0x1d96   :  { %v12432_v26 = vadd.f32 %v12370_v43, %v5068_v50  ;;  %v9340_v50 = vpack.c.bf16 %v7274_v60, %v7258_v12  ;;  %v7396_v12 = vld [vmem:[%s13763_s13 + $0x9a8] sm:$0xff] }
0x1d97   :  { %v12399_v10 = vadd.f32 %v12370_v43, %v5067_v58  ;;  %v7260_v58 = vld [vmem:[%s13761_s11 + $0x278] sm:$0xff] }
0x1d99   :  { %7311 = vmatmul.mubr.msk.f32.vlgmr.msra.gmra.mrb[104].mxu0 %vm200_vm2, %v12399_v10  ;;  %7315 = vmatmul.mubr.msk.f32.vlgmr.msra.gmra.mrb[108].mxu1 %vm200_vm2, %v12399_v10 }
0x1d9a   :  { %5313 = vmatprep.mubr.f32.mxu0 %v9992_v30  ;;  %5402 = vmatprep.mubr.f32.mxu1 %v9992_v30 }
0x1d9b   :  { %9311 = vmatpush1.bf16.msra.mxu0 %v9310_v54  ;;  %9319 = vmatpush1.bf16.msra.mxu1 %v9318_v15  ;;  %v9348_v54 = vpack.c.bf16 %v7276_v11, %v7260_v58  ;;  %v7257_v15 = vld [vmem:[%s13761_s11 + $0x260] sm:$0xff] }
0x1d9c   :  { %9313 = vmatprep.subr.bf16.mxu0 %v9312_v51  ;;  %9321 = vmatprep.subr.bf16.mxu1 %v9320_v19  ;;  %v7275_v51 = vld [vmem:[%s13761_s11 + $0x2f0] sm:$0xff]  ;;  %v7290_v19 = vld [vmem:[%s13761_s11 + $0x368] sm:$0xff]  ;;  %v9342_v63 = vpack.c.bf16 %v7273_v17, %v7257_v15  ;;  %v7347_v11 = vld [vmem:[%s13763_s13 + $0x820] sm:$0xff] }
0x1d9d   :  { %7312 = vmatmul.mubr.msk.f32.gmra.mrb[106].mxu0 %vm200_vm2, %v12432_v26  ;;  %7316 = vmatmul.mubr.msk.f32.gmra.mrb[110].mxu1 %vm200_vm2, %v12432_v26  ;;  %v9350_v37 = vpack.c.bf16 %v7275_v51, %v7259_v27  ;;  %v7380_v15 = vld [vmem:[%s13763_s13 + $0x928] sm:$0xff]  ;;  %v7365_v17 = vld [vmem:[%s13763_s13 + $0x8b0] sm:$0xff]  ;;  %v7366_v27 = vld [vmem:[%s13763_s13 + $0x8b8] sm:$0xff] }
0x1d9e   :  { %5319 = vmatprep.mubr.f32.mxu0 %v9992_v30  ;;  %5408 = vmatprep.mubr.f32.mxu1 %v9992_v30  ;;  %v7397_v51 = vld [vmem:[%s13763_s13 + $0x9b0] sm:$0xff] }
0x1d9f   :  { %9315 = vmatpush1.bf16.msra.mxu0 %v9314_v46  ;;  %9323 = vmatpush1.bf16.msra.mxu1 %v9322_v41  ;;  %v7305_v46 = vld [vmem:[%s13761_s11 + $0x3e0] sm:$0xff]  ;;  %v9344_v41 = vpack.c.bf16 %v7306_v23, %v7290_v19  ;;  %v7398_v19 = vld [vmem:[%s13763_s13 + $0x9b8] sm:$0xff] }
0x1da0   :  { %9325 = vmatprep.subr.bf16.mxu0 %v9324_v22  ;;  %9333 = vmatprep.subr.bf16.mxu1 %v9332_v31  ;;  %v9352_v22 = vpack.c.bf16 %v7308_v16, %v7292_v44  ;;  %v7291_v31 = vld [vmem:[%s13761_s11 + $0x370] sm:$0xff]  ;;  %v7350_v16 = vld [vmem:[%s13763_s13 + $0x838] sm:$0xff] }
0x1da1   :  { %v7349_v44 = vld [vmem:[%s13763_s13 + $0x830] sm:$0xff] }
0x1db6   :  { %v5041_v42 = vpop.xlane.xlu1 %5040 }
0x1db7   :  { %v5047_v40 = vmul.f32 0.03125, %v5041_v42  ;;  %v7307_v42 = vld [vmem:[%s13761_s11 + $0x3f0] sm:$0xff] }
0x1db9   :  { %v5051_v62 = vadd.f32 1e-05, %v5047_v40  ;;  %v7359_v40 = vld [vmem:[%s13763_s13 + $0x880] sm:$0xff] }
0x1dba   :  { %v5044_v9 = vpop.xlane.xlu0 %5043 }
0x1dbb   :  { %9944 = vrsqrt.f32 %v5051_v62  ;;  %v5048_v24 = vmul.f32 0.03125, %v5044_v9  ;;  %v7360_v62 = vld [vmem:[%s13763_s13 + $0x888] sm:$0xff]  ;;  %v7391_v9 = vld [vmem:[%s13763_s13 + $0x980] sm:$0xff] }
0x1dbd   :  { %v5052_v45 = vadd.f32 1e-05, %v5048_v24  ;;  %v7392_v24 = vld [vmem:[%s13763_s13 + $0x988] sm:$0xff] }
0x1dbf   :  { %9946 = vrsqrt.f32 %v5052_v45  ;;  %v9346_v45 = vpack.c.bf16 %v7305_v46, %v7289_v0  ;;  %v7381_v0 = vld [vmem:[%s13763_s13 + $0x930] sm:$0xff]  ;;  %v7382_v46 = vld [vmem:[%s13763_s13 + $0x938] sm:$0xff] }
0x1dc5   :  { %v9945_v49 = vpop.eup %9944 }
0x1dc6   :  { %v5059_v18 = vmul.f32 %v9945_v49, %v12342_v35  ;;  %v9354_v49 = vpack.c.bf16 %v7307_v42, %v7291_v31  ;;  %v7399_v31 = vld [vmem:[%s13763_s13 + $0x9c0] sm:$0xff]  ;;  %v7400_v42 = vld [vmem:[%s13763_s13 + $0x9c8] sm:$0xff] }
0x1dc8   :  { %v5069_v53 = vmul.f32 %v7243_v3, %v5059_v18  ;;  %v9356_v18 = vpack.c.bf16 %v7360_v62, %v7359_v40  ;;  %v9370_v40 = vpack.c.bf16 %v7350_v16, %v7349_v44  ;;  %v7351_v62 = vld [vmem:[%s13763_s13 + $0x840] sm:$0xff]  ;;  %v7424_v16 = vld [vmem:[%s13763_s13 + $0xa88] sm:$0xff] }
0x1dc9   :  { %v9947_v56 = vpop.eup %9946  ;;  %v7423_v44 = vld [vmem:[%s13763_s13 + $0xa80] sm:$0xff] }
0x1dca   :  { %v12442_v20 = vadd.f32 %v12370_v43, %v5069_v53  ;;  %v5060_v61 = vmul.f32 %v9947_v56, %v12346_v48  ;;  %v7269_v48 = vld [vmem:[%s13761_s11 + $0x2c0] sm:$0xff]  ;;  %v9388_v53 = vpack.c.bf16 %v7392_v24, %v7391_v9  ;;  %v7352_v9 = vld [vmem:[%s13763_s13 + $0x848] sm:$0xff] }
0x1dcb   :  { %v9326_v8 = vpack.c.bf16 %v7269_v48, %v7253_v4  ;;  %v7343_v56 = vld [vmem:[%s13763_s13 + $0x800] sm:$0xff]  ;;  %v7376_v4 = vld [vmem:[%s13763_s13 + $0x908] sm:$0xff]  ;;  %v7361_v48 = vld [vmem:[%s13763_s13 + $0x890] sm:$0xff] }
0x1dcc   :  { %v5070_v25 = vmul.f32 %v7243_v3, %v5060_v61  ;;  %7313 = vmatmul.mubr.msk.f32.gmra.mrb[108].mxu0 %vm200_vm2, %v12442_v20  ;;  %7317 = vmatmul.mubr.msk.f32.gmra.mrb[112].mxu1 %vm200_vm2, %v12442_v20  ;;  %v9334_v3 = vpack.c.bf16 %v7271_v7, %v7255_v52  ;;  %v7344_v61 = vld [vmem:[%s13763_s13 + $0x808] sm:$0xff]  ;;  %v7362_v52 = vld [vmem:[%s13763_s13 + $0x898] sm:$0xff]  ;;  %v7393_v7 = vld [vmem:[%s13763_s13 + $0x990] sm:$0xff] }
0x1dcd   :  { %5325 = vmatprep.mubr.f32.mxu0 %v9992_v30  ;;  %5414 = vmatprep.mubr.f32.mxu1 %v9992_v30  ;;  %v9358_v55 = vpack.c.bf16 %v7344_v61, %v7343_v56  ;;  %v7370_v56 = vld [vmem:[%s13763_s13 + $0x8d8] sm:$0xff]  ;;  %v7401_v61 = vld [vmem:[%s13763_s13 + $0x9d0] sm:$0xff] }
0x1dce   :  { %v12452_v35 = vadd.f32 %v12370_v43, %v5070_v25  ;;  %v7285_v43 = vld [vmem:[%s13761_s11 + $0x340] sm:$0xff] }
0x1dcf   :  { %v9330_v14 = vpack.c.bf16 %v7301_v21, %v7285_v43  ;;  %v7375_v25 = vld [vmem:[%s13763_s13 + $0x900] sm:$0xff]  ;;  %v9392_v43 = vpack.c.bf16 %v7394_v6, %v7393_v7  ;;  %v7377_v21 = vld [vmem:[%s13763_s13 + $0x910] sm:$0xff] }
0x1dd0   :  { %7314 = vmatmul.mubr.msk.f32.gmra.mrb[110].mxu0 %vm200_vm2, %v12452_v35  ;;  %7318 = vmatmul.mubr.msk.f32.gmra.mrb[114].mxu1 %vm200_vm2, %v12452_v35  ;;  %v9390_v57 = vpack.c.bf16 %v7376_v4, %v7375_v25  ;;  %v7402_v25 = vld [vmem:[%s13763_s13 + $0x9d8] sm:$0xff]  ;;  %v9374_v4 = vpack.c.bf16 %v7352_v9, %v7351_v62  ;;  %v7407_v9 = vld [vmem:[%s13763_s13 + $0xa00] sm:$0xff] }
0x1dd1   :  { %5485 = vmatprep.mubr.f32.mxu0 %v9992_v30  ;;  %5574 = vmatprep.mubr.f32.mxu1 %v9992_v30  ;;  %v9408_v6 = vpack.c.bf16 %v7402_v25, %v7401_v61 }
0x1dd4   :  { %7319 = vmatmul.mubr.msk.f32.vlgmr.msra.gmra.mrb[112].mxu0 %vm200_vm2, %v12399_v10  ;;  %7323 = vmatmul.mubr.msk.f32.vlgmr.msra.gmra.mrb[116].mxu1 %vm200_vm2, %v12399_v10 }
0x1dd5   :  { %5491 = vmatprep.mubr.f32.mxu0 %v9992_v30  ;;  %5580 = vmatprep.mubr.f32.mxu1 %v9992_v30 }
0x1dd6   :  { %9327 = vmatpush1.bf16.msra.mxu0 %v9326_v8  ;;  %9335 = vmatpush1.bf16.msra.mxu1 %v9334_v3  ;;  %v7346_v8 = vld [vmem:[%s13763_s13 + $0x818] sm:$0xff]  ;;  %v9360_v3 = vpack.c.bf16 %v7362_v52, %v7361_v48 }
0x1dd7   :  { %9329 = vmatprep.subr.bf16.mxu0 %v9328_v32  ;;  %9337 = vmatprep.subr.bf16.mxu1 %v9336_v59  ;;  %v7378_v32 = vld [vmem:[%s13763_s13 + $0x918] sm:$0xff]  ;;  %v7363_v59 = vld [vmem:[%s13763_s13 + $0x8a0] sm:$0xff]  ;;  %v9362_v60 = vpack.c.bf16 %v7346_v8, %v7345_v2  ;;  %v7372_v8 = vld [vmem:[%s13763_s13 + $0x8e8] sm:$0xff] }
0x1dd8   :  { %7320 = vmatmul.mubr.msk.f32.gmra.mrb[114].mxu0 %vm200_vm2, %v12432_v26  ;;  %7324 = vmatmul.mubr.msk.f32.gmra.mrb[118].mxu1 %vm200_vm2, %v12432_v26  ;;  %v9394_v58 = vpack.c.bf16 %v7378_v32, %v7377_v21  ;;  %v7354_v52 = vld [vmem:[%s13763_s13 + $0x858] sm:$0xff]  ;;  %v7371_v2 = vld [vmem:[%s13763_s13 + $0x8e0] sm:$0xff] }
0x1dd9   :  { %5497 = vmatprep.mubr.f32.mxu0 %v9992_v30  ;;  %5586 = vmatprep.mubr.f32.mxu1 %v9992_v30 }
0x1dda   :  { %9331 = vmatpush1.bf16.msra.mxu0 %v9330_v14  ;;  %9339 = vmatpush1.bf16.msra.mxu1 %v9338_v39  ;;  %v7348_v14 = vld [vmem:[%s13763_s13 + $0x828] sm:$0xff]  ;;  %v9364_v39 = vpack.c.bf16 %v7364_v5, %v7363_v59  ;;  %v7355_v59 = vld [vmem:[%s13763_s13 + $0x860] sm:$0xff] }
0x1ddb   :  { %9341 = vmatprep.subr.bf16.mxu0 %v9340_v50  ;;  %9349 = vmatprep.subr.bf16.mxu1 %v9348_v54  ;;  %v9396_v50 = vpack.c.bf16 %v7396_v12, %v7395_v47  ;;  %v7379_v54 = vld [vmem:[%s13763_s13 + $0x920] sm:$0xff]  ;;  %v9366_v23 = vpack.c.bf16 %v7348_v14, %v7347_v11  ;;  %v7356_v5 = vld [vmem:[%s13763_s13 + $0x868] sm:$0xff]  ;;  %v9380_v47 = vpack.c.bf16 %v7372_v8, %v7371_v2  ;;  %v7373_v11 = vld [vmem:[%s13763_s13 + $0x8f0] sm:$0xff] }
0x1ddc   :  { %7321 = vmatmul.mubr.msk.f32.gmra.mrb[116].mxu0 %vm200_vm2, %v12442_v20  ;;  %7325 = vmatmul.mubr.msk.f32.gmra.mrb[120].mxu1 %vm200_vm2, %v12442_v20  ;;  %v7374_v14 = vld [vmem:[%s13763_s13 + $0x8f8] sm:$0xff]  ;;  %v7409_v8 = vld [vmem:[%s13763_s13 + $0xa10] sm:$0xff] }
0x1ddd   :  { %5503 = vmatprep.mubr.f32.mxu0 %v9992_v30  ;;  %5592 = vmatprep.mubr.f32.mxu1 %v9992_v30 }
0x1de0   :  { %7322 = vmatmul.mubr.msk.f32.gmra.mrb[118].mxu0 %vm200_vm2, %v12452_v35  ;;  %7326 = vmatmul.mubr.msk.f32.gmra.mrb[122].mxu1 %vm200_vm2, %v12452_v35 }
0x1de1   :  { %5663 = vmatprep.mubr.f32.mxu0 %v9992_v30  ;;  %5752 = vmatprep.mubr.f32.mxu1 %v9992_v30 }
0x1de4   :  { %7327 = vmatmul.mubr.msk.f32.vlgmr.msra.gmra.mrb[120].mxu0 %vm200_vm2, %v12399_v10  ;;  %7331 = vmatmul.mubr.msk.f32.vlgmr.msra.gmra.mrb[124].mxu1 %vm200_vm2, %v12399_v10 }
0x1de5   :  { %5669 = vmatprep.mubr.f32.mxu0 %v9992_v30  ;;  %5758 = vmatprep.mubr.f32.mxu1 %v9992_v30 }
0x1de6   :  { %9343 = vmatpush1.bf16.msra.mxu0 %v9342_v63  ;;  %9351 = vmatpush1.bf16.msra.mxu1 %v9350_v37  ;;  %v9368_v63 = vpack.c.bf16 %v7366_v27, %v7365_v17  ;;  %v9400_v37 = vpack.c.bf16 %v7398_v19, %v7397_v51  ;;  %v7357_v17 = vld [vmem:[%s13763_s13 + $0x870] sm:$0xff]  ;;  %v7358_v27 = vld [vmem:[%s13763_s13 + $0x878] sm:$0xff]  ;;  %v9384_v51 = vpack.c.bf16 %v7374_v14, %v7373_v11 }
0x1de7   :  { %9345 = vmatprep.subr.bf16.mxu0 %v9344_v41  ;;  %9353 = vmatprep.subr.bf16.mxu1 %v9352_v22  ;;  %v7367_v41 = vld [vmem:[%s13763_s13 + $0x8c0] sm:$0xff]  ;;  %v7368_v22 = vld [vmem:[%s13763_s13 + $0x8c8] sm:$0xff] }
0x1de8   :  { %7328 = vmatmul.mubr.msk.f32.gmra.mrb[122].mxu0 %vm200_vm2, %v12432_v26  ;;  %7332 = vmatmul.mubr.msk.f32.gmra.mrb[126].mxu1 %vm200_vm2, %v12432_v26  ;;  %v9372_v24 = vpack.c.bf16 %v7368_v22, %v7367_v41  ;;  %v9420_v41 = vpack.c.bf16 %v7424_v16, %v7423_v44 }
0x1de9   :  { %5675 = vmatprep.mubr.f32.mxu0 %v9992_v30  ;;  %5764 = vmatprep.mubr.f32.mxu1 %v9992_v30 }
0x1dea   :  { %9347 = vmatpush1.bf16.msra.mxu0 %v9346_v45  ;;  %9355 = vmatpush1.bf16.msra.mxu1 %v9354_v49  ;;  %v9404_v45 = vpack.c.bf16 %v7400_v42, %v7399_v31  ;;  %v7383_v49 = vld [vmem:[%s13763_s13 + $0x940] sm:$0xff]  ;;  %v12821_v31 = vld [vmem:[%s13762_s12 + $0x10] sm:$0xff] }
0x1deb   :  { %9357 = vmatprep.subr.bf16.mxu0 %v9356_v18  ;;  %9389 = vmatprep.subr.bf16.mxu1 %v9388_v53  ;;  %v7384_v18 = vld [vmem:[%s13763_s13 + $0x948] sm:$0xff]  ;;  %v7369_v53 = vld [vmem:[%s13763_s13 + $0x8d0] sm:$0xff]  ;;  %v12825_v42 = vrot.slane %v12821_v31, %v10991_v28  ;;  %v12837_v62 = vrot.slane %v12821_v31, %v11005_v36 }
0x1dec   :  { %7329 = vmatmul.mubr.msk.f32.gmra.mrb[124].mxu0 %vm200_vm2, %v12442_v20  ;;  %7333 = vmatmul.mubr.msk.f32.gmra.mrb[128].mxu1 %vm200_vm2, %v12442_v20  ;;  %v9406_v48 = vpack.c.bf16 %v7384_v18, %v7383_v49  ;;  %v9376_v7 = vpack.c.bf16 %v7370_v56, %v7369_v53  ;;  %v7439_v18 = vld [vmem:[%s13763_s13 + $0xb00] sm:$0xff]  ;;  %v7440_v53 = vld [vmem:[%s13763_s13 + $0xb08] sm:$0xff]  ;;  %v7425_v56 = vld [vmem:[%s13763_s13 + $0xa90] sm:$0xff] }
0x1ded   :  { %5681 = vmatprep.mubr.f32.mxu0 %v9992_v30  ;;  %5770 = vmatprep.mubr.f32.mxu1 %v9992_v30  ;;  %v9454_v2 = vpack.c.bf16 %v7440_v53, %v7439_v18  ;;  %v7430_v18 = vld [vmem:[%s13763_s13 + $0xab8] sm:$0xff]  ;;  %v7461_v53 = vld [vmem:[%s13763_s13 + $0xbb0] sm:$0xff] }
0x1df0   :  { %7330 = vmatmul.mubr.msk.f32.gmra.mrb[126].mxu0 %vm200_vm2, %v12452_v35  ;;  %7334 = vmatmul.mubr.msk.f32.gmra.mrb[130].mxu1 %vm200_vm2, %v12452_v35 }
0x1df1   :  { %5841 = vmatprep.mubr.f32.mxu0 %v9992_v30  ;;  %5930 = vmatprep.mubr.f32.mxu1 %v9992_v30 }
0x1df4   :  { %7335 = vmatmul.mubr.msk.f32.vlgmr.msra.gmra.mrb[128].mxu0 %vm200_vm2, %v12399_v10  ;;  %7339 = vmatmul.mubr.msk.f32.vlgmr.msra.gmra.mrb[132].mxu1 %vm200_vm2, %v12399_v10 }
0x1df5   :  { %5847 = vmatprep.mubr.f32.mxu0 %v9992_v30  ;;  %5936 = vmatprep.mubr.f32.mxu1 %v9992_v30 }
0x1df6   :  { %9359 = vmatpush3.bf16.msra.mxu0 %v9358_v55  ;;  %9391 = vmatpush3.bf16.msra.mxu1 %v9390_v57  ;;  %v7385_v55 = vld [vmem:[%s13763_s13 + $0x950] sm:$0xff]  ;;  %v7386_v57 = vld [vmem:[%s13763_s13 + $0x958] sm:$0xff] }
0x1df7   :  { %9361 = vmatprep.subr.bf16.mxu0 %v9360_v3  ;;  %9393 = vmatprep.subr.bf16.mxu1 %v9392_v43  ;;  %v7403_v3 = vld [vmem:[%s13763_s13 + $0x9e0] sm:$0xff]  ;;  %v7404_v43 = vld [vmem:[%s13763_s13 + $0x9e8] sm:$0xff]  ;;  %v9410_v32 = vpack.c.bf16 %v7386_v57, %v7385_v55 }
0x1df8   :  { %7336 = vmatmul.mubr.msk.f32.gmra.mrb[130].mxu0 %vm200_vm2, %v12432_v26  ;;  %7340 = vmatmul.mubr.msk.f32.gmra.mrb[134].mxu1 %vm200_vm2, %v12432_v26  ;;  %v9398_v26 = vpack.c.bf16 %v7380_v15, %v7379_v54  ;;  %v9412_v12 = vpack.c.bf16 %v7404_v43, %v7403_v3  ;;  %v9382_v54 = vpack.c.bf16 %v7356_v5, %v7355_v59 }
0x1df9   :  { %5853 = vmatprep.mubr.f32.mxu0 %v9992_v30  ;;  %5942 = vmatprep.mubr.f32.mxu1 %v9992_v30 }
0x1dfa   :  { %9363 = vmatpush3.bf16.msra.mxu0 %v9362_v60  ;;  %9395 = vmatpush3.bf16.msra.mxu1 %v9394_v58  ;;  %v7387_v60 = vld [vmem:[%s13763_s13 + $0x960] sm:$0xff]  ;;  %v7388_v58 = vld [vmem:[%s13763_s13 + $0x968] sm:$0xff] }
0x1dfb   :  { %9365 = vmatprep.subr.bf16.mxu0 %v9364_v39  ;;  %9397 = vmatprep.subr.bf16.mxu1 %v9396_v50  ;;  %v7405_v39 = vld [vmem:[%s13763_s13 + $0x9f0] sm:$0xff]  ;;  %v7406_v50 = vld [vmem:[%s13763_s13 + $0x9f8] sm:$0xff]  ;;  %v9414_v15 = vpack.c.bf16 %v7388_v58, %v7387_v60 }
0x1dfc   :  { %7337 = vmatmul.mubr.msk.f32.gmra.mrb[132].mxu0 %vm200_vm2, %v12442_v20  ;;  %7341 = vmatmul.mubr.msk.f32.gmra.mrb[136].mxu1 %vm200_vm2, %v12442_v20  ;;  %v9402_v20 = vpack.c.bf16 %v7382_v46, %v7381_v0  ;;  %v9416_v19 = vpack.c.bf16 %v7406_v50, %v7405_v39  ;;  %v9386_v0 = vpack.c.bf16 %v7358_v27, %v7357_v17 }
0x1dfd   :  { %5859 = vmatprep.mubr.f32.mxu0 %v9992_v30  ;;  %5948 = vmatprep.mubr.f32.mxu1 %v9992_v30 }
0x1dfe   :  { %9367 = vmatpush3.bf16.msra.mxu0 %v9366_v23  ;;  %9399 = vmatpush3.bf16.msra.mxu1 %v9398_v26  ;;  %v7389_v23 = vld [vmem:[%s13763_s13 + $0x970] sm:$0xff]  ;;  %v7390_v26 = vld [vmem:[%s13763_s13 + $0x978] sm:$0xff] }
0x1dff   :  { %9369 = vmatprep.subr.bf16.mxu0 %v9368_v63  ;;  %9401 = vmatprep.subr.bf16.mxu1 %v9400_v37  ;;  %v7455_v63 = vld [vmem:[%s13763_s13 + $0xb80] sm:$0xff]  ;;  %v7456_v37 = vld [vmem:[%s13763_s13 + $0xb88] sm:$0xff]  ;;  %v9418_v46 = vpack.c.bf16 %v7390_v26, %v7389_v23 }
0x1e00   :  { %7338 = vmatmul.mubr.msk.f32.gmra.mrb[134].mxu0 %vm200_vm2, %v12452_v35  ;;  %7342 = vmatmul.mubr.msk.f32.gmra.mrb[138].mxu1 %vm200_vm2, %v12452_v35  ;;  %v7353_v35 = vld [vmem:[%s13763_s13 + $0x850] sm:$0xff]  ;;  %v9452_v22 = vpack.c.bf16 %v7456_v37, %v7455_v63  ;;  %v7460_v23 = vld [vmem:[%s13763_s13 + $0xba8] sm:$0xff]  ;;  %v7411_v37 = vld [vmem:[%s13763_s13 + $0xa20] sm:$0xff] }
0x1e01   :  { %v9378_v21 = vpack.c.bf16 %v7354_v52, %v7353_v35  ;;  %v7426_v35 = vld [vmem:[%s13763_s13 + $0xa98] sm:$0xff]  ;;  %v7457_v52 = vld [vmem:[%s13763_s13 + $0xb90] sm:$0xff] }
0x1e02   :  { %9371 = vmatpush3.bf16.msra.mxu0 %v9370_v40  ;;  %9403 = vmatpush3.bf16.msra.mxu1 %v9402_v20  ;;  %v12829_v40 = vrot.slane %v12821_v31, %v10994_v29  ;;  %v12833_v20 = vrot.slane %v12821_v31, %v11002_v33  ;;  %v9424_v59 = vpack.c.bf16 %v7426_v35, %v7425_v56  ;;  %v7462_v56 = vld [vmem:[%s13763_s13 + $0xbb8] sm:$0xff] }
0x1e03   :  { %9373 = vmatprep.subr.bf16.mxu0 %v9372_v24  ;;  %9405 = vmatprep.subr.bf16.mxu1 %v9404_v45  ;;  %v7408_v24 = vld [vmem:[%s13763_s13 + $0xa08] sm:$0xff] }
0x1e04   :  { %v9422_v57 = vpack.c.bf16 %v7408_v24, %v7407_v9  ;;  %v7443_v24 = vld [vmem:[%s13763_s13 + $0xb20] sm:$0xff] }
0x1e06   :  { %9375 = vmatpush3.bf16.msra.mxu0 %v9374_v4  ;;  %9407 = vmatpush3.bf16.msra.mxu1 %v9406_v48 }
0x1e07   :  { %9377 = vmatprep.subr.bf16.mxu0 %v9376_v7  ;;  %9409 = vmatprep.subr.bf16.mxu1 %v9408_v6  ;;  %v7458_v7 = vld [vmem:[%s13763_s13 + $0xb98] sm:$0xff] }
0x1e08   :  { %v9456_v5 = vpack.c.bf16 %v7458_v7, %v7457_v52  ;;  %v9464_v52 = vpack.c.bf16 %v7462_v56, %v7461_v53  ;;  %v7445_v7 = vld [vmem:[%s13763_s13 + $0xb30] sm:$0xff]  ;;  %v7470_v53 = vld [vmem:[%s13763_s13 + $0xbf8] sm:$0xff] }
0x1e0a   :  { %9379 = vmatpush3.bf16.msra.mxu0 %v9378_v21  ;;  %9411 = vmatpush3.bf16.msra.mxu1 %v9410_v32 }
0x1e0b   :  { %9381 = vmatprep.subr.bf16.mxu0 %v9380_v47  ;;  %9413 = vmatprep.subr.bf16.mxu1 %v9412_v12  ;;  %v7410_v47 = vld [vmem:[%s13763_s13 + $0xa18] sm:$0xff]  ;;  %v7441_v12 = vld [vmem:[%s13763_s13 + $0xb10] sm:$0xff] }
0x1e0c   :  { %v9426_v16 = vpack.c.bf16 %v7410_v47, %v7409_v8  ;;  %v7464_v8 = vld [vmem:[%s13763_s13 + $0xbc8] sm:$0xff]  ;;  %v7447_v47 = vld [vmem:[%s13763_s13 + $0xb40] sm:$0xff] }
0x1e0e   :  { %9383 = vmatpush3.bf16.msra.mxu0 %v9382_v54  ;;  %9415 = vmatpush3.bf16.msra.mxu1 %v9414_v15  ;;  %v7442_v54 = vld [vmem:[%s13763_s13 + $0xb18] sm:$0xff]  ;;  %v7427_v15 = vld [vmem:[%s13763_s13 + $0xaa0] sm:$0xff] }
0x1e0f   :  { %9385 = vmatprep.subr.bf16.mxu0 %v9384_v51  ;;  %9417 = vmatprep.subr.bf16.mxu1 %v9416_v19  ;;  %v7428_v51 = vld [vmem:[%s13763_s13 + $0xaa8] sm:$0xff]  ;;  %v7459_v19 = vld [vmem:[%s13763_s13 + $0xba0] sm:$0xff]  ;;  %v9458_v63 = vpack.c.bf16 %v7442_v54, %v7441_v12  ;;  %v7417_v54 = vld [vmem:[%s13763_s13 + $0xa50] sm:$0xff] }
0x1e10   :  { %v9460_v9 = vpack.c.bf16 %v7460_v23, %v7459_v19  ;;  %v7448_v12 = vld [vmem:[%s13763_s13 + $0xb48] sm:$0xff]  ;;  %v7450_v19 = vld [vmem:[%s13763_s13 + $0xb58] sm:$0xff]  ;;  %v7435_v23 = vld [vmem:[%s13763_s13 + $0xae0] sm:$0xff] }
0x1e12   :  { %9387 = vmatpush3.bf16.msra.mxu0 %v9386_v0  ;;  %9419 = vmatpush3.bf16.msra.mxu1 %v9418_v46  ;;  %v7412_v0 = vld [vmem:[%s13763_s13 + $0xa28] sm:$0xff] }
0x1e13   :  { %9421 = vmatprep.subr.bf16.mxu0 %v9420_v41  ;;  %9453 = vmatprep.subr.bf16.mxu1 %v9452_v22  ;;  %v9428_v22 = vpack.c.bf16 %v7428_v51, %v7427_v15  ;;  %v7418_v15 = vld [vmem:[%s13763_s13 + $0xa58] sm:$0xff]  ;;  %v7449_v51 = vld [vmem:[%s13763_s13 + $0xb50] sm:$0xff] }
0x1e6c   :  { %v5309_v45 = vpop.f32.mrb[104].mxu0  ;;  %v5398_v49 = vpop.f32.mrb[108].mxu1 }
0x1e6d   :  { %v5310_v61 = vadd.f32 %v5309_v45, %v12825_v42  ;;  %v5399_v25 = vadd.f32 %v5398_v49, %v12829_v40  ;;  %v5311_v4 = vpop.f32.mrb[105].mxu0  ;;  %v5400_v48 = vpop.f32.mrb[109].mxu1  ;;  %v7444_v45 = vld [vmem:[%s13763_s13 + $0xb28] sm:$0xff]  ;;  %v7429_v49 = vld [vmem:[%s13763_s13 + $0xab0] sm:$0xff] }
0x1e6e   :  { %v5312_v6 = vadd.f32 %v5311_v4, %v12833_v20  ;;  %v5401_v55 = vadd.f32 %v5400_v48, %v12837_v62  ;;  %v7413_v4 = vld [vmem:[%s13763_s13 + $0xa30] sm:$0xff]  ;;  %v7414_v48 = vld [vmem:[%s13763_s13 + $0xa38] sm:$0xff]  ;;  %v9432_v35 = vpack.c.bf16 %v7430_v18, %v7429_v49 }
0x1e6f   :  { %v5955_v60 = vmax.f32 %v5310_v61, 0.0  ;;  %v5957_v58 = vmax.f32 %v5399_v25, 0.0  ;;  %v9430_v61 = vpack.c.bf16 %v7412_v0, %v7411_v37  ;;  %v9462_v25 = vpack.c.bf16 %v7444_v45, %v7443_v24  ;;  %v7419_v0 = vld [vmem:[%s13763_s13 + $0xa60] sm:$0xff]  ;;  %v7452_v24 = vld [vmem:[%s13763_s13 + $0xb68] sm:$0xff]  ;;  %v7437_v45 = vld [vmem:[%s13763_s13 + $0xaf0] sm:$0xff] }
0x1e70   :  { %v5956_v3 = vmax.f32 %v5312_v6, 0.0  ;;  %v5958_v43 = vmax.f32 %v5401_v55, 0.0  ;;  %v5315_v21 = vpop.f32.mrb[106].mxu0  ;;  %v5404_v32 = vpop.f32.mrb[110].mxu1  ;;  %v7446_v6 = vld [vmem:[%s13763_s13 + $0xb38] sm:$0xff]  ;;  %v7431_v55 = vld [vmem:[%s13763_s13 + $0xac0] sm:$0xff]  ;;  %v9474_v37 = vpack.c.bf16 %v7450_v19, %v7449_v51 }
0x1e71   :  { %v5316_v11 = vadd.f32 %v5315_v21, %v12825_v42  ;;  %v5405_v14 = vadd.f32 %v5404_v32, %v12829_v40  ;;  %v5317_v39 = vpop.f32.mrb[107].mxu0  ;;  %v5406_v50 = vpop.f32.mrb[111].mxu1  ;;  %v7415_v21 = vld [vmem:[%s13763_s13 + $0xa40] sm:$0xff]  ;;  %v7416_v32 = vld [vmem:[%s13763_s13 + $0xa48] sm:$0xff]  ;;  %v7438_v49 = vld [vmem:[%s13763_s13 + $0xaf8] sm:$0xff] }
0x1e72   :  { %v5318_v17 = vadd.f32 %v5317_v39, %v12833_v20  ;;  %v5407_v27 = vadd.f32 %v5406_v50, %v12837_v62  ;;  %6348 = vmatprep.mubr.f32.mxu0 %v5956_v3  ;;  %6430 = vmatprep.mubr.f32.mxu1 %v5958_v43  ;;  %v9434_v3 = vpack.c.bf16 %v7414_v48, %v7413_v4  ;;  %v7469_v18 = vld [vmem:[%s13763_s13 + $0xbf0] sm:$0xff]  ;;  %v7422_v4 = vld [vmem:[%s13763_s13 + $0xa78] sm:$0xff] }
0x1e73   :  { %6349 = vmatmul.mubr.f32.vlgmr.msra.gmra.mrb[136].mxu0 %v5955_v60  ;;  %6431 = vmatmul.mubr.f32.vlgmr.msra.gmra.mrb[140].mxu1 %v5957_v58  ;;  %v5971_v46 = vmax.f32 %v5316_v11, 0.0  ;;  %v5973_v41 = vmax.f32 %v5405_v14, 0.0  ;;  %v9466_v43 = vpack.c.bf16 %v7446_v6, %v7445_v7  ;;  %v7433_v60 = vld [vmem:[%s13763_s13 + $0xad0] sm:$0xff]  ;;  %v7434_v58 = vld [vmem:[%s13763_s13 + $0xad8] sm:$0xff]  ;;  %v9438_v39 = vpack.c.bf16 %v7416_v32, %v7415_v21  ;;  %v7487_v6 = vld [vmem:[%s13763_s13 + $0xc80] sm:$0xff] }
0x1e74   :  { %v5972_v26 = vmax.f32 %v5318_v17, 0.0  ;;  %v5974_v44 = vmax.f32 %v5407_v27, 0.0  ;;  %9423 = vmatpush3.bf16.msra.mxu0 %v9422_v57  ;;  %9455 = vmatpush3.bf16.msra.mxu1 %v9454_v2  ;;  %v7432_v57 = vld [vmem:[%s13763_s13 + $0xac8] sm:$0xff]  ;;  %v7463_v2 = vld [vmem:[%s13763_s13 + $0xbc0] sm:$0xff]  ;;  %v7465_v11 = vld [vmem:[%s13763_s13 + $0xbd0] sm:$0xff]  ;;  %v9470_v50 = vpack.c.bf16 %v7448_v12, %v7447_v47  ;;  %v9440_v17 = vpack.c.bf16 %v7434_v58, %v7433_v60 }
0x1e75   :  { %9425 = vmatprep.subr.bf16.mxu0 %v9424_v59  ;;  %9457 = vmatprep.subr.bf16.mxu1 %v9456_v5  ;;  %v9436_v59 = vpack.c.bf16 %v7432_v57, %v7431_v55  ;;  %v9468_v5 = vpack.c.bf16 %v7464_v8, %v7463_v2  ;;  %v7466_v14 = vld [vmem:[%s13763_s13 + $0xbd8] sm:$0xff]  ;;  %v9448_v48 = vpack.c.bf16 %v7438_v49, %v7437_v45  ;;  %v7488_v55 = vld [vmem:[%s13763_s13 + $0xc88] sm:$0xff]  ;;  %v7519_v57 = vld [vmem:[%s13763_s13 + $0xd80] sm:$0xff] }
0x1e76   :  { %6353 = vmatprep.mubr.f32.mxu0 %v5972_v26  ;;  %6435 = vmatprep.mubr.f32.mxu1 %v5974_v44  ;;  %v9472_v27 = vpack.c.bf16 %v7466_v14, %v7465_v11  ;;  %v7436_v26 = vld [vmem:[%s13763_s13 + $0xae8] sm:$0xff]  ;;  %v7467_v44 = vld [vmem:[%s13763_s13 + $0xbe0] sm:$0xff]  ;;  %v7454_v7 = vld [vmem:[%s13763_s13 + $0xb78] sm:$0xff]  ;;  %v13045_v14 = vrot.slane %v12821_v31, %v11224_v1 }
0x1e77   :  { %6354 = vmatmul.mubr.f32.gmra.mrb[138].mxu0 %v5971_v46  ;;  %6436 = vmatmul.mubr.f32.gmra.mrb[142].mxu1 %v5973_v41  ;;  %v7420_v46 = vld [vmem:[%s13763_s13 + $0xa68] sm:$0xff]  ;;  %v9444_v41 = vpack.c.bf16 %v7436_v26, %v7435_v23 }
0x1e78   :  { %9427 = vmatpush3.bf16.msra.mxu0 %v9426_v16  ;;  %9459 = vmatpush3.bf16.msra.mxu1 %v9458_v63  ;;  %v7468_v16 = vld [vmem:[%s13763_s13 + $0xbe8] sm:$0xff]  ;;  %v9442_v63 = vpack.c.bf16 %v7418_v15, %v7417_v54  ;;  %v9446_v56 = vpack.c.bf16 %v7420_v46, %v7419_v0  ;;  %v13061_v0 = vrot.slane %v12821_v31, %v11237_v13  ;;  %v13066_v46 = vld [vmem:[%s13763_s13 + $0xc00] sm:$0xff] }
0x1e79   :  { %9429 = vmatprep.subr.bf16.mxu0 %v9428_v22  ;;  %9461 = vmatprep.subr.bf16.mxu1 %v9460_v9  ;;  %v9476_v22 = vpack.c.bf16 %v7468_v16, %v7467_v44  ;;  %v7451_v9 = vld [vmem:[%s13763_s13 + $0xb60] sm:$0xff]  ;;  %v7520_v2 = vld [vmem:[%s13763_s13 + $0xd88] sm:$0xff] }
0x1e7a   :  { %v9516_v21 = vpack.c.bf16 %v7520_v2, %v7519_v57  ;;  %v13111_v57 = vld [vmem:[%s13763_s13 + $0xd10] sm:$0xff]  ;;  %v13116_v2 = vld [vmem:[%s13763_s13 + $0xd18] sm:$0xff] }
0x1e7c   :  { %9431 = vmatpush3.bf16.msra.mxu0 %v9430_v61  ;;  %9463 = vmatpush3.bf16.msra.mxu1 %v9462_v25  ;;  %v9478_v61 = vpack.c.bf16 %v7452_v24, %v7451_v9  ;;  %v7421_v25 = vld [vmem:[%s13763_s13 + $0xa70] sm:$0xff]  ;;  %v13085_v24 = vld [vmem:[%s13763_s13 + $0xc98] sm:$0xff] }
0x1e7d   :  { %9433 = vmatprep.subr.bf16.mxu0 %v9432_v35  ;;  %9465 = vmatprep.subr.bf16.mxu1 %v9464_v52  ;;  %v9480_v35 = vpack.c.bf16 %v7470_v53, %v7469_v18  ;;  %v7453_v52 = vld [vmem:[%s13763_s13 + $0xb70] sm:$0xff]  ;;  %v9450_v8 = vpack.c.bf16 %v7422_v4, %v7421_v25  ;;  %v7522_v4 = vld [vmem:[%s13763_s13 + $0xd98] sm:$0xff] }
0x1e7e   :  { %v13080_v9 = vld [vmem:[%s13763_s13 + $0xc90] sm:$0xff] }
0x1e7f   :  { %v7521_v25 = vld [vmem:[%s13763_s13 + $0xd90] sm:$0xff] }
0x1e80   :  { %9435 = vmatpush3.bf16.msra.mxu0 %v9434_v3  ;;  %9467 = vmatpush3.bf16.msra.mxu1 %v9466_v43  ;;  %v9482_v3 = vpack.c.bf16 %v7454_v7, %v7453_v52  ;;  %v9484_v43 = vpack.c.bf16 %v7488_v55, %v7487_v6  ;;  %v13100_v52 = vld [vmem:[%s13763_s13 + $0xc10] sm:$0xff]  ;;  %v13106_v55 = vld [vmem:[%s13763_s13 + $0xc18] sm:$0xff] }
0x1e81   :  { %9437 = vmatprep.subr.bf16.mxu0 %v9436_v59  ;;  %9469 = vmatprep.subr.bf16.mxu1 %v9468_v5 }
0x1e84   :  { %9439 = vmatpush3.bf16.msra.mxu0 %v9438_v39  ;;  %9471 = vmatpush3.bf16.msra.mxu1 %v9470_v50 }
0x1e85   :  { %9441 = vmatprep.subr.bf16.mxu0 %v9440_v17  ;;  %9473 = vmatprep.subr.bf16.mxu1 %v9472_v27  ;;  %v13049_v17 = vrot.slane %v12821_v31, %v11227_v34  ;;  %v13053_v27 = vrot.slane %v12821_v31, %v11230_v38  ;;  %v7504_v31 = vld [vmem:[%s13763_s13 + $0xd08] sm:$0xff] }
0x1e88   :  { %9443 = vmatpush3.bf16.msra.mxu0 %v9442_v63  ;;  %9475 = vmatpush3.bf16.msra.mxu1 %v9474_v37 }
0x1e89   :  { %9445 = vmatprep.subr.bf16.mxu0 %v9444_v41  ;;  %9477 = vmatprep.subr.bf16.mxu1 %v9476_v22 }
0x1e8c   :  { %9447 = vmatpush3.bf16.msra.mxu0 %v9446_v56  ;;  %9479 = vmatpush3.bf16.msra.mxu1 %v9478_v61 }
0x1e8d   :  { %9449 = vmatprep.subr.bf16.mxu0 %v9448_v48  ;;  %9481 = vmatprep.subr.bf16.mxu1 %v9480_v35 }
0x1e90   :  { %9451 = vmatpush3.bf16.msra.mxu0 %v9450_v8  ;;  %9483 = vmatpush3.bf16.msra.mxu1 %v9482_v3 }
0x1e91   :  { %9485 = vmatprep.subr.bf16.mxu0 %v9484_v43  ;;  %9517 = vmatprep.subr.bf16.mxu1 %v9516_v21 }
0x1e9f   :  { %v5321_v32 = vpop.f32.mrb[108].mxu0  ;;  %v5410_v59 = vpop.f32.mrb[112].mxu1 }
0x1ea0   :  { %v5322_v5 = vadd.f32 %v5321_v32, %v12825_v42  ;;  %v5411_v47 = vadd.f32 %v5410_v59, %v12829_v40  ;;  %v5323_v12 = vpop.f32.mrb[109].mxu0  ;;  %v5412_v60 = vpop.f32.mrb[113].mxu1  ;;  %v9488_v32 = vpack.c.bf16 %v13085_v24, %v13080_v9  ;;  %v9520_v59 = vpack.c.bf16 %v7522_v4, %v7521_v25  ;;  %v13179_v9 = vld [vmem:[%s13763_s13 + $0xcb8] sm:$0xff] }
0x1ea1   :  { %v5324_v58 = vadd.f32 %v5323_v12, %v12833_v20  ;;  %v5413_v11 = vadd.f32 %v5412_v60, %v12837_v62  ;;  %v7526_v25 = vld [vmem:[%s13763_s13 + $0xdb8] sm:$0xff] }
0x1ea2   :  { %v5987_v51 = vmax.f32 %v5322_v5, 0.0  ;;  %v5989_v19 = vmax.f32 %v5411_v47, 0.0  ;;  %v13123_v5 = vld [vmem:[%s13763_s13 + $0xca0] sm:$0xff]  ;;  %v13128_v47 = vld [vmem:[%s13763_s13 + $0xca8] sm:$0xff] }
0x1ea3   :  { %v5988_v39 = vmax.f32 %v5324_v58, 0.0  ;;  %v5990_v50 = vmax.f32 %v5413_v11, 0.0  ;;  %v5327_v54 = vpop.f32.mrb[110].mxu0  ;;  %v5416_v15 = vpop.f32.mrb[114].mxu1 }
0x1ea4   :  { %v5328_v23 = vadd.f32 %v5327_v54, %v12825_v42  ;;  %v5417_v26 = vadd.f32 %v5416_v15, %v12829_v40  ;;  %v5329_v44 = vpop.f32.mrb[111].mxu0  ;;  %v5418_v16 = vpop.f32.mrb[115].mxu1  ;;  %v7472_v42 = vld [vmem:[%s13763_s13 + $0xc08] sm:$0xff]  ;;  %v7503_v40 = vld [vmem:[%s13763_s13 + $0xd00] sm:$0xff] }
0x1ea5   :  { %v5330_v63 = vadd.f32 %v5329_v44, %v12833_v20  ;;  %v5419_v37 = vadd.f32 %v5418_v16, %v12837_v62  ;;  %6357 = vmatprep.mubr.f32.mxu0 %v5988_v39  ;;  %6439 = vmatprep.mubr.f32.mxu1 %v5990_v50  ;;  %v9486_v7 = vpack.c.bf16 %v7472_v42, %v13066_v46  ;;  %v7523_v54 = vld [vmem:[%s13763_s13 + $0xda0] sm:$0xff]  ;;  %v7524_v15 = vld [vmem:[%s13763_s13 + $0xda8] sm:$0xff]  ;;  %v13167_v46 = vld [vmem:[%s13762_s12 + $0x18] sm:$0xff] }
0x1ea6   :  { %6358 = vmatmul.mubr.f32.gmra.mrb[140].mxu0 %v5987_v51  ;;  %6440 = vmatmul.mubr.f32.gmra.mrb[144].mxu1 %v5989_v19  ;;  %v6003_v45 = vmax.f32 %v5328_v23, 0.0  ;;  %v6005_v49 = vmax.f32 %v5417_v26, 0.0  ;;  %v9518_v6 = vpack.c.bf16 %v7504_v31, %v7503_v40  ;;  %v13143_v23 = vld [vmem:[%s13763_s13 + $0xc20] sm:$0xff]  ;;  %v13148_v26 = vld [vmem:[%s13763_s13 + $0xc28] sm:$0xff]  ;;  %v9490_v44 = vpack.c.bf16 %v13106_v55, %v13100_v52 }
0x1ea7   :  { %v6004_v20 = vmax.f32 %v5330_v63, 0.0  ;;  %v6006_v62 = vmax.f32 %v5419_v37, 0.0  ;;  %v5487_v41 = vpop.f32.mrb[112].mxu0  ;;  %v5576_v22 = vpop.f32.mrb[116].mxu1  ;;  %v9522_v16 = vpack.c.bf16 %v13116_v2, %v13111_v57  ;;  %v13157_v63 = vld [vmem:[%s13763_s13 + $0xd20] sm:$0xff]  ;;  %v13162_v37 = vld [vmem:[%s13763_s13 + $0xd28] sm:$0xff] }
0x1ea8   :  { %v5488_v18 = vadd.f32 %v5487_v41, %v13045_v14  ;;  %v5577_v53 = vadd.f32 %v5576_v22, %v13049_v17  ;;  %v5489_v56 = vpop.f32.mrb[113].mxu0  ;;  %v5578_v61 = vpop.f32.mrb[117].mxu1  ;;  %v9524_v41 = vpack.c.bf16 %v7524_v15, %v7523_v54  ;;  %v13174_v22 = vld [vmem:[%s13763_s13 + $0xcb0] sm:$0xff]  ;;  %v9526_v52 = vpack.c.bf16 %v13162_v37, %v13157_v63  ;;  %v7527_v54 = vld [vmem:[%s13763_s13 + $0xdc0] sm:$0xff] }
0x1ea9   :  { %v5490_v48 = vadd.f32 %v5489_v56, %v13053_v27  ;;  %v5579_v35 = vadd.f32 %v5578_v61, %v13061_v0  ;;  %6361 = vmatprep.mubr.f32.mxu0 %v6004_v20  ;;  %6443 = vmatprep.mubr.f32.mxu1 %v6006_v62  ;;  %v9492_v62 = vpack.c.bf16 %v13128_v47, %v13123_v5  ;;  %v7525_v61 = vld [vmem:[%s13763_s13 + $0xdb0] sm:$0xff] }
0x1eaa   :  { %6362 = vmatmul.mubr.f32.gmra.mrb[142].mxu0 %v6003_v45  ;;  %6444 = vmatmul.mubr.f32.gmra.mrb[146].mxu1 %v6005_v49  ;;  %v5959_v12 = vmax.f32 %v5488_v18, 0.0  ;;  %v5961_v60 = vmax.f32 %v5577_v53, 0.0 }
0x1eab   :  { %v5960_v8 = vmax.f32 %v5490_v48, 0.0  ;;  %v5962_v3 = vmax.f32 %v5579_v35, 0.0  ;;  %v5493_v43 = vpop.f32.mrb[114].mxu0  ;;  %v5582_v21 = vpop.f32.mrb[118].mxu1  ;;  %v9494_v35 = vpack.c.bf16 %v13148_v26, %v13143_v23 }
0x1eac   :  { %v5494_v58 = vadd.f32 %v5493_v43, %v13045_v14  ;;  %v5583_v11 = vadd.f32 %v5582_v21, %v13049_v17  ;;  %v5495_v39 = vpop.f32.mrb[115].mxu0  ;;  %v5584_v50 = vpop.f32.mrb[119].mxu1  ;;  %v9528_v43 = vpack.c.bf16 %v7526_v25, %v7525_v61  ;;  %v7509_v21 = vld [vmem:[%s13763_s13 + $0xd30] sm:$0xff] }
0x1ead   :  { %v5496_v51 = vadd.f32 %v5495_v39, %v13053_v27  ;;  %v5585_v19 = vadd.f32 %v5584_v50, %v13061_v0  ;;  %6512 = vmatprep.mubr.f32.mxu0 %v5960_v8  ;;  %6594 = vmatprep.mubr.f32.mxu1 %v5962_v3  ;;  %v9496_v3 = vpack.c.bf16 %v13179_v9, %v13174_v22 }
0x1eae   :  { %6513 = vmatmul.mubr.f32.vlgmr.msra.gmra.mrb[144].mxu0 %v5959_v12  ;;  %6595 = vmatmul.mubr.f32.vlgmr.msra.gmra.mrb[148].mxu1 %v5961_v60  ;;  %v5975_v24 = vmax.f32 %v5494_v58, 0.0  ;;  %v5977_v45 = vmax.f32 %v5583_v11, 0.0  ;;  %v7510_v58 = vld [vmem:[%s13763_s13 + $0xd38] sm:$0xff]  ;;  %v7495_v11 = vld [vmem:[%s13763_s13 + $0xcc0] sm:$0xff] }
0x1eaf   :  { %v5976_v42 = vmax.f32 %v5496_v51, 0.0  ;;  %v5978_v40 = vmax.f32 %v5585_v19, 0.0  ;;  %9487 = vmatpush3.bf16.msra.mxu0 %v9486_v7  ;;  %9519 = vmatpush3.bf16.msra.mxu1 %v9518_v6  ;;  %v5499_v31 = vpop.f32.mrb[116].mxu0  ;;  %v5588_v20 = vpop.f32.mrb[120].mxu1  ;;  %v13197_v7 = vrot.slane %v13167_v46, %v11002_v33  ;;  %v13202_v6 = vld [vmem:[%s13763_s13 + $0xc30] sm:$0xff]  ;;  %v7478_v33 = vld [vmem:[%s13763_s13 + $0xc38] sm:$0xff]  ;;  %v9530_v26 = vpack.c.bf16 %v7510_v58, %v7509_v21 }
0x1eb0   :  { %v5500_v49 = vadd.f32 %v5499_v31, %v13045_v14  ;;  %v5589_v18 = vadd.f32 %v5588_v20, %v13049_v17  ;;  %v5501_v53 = vpop.f32.mrb[117].mxu0  ;;  %v5590_v56 = vpop.f32.mrb[121].mxu1  ;;  %9489 = vmatprep.subr.bf16.mxu0 %v9488_v32  ;;  %9521 = vmatprep.subr.bf16.mxu1 %v9520_v59  ;;  %v9498_v23 = vpack.c.bf16 %v7478_v33, %v13202_v6  ;;  %v7531_v33 = vld [vmem:[%s13763_s13 + $0xde0] sm:$0xff]  ;;  %v7532_v21 = vld [vmem:[%s13763_s13 + $0xde8] sm:$0xff] }
0x1eb1   :  { %v5502_v4 = vadd.f32 %v5501_v53, %v13053_v27  ;;  %v5591_v48 = vadd.f32 %v5590_v56, %v13061_v0  ;;  %6517 = vmatprep.mubr.f32.mxu0 %v5976_v42  ;;  %6599 = vmatprep.mubr.f32.mxu1 %v5978_v40 }
0x1eb2   :  { %6518 = vmatmul.mubr.f32.gmra.mrb[146].mxu0 %v5975_v24  ;;  %6600 = vmatmul.mubr.f32.gmra.mrb[150].mxu1 %v5977_v45  ;;  %v5991_v32 = vmax.f32 %v5500_v49, 0.0  ;;  %v5993_v59 = vmax.f32 %v5589_v18, 0.0  ;;  %v7498_v24 = vld [vmem:[%s13763_s13 + $0xcd8] sm:$0xff]  ;;  %v7529_v45 = vld [vmem:[%s13763_s13 + $0xdd0] sm:$0xff] }
0x1eb3   :  { %v5992_v55 = vmax.f32 %v5502_v4, 0.0  ;;  %v5994_v57 = vmax.f32 %v5591_v48, 0.0  ;;  %9491 = vmatpush3.bf16.msra.mxu0 %v9490_v44  ;;  %9523 = vmatpush3.bf16.msra.mxu1 %v9522_v16  ;;  %v5505_v2 = vpop.f32.mrb[118].mxu0  ;;  %v5594_v8 = vpop.f32.mrb[122].mxu1  ;;  %v7480_v44 = vld [vmem:[%s13763_s13 + $0xc48] sm:$0xff]  ;;  %v7511_v16 = vld [vmem:[%s13763_s13 + $0xd40] sm:$0xff] }
0x1eb4   :  { %v5506_v5 = vadd.f32 %v5505_v2, %v13045_v14  ;;  %v5595_v47 = vadd.f32 %v5594_v8, %v13049_v17  ;;  %v5507_v12 = vpop.f32.mrb[119].mxu0  ;;  %v5596_v60 = vpop.f32.mrb[123].mxu1  ;;  %9493 = vmatprep.subr.bf16.mxu0 %v9492_v62  ;;  %9525 = vmatprep.subr.bf16.mxu1 %v9524_v41  ;;  %v13224_v14 = vrot.slane %v13167_v46, %v11005_v36  ;;  %v7496_v17 = vld [vmem:[%s13763_s13 + $0xcc8] sm:$0xff]  ;;  %v7497_v41 = vld [vmem:[%s13763_s13 + $0xcd0] sm:$0xff]  ;;  %v7530_v49 = vld [vmem:[%s13763_s13 + $0xdd8] sm:$0xff] }
0x1eb5   :  { %v5508_v39 = vadd.f32 %v5507_v12, %v13053_v27  ;;  %v5597_v50 = vadd.f32 %v5596_v60, %v13061_v0  ;;  %6521 = vmatprep.mubr.f32.mxu0 %v5992_v55  ;;  %6603 = vmatprep.mubr.f32.mxu1 %v5994_v57  ;;  %v7528_v27 = vld [vmem:[%s13763_s13 + $0xdc8] sm:$0xff]  ;;  %v7479_v0 = vld [vmem:[%s13763_s13 + $0xc40] sm:$0xff]  ;;  %v9500_v31 = vpack.c.bf16 %v7496_v17, %v7495_v11  ;;  %v7481_v48 = vld [vmem:[%s13763_s13 + $0xc50] sm:$0xff] }
0x1eb6   :  { %6522 = vmatmul.mubr.f32.gmra.mrb[148].mxu0 %v5991_v32  ;;  %6604 = vmatmul.mubr.f32.gmra.mrb[152].mxu1 %v5993_v59  ;;  %v6007_v63 = vmax.f32 %v5506_v5, 0.0  ;;  %v6009_v37 = vmax.f32 %v5595_v47, 0.0  ;;  %v9532_v20 = vpack.c.bf16 %v7528_v27, %v7527_v54  ;;  %v7512_v62 = vld [vmem:[%s13763_s13 + $0xd48] sm:$0xff]  ;;  %v9502_v25 = vpack.c.bf16 %v7480_v44, %v7479_v0  ;;  %v7513_v2 = vld [vmem:[%s13763_s13 + $0xd50] sm:$0xff]  ;;  %v7514_v8 = vld [vmem:[%s13763_s13 + $0xd58] sm:$0xff] }
0x1eb7   :  { %v6008_v36 = vmax.f32 %v5508_v39, 0.0  ;;  %v6010_v15 = vmax.f32 %v5597_v50, 0.0  ;;  %9495 = vmatpush3.bf16.msra.mxu0 %v9494_v35  ;;  %9527 = vmatpush3.bf16.msra.mxu1 %v9526_v52  ;;  %v13238_v51 = vpop.f32.mrb[120].mxu0  ;;  %v13240_v19 = vpop.f32.mrb[124].mxu1  ;;  %v9534_v4 = vpack.c.bf16 %v7512_v62, %v7511_v16  ;;  %v7482_v35 = vld [vmem:[%s13763_s13 + $0xc58] sm:$0xff]  ;;  %v9504_v55 = vpack.c.bf16 %v7498_v24, %v7497_v41  ;;  %v7483_v12 = vld [vmem:[%s13763_s13 + $0xc60] sm:$0xff] }
0x1eb8   :  { %v5667_v42 = vpop.f32.mrb[121].mxu0  ;;  %v5756_v40 = vpop.f32.mrb[125].mxu1  ;;  %9497 = vmatprep.subr.bf16.mxu0 %v9496_v3  ;;  %9529 = vmatprep.subr.bf16.mxu1 %v9528_v43  ;;  %v9536_v57 = vpack.c.bf16 %v7530_v49, %v7529_v45  ;;  %v7499_v3 = vld [vmem:[%s13763_s13 + $0xce0] sm:$0xff]  ;;  %v7500_v43 = vld [vmem:[%s13763_s13 + $0xce8] sm:$0xff]  ;;  %v9506_v5 = vpack.c.bf16 %v7482_v35, %v7481_v48  ;;  %v9538_v47 = vpack.c.bf16 %v7514_v8, %v7513_v2  ;;  %v7501_v27 = vld [vmem:[%s13763_s13 + $0xcf0] sm:$0xff] }
0x1eb9   :  { %v5668_v22 = vadd.f32 %v5667_v42, %v13197_v7  ;;  %v5757_v9 = vadd.f32 %v5756_v40, %v13224_v14  ;;  %6525 = vmatprep.mubr.f32.mxu0 %v6008_v36  ;;  %6607 = vmatprep.mubr.f32.mxu1 %v6010_v15  ;;  %v7484_v60 = vld [vmem:[%s13763_s13 + $0xc68] sm:$0xff]  ;;  %v9508_v39 = vpack.c.bf16 %v7500_v43, %v7499_v3  ;;  %v7515_v17 = vld [vmem:[%s13763_s13 + $0xd60] sm:$0xff]  ;;  %v7502_v0 = vld [vmem:[%s13763_s13 + $0xcf8] sm:$0xff] }
0x1eba   :  { %6526 = vmatmul.mubr.f32.gmra.mrb[150].mxu0 %v6007_v63  ;;  %6608 = vmatmul.mubr.f32.gmra.mrb[154].mxu1 %v6009_v37  ;;  %v9540_v50 = vpack.c.bf16 %v7532_v21, %v7531_v33  ;;  %v7516_v54 = vld [vmem:[%s13763_s13 + $0xd68] sm:$0xff]  ;;  %v7533_v36 = vld [vmem:[%s13763_s13 + $0xdf0] sm:$0xff]  ;;  %v7534_v15 = vld [vmem:[%s13763_s13 + $0xdf8] sm:$0xff]  ;;  %v9510_v16 = vpack.c.bf16 %v7484_v60, %v7483_v12  ;;  %v13349_v40 = vrot.slane %v13167_v46, %v10994_v29 }
0x1ebb   :  { %v5964_v18 = vmax.f32 %v5668_v22, 0.0  ;;  %v5966_v53 = vmax.f32 %v5757_v9, 0.0  ;;  %9499 = vmatpush3.bf16.msra.mxu0 %v9498_v23  ;;  %9531 = vmatpush3.bf16.msra.mxu1 %v9530_v26  ;;  %v13266_v56 = vpop.f32.mrb[122].mxu0  ;;  %v13268_v61 = vpop.f32.mrb[126].mxu1  ;;  %v13332_v23 = vrot.slane %v13167_v46, %v10991_v28  ;;  %v9542_v63 = vpack.c.bf16 %v7516_v54, %v7515_v17  ;;  %v7485_v37 = vld [vmem:[%s13763_s13 + $0xc70] sm:$0xff]  ;;  %v7486_v42 = vld [vmem:[%s13763_s13 + $0xc78] sm:$0xff] }
0x1ebc   :  { %v13276_v52 = vpop.f32.mrb[123].mxu0  ;;  %v13278_v6 = vpop.f32.mrb[127].mxu1  ;;  %9501 = vmatprep.subr.bf16.mxu0 %v9500_v31  ;;  %9533 = vmatprep.subr.bf16.mxu1 %v9532_v20  ;;  %v7517_v28 = vld [vmem:[%s13763_s13 + $0xd70] sm:$0xff]  ;;  %v9512_v62 = vpack.c.bf16 %v7502_v0, %v7501_v27  ;;  %v9544_v41 = vpack.c.bf16 %v7534_v15, %v7533_v36  ;;  %v7518_v22 = vld [vmem:[%s13763_s13 + $0xd78] sm:$0xff]  ;;  %v7551_v9 = vld [vmem:[%s13763_s13 + $0xe80] sm:$0xff]  ;;  %v5755_v3 = vadd.f32 %v13240_v19, %v13349_v40 }
0x1ebd   :  { %6676 = vmatprep.mubr.f32.mxu0 %v5964_v18  ;;  %6758 = vmatprep.mubr.f32.mxu1 %v5966_v53  ;;  %v7552_v29 = vld [vmem:[%s13763_s13 + $0xe88] sm:$0xff]  ;;  %v7583_v24 = vld [vmem:[%s13763_s13 + $0xf80] sm:$0xff]  ;;  %v9546_v48 = vpack.c.bf16 %v7518_v22, %v7517_v28  ;;  %v13397_v2 = vld [vmem:[%s13763_s13 + $0xe90] sm:$0xff]  ;;  %v5666_v8 = vadd.f32 %v13238_v51, %v13332_v23  ;;  %v5674_v19 = vadd.f32 %v13276_v52, %v13197_v7 }
0x1ebe   :  { %v7584_v45 = vld [vmem:[%s13763_s13 + $0xf88] sm:$0xff]  ;;  %v13373_v49 = vld [vmem:[%s13763_s13 + $0xe00] sm:$0xff]  ;;  %v9548_v35 = vpack.c.bf16 %v7552_v29, %v7551_v9  ;;  %v13420_v51 = vld [vmem:[%s13763_s13 + $0xf98] sm:$0xff]  ;;  %v5763_v12 = vadd.f32 %v13278_v6, %v13224_v14  ;;  %v5761_v28 = vadd.f32 %v13268_v61, %v13349_v40 }
0x1ebf   :  { %9503 = vmatpush3.bf16.msra.mxu0 %v9502_v25  ;;  %9535 = vmatpush3.bf16.msra.mxu1 %v9534_v4  ;;  %v13298_v32 = vpop.f32.mrb[124].mxu0  ;;  %v13300_v59 = vpop.f32.mrb[128].mxu1  ;;  %v13378_v18 = vld [vmem:[%s13763_s13 + $0xe08] sm:$0xff]  ;;  %v9514_v4 = vpack.c.bf16 %v7486_v42, %v7485_v37  ;;  %v9580_v21 = vpack.c.bf16 %v7584_v45, %v7583_v24  ;;  %v13441_v52 = vld [vmem:[%s13763_s13 + $0xf10] sm:$0xff]  ;;  %v13456_v36 = vld [vmem:[%s13763_s13 + $0xf18] sm:$0xff]  ;;  %v5965_v37 = vmax.f32 %v5755_v3, 0.0  ;;  %v5672_v42 = vadd.f32 %v13266_v56, %v13332_v23 }
0x1ec0   :  { %v13308_v58 = vpop.f32.mrb[125].mxu0  ;;  %v13310_v11 = vpop.f32.mrb[129].mxu1  ;;  %9505 = vmatprep.subr.bf16.mxu0 %v9504_v55  ;;  %9537 = vmatprep.subr.bf16.mxu1 %v9536_v57  ;;  %v13387_v55 = vld [vmem:[%s13763_s13 + $0xf00] sm:$0xff]  ;;  %v13392_v57 = vld [vmem:[%s13763_s13 + $0xf08] sm:$0xff]  ;;  %v9550_v60 = vpack.c.bf16 %v13378_v18, %v13373_v49  ;;  %v5980_v56 = vmax.f32 %v5674_v19, 0.0  ;;  %v5982_v29 = vmax.f32 %v5763_v12, 0.0  ;;  %v13492_v45 = vrot.slane %v13167_v46, %v11230_v38 }
0x1ec1   :  { %v9582_v54 = vpack.c.bf16 %v13392_v57, %v13387_v55  ;;  %v13461_v15 = vld [vmem:[%s13763_s13 + $0xea0] sm:$0xff]  ;;  %v13484_v9 = vld [vmem:[%s13763_s13 + $0xfa8] sm:$0xff]  ;;  %v5680_v61 = vadd.f32 %v13308_v58, %v13197_v7  ;;  %v5769_v24 = vadd.f32 %v13310_v11, %v13224_v14  ;;  %v13496_v49 = vrot.slane %v13167_v46, %v11237_v13  ;;  %v7589_v12 = vld [vmem:[%s13763_s13 + $0xfb0] sm:$0xff] }
0x1ec2   :  { %v13479_v22 = vld [vmem:[%s13763_s13 + $0xfa0] sm:$0xff]  ;;  %v13508_v11 = vld [vmem:[%s13763_s13 + $0xe28] sm:$0xff]  ;;  %v5979_v3 = vmax.f32 %v5672_v42, 0.0  ;;  %v7542_v42 = vld [vmem:[%s13763_s13 + $0xe38] sm:$0xff] }
0x1ec3   :  { %9507 = vmatpush3.bf16.msra.mxu0 %v9506_v5  ;;  %9539 = vmatpush3.bf16.msra.mxu1 %v9538_v47  ;;  %v13334_v26 = vpop.f32.mrb[126].mxu0  ;;  %v13336_v44 = vpop.f32.mrb[130].mxu1  ;;  %v13410_v5 = vld [vmem:[%s13763_s13 + $0xe98] sm:$0xff]  ;;  %v13415_v47 = vld [vmem:[%s13763_s13 + $0xf90] sm:$0xff]  ;;  %v13503_v58 = vld [vmem:[%s13763_s13 + $0xe20] sm:$0xff]  ;;  %v9588_v55 = vpack.c.bf16 %v13484_v9, %v13479_v22 }
0x1ec4   :  { %v13351_v31 = vpop.f32.mrb[127].mxu0  ;;  %v13353_v20 = vpop.f32.mrb[131].mxu1  ;;  %9509 = vmatprep.subr.bf16.mxu0 %v9508_v39  ;;  %9541 = vmatprep.subr.bf16.mxu1 %v9540_v50  ;;  %v13431_v39 = vld [vmem:[%s13763_s13 + $0xe10] sm:$0xff]  ;;  %v13436_v50 = vld [vmem:[%s13763_s13 + $0xe18] sm:$0xff]  ;;  %v9552_v27 = vpack.c.bf16 %v13410_v5, %v13397_v2  ;;  %v9584_v0 = vpack.c.bf16 %v13420_v51, %v13415_v47  ;;  %v13513_v38 = vld [vmem:[%s13763_s13 + $0xf20] sm:$0xff]  ;;  %v5678_v5 = vadd.f32 %v13298_v32, %v13332_v23 }
0x1ec5   :  { %v9554_v18 = vpack.c.bf16 %v13436_v50, %v13431_v39  ;;  %v7572_v57 = vld [vmem:[%s13763_s13 + $0xf28] sm:$0xff]  ;;  %v13531_v2 = vld [vmem:[%s13763_s13 + $0xeb0] sm:$0xff]  ;;  %v5767_v47 = vadd.f32 %v13300_v59, %v13349_v40  ;;  %v7590_v39 = vld [vmem:[%s13763_s13 + $0xfb8] sm:$0xff]  ;;  %v5996_v50 = vmax.f32 %v5680_v61, 0.0  ;;  %v5686_v32 = vadd.f32 %v13351_v31, %v13197_v7 }
0x1ec6   :  { %v5775_v59 = vadd.f32 %v13353_v20, %v13224_v14  ;;  %v9592_v31 = vpack.c.bf16 %v7590_v39, %v7589_v12  ;;  %v5995_v14 = vmax.f32 %v5678_v5, 0.0  ;;  %v7559_v9 = vld [vmem:[%s13763_s13 + $0xec0] sm:$0xff]  ;;  %v7594_v5 = vld [vmem:[%s13763_s13 + $0xfd8] sm:$0xff]  ;;  %v7545_v39 = vld [vmem:[%s13763_s13 + $0xe50] sm:$0xff] }
0x1ec7   :  { %9511 = vmatpush3.bf16.msra.mxu0 %v9510_v16  ;;  %9543 = vmatpush3.bf16.msra.mxu1 %v9542_v63  ;;  %v13380_v53 = vpop.f32.mrb[128].mxu0  ;;  %v13382_v25 = vpop.f32.mrb[132].mxu1  ;;  %v13466_v16 = vld [vmem:[%s13763_s13 + $0xea8] sm:$0xff]  ;;  %v5963_v63 = vmax.f32 %v5666_v8, 0.0  ;;  %v13536_v8 = vld [vmem:[%s13763_s13 + $0xeb8] sm:$0xff]  ;;  %v5997_v20 = vmax.f32 %v5767_v47, 0.0 }
0x1ec8   :  { %v13403_v43 = vpop.f32.mrb[129].mxu0  ;;  %v13405_v33 = vpop.f32.mrb[133].mxu1  ;;  %9513 = vmatprep.subr.bf16.mxu0 %v9512_v62  ;;  %9545 = vmatprep.subr.bf16.mxu1 %v9544_v41  ;;  %v9560_v7 = vpack.c.bf16 %v13536_v8, %v13531_v2  ;;  %v6014_v22 = vmax.f32 %v5775_v59, 0.0  ;;  %v7576_v2 = vld [vmem:[%s13763_s13 + $0xf48] sm:$0xff]  ;;  %v7561_v8 = vld [vmem:[%s13763_s13 + $0xed0] sm:$0xff] }
0x1ec9   :  { %v7577_v59 = vld [vmem:[%s13763_s13 + $0xf50] sm:$0xff] }
0x1ecb   :  { %9515 = vmatpush3.bf16.msra.mxu0 %v9514_v4  ;;  %9547 = vmatpush3.bf16.msra.mxu1 %v9546_v48  ;;  %v13443_v6 = vpop.f32.mrb[130].mxu0  ;;  %v13445_v17 = vpop.f32.mrb[134].mxu1  ;;  %v9586_v48 = vpack.c.bf16 %v13456_v36, %v13441_v52  ;;  %v5998_v52 = vmax.f32 %v5769_v24, 0.0 }
0x1ecc   :  { %v13472_v62 = vpop.f32.mrb[131].mxu0  ;;  %v13474_v41 = vpop.f32.mrb[135].mxu1  ;;  %9549 = vmatprep.subr.bf16.mxu0 %v9548_v35  ;;  %9581 = vmatprep.subr.bf16.mxu1 %v9580_v21  ;;  %v9556_v35 = vpack.c.bf16 %v13466_v16, %v13461_v15  ;;  %v5981_v21 = vmax.f32 %v5761_v28, 0.0  ;;  %v9590_v15 = vpack.c.bf16 %v7572_v57, %v13513_v38  ;;  %v6012_v28 = vmax.f32 %v5686_v32, 0.0  ;;  %v7575_v57 = vld [vmem:[%s13763_s13 + $0xf40] sm:$0xff] }
0x1ecd   :  { %v9598_v12 = vpack.c.bf16 %v7576_v2, %v7575_v57 }
0x1ece   :  { %6677 = vmatmul.mubr.f32.vlgmr.msra.gmra.mrb[152].mxu0 %v5963_v63  ;;  %6759 = vmatmul.mubr.f32.vlgmr.msra.gmra.mrb[156].mxu1 %v5965_v37  ;;  %v7541_v37 = vld [vmem:[%s13763_s13 + $0xe30] sm:$0xff] }
0x1ecf   :  { %6681 = vmatprep.mubr.f32.mxu0 %v5980_v56  ;;  %6763 = vmatprep.mubr.f32.mxu1 %v5982_v29  ;;  %v13515_v13 = vpop.f32.mrb[132].mxu0  ;;  %v13517_v4 = vpop.f32.mrb[136].mxu1  ;;  %v7592_v56 = vld [vmem:[%s13763_s13 + $0xfc8] sm:$0xff]  ;;  %v9562_v24 = vpack.c.bf16 %v7542_v42, %v7541_v37 }
0x1ed0   :  { %9551 = vmatpush3.bf16.msra.mxu0 %v9550_v60  ;;  %9583 = vmatpush3.bf16.msra.mxu1 %v9582_v54  ;;  %v13542_v51 = vpop.f32.mrb[133].mxu0  ;;  %v13544_v19 = vpop.f32.mrb[137].mxu1  ;;  %v9558_v60 = vpack.c.bf16 %v13508_v11, %v13503_v58  ;;  %v7543_v58 = vld [vmem:[%s13763_s13 + $0xe40] sm:$0xff]  ;;  %v7544_v11 = vld [vmem:[%s13763_s13 + $0xe48] sm:$0xff] }
0x1ed1   :  { %9553 = vmatprep.subr.bf16.mxu0 %v9552_v27  ;;  %9585 = vmatprep.subr.bf16.mxu1 %v9584_v0  ;;  %v5684_v27 = vadd.f32 %v13334_v26, %v13332_v23  ;;  %v5773_v0 = vadd.f32 %v13336_v44, %v13349_v40  ;;  %v5846_v23 = vadd.f32 %v13403_v43, %v13492_v45  ;;  %v7573_v44 = vld [vmem:[%s13763_s13 + $0xf30] sm:$0xff]  ;;  %v7574_v40 = vld [vmem:[%s13763_s13 + $0xf38] sm:$0xff]  ;;  %v7560_v43 = vld [vmem:[%s13763_s13 + $0xec8] sm:$0xff] }
0x1ed2   :  { %6682 = vmatmul.mubr.f32.gmra.mrb[154].mxu0 %v5979_v3  ;;  %6764 = vmatmul.mubr.f32.gmra.mrb[158].mxu1 %v5981_v21  ;;  %v5935_v26 = vadd.f32 %v13405_v33, %v13496_v49  ;;  %v7591_v33 = vld [vmem:[%s13763_s13 + $0xfc0] sm:$0xff]  ;;  %v7562_v3 = vld [vmem:[%s13763_s13 + $0xed8] sm:$0xff]  ;;  %v7593_v21 = vld [vmem:[%s13763_s13 + $0xfd0] sm:$0xff]  ;;  %v9566_v47 = vpack.c.bf16 %v7544_v11, %v7543_v58 }
0x1ed3   :  { %6685 = vmatprep.mubr.f32.mxu0 %v5996_v50  ;;  %6767 = vmatprep.mubr.f32.mxu1 %v5998_v52  ;;  %v13558_v54 = vpop.f32.mrb[134].mxu0  ;;  %v13560_v36 = vpop.f32.mrb[138].mxu1  ;;  %v6011_v29 = vmax.f32 %v5684_v27, 0.0  ;;  %v6013_v61 = vmax.f32 %v5773_v0, 0.0  ;;  %v5968_v38 = vmax.f32 %v5846_v23, 0.0  ;;  %v7546_v50 = vld [vmem:[%s13763_s13 + $0xe58] sm:$0xff]  ;;  %v9568_v52 = vpack.c.bf16 %v7562_v3, %v7561_v8 }
0x1ed4   :  { %9555 = vmatpush3.bf16.msra.mxu0 %v9554_v18  ;;  %9587 = vmatpush3.bf16.msra.mxu1 %v9586_v48  ;;  %v13569_v16 = vpop.f32.mrb[135].mxu0  ;;  %v13571_v63 = vpop.f32.mrb[139].mxu1  ;;  %v9594_v18 = vpack.c.bf16 %v7574_v40, %v7573_v44  ;;  %v5970_v48 = vmax.f32 %v5935_v26, 0.0  ;;  %v9600_v32 = vpack.c.bf16 %v7594_v5, %v7593_v21  ;;  %v7547_v0 = vld [vmem:[%s13763_s13 + $0xe60] sm:$0xff]  ;;  %v7548_v37 = vld [vmem:[%s13763_s13 + $0xe68] sm:$0xff]  ;;  %v7565_v26 = vld [vmem:[%s13763_s13 + $0xef0] sm:$0xff]  ;;  %v5947_v5 = vadd.f32 %v13544_v19, %v13496_v49 }
0x1ed5   :  { %9557 = vmatprep.subr.bf16.mxu0 %v9556_v35  ;;  %9589 = vmatprep.subr.bf16.mxu1 %v9588_v55  ;;  %v9564_v35 = vpack.c.bf16 %v7560_v43, %v7559_v9  ;;  %v9596_v55 = vpack.c.bf16 %v7592_v56, %v7591_v33  ;;  %v7580_v23 = vld [vmem:[%s13763_s13 + $0xf68] sm:$0xff]  ;;  %v7566_v44 = vld [vmem:[%s13763_s13 + $0xef8] sm:$0xff]  ;;  %v7597_v40 = vld [vmem:[%s13763_s13 + $0xff0] sm:$0xff]  ;;  %v5202_v43 = vrot.slane %v13167_v46, %v11224_v1 }
0x1ed6   :  { %6686 = vmatmul.mubr.f32.gmra.mrb[156].mxu0 %v5995_v14  ;;  %6768 = vmatmul.mubr.f32.gmra.mrb[160].mxu1 %v5997_v20  ;;  %v7596_v14 = vld [vmem:[%s13763_s13 + $0xfe8] sm:$0xff]  ;;  %v9570_v20 = vpack.c.bf16 %v7546_v50, %v7545_v39  ;;  %v7598_v9 = vld [vmem:[%s13763_s13 + $0xff8] sm:$0xff]  ;;  %v9574_v33 = vpack.c.bf16 %v7548_v37, %v7547_v0  ;;  %v7581_v1 = vld [vmem:[%s13763_s13 + $0xf70] sm:$0xff]  ;;  %v5864_v39 = vadd.f32 %v13569_v16, %v13492_v45 }
0x1ed7   :  { %6689 = vmatprep.mubr.f32.mxu0 %v6012_v28  ;;  %6771 = vmatprep.mubr.f32.mxu1 %v6014_v22  ;;  %v7579_v22 = vld [vmem:[%s13763_s13 + $0xf60] sm:$0xff]  ;;  %v7550_v58 = vld [vmem:[%s13763_s13 + $0xe78] sm:$0xff]  ;;  %v5850_v8 = vadd.f32 %v13443_v6, %v5202_v43 }
0x1ed8   :  { %9559 = vmatpush3.bf16.msra.mxu0 %v9558_v60  ;;  %9591 = vmatpush3.bf16.msra.mxu1 %v9590_v15  ;;  %v7578_v60 = vld [vmem:[%s13763_s13 + $0xf58] sm:$0xff]  ;;  %v7563_v15 = vld [vmem:[%s13763_s13 + $0xee0] sm:$0xff]  ;;  %v9606_v56 = vpack.c.bf16 %v7580_v23, %v7579_v22 }
0x1ed9   :  { %9561 = vmatprep.subr.bf16.mxu0 %v9560_v7  ;;  %9593 = vmatprep.subr.bf16.mxu1 %v9592_v31  ;;  %v7564_v7 = vld [vmem:[%s13763_s13 + $0xee8] sm:$0xff]  ;;  %v7595_v31 = vld [vmem:[%s13763_s13 + $0xfe0] sm:$0xff]  ;;  %v9602_v27 = vpack.c.bf16 %v7578_v60, %v7577_v59  ;;  %v7582_v11 = vld [vmem:[%s13763_s13 + $0xf78] sm:$0xff] }
0x1eda   :  { %6690 = vmatmul.mubr.f32.gmra.mrb[158].mxu0 %v6011_v29  ;;  %6772 = vmatmul.mubr.f32.gmra.mrb[162].mxu1 %v6013_v61  ;;  %v9572_v42 = vpack.c.bf16 %v7564_v7, %v7563_v15  ;;  %v9604_v28 = vpack.c.bf16 %v7596_v14, %v7595_v31  ;;  %v7549_v29 = vld [vmem:[%s13763_s13 + $0xe70] sm:$0xff]  ;;  %v5210_v61 = vrot.slane %v13167_v46, %v11227_v34  ;;  %v7600_v59 = vld [vmem:[%s13764_s14 + $0x1] ss:$0 sm:$0xff] }
0x1edb   :  { %6840 = vmatprep.mubr.f32.mxu0 %v5968_v38  ;;  %6922 = vmatprep.mubr.f32.mxu1 %v5970_v48  ;;  %v9578_v38 = vpack.c.bf16 %v7550_v58, %v7549_v29  ;;  %v9610_v34 = vpack.c.bf16 %v7582_v11, %v7581_v1  ;;  %v5844_v46 = vadd.f32 %v13380_v53, %v5202_v43 }
0x1edc   :  { %9563 = vmatpush3.bf16.msra.mxu0 %v9562_v24  ;;  %9595 = vmatpush3.bf16.msra.mxu1 %v9594_v18  ;;  %v9576_v24 = vpack.c.bf16 %v7566_v44, %v7565_v26  ;;  %v9608_v18 = vpack.c.bf16 %v7598_v9, %v7597_v40  ;;  %v5933_v48 = vadd.f32 %v13382_v25, %v5210_v61 }
0x1edd   :  { %9565 = vmatprep.subr.bf16.mxu0 %v9564_v35  ;;  %9597 = vmatprep.subr.bf16.mxu1 %v9596_v55  ;;  %v5852_v35 = vadd.f32 %v13472_v62, %v13492_v45  ;;  %v5941_v55 = vadd.f32 %v13474_v41, %v13496_v49  ;;  %v5967_v57 = vmax.f32 %v5844_v46, 0.0  ;;  %v5939_v3 = vadd.f32 %v13445_v17, %v5210_v61 }
0x1ede   :  { %v5969_v2 = vmax.f32 %v5933_v48, 0.0  ;;  %v5858_v25 = vadd.f32 %v13542_v51, %v13492_v45  ;;  %v5983_v62 = vmax.f32 %v5850_v8, 0.0  ;;  %v5945_v6 = vadd.f32 %v13517_v4, %v5210_v61 }
0x1edf   :  { %v5984_v21 = vmax.f32 %v5852_v35, 0.0  ;;  %v5986_v53 = vmax.f32 %v5941_v55, 0.0  ;;  %v5985_v41 = vmax.f32 %v5939_v3, 0.0  ;;  %v6002_v17 = vmax.f32 %v5947_v5, 0.0 }
0x1ee0   :  { %9567 = vmatpush3.bf16.msra.mxu0 %v9566_v47  ;;  %9599 = vmatpush3.bf16.msra.mxu1 %v9598_v12  ;;  %v5856_v47 = vadd.f32 %v13515_v13, %v5202_v43  ;;  %v6000_v12 = vmax.f32 %v5858_v25, 0.0  ;;  %v5953_v51 = vadd.f32 %v13571_v63, %v13496_v49  ;;  %v6001_v50 = vmax.f32 %v5945_v6, 0.0 }
0x1ee1   :  { %9569 = vmatprep.subr.bf16.mxu0 %v9568_v52  ;;  %9601 = vmatprep.subr.bf16.mxu1 %v9600_v32  ;;  %v5862_v52 = vadd.f32 %v13558_v54, %v5202_v43  ;;  %v5951_v13 = vadd.f32 %v13560_v36, %v5210_v61  ;;  %v6016_v32 = vmax.f32 %v5864_v39, 0.0 }
0x1ee2   :  { %v5999_v19 = vmax.f32 %v5856_v47, 0.0  ;;  %v6018_v4 = vmax.f32 %v5953_v51, 0.0 }
0x1ee3   :  { %v6015_v45 = vmax.f32 %v5862_v52, 0.0  ;;  %v6017_v16 = vmax.f32 %v5951_v13, 0.0 }
0x1ee4   :  { %9571 = vmatpush3.bf16.msra.mxu0 %v9570_v20  ;;  %9603 = vmatpush3.bf16.msra.mxu1 %v9602_v27 }
0x1ee5   :  { %9573 = vmatprep.subr.bf16.mxu0 %v9572_v42  ;;  %9605 = vmatprep.subr.bf16.mxu1 %v9604_v28 }
0x1ee8   :  { %9575 = vmatpush3.bf16.msra.mxu0 %v9574_v33  ;;  %9607 = vmatpush3.bf16.msra.mxu1 %v9606_v56 }
0x1ee9   :  { %9577 = vmatprep.subr.bf16.mxu0 %v9576_v24  ;;  %9609 = vmatprep.subr.bf16.mxu1 %v9608_v18 }
0x1eec   :  { %9579 = vmatpush3.bf16.msra.mxu0 %v9578_v38  ;;  %9611 = vmatpush3.bf16.msra.mxu1 %v9610_v34 }
0x1eef   :  { %6841 = vmatmul.mubr.f32.vlgmr.msra.gmra.mrb[160].mxu0 %v5967_v57  ;;  %6923 = vmatmul.mubr.f32.vlgmr.msra.gmra.mrb[164].mxu1 %v5969_v2 }
0x1ef0   :  { %6845 = vmatprep.mubr.f32.mxu0 %v5984_v21  ;;  %6927 = vmatprep.mubr.f32.mxu1 %v5986_v53 }
0x1ef3   :  { %6846 = vmatmul.mubr.f32.gmra.mrb[162].mxu0 %v5983_v62  ;;  %6928 = vmatmul.mubr.f32.gmra.mrb[166].mxu1 %v5985_v41 }
0x1ef4   :  { %6849 = vmatprep.mubr.f32.mxu0 %v6000_v12  ;;  %6931 = vmatprep.mubr.f32.mxu1 %v6002_v17 }
0x1ef7   :  { %6850 = vmatmul.mubr.f32.gmra.mrb[164].mxu0 %v5999_v19  ;;  %6932 = vmatmul.mubr.f32.gmra.mrb[168].mxu1 %v6001_v50 }
0x1ef8   :  { %6853 = vmatprep.mubr.f32.mxu0 %v6016_v32  ;;  %6935 = vmatprep.mubr.f32.mxu1 %v6018_v4 }
0x1efb   :  { %6854 = vmatmul.mubr.f32.gmra.mrb[166].mxu0 %v6015_v45  ;;  %6936 = vmatmul.mubr.f32.gmra.mrb[170].mxu1 %v6017_v16 }
0x1efc   :  { %8777 = vmatprep.mubr.msk.f32.mxu0 %vm9994_vm7, %v9992_v30  ;;  %v7605_v30 = vld [vmem:[%s13768_s18] ss:$0 sm:$0xff] }
0x1f46   :  { %v8156_v49 = vpop.f32.mrb[136].mxu0  ;;  %v8200_v63 = vpop.f32.mrb[140].mxu1 }
0x1f47   :  { %v8157_v60 = vpop.f32.mrb[137].mxu0  ;;  %v8201_v54 = vpop.f32.mrb[141].mxu1 }
0x1f48   :  { %v8158_v15 = vadd.f32 %v8157_v60, %v8156_v49  ;;  %v8202_v36 = vadd.f32 %v8201_v54, %v8200_v63 }
0x1f4a   :  { %v6351_v7 = vadd.f32 %v8158_v15, %v7600_v59  ;;  %v8159_v31 = vpop.f32.mrb[138].mxu0  ;;  %v8203_v14 = vpop.f32.mrb[142].mxu1 }
0x1f4b   :  { %v8160_v20 = vpop.f32.mrb[139].mxu0  ;;  %v8204_v27 = vpop.f32.mrb[143].mxu1 }
0x1f4c   :  { %v6433_v0 = vadd.f32 %v8202_v36, %v6351_v7 }
0x1f79   :  { %v8162_v37 = vpop.f32.mrb[140].mxu0  ;;  %v8206_v42 = vpop.f32.mrb[144].mxu1 }
0x1f7a   :  { %v8163_v28 = vpop.f32.mrb[141].mxu0  ;;  %v8207_v22 = vpop.f32.mrb[145].mxu1 }
0x1f7d   :  { %v8165_v23 = vpop.f32.mrb[142].mxu0  ;;  %v8209_v26 = vpop.f32.mrb[146].mxu1 }
0x1f7e   :  { %v8166_v44 = vpop.f32.mrb[143].mxu0  ;;  %v8210_v40 = vpop.f32.mrb[147].mxu1 }
0x1f81   :  { %v8244_v9 = vpop.f32.mrb[144].mxu0  ;;  %v8288_v43 = vpop.f32.mrb[148].mxu1 }
0x1f82   :  { %v8245_v33 = vpop.f32.mrb[145].mxu0  ;;  %v8289_v56 = vpop.f32.mrb[149].mxu1 }
0x1f83   :  { %v8246_v29 = vadd.f32 %v8245_v33, %v8244_v9  ;;  %v8290_v61 = vadd.f32 %v8289_v56, %v8288_v43 }
0x1f85   :  { %v6515_v24 = vadd.f32 %v8246_v29, %v6433_v0  ;;  %v8247_v18 = vpop.f32.mrb[146].mxu0  ;;  %v8291_v58 = vpop.f32.mrb[150].mxu1 }
0x1f86   :  { %v8248_v1 = vpop.f32.mrb[147].mxu0  ;;  %v8292_v11 = vpop.f32.mrb[151].mxu1  ;;  %v9993_v18 = vmov 0.0|0.0   ;;  %v6974_v58 = vld [vmem:[%s13767_s17 + $0x10] sm:$0xff] }
0x1f87   :  { %v6597_v38 = vadd.f32 %v8290_v61, %v6515_v24  ;;  %v6973_v61 = vld [vmem:[%s13767_s17 + $0x8] sm:$0xff]  ;;  %9612 = vmatprep.subr.bf16.mxu0 %v9993_v18  ;;  %v6975_v1 = vld [vmem:[%s13767_s17 + $0x18] sm:$0xff] }
0x1f88   :  { %v9616_v11 = vpack.c.bf16 %v6975_v1, %v6974_v58 }
0x1f89   :  { %v8250_v34 = vpop.f32.mrb[148].mxu0  ;;  %v8294_v46 = vpop.f32.mrb[152].mxu1 }
0x1f8a   :  { %v8251_v48 = vpop.f32.mrb[149].mxu0  ;;  %v8295_v35 = vpop.f32.mrb[153].mxu1 }
0x1f8b   :  { %v7603_v35 = vld [vmem:[%s13765_s15 + $0x1] ss:$0 sm:$0xff]  ;;  %s9954_s15 = scalar_lea.vmem %s7065_s1, 64 }
0x1f8c   :  { %p9955_p0 = scmp.ne.s32.totalorder %s7065_s1, %s9954_s15  ;;  %p9960_p2 = scmp.lt.s32.totalorder %s9954_s15, %s9954_s15 }
0x1f8d   :  { %v8253_v55 = vpop.f32.mrb[150].mxu0  ;;  %v8297_v57 = vpop.f32.mrb[154].mxu1 }
0x1f8e   :  { %v8254_v2 = vpop.f32.mrb[151].mxu0  ;;  %v8298_v8 = vpop.f32.mrb[155].mxu1  ;;  %v7604_v57 = vld [vmem:[%s13766_s16 + $0x1] ss:$0 sm:$0xff]  ;;  %p9961_p3 = por %p9960_p2, %p9959_p1 }
0x1f90   :  { %p9962_p4 = pnand %p9961_p3, %p9955_p0 }
0x1fa1   :  { %v8332_v3 = vpop.f32.mrb[152].mxu0  ;;  %v8376_v21 = vpop.f32.mrb[156].mxu1 }
0x1fa2   :  { %v8333_v53 = vpop.f32.mrb[153].mxu0  ;;  %v8377_v25 = vpop.f32.mrb[157].mxu1 }
0x1fa3   :  { %v8334_v5 = vadd.f32 %v8333_v53, %v8332_v3  ;;  %v8378_v62 = vadd.f32 %v8377_v25, %v8376_v21 }
0x1fa5   :  { %v6679_v41 = vadd.f32 %v8334_v5, %v6597_v38  ;;  %v8335_v47 = vpop.f32.mrb[154].mxu0  ;;  %v8379_v6 = vpop.f32.mrb[158].mxu1 }
0x1fa6   :  { %v8336_v12 = vpop.f32.mrb[155].mxu0  ;;  %v8380_v17 = vpop.f32.mrb[159].mxu1 }
0x1fa7   :  { %v6761_v39 = vadd.f32 %v8378_v62, %v6679_v41 }
0x1fa9   :  { %v8338_v51 = vpop.f32.mrb[156].mxu0  ;;  %v8382_v19 = vpop.f32.mrb[160].mxu1 }
0x1faa   :  { %v8339_v50 = vpop.f32.mrb[157].mxu0  ;;  %v8383_v52 = vpop.f32.mrb[161].mxu1 }
0x1fad   :  { %v8341_v13 = vpop.f32.mrb[158].mxu0  ;;  %v8385_v32 = vpop.f32.mrb[162].mxu1 }
0x1fae   :  { %v8342_v4 = vpop.f32.mrb[159].mxu0  ;;  %v8386_v45 = vpop.f32.mrb[163].mxu1 }
0x1fc2   :  { %v8420_v16 = vpop.f32.mrb[160].mxu0  ;;  %v8464_v49 = vpop.f32.mrb[164].mxu1 }
0x1fc3   :  { %v8421_v63 = vpop.f32.mrb[161].mxu0  ;;  %v8465_v59 = vpop.f32.mrb[165].mxu1 }
0x1fc4   :  { %v8422_v60 = vadd.f32 %v8421_v63, %v8420_v16  ;;  %v8466_v54 = vadd.f32 %v8465_v59, %v8464_v49 }
0x1fc6   :  { %v6843_v15 = vadd.f32 %v8422_v60, %v6761_v39  ;;  %v8423_v36 = vpop.f32.mrb[162].mxu0  ;;  %v8467_v7 = vpop.f32.mrb[166].mxu1 }
0x1fc7   :  { %v8424_v31 = vpop.f32.mrb[163].mxu0  ;;  %v8468_v14 = vpop.f32.mrb[167].mxu1 }
0x1fc8   :  { %v6925_v20 = vadd.f32 %v8466_v54, %v6843_v15 }
0x1fca   :  { %v8426_v27 = vpop.f32.mrb[164].mxu0  ;;  %v8470_v0 = vpop.f32.mrb[168].mxu1  ;;  %v6940_v37 = vadd.f32 %v6925_v20, %v12399_v10  ;;  %v6972_v10 = vld [vmem:[%s13767_s17] sm:$0xff] }
0x1fcb   :  { %v8427_v42 = vpop.f32.mrb[165].mxu0  ;;  %v8471_v28 = vpop.f32.mrb[169].mxu1  ;;  %v9613_v24 = vpack.c.bf16 %v6973_v61, %v6972_v10 }
0x1fcc   :  { %v6945_v22 = vsel %vm200_vm2, %v6940_v37, 0.0 }
0x1fcd   :  { %6946 = vadd.xlane.f32.xlu1 %v6945_v22  ;;  %9614 = vmatpush3.bf16.msra.mxu0 %v9613_v24 }
0x1fce   :  { %v8429_v23 = vpop.f32.mrb[166].mxu0  ;;  %v8473_v26 = vpop.f32.mrb[170].mxu1  ;;  %9615 = vmatprep.subr.bf16.mxu0 %v9993_v18 }
0x1fcf   :  { %v8430_v44 = vpop.f32.mrb[167].mxu0  ;;  %v8474_v40 = vpop.f32.mrb[171].mxu1 }
0x1fd1   :  { %9617 = vmatpush3.bf16.msra.mxu0 %v9616_v11 }
0x205a   :  { %v6947_v9 = vpop.xlane.xlu1 %6946 }
0x205b   :  { %v6948_v43 = vmul.f32 0.03125, %v6947_v9 }
0x205d   :  { %v6949_v33 = vsub.f32 %v6940_v37, %v6948_v43 }
0x205f   :  { %v6950_v56 = vmul.f32 %v6949_v33, %v6949_v33 }
0x2061   :  { %v6951_v29 = vsel %vm200_vm2, %v6950_v56, 0.0 }
0x2062   :  { %6952 = vadd.xlane.f32.xlu0 %v6951_v29 }
0x20ef   :  { %v6953_v38 = vpop.xlane.xlu0 %6952 }
0x20f0   :  { %v6954_v34 = vmul.f32 0.03125, %v6953_v38 }
0x20f2   :  { %v6955_v46 = vadd.f32 1e-05, %v6954_v34 }
0x20f4   :  { %9948 = vrsqrt.f32 %v6955_v46 }
0x20fe   :  { %v9949_v48 = vpop.eup %9948 }
0x20ff   :  { %v6957_v55 = vmul.f32 %v9949_v48, %v6949_v33 }
0x2101   :  { %v6964_v2 = vmul.f32 %v7603_v35, %v6957_v55 }
0x2103   :  { %v6971_v8 = vadd.f32 %v7604_v57, %v6964_v2 }
0x2105   :  { %8778 = vmatmul.mubr.msk.f32.vlgmr.msra.gmra.mrb[168].mxu0 %vm200_vm2, %v6971_v8 }
0x21d8   :  { %v7052_v3 = vpop.f32.mrb[168].mxu0 }
0x21d9   :  { %v7053_v21 = vadd.f32 %v7605_v30, %v7052_v3  ;;  %v8779_v53 = vpop.f32.mrb[169].mxu0 }
0x21db   :  { %7057 = vst.msk [vmem:[#allocation2] sm:$0xf] %vm7056_vm8, %v7053_v21 }
0x21dc   :  { %9965 = shalt.err (!%p9962_p4)
}
0x21dd   :  { %s9966_s22 = scalar_lea.hbm %s13769_s19, 64 }
0x21de   :  { %p9967_p5 = scmp.ne.s32.totalorder %s13769_s19, %s9966_s22  ;;  %p9970_p6 = scmp.lt.u32.totalorder %s9966_s22, %s13769_s19 }
0x21e0   :  { %p9972_p7 = pnand %p9970_p6, %p9967_p5 }
0x21e2   :  { %9975 = shalt.err (!%p9972_p7)
}
0x21e3   :  { %7067 = dma.vmem_to_hbm [thread:$0]  %s7065_s1, 64, %s13769_s19, [#allocation3]  }
0x21e4   :  { %9976 = dma.done.wait [#allocation3], 64  }
0x21e5   :  { %9977 = vsyncadd [#allocation3], 4294967232 }
0x21e6   :  { %7071 = vsyncpa [#allocation3], 1 }

</bundles_post_ra>
